<compile_context>
chip_gen: v5e
topology: v5e:2x2
jax: 0.10.0
libtpu: 0.0.40
codegen_flags: <defaults>
</compile_context>

<pallas_src>
import functools

import jax
import jax.numpy as jnp
import numpy as np
from jax.experimental import pallas as pl
from jax.experimental.pallas import tpu as pltpu


def _round_up(x, m):
    return ((x + m - 1) // m) * m


# ------------------------------ Pallas kernel -------------------------------

def _basic_block_kernel(x_ref, mask_ref, w1_ref, b1_ref, w2_ref, b2_ref,
                        o_ref, xb_ref, h1_ref, *, wp, guard, chunk):
    """Fused BasicBlock forward for one zero-padded, row-flattened image.

    x_ref   : (P_pad, C) f32   zero-padded image, rows flattened p = y*Wp + x
    mask_ref: (P_pad, 1) f32   1.0 on interior rows, 0.0 on padding/junk rows
    w1_ref  : (9, C, C)  bf16  conv1 taps, t = dy*3 + dx, layout [Cin, Cout]
    b1_ref  : (1, C)     f32
    w2_ref  : (9, C, C)  bf16  conv2 taps
    b2_ref  : (1, C)     f32
    o_ref   : (P_pad, C) f32   output in the same flattened padded layout
                               (junk on non-interior rows; wrapper slices them)
    xb_ref  : (G+P_pad+G, C) bf16  scratch: bf16 copy of x with guard rows
    h1_ref  : (G+P_pad+G, C) bf16  scratch: masked relu(conv1) with guard rows
    """
    p_pad, c = x_ref.shape
    n_chunks = p_pad // chunk
    shifts = [(dy - 1) * wp + (dx - 1) for dy in range(3) for dx in range(3)]

    # ---- single f32 -> bf16 cast of the padded image (chunked, one pass) ----
    for ci in range(n_chunks):
        p0 = ci * chunk
        xb_ref[pl.ds(guard + p0, chunk), :] = (
            x_ref[pl.ds(p0, chunk), :].astype(jnp.bfloat16))

    # ---- conv1 + bias + ReLU, masked to zero outside the image --------------
    # (those zeros are exactly conv2's padding=1; jnp.where is NaN-safe w.r.t.
    #  the uninitialized guard rows that only feed discarded border rows)
    for ci in range(n_chunks):
        p0 = ci * chunk
        acc = jnp.zeros((chunk, c), jnp.float32)
        for t in range(9):
            a = xb_ref[pl.ds(guard + p0 + shifts[t], chunk), :]
            acc = acc + jnp.dot(a, w1_ref[t],
                                preferred_element_type=jnp.float32)
        h = jnp.maximum(acc + b1_ref[...], 0.0)
        h = jnp.where(mask_ref[pl.ds(p0, chunk), :] > 0.5, h, 0.0)
        h1_ref[pl.ds(guard + p0, chunk), :] = h.astype(jnp.bfloat16)

    # ---- conv2 + bias + residual + ReLU --------------------------------------
    for ci in range(n_chunks):
        p0 = ci * chunk
        acc = jnp.zeros((chunk, c), jnp.float32)
        for t in range(9):
            a = h1_ref[pl.ds(guard + p0 + shifts[t], chunk), :]
            acc = acc + jnp.dot(a, w2_ref[t],
                                preferred_element_type=jnp.float32)
        res = x_ref[pl.ds(p0, chunk), :]                     # f32 residual
        o_ref[pl.ds(p0, chunk), :] = jnp.maximum(
            acc + b2_ref[...] + res, 0.0).astype(o_ref.dtype)


# ------------------------------- JAX wrappers --------------------------------

def basic_block_forward_nhwc(x_nhwc, params):
    """Preferred entry point: (B, H, W, C) f32 -> (B, H, W, C) f32, no transposes."""
    b, h, w, c = x_nhwc.shape
    hp, wp = h + 2, w + 2
    p = hp * wp
    chunk = 128 if p >= 128 else _round_up(p, 8)
    p_pad = _round_up(p, chunk)
    guard = _round_up(wp + 1, 32)        # covers the max tap shift |s| = Wp+1

    # Zero-pad spatially, flatten rows, pad the flat axis to a chunk multiple.
    # Single small fused XLA op; stays channels-last throughout.
    xp = jnp.pad(x_nhwc.astype(jnp.float32), ((0, 0), (1, 1), (1, 1), (0, 0)))
    xf = xp.reshape(b, p, c)
    xf = jnp.pad(xf, ((0, 0), (0, p_pad - p), (0, 0)))

    # Interior mask over flattened padded rows (tiny constant, built on host).
    m2 = np.zeros((hp, wp), np.float32)
    m2[1:h + 1, 1:w + 1] = 1.0
    mask_np = np.zeros((p_pad, 1), np.float32)
    mask_np[:p, 0] = m2.reshape(-1)
    mask = jnp.asarray(mask_np)

    kernel = functools.partial(_basic_block_kernel,
                               wp=wp, guard=guard, chunk=chunk)

    # Derive a safe VMEM budget from the actual (double-buffered) block sums.
    blk_bytes = (
        2 * p_pad * c * 4                    # x blocks
        + 2 * p_pad * c * 4                  # out blocks
        + 2 * p_pad * 128 * 4                # mask blocks (lane-padded)
        + 2 * 2 * 9 * c * c * 2              # w1 + w2 blocks (bf16)
        + 2 * 2 * max(c, 128) * 4            # b1 + b2 blocks
        + 2 * (guard + p_pad + guard) * c * 2  # xb + h1 scratches (bf16)
    )
    vmem_limit = int(min(blk_bytes + (4 << 20), 64 * 1024 * 1024))

    grid_spec = pltpu.PrefetchScalarGridSpec(
        num_scalar_prefetch=0,
        grid=(b,),
        in_specs=[
            pl.BlockSpec((None, p_pad, c), lambda i: (i, 0, 0)),   # x (per image)
            pl.BlockSpec((p_pad, 1), lambda i: (0, 0)),            # interior mask
            pl.BlockSpec((9, c, c), lambda i: (0, 0, 0)),          # w1
            pl.BlockSpec((1, c), lambda i: (0, 0)),                # b1
            pl.BlockSpec((9, c, c), lambda i: (0, 0, 0)),          # w2
            pl.BlockSpec((1, c), lambda i: (0, 0)),                # b2
        ],
        out_specs=pl.BlockSpec((None, p_pad, c), lambda i: (i, 0, 0)),
        scratch_shapes=[
            pltpu.VMEM((guard + p_pad + guard, c), jnp.bfloat16),  # xb (bf16 x)
            pltpu.VMEM((guard + p_pad + guard, c), jnp.bfloat16),  # h1
        ],
    )

    out_flat = pl.pallas_call(
        kernel,
        out_shape=jax.ShapeDtypeStruct((b, p_pad, c), jnp.float32),
        grid_spec=grid_spec,
        compiler_params=pltpu.CompilerParams(
            dimension_semantics=("parallel",),     # megacore split on v7x
            vmem_limit_bytes=vmem_limit,
        ),
    )(xf, mask, params['w1'], params['b1'], params['w2'], params['b2'])

    # Drop the padding / junk rows (cheap slice, fuses with the consumer).
    out = out_flat[:, :p, :].reshape(b, hp, wp, c)[:, 1:h + 1, 1:w + 1, :]
    return out


def basic_block_forward(x_nchw, params):
    """Module-faithful interface: (B, C, H, W) f32 -> (B, C, H, W) f32.
    # TODO(synk): in a real network keep activations NHWC end-to-end and call
    # basic_block_forward_nhwc directly; these transposes are HBM round trips.
    """
    x = jnp.transpose(x_nchw, (0, 2, 3, 1))
    y = basic_block_forward_nhwc(x, params)
    return jnp.transpose(y, (0, 3, 1, 2))


# --------------------------- deterministic params ----------------------------

def init_params(key, c):
    k1, k2, k3, k4 = jax.random.split(key, 4)
    scale = 1.0 / np.sqrt(9 * c)
    w1 = jax.random.normal(k1, (3, 3, c, c), jnp.float32) * scale   # HWIO
    w2 = jax.random.normal(k2, (3, 3, c, c), jnp.float32) * scale
    b1 = jax.random.normal(k3, (c,), jnp.float32) * 0.1
    b2 = jax.random.normal(k4, (c,), jnp.float32) * 0.1
    return dict(
        # tap-major (t = dy*3+dx, Cin, Cout), bf16 MXU inputs
        w1=w1.reshape(9, c, c).astype(jnp.bfloat16),
        w2=w2.reshape(9, c, c).astype(jnp.bfloat16),
        b1=b1.reshape(1, c),
        b2=b2.reshape(1, c),
        # HWIO copies for the lax.conv reference
        w1_hwio=w1.astype(jnp.bfloat16),
        w2_hwio=w2.astype(jnp.bfloat16),
    )


# ----------------------------- pure-JAX reference ----------------------------

def ref_forward(x_nchw, params):
    x = jnp.transpose(x_nchw, (0, 2, 3, 1)).astype(jnp.float32)
    dn = ('NHWC', 'HWIO', 'NHWC')
    h = jax.lax.conv_general_dilated(
        x.astype(jnp.bfloat16), params['w1_hwio'], (1, 1), 'SAME',
        dimension_numbers=dn, preferred_element_type=jnp.float32)
    h = jnp.maximum(h + params['b1'].reshape(1, 1, 1, -1), 0.0)
    h2 = jax.lax.conv_general_dilated(
        h.astype(jnp.bfloat16), params['w2_hwio'], (1, 1), 'SAME',
        dimension_numbers=dn, preferred_element_type=jnp.float32)
    out = jnp.maximum(h2 + params['b2'].reshape(1, 1, 1, -1) + x, 0.0)
    return out.transpose(0, 3, 1, 2)


# ------------------------------------ main -----------------------------------

if __name__ == "__main__":
    key = jax.random.PRNGKey(0)
    kx, kp = jax.random.split(key)

    # Small but MXU/lane-friendly shapes consistent with a ResNet BasicBlock:
    # inplanes == planes (downsample=None requires it), channels-last C=128.
    # B=8 gives the grid enough steps for BlockSpec double-buffering to pipeline.
    B, C, H, W = 8, 128, 16, 16
    x = jax.random.normal(kx, (B, C, H, W), jnp.float32)
    params = init_params(kp, C)

    fwd = jax.jit(basic_block_forward)
    out = fwd(x, params)
    jax.block_until_ready(out)

    ref = ref_forward(x, params)
    np.testing.assert_allclose(np.asarray(out), np.asarray(ref),
                               rtol=2e-3, atol=2e-3)

    print("KERNEL_OK")
</pallas_src>

<mosaic_0001>
module attributes {stable_mosaic.version = 11 : i64} {
  func.func @_basic_block_kernel(%arg0: i32, %arg1: memref<1x384x128xf32, #tpu.memory_space<vmem>>, %arg2: memref<384x1xf32, #tpu.memory_space<vmem>>, %arg3: memref<9x128x128xbf16, #tpu.memory_space<vmem>>, %arg4: memref<1x128xf32, #tpu.memory_space<vmem>>, %arg5: memref<9x128x128xbf16, #tpu.memory_space<vmem>>, %arg6: memref<1x128xf32, #tpu.memory_space<vmem>>, %arg7: memref<1x384x128xf32, #tpu.memory_space<vmem>>, %arg8: memref<448x128xbf16, #tpu.memory_space<vmem>>, %arg9: memref<448x128xbf16, #tpu.memory_space<vmem>>) attributes {dimension_semantics = [#tpu.dimension_semantics<parallel>], iteration_bounds = array<i64: 8>, scalar_prefetch = 0 : i64, scratch_operands = 2 : i64, tpu.core_type = #tpu.core_type<tc>, window_params = [{transform_indices = @transform_0, window_bounds = array<i64: 1, 384, 128>}, {pipeline_mode = #tpu.pipeline_mode<synchronous>, transform_indices = @transform_1, window_bounds = array<i64: 384, 1>}, {pipeline_mode = #tpu.pipeline_mode<synchronous>, transform_indices = @transform_2, window_bounds = array<i64: 9, 128, 128>}, {pipeline_mode = #tpu.pipeline_mode<synchronous>, transform_indices = @transform_3, window_bounds = array<i64: 1, 128>}, {pipeline_mode = #tpu.pipeline_mode<synchronous>, transform_indices = @transform_4, window_bounds = array<i64: 9, 128, 128>}, {pipeline_mode = #tpu.pipeline_mode<synchronous>, transform_indices = @transform_5, window_bounds = array<i64: 1, 128>}, {transform_indices = @transform_6, window_bounds = array<i64: 1, 384, 128>}]} {
    %c0 = arith.constant 0 : index
    %c0_0 = arith.constant 0 : index
    %c0_1 = arith.constant 0 : index
    %0 = vector.load %arg1[%c0, %c0_0, %c0_1] : memref<1x384x128xf32, #tpu.memory_space<vmem>>, vector<1x128x128xf32>
    %1 = vector.shape_cast %0 : vector<1x128x128xf32> to vector<128x128xf32>
    %2 = arith.truncf %1 : vector<128x128xf32> to vector<128x128xbf16>
    %c32 = arith.constant 32 : index
    %c0_2 = arith.constant 0 : index
    %3 = vector.load %arg8[%c32, %c0_2] : memref<448x128xbf16, #tpu.memory_space<vmem>>, vector<128x128xbf16>
    tpu.vector_store %arg8[%c32, %c0_2], %2 {strides = array<i32>} : memref<448x128xbf16, #tpu.memory_space<vmem>>, vector<128x128xbf16>,
    %c0_3 = arith.constant 0 : index
    %c128 = arith.constant 128 : index
    %c0_4 = arith.constant 0 : index
    %4 = vector.load %arg1[%c0_3, %c128, %c0_4] : memref<1x384x128xf32, #tpu.memory_space<vmem>>, vector<1x128x128xf32>
    %5 = vector.shape_cast %4 : vector<1x128x128xf32> to vector<128x128xf32>
    %6 = arith.truncf %5 : vector<128x128xf32> to vector<128x128xbf16>
    %c160 = arith.constant 160 : index
    %c0_5 = arith.constant 0 : index
    %7 = vector.load %arg8[%c160, %c0_5] : memref<448x128xbf16, #tpu.memory_space<vmem>>, vector<128x128xbf16>
    tpu.vector_store %arg8[%c160, %c0_5], %6 {strides = array<i32>} : memref<448x128xbf16, #tpu.memory_space<vmem>>, vector<128x128xbf16>,
    %c0_6 = arith.constant 0 : index
    %c256 = arith.constant 256 : index
    %c0_7 = arith.constant 0 : index
    %8 = vector.load %arg1[%c0_6, %c256, %c0_7] : memref<1x384x128xf32, #tpu.memory_space<vmem>>, vector<1x128x128xf32>
    %9 = vector.shape_cast %8 : vector<1x128x128xf32> to vector<128x128xf32>
    %10 = arith.truncf %9 : vector<128x128xf32> to vector<128x128xbf16>
    %c288 = arith.constant 288 : index
    %c0_8 = arith.constant 0 : index
    %11 = vector.load %arg8[%c288, %c0_8] : memref<448x128xbf16, #tpu.memory_space<vmem>>, vector<128x128xbf16>
    tpu.vector_store %arg8[%c288, %c0_8], %10 {strides = array<i32>} : memref<448x128xbf16, #tpu.memory_space<vmem>>, vector<128x128xbf16>,
    %cst = arith.constant 0.000000e+00 : f32
    %12 = vector.broadcast %cst : f32 to vector<128x128xf32>
    %c13 = arith.constant 13 : index
    %c0_9 = arith.constant 0 : index
    %13 = vector.load %arg8[%c13, %c0_9] : memref<448x128xbf16, #tpu.memory_space<vmem>>, vector<128x128xbf16>
    %c0_10 = arith.constant 0 : index
    %c0_11 = arith.constant 0 : index
    %c0_12 = arith.constant 0 : index
    %14 = vector.load %arg3[%c0_10, %c0_11, %c0_12] : memref<9x128x128xbf16, #tpu.memory_space<vmem>>, vector<1x128x128xbf16>
    %15 = vector.shape_cast %14 : vector<1x128x128xbf16> to vector<128x128xbf16>
    %cst_13 = arith.constant dense<0.000000e+00> : vector<128x128xf32>
    %16 = tpu.matmul %13, %15, %cst_13 {dimension_numbers = #tpu.dot_dimension_numbers<[1], [0], [0], [1], [0, 0, 1, 1], [], []>} : vector<128x128xbf16>, vector<128x128xbf16>, vector<128x128xf32> -> vector<128x128xf32>
    %17 = arith.addf %12, %16 : vector<128x128xf32>
    %c14 = arith.constant 14 : index
    %c0_14 = arith.constant 0 : index
    %18 = vector.load %arg8[%c14, %c0_14] : memref<448x128xbf16, #tpu.memory_space<vmem>>, vector<128x128xbf16>
    %c1 = arith.constant 1 : index
    %c0_15 = arith.constant 0 : index
    %c0_16 = arith.constant 0 : index
    %19 = vector.load %arg3[%c1, %c0_15, %c0_16] : memref<9x128x128xbf16, #tpu.memory_space<vmem>>, vector<1x128x128xbf16>
    %20 = vector.shape_cast %19 : vector<1x128x128xbf16> to vector<128x128xbf16>
    %cst_17 = arith.constant dense<0.000000e+00> : vector<128x128xf32>
    %21 = tpu.matmul %18, %20, %cst_17 {dimension_numbers = #tpu.dot_dimension_numbers<[1], [0], [0], [1], [0, 0, 1, 1], [], []>} : vector<128x128xbf16>, vector<128x128xbf16>, vector<128x128xf32> -> vector<128x128xf32>
    %22 = arith.addf %17, %21 : vector<128x128xf32>
    %c15 = arith.constant 15 : index
    %c0_18 = arith.constant 0 : index
    %23 = vector.load %arg8[%c15, %c0_18] : memref<448x128xbf16, #tpu.memory_space<vmem>>, vector<128x128xbf16>
    %c2 = arith.constant 2 : index
    %c0_19 = arith.constant 0 : index
    %c0_20 = arith.constant 0 : index
    %24 = vector.load %arg3[%c2, %c0_19, %c0_20] : memref<9x128x128xbf16, #tpu.memory_space<vmem>>, vector<1x128x128xbf16>
    %25 = vector.shape_cast %24 : vector<1x128x128xbf16> to vector<128x128xbf16>
    %cst_21 = arith.constant dense<0.000000e+00> : vector<128x128xf32>
    %26 = tpu.matmul %23, %25, %cst_21 {dimension_numbers = #tpu.dot_dimension_numbers<[1], [0], [0], [1], [0, 0, 1, 1], [], []>} : vector<128x128xbf16>, vector<128x128xbf16>, vector<128x128xf32> -> vector<128x128xf32>
    %27 = arith.addf %22, %26 : vector<128x128xf32>
    %c31 = arith.constant 31 : index
    %c0_22 = arith.constant 0 : index
    %28 = vector.load %arg8[%c31, %c0_22] : memref<448x128xbf16, #tpu.memory_space<vmem>>, vector<128x128xbf16>
    %c3 = arith.constant 3 : index
    %c0_23 = arith.constant 0 : index
    %c0_24 = arith.constant 0 : index
    %29 = vector.load %arg3[%c3, %c0_23, %c0_24] : memref<9x128x128xbf16, #tpu.memory_space<vmem>>, vector<1x128x128xbf16>
    %30 = vector.shape_cast %29 : vector<1x128x128xbf16> to vector<128x128xbf16>
    %cst_25 = arith.constant dense<0.000000e+00> : vector<128x128xf32>
    %31 = tpu.matmul %28, %30, %cst_25 {dimension_numbers = #tpu.dot_dimension_numbers<[1], [0], [0], [1], [0, 0, 1, 1], [], []>} : vector<128x128xbf16>, vector<128x128xbf16>, vector<128x128xf32> -> vector<128x128xf32>
    %32 = arith.addf %27, %31 : vector<128x128xf32>
    %c32_26 = arith.constant 32 : index
    %c0_27 = arith.constant 0 : index
    %33 = vector.load %arg8[%c32_26, %c0_27] : memref<448x128xbf16, #tpu.memory_space<vmem>>, vector<128x128xbf16>
    %c4 = arith.constant 4 : index
    %c0_28 = arith.constant 0 : index
    %c0_29 = arith.constant 0 : index
    %34 = vector.load %arg3[%c4, %c0_28, %c0_29] : memref<9x128x128xbf16, #tpu.memory_space<vmem>>, vector<1x128x128xbf16>
    %35 = vector.shape_cast %34 : vector<1x128x128xbf16> to vector<128x128xbf16>
    %cst_30 = arith.constant dense<0.000000e+00> : vector<128x128xf32>
    %36 = tpu.matmul %33, %35, %cst_30 {dimension_numbers = #tpu.dot_dimension_numbers<[1], [0], [0], [1], [0, 0, 1, 1], [], []>} : vector<128x128xbf16>, vector<128x128xbf16>, vector<128x128xf32> -> vector<128x128xf32>
    %37 = arith.addf %32, %36 : vector<128x128xf32>
    %c33 = arith.constant 33 : index
    %c0_31 = arith.constant 0 : index
    %38 = vector.load %arg8[%c33, %c0_31] : memref<448x128xbf16, #tpu.memory_space<vmem>>, vector<128x128xbf16>
    %c5 = arith.constant 5 : index
    %c0_32 = arith.constant 0 : index
    %c0_33 = arith.constant 0 : index
    %39 = vector.load %arg3[%c5, %c0_32, %c0_33] : memref<9x128x128xbf16, #tpu.memory_space<vmem>>, vector<1x128x128xbf16>
    %40 = vector.shape_cast %39 : vector<1x128x128xbf16> to vector<128x128xbf16>
    %cst_34 = arith.constant dense<0.000000e+00> : vector<128x128xf32>
    %41 = tpu.matmul %38, %40, %cst_34 {dimension_numbers = #tpu.dot_dimension_numbers<[1], [0], [0], [1], [0, 0, 1, 1], [], []>} : vector<128x128xbf16>, vector<128x128xbf16>, vector<128x128xf32> -> vector<128x128xf32>
    %42 = arith.addf %37, %41 : vector<128x128xf32>
    %c49 = arith.constant 49 : index
    %c0_35 = arith.constant 0 : index
    %43 = vector.load %arg8[%c49, %c0_35] : memref<448x128xbf16, #tpu.memory_space<vmem>>, vector<128x128xbf16>
    %c6 = arith.constant 6 : index
    %c0_36 = arith.constant 0 : index
    %c0_37 = arith.constant 0 : index
    %44 = vector.load %arg3[%c6, %c0_36, %c0_37] : memref<9x128x128xbf16, #tpu.memory_space<vmem>>, vector<1x128x128xbf16>
    %45 = vector.shape_cast %44 : vector<1x128x128xbf16> to vector<128x128xbf16>
    %cst_38 = arith.constant dense<0.000000e+00> : vector<128x128xf32>
    %46 = tpu.matmul %43, %45, %cst_38 {dimension_numbers = #tpu.dot_dimension_numbers<[1], [0], [0], [1], [0, 0, 1, 1], [], []>} : vector<128x128xbf16>, vector<128x128xbf16>, vector<128x128xf32> -> vector<128x128xf32>
    %47 = arith.addf %42, %46 : vector<128x128xf32>
    %c50 = arith.constant 50 : index
    %c0_39 = arith.constant 0 : index
    %48 = vector.load %arg8[%c50, %c0_39] : memref<448x128xbf16, #tpu.memory_space<vmem>>, vector<128x128xbf16>
    %c7 = arith.constant 7 : index
    %c0_40 = arith.constant 0 : index
    %c0_41 = arith.constant 0 : index
    %49 = vector.load %arg3[%c7, %c0_40, %c0_41] : memref<9x128x128xbf16, #tpu.memory_space<vmem>>, vector<1x128x128xbf16>
    %50 = vector.shape_cast %49 : vector<1x128x128xbf16> to vector<128x128xbf16>
    %cst_42 = arith.constant dense<0.000000e+00> : vector<128x128xf32>
    %51 = tpu.matmul %48, %50, %cst_42 {dimension_numbers = #tpu.dot_dimension_numbers<[1], [0], [0], [1], [0, 0, 1, 1], [], []>} : vector<128x128xbf16>, vector<128x128xbf16>, vector<128x128xf32> -> vector<128x128xf32>
    %52 = arith.addf %47, %51 : vector<128x128xf32>
    %c51 = arith.constant 51 : index
    %c0_43 = arith.constant 0 : index
    %53 = vector.load %arg8[%c51, %c0_43] : memref<448x128xbf16, #tpu.memory_space<vmem>>, vector<128x128xbf16>
    %c8 = arith.constant 8 : index
    %c0_44 = arith.constant 0 : index
    %c0_45 = arith.constant 0 : index
    %54 = vector.load %arg3[%c8, %c0_44, %c0_45] : memref<9x128x128xbf16, #tpu.memory_space<vmem>>, vector<1x128x128xbf16>
    %55 = vector.shape_cast %54 : vector<1x128x128xbf16> to vector<128x128xbf16>
    %cst_46 = arith.constant dense<0.000000e+00> : vector<128x128xf32>
    %56 = tpu.matmul %53, %55, %cst_46 {dimension_numbers = #tpu.dot_dimension_numbers<[1], [0], [0], [1], [0, 0, 1, 1], [], []>} : vector<128x128xbf16>, vector<128x128xbf16>, vector<128x128xf32> -> vector<128x128xf32>
    %57 = arith.addf %52, %56 : vector<128x128xf32>
    %c0_47 = arith.constant 0 : index
    %c0_48 = arith.constant 0 : index
    %58 = vector.load %arg4[%c0_47, %c0_48] : memref<1x128xf32, #tpu.memory_space<vmem>>, vector<1x128xf32>
    %59 = vector.broadcast %58 : vector<1x128xf32> to vector<128x128xf32>
    %60 = arith.addf %57, %59 : vector<128x128xf32>
    %cst_49 = arith.constant 0.000000e+00 : f32
    %61 = vector.broadcast %cst_49 : f32 to vector<128x128xf32>
    %62 = arith.maximumf %60, %61 : vector<128x128xf32>
    %c0_50 = arith.constant 0 : index
    %c0_51 = arith.constant 0 : index
    %63 = vector.load %arg2[%c0_50, %c0_51] : memref<384x1xf32, #tpu.memory_space<vmem>>, vector<128x1xf32>
    %cst_52 = arith.constant 5.000000e-01 : f32
    %64 = vector.broadcast %cst_52 : f32 to vector<128x1xf32>
    %65 = arith.cmpf ogt, %63, %64 : vector<128x1xf32>
    %cst_53 = arith.constant 0.000000e+00 : f32
    %66 = vector.shape_cast %65 : vector<128x1xi1> to vector<128x1xi1>
    %67 = vector.broadcast %66 : vector<128x1xi1> to vector<128x128xi1>
    %68 = vector.broadcast %cst_53 : f32 to vector<128x128xf32>
    %69 = arith.select %67, %62, %68 : vector<128x128xi1>, vector<128x128xf32>
    %70 = arith.truncf %69 : vector<128x128xf32> to vector<128x128xbf16>
    %c32_54 = arith.constant 32 : index
    %c0_55 = arith.constant 0 : index
    %71 = vector.load %arg9[%c32_54, %c0_55] : memref<448x128xbf16, #tpu.memory_space<vmem>>, vector<128x128xbf16>
    tpu.vector_store %arg9[%c32_54, %c0_55], %70 {strides = array<i32>} : memref<448x128xbf16, #tpu.memory_space<vmem>>, vector<128x128xbf16>,
    %cst_56 = arith.constant 0.000000e+00 : f32
    %72 = vector.broadcast %cst_56 : f32 to vector<128x128xf32>
    %c141 = arith.constant 141 : index
    %c0_57 = arith.constant 0 : index
    %73 = vector.load %arg8[%c141, %c0_57] : memref<448x128xbf16, #tpu.memory_space<vmem>>, vector<128x128xbf16>
    %c0_58 = arith.constant 0 : index
    %c0_59 = arith.constant 0 : index
    %c0_60 = arith.constant 0 : index
    %74 = vector.load %arg3[%c0_58, %c0_59, %c0_60] : memref<9x128x128xbf16, #tpu.memory_space<vmem>>, vector<1x128x128xbf16>
    %75 = vector.shape_cast %74 : vector<1x128x128xbf16> to vector<128x128xbf16>
    %cst_61 = arith.constant dense<0.000000e+00> : vector<128x128xf32>
    %76 = tpu.matmul %73, %75, %cst_61 {dimension_numbers = #tpu.dot_dimension_numbers<[1], [0], [0], [1], [0, 0, 1, 1], [], []>} : vector<128x128xbf16>, vector<128x128xbf16>, vector<128x128xf32> -> vector<128x128xf32>
    %77 = arith.addf %72, %76 : vector<128x128xf32>
    %c142 = arith.constant 142 : index
    %c0_62 = arith.constant 0 : index
    %78 = vector.load %arg8[%c142, %c0_62] : memref<448x128xbf16, #tpu.memory_space<vmem>>, vector<128x128xbf16>
    %c1_63 = arith.constant 1 : index
    %c0_64 = arith.constant 0 : index
    %c0_65 = arith.constant 0 : index
    %79 = vector.load %arg3[%c1_63, %c0_64, %c0_65] : memref<9x128x128xbf16, #tpu.memory_space<vmem>>, vector<1x128x128xbf16>
    %80 = vector.shape_cast %79 : vector<1x128x128xbf16> to vector<128x128xbf16>
    %cst_66 = arith.constant dense<0.000000e+00> : vector<128x128xf32>
    %81 = tpu.matmul %78, %80, %cst_66 {dimension_numbers = #tpu.dot_dimension_numbers<[1], [0], [0], [1], [0, 0, 1, 1], [], []>} : vector<128x128xbf16>, vector<128x128xbf16>, vector<128x128xf32> -> vector<128x128xf32>
    %82 = arith.addf %77, %81 : vector<128x128xf32>
    %c143 = arith.constant 143 : index
    %c0_67 = arith.constant 0 : index
    %83 = vector.load %arg8[%c143, %c0_67] : memref<448x128xbf16, #tpu.memory_space<vmem>>, vector<128x128xbf16>
    %c2_68 = arith.constant 2 : index
    %c0_69 = arith.constant 0 : index
    %c0_70 = arith.constant 0 : index
    %84 = vector.load %arg3[%c2_68, %c0_69, %c0_70] : memref<9x128x128xbf16, #tpu.memory_space<vmem>>, vector<1x128x128xbf16>
    %85 = vector.shape_cast %84 : vector<1x128x128xbf16> to vector<128x128xbf16>
    %cst_71 = arith.constant dense<0.000000e+00> : vector<128x128xf32>
    %86 = tpu.matmul %83, %85, %cst_71 {dimension_numbers = #tpu.dot_dimension_numbers<[1], [0], [0], [1], [0, 0, 1, 1], [], []>} : vector<128x128xbf16>, vector<128x128xbf16>, vector<128x128xf32> -> vector<128x128xf32>
    %87 = arith.addf %82, %86 : vector<128x128xf32>
    %c159 = arith.constant 159 : index
    %c0_72 = arith.constant 0 : index
    %88 = vector.load %arg8[%c159, %c0_72] : memref<448x128xbf16, #tpu.memory_space<vmem>>, vector<128x128xbf16>
    %c3_73 = arith.constant 3 : index
    %c0_74 = arith.constant 0 : index
    %c0_75 = arith.constant 0 : index
    %89 = vector.load %arg3[%c3_73, %c0_74, %c0_75] : memref<9x128x128xbf16, #tpu.memory_space<vmem>>, vector<1x128x128xbf16>
    %90 = vector.shape_cast %89 : vector<1x128x128xbf16> to vector<128x128xbf16>
    %cst_76 = arith.constant dense<0.000000e+00> : vector<128x128xf32>
    %91 = tpu.matmul %88, %90, %cst_76 {dimension_numbers = #tpu.dot_dimension_numbers<[1], [0], [0], [1], [0, 0, 1, 1], [], []>} : vector<128x128xbf16>, vector<128x128xbf16>, vector<128x128xf32> -> vector<128x128xf32>
    %92 = arith.addf %87, %91 : vector<128x128xf32>
    %c160_77 = arith.constant 160 : index
    %c0_78 = arith.constant 0 : index
    %93 = vector.load %arg8[%c160_77, %c0_78] : memref<448x128xbf16, #tpu.memory_space<vmem>>, vector<128x128xbf16>
    %c4_79 = arith.constant 4 : index
    %c0_80 = arith.constant 0 : index
    %c0_81 = arith.constant 0 : index
    %94 = vector.load %arg3[%c4_79, %c0_80, %c0_81] : memref<9x128x128xbf16, #tpu.memory_space<vmem>>, vector<1x128x128xbf16>
    %95 = vector.shape_cast %94 : vector<1x128x128xbf16> to vector<128x128xbf16>
    %cst_82 = arith.constant dense<0.000000e+00> : vector<128x128xf32>
    %96 = tpu.matmul %93, %95, %cst_82 {dimension_numbers = #tpu.dot_dimension_numbers<[1], [0], [0], [1], [0, 0, 1, 1], [], []>} : vector<128x128xbf16>, vector<128x128xbf16>, vector<128x128xf32> -> vector<128x128xf32>
    %97 = arith.addf %92, %96 : vector<128x128xf32>
    %c161 = arith.constant 161 : index
    %c0_83 = arith.constant 0 : index
    %98 = vector.load %arg8[%c161, %c0_83] : memref<448x128xbf16, #tpu.memory_space<vmem>>, vector<128x128xbf16>
    %c5_84 = arith.constant 5 : index
    %c0_85 = arith.constant 0 : index
    %c0_86 = arith.constant 0 : index
    %99 = vector.load %arg3[%c5_84, %c0_85, %c0_86] : memref<9x128x128xbf16, #tpu.memory_space<vmem>>, vector<1x128x128xbf16>
    %100 = vector.shape_cast %99 : vector<1x128x128xbf16> to vector<128x128xbf16>
    %cst_87 = arith.constant dense<0.000000e+00> : vector<128x128xf32>
    %101 = tpu.matmul %98, %100, %cst_87 {dimension_numbers = #tpu.dot_dimension_numbers<[1], [0], [0], [1], [0, 0, 1, 1], [], []>} : vector<128x128xbf16>, vector<128x128xbf16>, vector<128x128xf32> -> vector<128x128xf32>
    %102 = arith.addf %97, %101 : vector<128x128xf32>
    %c177 = arith.constant 177 : index
    %c0_88 = arith.constant 0 : index
    %103 = vector.load %arg8[%c177, %c0_88] : memref<448x128xbf16, #tpu.memory_space<vmem>>, vector<128x128xbf16>
    %c6_89 = arith.constant 6 : index
    %c0_90 = arith.constant 0 : index
    %c0_91 = arith.constant 0 : index
    %104 = vector.load %arg3[%c6_89, %c0_90, %c0_91] : memref<9x128x128xbf16, #tpu.memory_space<vmem>>, vector<1x128x128xbf16>
    %105 = vector.shape_cast %104 : vector<1x128x128xbf16> to vector<128x128xbf16>
    %cst_92 = arith.constant dense<0.000000e+00> : vector<128x128xf32>
    %106 = tpu.matmul %103, %105, %cst_92 {dimension_numbers = #tpu.dot_dimension_numbers<[1], [0], [0], [1], [0, 0, 1, 1], [], []>} : vector<128x128xbf16>, vector<128x128xbf16>, vector<128x128xf32> -> vector<128x128xf32>
    %107 = arith.addf %102, %106 : vector<128x128xf32>
    %c178 = arith.constant 178 : index
    %c0_93 = arith.constant 0 : index
    %108 = vector.load %arg8[%c178, %c0_93] : memref<448x128xbf16, #tpu.memory_space<vmem>>, vector<128x128xbf16>
    %c7_94 = arith.constant 7 : index
    %c0_95 = arith.constant 0 : index
    %c0_96 = arith.constant 0 : index
    %109 = vector.load %arg3[%c7_94, %c0_95, %c0_96] : memref<9x128x128xbf16, #tpu.memory_space<vmem>>, vector<1x128x128xbf16>
    %110 = vector.shape_cast %109 : vector<1x128x128xbf16> to vector<128x128xbf16>
    %cst_97 = arith.constant dense<0.000000e+00> : vector<128x128xf32>
    %111 = tpu.matmul %108, %110, %cst_97 {dimension_numbers = #tpu.dot_dimension_numbers<[1], [0], [0], [1], [0, 0, 1, 1], [], []>} : vector<128x128xbf16>, vector<128x128xbf16>, vector<128x128xf32> -> vector<128x128xf32>
    %112 = arith.addf %107, %111 : vector<128x128xf32>
    %c179 = arith.constant 179 : index
    %c0_98 = arith.constant 0 : index
    %113 = vector.load %arg8[%c179, %c0_98] : memref<448x128xbf16, #tpu.memory_space<vmem>>, vector<128x128xbf16>
    %c8_99 = arith.constant 8 : index
    %c0_100 = arith.constant 0 : index
    %c0_101 = arith.constant 0 : index
    %114 = vector.load %arg3[%c8_99, %c0_100, %c0_101] : memref<9x128x128xbf16, #tpu.memory_space<vmem>>, vector<1x128x128xbf16>
    %115 = vector.shape_cast %114 : vector<1x128x128xbf16> to vector<128x128xbf16>
    %cst_102 = arith.constant dense<0.000000e+00> : vector<128x128xf32>
    %116 = tpu.matmul %113, %115, %cst_102 {dimension_numbers = #tpu.dot_dimension_numbers<[1], [0], [0], [1], [0, 0, 1, 1], [], []>} : vector<128x128xbf16>, vector<128x128xbf16>, vector<128x128xf32> -> vector<128x128xf32>
    %117 = arith.addf %112, %116 : vector<128x128xf32>
    %c0_103 = arith.constant 0 : index
    %c0_104 = arith.constant 0 : index
    %118 = vector.load %arg4[%c0_103, %c0_104] : memref<1x128xf32, #tpu.memory_space<vmem>>, vector<1x128xf32>
    %119 = vector.broadcast %118 : vector<1x128xf32> to vector<128x128xf32>
    %120 = arith.addf %117, %119 : vector<128x128xf32>
    %cst_105 = arith.constant 0.000000e+00 : f32
    %121 = vector.broadcast %cst_105 : f32 to vector<128x128xf32>
    %122 = arith.maximumf %120, %121 : vector<128x128xf32>
    %c128_106 = arith.constant 128 : index
    %c0_107 = arith.constant 0 : index
    %123 = vector.load %arg2[%c128_106, %c0_107] : memref<384x1xf32, #tpu.memory_space<vmem>>, vector<128x1xf32>
    %cst_108 = arith.constant 5.000000e-01 : f32
    %124 = vector.broadcast %cst_108 : f32 to vector<128x1xf32>
    %125 = arith.cmpf ogt, %123, %124 : vector<128x1xf32>
    %cst_109 = arith.constant 0.000000e+00 : f32
    %126 = vector.shape_cast %125 : vector<128x1xi1> to vector<128x1xi1>
    %127 = vector.broadcast %126 : vector<128x1xi1> to vector<128x128xi1>
    %128 = vector.broadcast %cst_109 : f32 to vector<128x128xf32>
    %129 = arith.select %127, %122, %128 : vector<128x128xi1>, vector<128x128xf32>
    %130 = arith.truncf %129 : vector<128x128xf32> to vector<128x128xbf16>
    %c160_110 = arith.constant 160 : index
    %c0_111 = arith.constant 0 : index
    %131 = vector.load %arg9[%c160_110, %c0_111] : memref<448x128xbf16, #tpu.memory_space<vmem>>, vector<128x128xbf16>
    tpu.vector_store %arg9[%c160_110, %c0_111], %130 {strides = array<i32>} : memref<448x128xbf16, #tpu.memory_space<vmem>>, vector<128x128xbf16>,
    %cst_112 = arith.constant 0.000000e+00 : f32
    %132 = vector.broadcast %cst_112 : f32 to vector<128x128xf32>
    %c269 = arith.constant 269 : index
    %c0_113 = arith.constant 0 : index
    %133 = vector.load %arg8[%c269, %c0_113] : memref<448x128xbf16, #tpu.memory_space<vmem>>, vector<128x128xbf16>
    %c0_114 = arith.constant 0 : index
    %c0_115 = arith.constant 0 : index
    %c0_116 = arith.constant 0 : index
    %134 = vector.load %arg3[%c0_114, %c0_115, %c0_116] : memref<9x128x128xbf16, #tpu.memory_space<vmem>>, vector<1x128x128xbf16>
    %135 = vector.shape_cast %134 : vector<1x128x128xbf16> to vector<128x128xbf16>
    %cst_117 = arith.constant dense<0.000000e+00> : vector<128x128xf32>
    %136 = tpu.matmul %133, %135, %cst_117 {dimension_numbers = #tpu.dot_dimension_numbers<[1], [0], [0], [1], [0, 0, 1, 1], [], []>} : vector<128x128xbf16>, vector<128x128xbf16>, vector<128x128xf32> -> vector<128x128xf32>
    %137 = arith.addf %132, %136 : vector<128x128xf32>
    %c270 = arith.constant 270 : index
    %c0_118 = arith.constant 0 : index
    %138 = vector.load %arg8[%c270, %c0_118] : memref<448x128xbf16, #tpu.memory_space<vmem>>, vector<128x128xbf16>
    %c1_119 = arith.constant 1 : index
    %c0_120 = arith.constant 0 : index
    %c0_121 = arith.constant 0 : index
    %139 = vector.load %arg3[%c1_119, %c0_120, %c0_121] : memref<9x128x128xbf16, #tpu.memory_space<vmem>>, vector<1x128x128xbf16>
    %140 = vector.shape_cast %139 : vector<1x128x128xbf16> to vector<128x128xbf16>
    %cst_122 = arith.constant dense<0.000000e+00> : vector<128x128xf32>
    %141 = tpu.matmul %138, %140, %cst_122 {dimension_numbers = #tpu.dot_dimension_numbers<[1], [0], [0], [1], [0, 0, 1, 1], [], []>} : vector<128x128xbf16>, vector<128x128xbf16>, vector<128x128xf32> -> vector<128x128xf32>
    %142 = arith.addf %137, %141 : vector<128x128xf32>
    %c271 = arith.constant 271 : index
    %c0_123 = arith.constant 0 : index
    %143 = vector.load %arg8[%c271, %c0_123] : memref<448x128xbf16, #tpu.memory_space<vmem>>, vector<128x128xbf16>
    %c2_124 = arith.constant 2 : index
    %c0_125 = arith.constant 0 : index
    %c0_126 = arith.constant 0 : index
    %144 = vector.load %arg3[%c2_124, %c0_125, %c0_126] : memref<9x128x128xbf16, #tpu.memory_space<vmem>>, vector<1x128x128xbf16>
    %145 = vector.shape_cast %144 : vector<1x128x128xbf16> to vector<128x128xbf16>
    %cst_127 = arith.constant dense<0.000000e+00> : vector<128x128xf32>
    %146 = tpu.matmul %143, %145, %cst_127 {dimension_numbers = #tpu.dot_dimension_numbers<[1], [0], [0], [1], [0, 0, 1, 1], [], []>} : vector<128x128xbf16>, vector<128x128xbf16>, vector<128x128xf32> -> vector<128x128xf32>
    %147 = arith.addf %142, %146 : vector<128x128xf32>
    %c287 = arith.constant 287 : index
    %c0_128 = arith.constant 0 : index
    %148 = vector.load %arg8[%c287, %c0_128] : memref<448x128xbf16, #tpu.memory_space<vmem>>, vector<128x128xbf16>
    %c3_129 = arith.constant 3 : index
    %c0_130 = arith.constant 0 : index
    %c0_131 = arith.constant 0 : index
    %149 = vector.load %arg3[%c3_129, %c0_130, %c0_131] : memref<9x128x128xbf16, #tpu.memory_space<vmem>>, vector<1x128x128xbf16>
    %150 = vector.shape_cast %149 : vector<1x128x128xbf16> to vector<128x128xbf16>
    %cst_132 = arith.constant dense<0.000000e+00> : vector<128x128xf32>
    %151 = tpu.matmul %148, %150, %cst_132 {dimension_numbers = #tpu.dot_dimension_numbers<[1], [0], [0], [1], [0, 0, 1, 1], [], []>} : vector<128x128xbf16>, vector<128x128xbf16>, vector<128x128xf32> -> vector<128x128xf32>
    %152 = arith.addf %147, %151 : vector<128x128xf32>
    %c288_133 = arith.constant 288 : index
    %c0_134 = arith.constant 0 : index
    %153 = vector.load %arg8[%c288_133, %c0_134] : memref<448x128xbf16, #tpu.memory_space<vmem>>, vector<128x128xbf16>
    %c4_135 = arith.constant 4 : index
    %c0_136 = arith.constant 0 : index
    %c0_137 = arith.constant 0 : index
    %154 = vector.load %arg3[%c4_135, %c0_136, %c0_137] : memref<9x128x128xbf16, #tpu.memory_space<vmem>>, vector<1x128x128xbf16>
    %155 = vector.shape_cast %154 : vector<1x128x128xbf16> to vector<128x128xbf16>
    %cst_138 = arith.constant dense<0.000000e+00> : vector<128x128xf32>
    %156 = tpu.matmul %153, %155, %cst_138 {dimension_numbers = #tpu.dot_dimension_numbers<[1], [0], [0], [1], [0, 0, 1, 1], [], []>} : vector<128x128xbf16>, vector<128x128xbf16>, vector<128x128xf32> -> vector<128x128xf32>
    %157 = arith.addf %152, %156 : vector<128x128xf32>
    %c289 = arith.constant 289 : index
    %c0_139 = arith.constant 0 : index
    %158 = vector.load %arg8[%c289, %c0_139] : memref<448x128xbf16, #tpu.memory_space<vmem>>, vector<128x128xbf16>
    %c5_140 = arith.constant 5 : index
    %c0_141 = arith.constant 0 : index
    %c0_142 = arith.constant 0 : index
    %159 = vector.load %arg3[%c5_140, %c0_141, %c0_142] : memref<9x128x128xbf16, #tpu.memory_space<vmem>>, vector<1x128x128xbf16>
    %160 = vector.shape_cast %159 : vector<1x128x128xbf16> to vector<128x128xbf16>
    %cst_143 = arith.constant dense<0.000000e+00> : vector<128x128xf32>
    %161 = tpu.matmul %158, %160, %cst_143 {dimension_numbers = #tpu.dot_dimension_numbers<[1], [0], [0], [1], [0, 0, 1, 1], [], []>} : vector<128x128xbf16>, vector<128x128xbf16>, vector<128x128xf32> -> vector<128x128xf32>
    %162 = arith.addf %157, %161 : vector<128x128xf32>
    %c305 = arith.constant 305 : index
    %c0_144 = arith.constant 0 : index
    %163 = vector.load %arg8[%c305, %c0_144] : memref<448x128xbf16, #tpu.memory_space<vmem>>, vector<128x128xbf16>
    %c6_145 = arith.constant 6 : index
    %c0_146 = arith.constant 0 : index
    %c0_147 = arith.constant 0 : index
    %164 = vector.load %arg3[%c6_145, %c0_146, %c0_147] : memref<9x128x128xbf16, #tpu.memory_space<vmem>>, vector<1x128x128xbf16>
    %165 = vector.shape_cast %164 : vector<1x128x128xbf16> to vector<128x128xbf16>
    %cst_148 = arith.constant dense<0.000000e+00> : vector<128x128xf32>
    %166 = tpu.matmul %163, %165, %cst_148 {dimension_numbers = #tpu.dot_dimension_numbers<[1], [0], [0], [1], [0, 0, 1, 1], [], []>} : vector<128x128xbf16>, vector<128x128xbf16>, vector<128x128xf32> -> vector<128x128xf32>
    %167 = arith.addf %162, %166 : vector<128x128xf32>
    %c306 = arith.constant 306 : index
    %c0_149 = arith.constant 0 : index
    %168 = vector.load %arg8[%c306, %c0_149] : memref<448x128xbf16, #tpu.memory_space<vmem>>, vector<128x128xbf16>
    %c7_150 = arith.constant 7 : index
    %c0_151 = arith.constant 0 : index
    %c0_152 = arith.constant 0 : index
    %169 = vector.load %arg3[%c7_150, %c0_151, %c0_152] : memref<9x128x128xbf16, #tpu.memory_space<vmem>>, vector<1x128x128xbf16>
    %170 = vector.shape_cast %169 : vector<1x128x128xbf16> to vector<128x128xbf16>
    %cst_153 = arith.constant dense<0.000000e+00> : vector<128x128xf32>
    %171 = tpu.matmul %168, %170, %cst_153 {dimension_numbers = #tpu.dot_dimension_numbers<[1], [0], [0], [1], [0, 0, 1, 1], [], []>} : vector<128x128xbf16>, vector<128x128xbf16>, vector<128x128xf32> -> vector<128x128xf32>
    %172 = arith.addf %167, %171 : vector<128x128xf32>
    %c307 = arith.constant 307 : index
    %c0_154 = arith.constant 0 : index
    %173 = vector.load %arg8[%c307, %c0_154] : memref<448x128xbf16, #tpu.memory_space<vmem>>, vector<128x128xbf16>
    %c8_155 = arith.constant 8 : index
    %c0_156 = arith.constant 0 : index
    %c0_157 = arith.constant 0 : index
    %174 = vector.load %arg3[%c8_155, %c0_156, %c0_157] : memref<9x128x128xbf16, #tpu.memory_space<vmem>>, vector<1x128x128xbf16>
    %175 = vector.shape_cast %174 : vector<1x128x128xbf16> to vector<128x128xbf16>
    %cst_158 = arith.constant dense<0.000000e+00> : vector<128x128xf32>
    %176 = tpu.matmul %173, %175, %cst_158 {dimension_numbers = #tpu.dot_dimension_numbers<[1], [0], [0], [1], [0, 0, 1, 1], [], []>} : vector<128x128xbf16>, vector<128x128xbf16>, vector<128x128xf32> -> vector<128x128xf32>
    %177 = arith.addf %172, %176 : vector<128x128xf32>
    %c0_159 = arith.constant 0 : index
    %c0_160 = arith.constant 0 : index
    %178 = vector.load %arg4[%c0_159, %c0_160] : memref<1x128xf32, #tpu.memory_space<vmem>>, vector<1x128xf32>
    %179 = vector.broadcast %178 : vector<1x128xf32> to vector<128x128xf32>
    %180 = arith.addf %177, %179 : vector<128x128xf32>
    %cst_161 = arith.constant 0.000000e+00 : f32
    %181 = vector.broadcast %cst_161 : f32 to vector<128x128xf32>
    %182 = arith.maximumf %180, %181 : vector<128x128xf32>
    %c256_162 = arith.constant 256 : index
    %c0_163 = arith.constant 0 : index
    %183 = vector.load %arg2[%c256_162, %c0_163] : memref<384x1xf32, #tpu.memory_space<vmem>>, vector<128x1xf32>
    %cst_164 = arith.constant 5.000000e-01 : f32
    %184 = vector.broadcast %cst_164 : f32 to vector<128x1xf32>
    %185 = arith.cmpf ogt, %183, %184 : vector<128x1xf32>
    %cst_165 = arith.constant 0.000000e+00 : f32
    %186 = vector.shape_cast %185 : vector<128x1xi1> to vector<128x1xi1>
    %187 = vector.broadcast %186 : vector<128x1xi1> to vector<128x128xi1>
    %188 = vector.broadcast %cst_165 : f32 to vector<128x128xf32>
    %189 = arith.select %187, %182, %188 : vector<128x128xi1>, vector<128x128xf32>
    %190 = arith.truncf %189 : vector<128x128xf32> to vector<128x128xbf16>
    %c288_166 = arith.constant 288 : index
    %c0_167 = arith.constant 0 : index
    %191 = vector.load %arg9[%c288_166, %c0_167] : memref<448x128xbf16, #tpu.memory_space<vmem>>, vector<128x128xbf16>
    tpu.vector_store %arg9[%c288_166, %c0_167], %190 {strides = array<i32>} : memref<448x128xbf16, #tpu.memory_space<vmem>>, vector<128x128xbf16>,
    %cst_168 = arith.constant 0.000000e+00 : f32
    %192 = vector.broadcast %cst_168 : f32 to vector<128x128xf32>
    %c13_169 = arith.constant 13 : index
    %c0_170 = arith.constant 0 : index
    %193 = vector.load %arg9[%c13_169, %c0_170] : memref<448x128xbf16, #tpu.memory_space<vmem>>, vector<128x128xbf16>
    %c0_171 = arith.constant 0 : index
    %c0_172 = arith.constant 0 : index
    %c0_173 = arith.constant 0 : index
    %194 = vector.load %arg5[%c0_171, %c0_172, %c0_173] : memref<9x128x128xbf16, #tpu.memory_space<vmem>>, vector<1x128x128xbf16>
    %195 = vector.shape_cast %194 : vector<1x128x128xbf16> to vector<128x128xbf16>
    %cst_174 = arith.constant dense<0.000000e+00> : vector<128x128xf32>
    %196 = tpu.matmul %193, %195, %cst_174 {dimension_numbers = #tpu.dot_dimension_numbers<[1], [0], [0], [1], [0, 0, 1, 1], [], []>} : vector<128x128xbf16>, vector<128x128xbf16>, vector<128x128xf32> -> vector<128x128xf32>
    %197 = arith.addf %192, %196 : vector<128x128xf32>
    %c14_175 = arith.constant 14 : index
    %c0_176 = arith.constant 0 : index
    %198 = vector.load %arg9[%c14_175, %c0_176] : memref<448x128xbf16, #tpu.memory_space<vmem>>, vector<128x128xbf16>
    %c1_177 = arith.constant 1 : index
    %c0_178 = arith.constant 0 : index
    %c0_179 = arith.constant 0 : index
    %199 = vector.load %arg5[%c1_177, %c0_178, %c0_179] : memref<9x128x128xbf16, #tpu.memory_space<vmem>>, vector<1x128x128xbf16>
    %200 = vector.shape_cast %199 : vector<1x128x128xbf16> to vector<128x128xbf16>
    %cst_180 = arith.constant dense<0.000000e+00> : vector<128x128xf32>
    %201 = tpu.matmul %198, %200, %cst_180 {dimension_numbers = #tpu.dot_dimension_numbers<[1], [0], [0], [1], [0, 0, 1, 1], [], []>} : vector<128x128xbf16>, vector<128x128xbf16>, vector<128x128xf32> -> vector<128x128xf32>
    %202 = arith.addf %197, %201 : vector<128x128xf32>
    %c15_181 = arith.constant 15 : index
    %c0_182 = arith.constant 0 : index
    %203 = vector.load %arg9[%c15_181, %c0_182] : memref<448x128xbf16, #tpu.memory_space<vmem>>, vector<128x128xbf16>
    %c2_183 = arith.constant 2 : index
    %c0_184 = arith.constant 0 : index
    %c0_185 = arith.constant 0 : index
    %204 = vector.load %arg5[%c2_183, %c0_184, %c0_185] : memref<9x128x128xbf16, #tpu.memory_space<vmem>>, vector<1x128x128xbf16>
    %205 = vector.shape_cast %204 : vector<1x128x128xbf16> to vector<128x128xbf16>
    %cst_186 = arith.constant dense<0.000000e+00> : vector<128x128xf32>
    %206 = tpu.matmul %203, %205, %cst_186 {dimension_numbers = #tpu.dot_dimension_numbers<[1], [0], [0], [1], [0, 0, 1, 1], [], []>} : vector<128x128xbf16>, vector<128x128xbf16>, vector<128x128xf32> -> vector<128x128xf32>
    %207 = arith.addf %202, %206 : vector<128x128xf32>
    %c31_187 = arith.constant 31 : index
    %c0_188 = arith.constant 0 : index
    %208 = vector.load %arg9[%c31_187, %c0_188] : memref<448x128xbf16, #tpu.memory_space<vmem>>, vector<128x128xbf16>
    %c3_189 = arith.constant 3 : index
    %c0_190 = arith.constant 0 : index
    %c0_191 = arith.constant 0 : index
    %209 = vector.load %arg5[%c3_189, %c0_190, %c0_191] : memref<9x128x128xbf16, #tpu.memory_space<vmem>>, vector<1x128x128xbf16>
    %210 = vector.shape_cast %209 : vector<1x128x128xbf16> to vector<128x128xbf16>
    %cst_192 = arith.constant dense<0.000000e+00> : vector<128x128xf32>
    %211 = tpu.matmul %208, %210, %cst_192 {dimension_numbers = #tpu.dot_dimension_numbers<[1], [0], [0], [1], [0, 0, 1, 1], [], []>} : vector<128x128xbf16>, vector<128x128xbf16>, vector<128x128xf32> -> vector<128x128xf32>
    %212 = arith.addf %207, %211 : vector<128x128xf32>
    %c32_193 = arith.constant 32 : index
    %c0_194 = arith.constant 0 : index
    %213 = vector.load %arg9[%c32_193, %c0_194] : memref<448x128xbf16, #tpu.memory_space<vmem>>, vector<128x128xbf16>
    %c4_195 = arith.constant 4 : index
    %c0_196 = arith.constant 0 : index
    %c0_197 = arith.constant 0 : index
    %214 = vector.load %arg5[%c4_195, %c0_196, %c0_197] : memref<9x128x128xbf16, #tpu.memory_space<vmem>>, vector<1x128x128xbf16>
    %215 = vector.shape_cast %214 : vector<1x128x128xbf16> to vector<128x128xbf16>
    %cst_198 = arith.constant dense<0.000000e+00> : vector<128x128xf32>
    %216 = tpu.matmul %213, %215, %cst_198 {dimension_numbers = #tpu.dot_dimension_numbers<[1], [0], [0], [1], [0, 0, 1, 1], [], []>} : vector<128x128xbf16>, vector<128x128xbf16>, vector<128x128xf32> -> vector<128x128xf32>
    %217 = arith.addf %212, %216 : vector<128x128xf32>
    %c33_199 = arith.constant 33 : index
    %c0_200 = arith.constant 0 : index
    %218 = vector.load %arg9[%c33_199, %c0_200] : memref<448x128xbf16, #tpu.memory_space<vmem>>, vector<128x128xbf16>
    %c5_201 = arith.constant 5 : index
    %c0_202 = arith.constant 0 : index
    %c0_203 = arith.constant 0 : index
    %219 = vector.load %arg5[%c5_201, %c0_202, %c0_203] : memref<9x128x128xbf16, #tpu.memory_space<vmem>>, vector<1x128x128xbf16>
    %220 = vector.shape_cast %219 : vector<1x128x128xbf16> to vector<128x128xbf16>
    %cst_204 = arith.constant dense<0.000000e+00> : vector<128x128xf32>
    %221 = tpu.matmul %218, %220, %cst_204 {dimension_numbers = #tpu.dot_dimension_numbers<[1], [0], [0], [1], [0, 0, 1, 1], [], []>} : vector<128x128xbf16>, vector<128x128xbf16>, vector<128x128xf32> -> vector<128x128xf32>
    %222 = arith.addf %217, %221 : vector<128x128xf32>
    %c49_205 = arith.constant 49 : index
    %c0_206 = arith.constant 0 : index
    %223 = vector.load %arg9[%c49_205, %c0_206] : memref<448x128xbf16, #tpu.memory_space<vmem>>, vector<128x128xbf16>
    %c6_207 = arith.constant 6 : index
    %c0_208 = arith.constant 0 : index
    %c0_209 = arith.constant 0 : index
    %224 = vector.load %arg5[%c6_207, %c0_208, %c0_209] : memref<9x128x128xbf16, #tpu.memory_space<vmem>>, vector<1x128x128xbf16>
    %225 = vector.shape_cast %224 : vector<1x128x128xbf16> to vector<128x128xbf16>
    %cst_210 = arith.constant dense<0.000000e+00> : vector<128x128xf32>
    %226 = tpu.matmul %223, %225, %cst_210 {dimension_numbers = #tpu.dot_dimension_numbers<[1], [0], [0], [1], [0, 0, 1, 1], [], []>} : vector<128x128xbf16>, vector<128x128xbf16>, vector<128x128xf32> -> vector<128x128xf32>
    %227 = arith.addf %222, %226 : vector<128x128xf32>
    %c50_211 = arith.constant 50 : index
    %c0_212 = arith.constant 0 : index
    %228 = vector.load %arg9[%c50_211, %c0_212] : memref<448x128xbf16, #tpu.memory_space<vmem>>, vector<128x128xbf16>
    %c7_213 = arith.constant 7 : index
    %c0_214 = arith.constant 0 : index
    %c0_215 = arith.constant 0 : index
    %229 = vector.load %arg5[%c7_213, %c0_214, %c0_215] : memref<9x128x128xbf16, #tpu.memory_space<vmem>>, vector<1x128x128xbf16>
    %230 = vector.shape_cast %229 : vector<1x128x128xbf16> to vector<128x128xbf16>
    %cst_216 = arith.constant dense<0.000000e+00> : vector<128x128xf32>
    %231 = tpu.matmul %228, %230, %cst_216 {dimension_numbers = #tpu.dot_dimension_numbers<[1], [0], [0], [1], [0, 0, 1, 1], [], []>} : vector<128x128xbf16>, vector<128x128xbf16>, vector<128x128xf32> -> vector<128x128xf32>
    %232 = arith.addf %227, %231 : vector<128x128xf32>
    %c51_217 = arith.constant 51 : index
    %c0_218 = arith.constant 0 : index
    %233 = vector.load %arg9[%c51_217, %c0_218] : memref<448x128xbf16, #tpu.memory_space<vmem>>, vector<128x128xbf16>
    %c8_219 = arith.constant 8 : index
    %c0_220 = arith.constant 0 : index
    %c0_221 = arith.constant 0 : index
    %234 = vector.load %arg5[%c8_219, %c0_220, %c0_221] : memref<9x128x128xbf16, #tpu.memory_space<vmem>>, vector<1x128x128xbf16>
    %235 = vector.shape_cast %234 : vector<1x128x128xbf16> to vector<128x128xbf16>
    %cst_222 = arith.constant dense<0.000000e+00> : vector<128x128xf32>
    %236 = tpu.matmul %233, %235, %cst_222 {dimension_numbers = #tpu.dot_dimension_numbers<[1], [0], [0], [1], [0, 0, 1, 1], [], []>} : vector<128x128xbf16>, vector<128x128xbf16>, vector<128x128xf32> -> vector<128x128xf32>
    %237 = arith.addf %232, %236 : vector<128x128xf32>
    %c0_223 = arith.constant 0 : index
    %c0_224 = arith.constant 0 : index
    %c0_225 = arith.constant 0 : index
    %238 = vector.load %arg1[%c0_223, %c0_224, %c0_225] : memref<1x384x128xf32, #tpu.memory_space<vmem>>, vector<1x128x128xf32>
    %239 = vector.shape_cast %238 : vector<1x128x128xf32> to vector<128x128xf32>
    %c0_226 = arith.constant 0 : index
    %c0_227 = arith.constant 0 : index
    %240 = vector.load %arg6[%c0_226, %c0_227] : memref<1x128xf32, #tpu.memory_space<vmem>>, vector<1x128xf32>
    %241 = vector.broadcast %240 : vector<1x128xf32> to vector<128x128xf32>
    %242 = arith.addf %237, %241 : vector<128x128xf32>
    %243 = arith.addf %242, %239 : vector<128x128xf32>
    %cst_228 = arith.constant 0.000000e+00 : f32
    %244 = vector.broadcast %cst_228 : f32 to vector<128x128xf32>
    %245 = arith.maximumf %243, %244 : vector<128x128xf32>
    %c0_229 = arith.constant 0 : index
    %c0_230 = arith.constant 0 : index
    %c0_231 = arith.constant 0 : index
    %246 = vector.load %arg7[%c0_229, %c0_230, %c0_231] : memref<1x384x128xf32, #tpu.memory_space<vmem>>, vector<1x128x128xf32>
    %247 = vector.shape_cast %246 : vector<1x128x128xf32> to vector<128x128xf32>
    %248 = vector.shape_cast %245 : vector<128x128xf32> to vector<1x128x128xf32>
    tpu.vector_store %arg7[%c0_229, %c0_230, %c0_231], %248 {strides = array<i32>} : memref<1x384x128xf32, #tpu.memory_space<vmem>>, vector<1x128x128xf32>,
    %cst_232 = arith.constant 0.000000e+00 : f32
    %249 = vector.broadcast %cst_232 : f32 to vector<128x128xf32>
    %c141_233 = arith.constant 141 : index
    %c0_234 = arith.constant 0 : index
    %250 = vector.load %arg9[%c141_233, %c0_234] : memref<448x128xbf16, #tpu.memory_space<vmem>>, vector<128x128xbf16>
    %c0_235 = arith.constant 0 : index
    %c0_236 = arith.constant 0 : index
    %c0_237 = arith.constant 0 : index
    %251 = vector.load %arg5[%c0_235, %c0_236, %c0_237] : memref<9x128x128xbf16, #tpu.memory_space<vmem>>, vector<1x128x128xbf16>
    %252 = vector.shape_cast %251 : vector<1x128x128xbf16> to vector<128x128xbf16>
    %cst_238 = arith.constant dense<0.000000e+00> : vector<128x128xf32>
    %253 = tpu.matmul %250, %252, %cst_238 {dimension_numbers = #tpu.dot_dimension_numbers<[1], [0], [0], [1], [0, 0, 1, 1], [], []>} : vector<128x128xbf16>, vector<128x128xbf16>, vector<128x128xf32> -> vector<128x128xf32>
    %254 = arith.addf %249, %253 : vector<128x128xf32>
    %c142_239 = arith.constant 142 : index
    %c0_240 = arith.constant 0 : index
    %255 = vector.load %arg9[%c142_239, %c0_240] : memref<448x128xbf16, #tpu.memory_space<vmem>>, vector<128x128xbf16>
    %c1_241 = arith.constant 1 : index
    %c0_242 = arith.constant 0 : index
    %c0_243 = arith.constant 0 : index
    %256 = vector.load %arg5[%c1_241, %c0_242, %c0_243] : memref<9x128x128xbf16, #tpu.memory_space<vmem>>, vector<1x128x128xbf16>
    %257 = vector.shape_cast %256 : vector<1x128x128xbf16> to vector<128x128xbf16>
    %cst_244 = arith.constant dense<0.000000e+00> : vector<128x128xf32>
    %258 = tpu.matmul %255, %257, %cst_244 {dimension_numbers = #tpu.dot_dimension_numbers<[1], [0], [0], [1], [0, 0, 1, 1], [], []>} : vector<128x128xbf16>, vector<128x128xbf16>, vector<128x128xf32> -> vector<128x128xf32>
    %259 = arith.addf %254, %258 : vector<128x128xf32>
    %c143_245 = arith.constant 143 : index
    %c0_246 = arith.constant 0 : index
    %260 = vector.load %arg9[%c143_245, %c0_246] : memref<448x128xbf16, #tpu.memory_space<vmem>>, vector<128x128xbf16>
    %c2_247 = arith.constant 2 : index
    %c0_248 = arith.constant 0 : index
    %c0_249 = arith.constant 0 : index
    %261 = vector.load %arg5[%c2_247, %c0_248, %c0_249] : memref<9x128x128xbf16, #tpu.memory_space<vmem>>, vector<1x128x128xbf16>
    %262 = vector.shape_cast %261 : vector<1x128x128xbf16> to vector<128x128xbf16>
    %cst_250 = arith.constant dense<0.000000e+00> : vector<128x128xf32>
    %263 = tpu.matmul %260, %262, %cst_250 {dimension_numbers = #tpu.dot_dimension_numbers<[1], [0], [0], [1], [0, 0, 1, 1], [], []>} : vector<128x128xbf16>, vector<128x128xbf16>, vector<128x128xf32> -> vector<128x128xf32>
    %264 = arith.addf %259, %263 : vector<128x128xf32>
    %c159_251 = arith.constant 159 : index
    %c0_252 = arith.constant 0 : index
    %265 = vector.load %arg9[%c159_251, %c0_252] : memref<448x128xbf16, #tpu.memory_space<vmem>>, vector<128x128xbf16>
    %c3_253 = arith.constant 3 : index
    %c0_254 = arith.constant 0 : index
    %c0_255 = arith.constant 0 : index
    %266 = vector.load %arg5[%c3_253, %c0_254, %c0_255] : memref<9x128x128xbf16, #tpu.memory_space<vmem>>, vector<1x128x128xbf16>
    %267 = vector.shape_cast %266 : vector<1x128x128xbf16> to vector<128x128xbf16>
    %cst_256 = arith.constant dense<0.000000e+00> : vector<128x128xf32>
    %268 = tpu.matmul %265, %267, %cst_256 {dimension_numbers = #tpu.dot_dimension_numbers<[1], [0], [0], [1], [0, 0, 1, 1], [], []>} : vector<128x128xbf16>, vector<128x128xbf16>, vector<128x128xf32> -> vector<128x128xf32>
    %269 = arith.addf %264, %268 : vector<128x128xf32>
    %c160_257 = arith.constant 160 : index
    %c0_258 = arith.constant 0 : index
    %270 = vector.load %arg9[%c160_257, %c0_258] : memref<448x128xbf16, #tpu.memory_space<vmem>>, vector<128x128xbf16>
    %c4_259 = arith.constant 4 : index
    %c0_260 = arith.constant 0 : index
    %c0_261 = arith.constant 0 : index
    %271 = vector.load %arg5[%c4_259, %c0_260, %c0_261] : memref<9x128x128xbf16, #tpu.memory_space<vmem>>, vector<1x128x128xbf16>
    %272 = vector.shape_cast %271 : vector<1x128x128xbf16> to vector<128x128xbf16>
    %cst_262 = arith.constant dense<0.000000e+00> : vector<128x128xf32>
    %273 = tpu.matmul %270, %272, %cst_262 {dimension_numbers = #tpu.dot_dimension_numbers<[1], [0], [0], [1], [0, 0, 1, 1], [], []>} : vector<128x128xbf16>, vector<128x128xbf16>, vector<128x128xf32> -> vector<128x128xf32>
    %274 = arith.addf %269, %273 : vector<128x128xf32>
    %c161_263 = arith.constant 161 : index
    %c0_264 = arith.constant 0 : index
    %275 = vector.load %arg9[%c161_263, %c0_264] : memref<448x128xbf16, #tpu.memory_space<vmem>>, vector<128x128xbf16>
    %c5_265 = arith.constant 5 : index
    %c0_266 = arith.constant 0 : index
    %c0_267 = arith.constant 0 : index
    %276 = vector.load %arg5[%c5_265, %c0_266, %c0_267] : memref<9x128x128xbf16, #tpu.memory_space<vmem>>, vector<1x128x128xbf16>
    %277 = vector.shape_cast %276 : vector<1x128x128xbf16> to vector<128x128xbf16>
    %cst_268 = arith.constant dense<0.000000e+00> : vector<128x128xf32>
    %278 = tpu.matmul %275, %277, %cst_268 {dimension_numbers = #tpu.dot_dimension_numbers<[1], [0], [0], [1], [0, 0, 1, 1], [], []>} : vector<128x128xbf16>, vector<128x128xbf16>, vector<128x128xf32> -> vector<128x128xf32>
    %279 = arith.addf %274, %278 : vector<128x128xf32>
    %c177_269 = arith.constant 177 : index
    %c0_270 = arith.constant 0 : index
    %280 = vector.load %arg9[%c177_269, %c0_270] : memref<448x128xbf16, #tpu.memory_space<vmem>>, vector<128x128xbf16>
    %c6_271 = arith.constant 6 : index
    %c0_272 = arith.constant 0 : index
    %c0_273 = arith.constant 0 : index
    %281 = vector.load %arg5[%c6_271, %c0_272, %c0_273] : memref<9x128x128xbf16, #tpu.memory_space<vmem>>, vector<1x128x128xbf16>
    %282 = vector.shape_cast %281 : vector<1x128x128xbf16> to vector<128x128xbf16>
    %cst_274 = arith.constant dense<0.000000e+00> : vector<128x128xf32>
    %283 = tpu.matmul %280, %282, %cst_274 {dimension_numbers = #tpu.dot_dimension_numbers<[1], [0], [0], [1], [0, 0, 1, 1], [], []>} : vector<128x128xbf16>, vector<128x128xbf16>, vector<128x128xf32> -> vector<128x128xf32>
    %284 = arith.addf %279, %283 : vector<128x128xf32>
    %c178_275 = arith.constant 178 : index
    %c0_276 = arith.constant 0 : index
    %285 = vector.load %arg9[%c178_275, %c0_276] : memref<448x128xbf16, #tpu.memory_space<vmem>>, vector<128x128xbf16>
    %c7_277 = arith.constant 7 : index
    %c0_278 = arith.constant 0 : index
    %c0_279 = arith.constant 0 : index
    %286 = vector.load %arg5[%c7_277, %c0_278, %c0_279] : memref<9x128x128xbf16, #tpu.memory_space<vmem>>, vector<1x128x128xbf16>
    %287 = vector.shape_cast %286 : vector<1x128x128xbf16> to vector<128x128xbf16>
    %cst_280 = arith.constant dense<0.000000e+00> : vector<128x128xf32>
    %288 = tpu.matmul %285, %287, %cst_280 {dimension_numbers = #tpu.dot_dimension_numbers<[1], [0], [0], [1], [0, 0, 1, 1], [], []>} : vector<128x128xbf16>, vector<128x128xbf16>, vector<128x128xf32> -> vector<128x128xf32>
    %289 = arith.addf %284, %288 : vector<128x128xf32>
    %c179_281 = arith.constant 179 : index
    %c0_282 = arith.constant 0 : index
    %290 = vector.load %arg9[%c179_281, %c0_282] : memref<448x128xbf16, #tpu.memory_space<vmem>>, vector<128x128xbf16>
    %c8_283 = arith.constant 8 : index
    %c0_284 = arith.constant 0 : index
    %c0_285 = arith.constant 0 : index
    %291 = vector.load %arg5[%c8_283, %c0_284, %c0_285] : memref<9x128x128xbf16, #tpu.memory_space<vmem>>, vector<1x128x128xbf16>
    %292 = vector.shape_cast %291 : vector<1x128x128xbf16> to vector<128x128xbf16>
    %cst_286 = arith.constant dense<0.000000e+00> : vector<128x128xf32>
    %293 = tpu.matmul %290, %292, %cst_286 {dimension_numbers = #tpu.dot_dimension_numbers<[1], [0], [0], [1], [0, 0, 1, 1], [], []>} : vector<128x128xbf16>, vector<128x128xbf16>, vector<128x128xf32> -> vector<128x128xf32>
    %294 = arith.addf %289, %293 : vector<128x128xf32>
    %c0_287 = arith.constant 0 : index
    %c128_288 = arith.constant 128 : index
    %c0_289 = arith.constant 0 : index
    %295 = vector.load %arg1[%c0_287, %c128_288, %c0_289] : memref<1x384x128xf32, #tpu.memory_space<vmem>>, vector<1x128x128xf32>
    %296 = vector.shape_cast %295 : vector<1x128x128xf32> to vector<128x128xf32>
    %c0_290 = arith.constant 0 : index
    %c0_291 = arith.constant 0 : index
    %297 = vector.load %arg6[%c0_290, %c0_291] : memref<1x128xf32, #tpu.memory_space<vmem>>, vector<1x128xf32>
    %298 = vector.broadcast %297 : vector<1x128xf32> to vector<128x128xf32>
    %299 = arith.addf %294, %298 : vector<128x128xf32>
    %300 = arith.addf %299, %296 : vector<128x128xf32>
    %cst_292 = arith.constant 0.000000e+00 : f32
    %301 = vector.broadcast %cst_292 : f32 to vector<128x128xf32>
    %302 = arith.maximumf %300, %301 : vector<128x128xf32>
    %c0_293 = arith.constant 0 : index
    %c128_294 = arith.constant 128 : index
    %c0_295 = arith.constant 0 : index
    %303 = vector.load %arg7[%c0_293, %c128_294, %c0_295] : memref<1x384x128xf32, #tpu.memory_space<vmem>>, vector<1x128x128xf32>
    %304 = vector.shape_cast %303 : vector<1x128x128xf32> to vector<128x128xf32>
    %305 = vector.shape_cast %302 : vector<128x128xf32> to vector<1x128x128xf32>
    tpu.vector_store %arg7[%c0_293, %c128_294, %c0_295], %305 {strides = array<i32>} : memref<1x384x128xf32, #tpu.memory_space<vmem>>, vector<1x128x128xf32>,
    %cst_296 = arith.constant 0.000000e+00 : f32
    %306 = vector.broadcast %cst_296 : f32 to vector<128x128xf32>
    %c269_297 = arith.constant 269 : index
    %c0_298 = arith.constant 0 : index
    %307 = vector.load %arg9[%c269_297, %c0_298] : memref<448x128xbf16, #tpu.memory_space<vmem>>, vector<128x128xbf16>
    %c0_299 = arith.constant 0 : index
    %c0_300 = arith.constant 0 : index
    %c0_301 = arith.constant 0 : index
    %308 = vector.load %arg5[%c0_299, %c0_300, %c0_301] : memref<9x128x128xbf16, #tpu.memory_space<vmem>>, vector<1x128x128xbf16>
    %309 = vector.shape_cast %308 : vector<1x128x128xbf16> to vector<128x128xbf16>
    %cst_302 = arith.constant dense<0.000000e+00> : vector<128x128xf32>
    %310 = tpu.matmul %307, %309, %cst_302 {dimension_numbers = #tpu.dot_dimension_numbers<[1], [0], [0], [1], [0, 0, 1, 1], [], []>} : vector<128x128xbf16>, vector<128x128xbf16>, vector<128x128xf32> -> vector<128x128xf32>
    %311 = arith.addf %306, %310 : vector<128x128xf32>
    %c270_303 = arith.constant 270 : index
    %c0_304 = arith.constant 0 : index
    %312 = vector.load %arg9[%c270_303, %c0_304] : memref<448x128xbf16, #tpu.memory_space<vmem>>, vector<128x128xbf16>
    %c1_305 = arith.constant 1 : index
    %c0_306 = arith.constant 0 : index
    %c0_307 = arith.constant 0 : index
    %313 = vector.load %arg5[%c1_305, %c0_306, %c0_307] : memref<9x128x128xbf16, #tpu.memory_space<vmem>>, vector<1x128x128xbf16>
    %314 = vector.shape_cast %313 : vector<1x128x128xbf16> to vector<128x128xbf16>
    %cst_308 = arith.constant dense<0.000000e+00> : vector<128x128xf32>
    %315 = tpu.matmul %312, %314, %cst_308 {dimension_numbers = #tpu.dot_dimension_numbers<[1], [0], [0], [1], [0, 0, 1, 1], [], []>} : vector<128x128xbf16>, vector<128x128xbf16>, vector<128x128xf32> -> vector<128x128xf32>
    %316 = arith.addf %311, %315 : vector<128x128xf32>
    %c271_309 = arith.constant 271 : index
    %c0_310 = arith.constant 0 : index
    %317 = vector.load %arg9[%c271_309, %c0_310] : memref<448x128xbf16, #tpu.memory_space<vmem>>, vector<128x128xbf16>
    %c2_311 = arith.constant 2 : index
    %c0_312 = arith.constant 0 : index
    %c0_313 = arith.constant 0 : index
    %318 = vector.load %arg5[%c2_311, %c0_312, %c0_313] : memref<9x128x128xbf16, #tpu.memory_space<vmem>>, vector<1x128x128xbf16>
    %319 = vector.shape_cast %318 : vector<1x128x128xbf16> to vector<128x128xbf16>
    %cst_314 = arith.constant dense<0.000000e+00> : vector<128x128xf32>
    %320 = tpu.matmul %317, %319, %cst_314 {dimension_numbers = #tpu.dot_dimension_numbers<[1], [0], [0], [1], [0, 0, 1, 1], [], []>} : vector<128x128xbf16>, vector<128x128xbf16>, vector<128x128xf32> -> vector<128x128xf32>
    %321 = arith.addf %316, %320 : vector<128x128xf32>
    %c287_315 = arith.constant 287 : index
    %c0_316 = arith.constant 0 : index
    %322 = vector.load %arg9[%c287_315, %c0_316] : memref<448x128xbf16, #tpu.memory_space<vmem>>, vector<128x128xbf16>
    %c3_317 = arith.constant 3 : index
    %c0_318 = arith.constant 0 : index
    %c0_319 = arith.constant 0 : index
    %323 = vector.load %arg5[%c3_317, %c0_318, %c0_319] : memref<9x128x128xbf16, #tpu.memory_space<vmem>>, vector<1x128x128xbf16>
    %324 = vector.shape_cast %323 : vector<1x128x128xbf16> to vector<128x128xbf16>
    %cst_320 = arith.constant dense<0.000000e+00> : vector<128x128xf32>
    %325 = tpu.matmul %322, %324, %cst_320 {dimension_numbers = #tpu.dot_dimension_numbers<[1], [0], [0], [1], [0, 0, 1, 1], [], []>} : vector<128x128xbf16>, vector<128x128xbf16>, vector<128x128xf32> -> vector<128x128xf32>
    %326 = arith.addf %321, %325 : vector<128x128xf32>
    %c288_321 = arith.constant 288 : index
    %c0_322 = arith.constant 0 : index
    %327 = vector.load %arg9[%c288_321, %c0_322] : memref<448x128xbf16, #tpu.memory_space<vmem>>, vector<128x128xbf16>
    %c4_323 = arith.constant 4 : index
    %c0_324 = arith.constant 0 : index
    %c0_325 = arith.constant 0 : index
    %328 = vector.load %arg5[%c4_323, %c0_324, %c0_325] : memref<9x128x128xbf16, #tpu.memory_space<vmem>>, vector<1x128x128xbf16>
    %329 = vector.shape_cast %328 : vector<1x128x128xbf16> to vector<128x128xbf16>
    %cst_326 = arith.constant dense<0.000000e+00> : vector<128x128xf32>
    %330 = tpu.matmul %327, %329, %cst_326 {dimension_numbers = #tpu.dot_dimension_numbers<[1], [0], [0], [1], [0, 0, 1, 1], [], []>} : vector<128x128xbf16>, vector<128x128xbf16>, vector<128x128xf32> -> vector<128x128xf32>
    %331 = arith.addf %326, %330 : vector<128x128xf32>
    %c289_327 = arith.constant 289 : index
    %c0_328 = arith.constant 0 : index
    %332 = vector.load %arg9[%c289_327, %c0_328] : memref<448x128xbf16, #tpu.memory_space<vmem>>, vector<128x128xbf16>
    %c5_329 = arith.constant 5 : index
    %c0_330 = arith.constant 0 : index
    %c0_331 = arith.constant 0 : index
    %333 = vector.load %arg5[%c5_329, %c0_330, %c0_331] : memref<9x128x128xbf16, #tpu.memory_space<vmem>>, vector<1x128x128xbf16>
    %334 = vector.shape_cast %333 : vector<1x128x128xbf16> to vector<128x128xbf16>
    %cst_332 = arith.constant dense<0.000000e+00> : vector<128x128xf32>
    %335 = tpu.matmul %332, %334, %cst_332 {dimension_numbers = #tpu.dot_dimension_numbers<[1], [0], [0], [1], [0, 0, 1, 1], [], []>} : vector<128x128xbf16>, vector<128x128xbf16>, vector<128x128xf32> -> vector<128x128xf32>
    %336 = arith.addf %331, %335 : vector<128x128xf32>
    %c305_333 = arith.constant 305 : index
    %c0_334 = arith.constant 0 : index
    %337 = vector.load %arg9[%c305_333, %c0_334] : memref<448x128xbf16, #tpu.memory_space<vmem>>, vector<128x128xbf16>
    %c6_335 = arith.constant 6 : index
    %c0_336 = arith.constant 0 : index
    %c0_337 = arith.constant 0 : index
    %338 = vector.load %arg5[%c6_335, %c0_336, %c0_337] : memref<9x128x128xbf16, #tpu.memory_space<vmem>>, vector<1x128x128xbf16>
    %339 = vector.shape_cast %338 : vector<1x128x128xbf16> to vector<128x128xbf16>
    %cst_338 = arith.constant dense<0.000000e+00> : vector<128x128xf32>
    %340 = tpu.matmul %337, %339, %cst_338 {dimension_numbers = #tpu.dot_dimension_numbers<[1], [0], [0], [1], [0, 0, 1, 1], [], []>} : vector<128x128xbf16>, vector<128x128xbf16>, vector<128x128xf32> -> vector<128x128xf32>
    %341 = arith.addf %336, %340 : vector<128x128xf32>
    %c306_339 = arith.constant 306 : index
    %c0_340 = arith.constant 0 : index
    %342 = vector.load %arg9[%c306_339, %c0_340] : memref<448x128xbf16, #tpu.memory_space<vmem>>, vector<128x128xbf16>
    %c7_341 = arith.constant 7 : index
    %c0_342 = arith.constant 0 : index
    %c0_343 = arith.constant 0 : index
    %343 = vector.load %arg5[%c7_341, %c0_342, %c0_343] : memref<9x128x128xbf16, #tpu.memory_space<vmem>>, vector<1x128x128xbf16>
    %344 = vector.shape_cast %343 : vector<1x128x128xbf16> to vector<128x128xbf16>
    %cst_344 = arith.constant dense<0.000000e+00> : vector<128x128xf32>
    %345 = tpu.matmul %342, %344, %cst_344 {dimension_numbers = #tpu.dot_dimension_numbers<[1], [0], [0], [1], [0, 0, 1, 1], [], []>} : vector<128x128xbf16>, vector<128x128xbf16>, vector<128x128xf32> -> vector<128x128xf32>
    %346 = arith.addf %341, %345 : vector<128x128xf32>
    %c307_345 = arith.constant 307 : index
    %c0_346 = arith.constant 0 : index
    %347 = vector.load %arg9[%c307_345, %c0_346] : memref<448x128xbf16, #tpu.memory_space<vmem>>, vector<128x128xbf16>
    %c8_347 = arith.constant 8 : index
    %c0_348 = arith.constant 0 : index
    %c0_349 = arith.constant 0 : index
    %348 = vector.load %arg5[%c8_347, %c0_348, %c0_349] : memref<9x128x128xbf16, #tpu.memory_space<vmem>>, vector<1x128x128xbf16>
    %349 = vector.shape_cast %348 : vector<1x128x128xbf16> to vector<128x128xbf16>
    %cst_350 = arith.constant dense<0.000000e+00> : vector<128x128xf32>
    %350 = tpu.matmul %347, %349, %cst_350 {dimension_numbers = #tpu.dot_dimension_numbers<[1], [0], [0], [1], [0, 0, 1, 1], [], []>} : vector<128x128xbf16>, vector<128x128xbf16>, vector<128x128xf32> -> vector<128x128xf32>
    %351 = arith.addf %346, %350 : vector<128x128xf32>
    %c0_351 = arith.constant 0 : index
    %c256_352 = arith.constant 256 : index
    %c0_353 = arith.constant 0 : index
    %352 = vector.load %arg1[%c0_351, %c256_352, %c0_353] : memref<1x384x128xf32, #tpu.memory_space<vmem>>, vector<1x128x128xf32>
    %353 = vector.shape_cast %352 : vector<1x128x128xf32> to vector<128x128xf32>
    %c0_354 = arith.constant 0 : index
    %c0_355 = arith.constant 0 : index
    %354 = vector.load %arg6[%c0_354, %c0_355] : memref<1x128xf32, #tpu.memory_space<vmem>>, vector<1x128xf32>
    %355 = vector.broadcast %354 : vector<1x128xf32> to vector<128x128xf32>
    %356 = arith.addf %351, %355 : vector<128x128xf32>
    %357 = arith.addf %356, %353 : vector<128x128xf32>
    %cst_356 = arith.constant 0.000000e+00 : f32
    %358 = vector.broadcast %cst_356 : f32 to vector<128x128xf32>
    %359 = arith.maximumf %357, %358 : vector<128x128xf32>
    %c0_357 = arith.constant 0 : index
    %c256_358 = arith.constant 256 : index
    %c0_359 = arith.constant 0 : index
    %360 = vector.load %arg7[%c0_357, %c256_358, %c0_359] : memref<1x384x128xf32, #tpu.memory_space<vmem>>, vector<1x128x128xf32>
    %361 = vector.shape_cast %360 : vector<1x128x128xf32> to vector<128x128xf32>
    %362 = vector.shape_cast %359 : vector<128x128xf32> to vector<1x128x128xf32>
    tpu.vector_store %arg7[%c0_357, %c256_358, %c0_359], %362 {strides = array<i32>} : memref<1x384x128xf32, #tpu.memory_space<vmem>>, vector<1x128x128xf32>,
    return
  }
  func.func @transform_0(%arg0: i32) -> (i32, i32, i32) {
    %c0_i32 = arith.constant 0 : i32
    %c0_i32_0 = arith.constant 0 : i32
    %c0_i32_1 = arith.constant 0 : i32
    return %arg0, %c0_i32, %c0_i32_0 : i32, i32, i32
  }
  func.func @transform_1(%arg0: i32) -> (i32, i32) {
    %c0_i32 = arith.constant 0 : i32
    %c0_i32_0 = arith.constant 0 : i32
    %c0_i32_1 = arith.constant 0 : i32
    return %c0_i32, %c0_i32_0 : i32, i32
  }
  func.func @transform_2(%arg0: i32) -> (i32, i32, i32) {
    %c0_i32 = arith.constant 0 : i32
    %c0_i32_0 = arith.constant 0 : i32
    %c0_i32_1 = arith.constant 0 : i32
    %c0_i32_2 = arith.constant 0 : i32
    return %c0_i32, %c0_i32_0, %c0_i32_1 : i32, i32, i32
  }
  func.func @transform_3(%arg0: i32) -> (i32, i32) {
    %c0_i32 = arith.constant 0 : i32
    %c0_i32_0 = arith.constant 0 : i32
    %c0_i32_1 = arith.constant 0 : i32
    return %c0_i32, %c0_i32_0 : i32, i32
  }
  func.func @transform_4(%arg0: i32) -> (i32, i32, i32) {
    %c0_i32 = arith.constant 0 : i32
    %c0_i32_0 = arith.constant 0 : i32
    %c0_i32_1 = arith.constant 0 : i32
    %c0_i32_2 = arith.constant 0 : i32
    return %c0_i32, %c0_i32_0, %c0_i32_1 : i32, i32, i32
  }
  func.func @transform_5(%arg0: i32) -> (i32, i32) {
    %c0_i32 = arith.constant 0 : i32
    %c0_i32_0 = arith.constant 0 : i32
    %c0_i32_1 = arith.constant 0 : i32
    return %c0_i32, %c0_i32_0 : i32, i32
  }
  func.func @transform_6(%arg0: i32) -> (i32, i32, i32) {
    %c0_i32 = arith.constant 0 : i32
    %c0_i32_0 = arith.constant 0 : i32
    %c0_i32_1 = arith.constant 0 : i32
    return %arg0, %c0_i32, %c0_i32_0 : i32, i32, i32
  }
}

</mosaic_0001>

<bundles_post_ra>
// kernel: basic_block_forward.1
= control target key start
LH: loop header
LB: loop body
LE: loop exit
PB: predicated region body
PF: predicated region fallthrough
CT: control target
= control target key end

     0   :  { %s17218_s21 = smov 0   ;;  %s21970_s0 = inlined_call_operand.vmem [shape: f32[8,384,128], index: 0, kind: input, shape index: {}]   ;;  %s21971_s1 = inlined_call_operand.vmem [shape: f32[384,1], index: 1, kind: input, shape index: {}]   ;;  %s21972_s2 = inlined_call_operand.vmem [shape: bf16[9,128,128], index: 2, kind: input, shape index: {}]   ;;  %s21973_s3 = inlined_call_operand.vmem [shape: f32[1,128], index: 3, kind: input, shape index: {}]   ;;  %s21974_s4 = inlined_call_operand.vmem [shape: bf16[9,128,128], index: 4, kind: input, shape index: {}]   ;;  %s21975_s5 = inlined_call_operand.vmem [shape: f32[1,128], index: 5, kind: input, shape index: {}]   ;;  %s21976_s6 = inlined_call_operand.vmem [shape: f32[8,384,128], index: 6, kind: output, shape index: {}]  }
   0x1 LB: > { %s12623_s22 = sadd.s32 4294967295, %s17180_s21   ;;  %p12627_p0 = scmp.ge.s32.totalorder %s17180_s21, 1  ;;  %s17180_s21 = sphi %s17218_s21, %s16_s21  }
   0x2   : > { %p212_p1 = scmp.lt.s32.totalorder %s17180_s21, 9 }
   0x4   : > { %p213_p2 = pnand %p12627_p0, %p212_p1 }
   0x6   : > { %216 = sbr.rel (%p213_p2) target bundleno = 1911 (0x777), region = 44 }
   0xb   : > { %v15678_v0 = vld [vmem:[%s21972_s2 + $0x78] sm:$0xff]  ;;  %p242_p3 = scmp.lt.s32.totalorder %s12623_s22, 7  ;;  %v15677_v2 = vld [vmem:[%s21972_s2 + $0x70] sm:$0xff]  ;;  %v15676_v4 = vld [vmem:[%s21972_s2 + $0x68] sm:$0xff]  ;;  %vm490_vm0 = vcmask 1044480   ;;  %vm1968_vm6 = vcmask 1046528  }
   0xc   : > { %v15670_v1 = vld [vmem:[%s21972_s2 + $0x38] sm:$0xff]  ;;  %564 = vmatpush.bf16.msra.mxu0 %v15678_v0  ;;  %17030 = vmatpush.bf16.msra.mxu2 %v15678_v0  ;;  %v15669_v3 = vld [vmem:[%s21972_s2 + $0x30] sm:$0xff]  ;;  %v15668_v5 = vld [vmem:[%s21972_s2 + $0x28] sm:$0xff]  ;;  %vm616_vm1 = vsmask.f32 5376 }
   0xd   : > { %s22170_s22 = smov (!%p242_p3, %s12623_s22), 7  ;;  %753 = vmatpush.bf16.msra.mxu1 %v15670_v1  ;;  %17038 = vmatpush.bf16.msra.mxu3 %v15670_v1  ;;  %v17254_v6 = vld [vmem:[#allocation2 + $0x8] sm:$0xf]  ;;  %v396_v7 = vld [vmem:[#allocation2 + $0x4] sm:$0xc]  ;;  %v15674_v29 = vld [vmem:[%s21972_s2 + $0x58] sm:$0xff] }
   0xe   : > { %s17136_s7 = smul.u32 384, %s22170_s22  ;;  %v465_v15 = vunpack.c.l.b16 %v17254_v6  ;;  %v614_v20 = vunpack.c.l.b16 %v396_v7  ;;  %v15675_v21 = vld [vmem:[%s21972_s2 + $0x60] sm:$0xff]  ;;  %v15666_v33 = vld [vmem:[%s21972_s2 + $0x18] sm:$0xff]  ;;  %v15673_v40 = vld [vmem:[%s21972_s2 + $0x50] sm:$0xff]  ;;  %vm823_vm2 = vsmask.f32 4352 }
   0xf   : > { %v15667_v22 = vld [vmem:[%s21972_s2 + $0x20] sm:$0xff]  ;;  %v15665_v42 = vld [vmem:[%s21972_s2 + $0x10] sm:$0xff]  ;;  %v15672_v49 = vld [vmem:[%s21972_s2 + $0x48] sm:$0xff]  ;;  %vm1491_vm3 = vsmask.f32 7424 }
  0x10   : > { %565 = vmatpush.bf16.msra.mxu0 %v15677_v2  ;;  %17031 = vmatpush.bf16.msra.mxu2 %v15677_v2  ;;  %s17252_s14 = scalar_lea.vmem %s21970_s0, %s17136_s7  ;;  %v429_v30 = vld [vmem:[#allocation2 + $0x4] sm:$0x8]  ;;  %v615_v31 = vpack.c.b16 %v465_v15, %v614_v20  ;;  %v15664_v54 = vld [vmem:[%s21972_s2 + $0x8] sm:$0xff]  ;;  %vm2128_vm5 = vsmask.f32 6400  ;;  %s20944_s25 = scalar_lea.vmem %s21976_s6, %s17136_s7 }
  0x11   : > { %754 = vmatpush.bf16.msra.mxu1 %v15669_v3  ;;  %17039 = vmatpush.bf16.msra.mxu3 %v15669_v3  ;;  %v252_v8 = vld [vmem:[%s17252_s14] sm:$0xff]  ;;  %v253_v9 = vld [vmem:[%s17252_s14 + $0x8] sm:$0xff]  ;;  %v258_v13 = vld [vmem:[%s17252_s14 + $0x30] sm:$0xff]  ;;  %v464_v38 = vunpack.c.l.b16 %v429_v30 }
  0x12   : > { %v256_v10 = vld [vmem:[%s17252_s14 + $0x20] sm:$0xff]  ;;  %v17259_v11 = vpack.c.bf16 %v253_v9, %v252_v8  ;;  %v257_v12 = vld [vmem:[%s17252_s14 + $0x28] sm:$0xff]  ;;  %v259_v14 = vld [vmem:[%s17252_s14 + $0x38] sm:$0xff]  ;;  %v618_v39 = vshrl.u32 %v615_v31, 16  ;;  %v621_v41 = vshll.u32 %v615_v31, 16 }
  0x13   : > { %v260_v16 = vld [vmem:[%s17252_s14 + $0x40] sm:$0xff]  ;;  %v261_v17 = vld [vmem:[%s17252_s14 + $0x48] sm:$0xff]  ;;  %v17267_v18 = vpack.c.bf16 %v257_v12, %v256_v10  ;;  %v17269_v19 = vpack.c.bf16 %v259_v14, %v258_v13  ;;  %v254_v24 = vld [vmem:[%s17252_s14 + $0x10] sm:$0xff]  ;;  %v17318_v47 = vpack.c.b16 %v465_v15, %v464_v38 }
  0x14   : > { %566 = vmatpush.bf16.msra.mxu0 %v15676_v4  ;;  %17032 = vmatpush.bf16.msra.mxu2 %v15676_v4  ;;  %16676 = vst [vmem:[#allocation2 + $0x10] sm:$0xff] %v17259_v11   ;;  %v17278_v23 = vpack.c.bf16 %v261_v17, %v260_v16  ;;  %v255_v25 = vld [vmem:[%s17252_s14 + $0x18] sm:$0xff]  ;;  %v262_v26 = vld [vmem:[%s17252_s14 + $0x50] sm:$0xff]  ;;  %v264_v34 = vld [vmem:[%s17252_s14 + $0x60] sm:$0xff]  ;;  %v620_v48 = vrot.slane %v618_v39, 2  ;;  %v623_v50 = vrot.slane %v621_v41, 3 }
  0x15   : > { %755 = vmatpush.bf16.msra.mxu1 %v15668_v5  ;;  %17040 = vmatpush.bf16.msra.mxu3 %v15668_v5  ;;  %16678 = vst [vmem:[#allocation2 + $0x20] sm:$0xff] %v17267_v18   ;;  %v17285_v27 = vpack.c.bf16 %v255_v25, %v254_v24  ;;  %v263_v28 = vld [vmem:[%s17252_s14 + $0x58] sm:$0xff]  ;;  %v265_v35 = vld [vmem:[%s17252_s14 + $0x68] sm:$0xff]  ;;  %v491_v61 = vrot.slane %v17318_v47, 3  ;;  %v15671_v63 = vld [vmem:[%s21972_s2 + $0x40] sm:$0xff] }
  0x16   : > { %16679 = vst [vmem:[#allocation2 + $0x28] sm:$0xff] %v17269_v19   ;;  %v17292_v32 = vpack.c.bf16 %v263_v28, %v262_v26  ;;  %v17301_v36 = vpack.c.bf16 %v265_v35, %v264_v34  ;;  %v624_v3 = vor.u32 %v623_v50, %v620_v48  ;;  %v15663_v4 = vld [vmem:[%s21972_s2] sm:$0xff]  ;;  %v15686_v8 = vld [vmem:[%s21972_s2 + $0xb8] sm:$0xff]  ;;  %v15717_v30 = vld [vmem:[%s21972_s2 + $0x170] sm:$0xff] }
  0x17   : > { %16680 = vst [vmem:[#allocation2 + $0x30] sm:$0xff] %v17278_v23   ;;  %v15694_v9 = vld [vmem:[%s21972_s2 + $0xf8] sm:$0xff]  ;;  %v15684_v31 = vld [vmem:[%s21972_s2 + $0xa8] sm:$0xff]  ;;  %v15691_v48 = vld [vmem:[%s21972_s2 + $0xe0] sm:$0xff] }
  0x18   : > { %567 = vmatpush.bf16.msra.mxu0 %v15675_v21  ;;  %17033 = vmatpush.bf16.msra.mxu2 %v15675_v21  ;;  %16677 = vst [vmem:[#allocation2 + $0x18] sm:$0xff] %v17285_v27   ;;  %v15702_v13 = vld [vmem:[%s21972_s2 + $0x138] sm:$0xff]  ;;  %v15685_v21 = vld [vmem:[%s21972_s2 + $0xb0] sm:$0xff]  ;;  %v15716_v41 = vld [vmem:[%s21972_s2 + $0x168] sm:$0xff] }
  0x19   : > { %756 = vmatpush.bf16.msra.mxu1 %v15667_v22  ;;  %17041 = vmatpush.bf16.msra.mxu3 %v15667_v22  ;;  %16681 = vst [vmem:[#allocation2 + $0x38] sm:$0xff] %v17292_v32   ;;  %v15718_v16 = vld [vmem:[%s21972_s2 + $0x178] sm:$0xff]  ;;  %v15693_v22 = vld [vmem:[%s21972_s2 + $0xf0] sm:$0xff] }
  0x1a   : > { %16682 = vst [vmem:[#allocation2 + $0x40] sm:$0xff] %v17301_v36  }
  0x1b   : > { %v17303_v37 = vld [vmem:[#allocation2 + $0xc] sm:$0xff] }
  0x1c   : > { %568 = vmatpush.bf16.msra.mxu0 %v15674_v29  ;;  %17034 = vmatpush.bf16.msra.mxu2 %v15674_v29  ;;  %v626_v44 = vshrl.u32 %v17303_v37, 16  ;;  %v629_v45 = vshll.u32 %v17303_v37, 16  ;;  %v492_v0 = vrot.slane %v17303_v37, 3  ;;  %v15701_v29 = vld [vmem:[%s21972_s2 + $0x130] sm:$0xff] }
  0x1d   : > { %757 = vmatpush.bf16.msra.mxu1 %v15666_v33  ;;  %17042 = vmatpush.bf16.msra.mxu3 %v15666_v33  ;;  %v17312_v43 = vld [vmem:[#allocation2 + $0x24] sm:$0xff] }
  0x1e   : > { %v17316_v46 = vld [vmem:[#allocation2 + $0x2c] sm:$0xff]  ;;  %v653_v51 = vshrl.u32 %v17312_v43, 16  ;;  %v656_v52 = vshll.u32 %v17312_v43, 16  ;;  %v628_v55 = vrot.slane %v626_v44, 2  ;;  %v631_v56 = vrot.slane %v629_v45, 3 }
  0x1f   : > { %v662_v53 = vshrl.u32 %v17316_v46, 16  ;;  %v665_v57 = vshll.u32 %v17316_v46, 16  ;;  %v498_v1 = vrot.slane %v17312_v43, 3  ;;  %v500_v2 = vrot.slane %v17316_v46, 3  ;;  %v17383_v17 = vld [vmem:[#allocation2 + $0x14] sm:$0xff]  ;;  %v15692_v33 = vld [vmem:[%s21972_s2 + $0xe8] sm:$0xff] }
  0x20   : > { %569 = vmatpush.bf16.msra.mxu0 %v15673_v40  ;;  %17035 = vmatpush.bf16.msra.mxu2 %v15673_v40  ;;  %v655_v58 = vrot.slane %v653_v51, 2  ;;  %v658_v59 = vrot.slane %v656_v52, 3  ;;  %v17352_v5 = vor.u32 %v631_v56, %v628_v55  ;;  %v493_v10 = vsel %vm490_vm0, %v491_v61, %v492_v0  ;;  %v17385_v20 = vld [vmem:[#allocation2 + $0x34] sm:$0xff]  ;;  %v15700_v40 = vld [vmem:[%s21972_s2 + $0x128] sm:$0xff]  ;;  %v15699_v56 = vld [vmem:[%s21972_s2 + $0x120] sm:$0xff] }
  0x21   : > { %758 = vmatpush.bf16.msra.mxu1 %v15665_v42  ;;  %17043 = vmatpush.bf16.msra.mxu3 %v15665_v42  ;;  %v664_v60 = vrot.slane %v662_v53, 2  ;;  %v667_v62 = vrot.slane %v665_v57, 3  ;;  %v501_v12 = vsel %vm490_vm0, %v498_v1, %v500_v2  ;;  %v635_v24 = vshrl.u32 %v17383_v17, 16  ;;  %v15683_v42 = vld [vmem:[%s21972_s2 + $0xa0] sm:$0xff]  ;;  %v15768_v43 = vld [vmem:[%s21972_s2 + $0x58] sm:$0xff]  ;;  %v15767_v46 = vld [vmem:[%s21972_s2 + $0x50] sm:$0xff] }
  0x22   : > { %v17354_v6 = vor.u32 %v658_v59, %v655_v58  ;;  %v633_v14 = vsel %vm616_vm1, %v624_v3, %v17352_v5  ;;  %v638_v25 = vshll.u32 %v17383_v17, 16  ;;  %v671_v26 = vshrl.u32 %v17385_v20, 16  ;;  %v15715_v58 = vld [vmem:[%s21972_s2 + $0x160] sm:$0xff]  ;;  %v15682_v59 = vld [vmem:[%s21972_s2 + $0x98] sm:$0xff] }
  0x23   : > { %v17356_v7 = vor.u32 %v667_v62, %v664_v60  ;;  %v674_v28 = vshll.u32 %v17385_v20, 16  ;;  %v637_v34 = vrot.slane %v635_v24, 2  ;;  %v502_v50 = vrot.slane %v17385_v20, 3  ;;  %v15690_v60 = vld [vmem:[%s21972_s2 + $0xd8] sm:$0xff] }
  0x24   : > { %570 = vmatpush.bf16.msra.mxu0 %v15672_v49  ;;  %17036 = vmatpush.bf16.msra.mxu2 %v15672_v49  ;;  %v640_v35 = vrot.slane %v638_v25, 3  ;;  %v673_v38 = vrot.slane %v671_v26, 2  ;;  %v494_v49 = vrot.slane %v17383_v17, 3 }
  0x25   : > { %759 = vmatpush.bf16.msra.mxu1 %v15664_v54  ;;  %17044 = vmatpush.bf16.msra.mxu3 %v15664_v54  ;;  %v669_v15 = vsel %vm616_vm1, %v17354_v6, %v17356_v7  ;;  %v676_v39 = vrot.slane %v674_v28, 3  ;;  %v503_v62 = vsel %vm490_vm0, %v500_v2, %v502_v50  ;;  %v15714_v2 = vld [vmem:[%s21972_s2 + $0x158] sm:$0xff] }
  0x26   : > { %v17431_v54 = vor.u32 %v640_v35, %v637_v34  ;;  %v495_v61 = vsel %vm490_vm0, %v492_v0, %v494_v49  ;;  %v15698_v0 = vld [vmem:[%s21972_s2 + $0x118] sm:$0xff]  ;;  %v15712_v34 = vld [vmem:[%s21972_s2 + $0x148] sm:$0xff]  ;;  %v412_v35 = vld [vmem:[#allocation2 + $0x44] sm:$0x7] }
  0x27   : > { %v17433_v55 = vor.u32 %v676_v39, %v673_v38  ;;  %v15679_v38 = vld [vmem:[%s21972_s2 + $0x80] sm:$0xff] }
  0x28   : > { %571 = vmatpush.bf16.msra.mxu0 %v15671_v63  ;;  %17037 = vmatpush.bf16.msra.mxu2 %v15671_v63  ;;  %v17457_v63 = vld [vmem:[#allocation2 + $0x1c] sm:$0xff]  ;;  %v642_v3 = vsel %vm616_vm1, %v17352_v5, %v17431_v54  ;;  %v15681_v5 = vld [vmem:[%s21972_s2 + $0x90] sm:$0xff] }
  0x29   : > { %760 = vmatpush.bf16.msra.mxu1 %v15663_v4  ;;  %17045 = vmatpush.bf16.msra.mxu3 %v15663_v4  ;;  %v678_v4 = vsel %vm616_vm1, %v17356_v7, %v17433_v55  ;;  %v15689_v7 = vld [vmem:[%s21972_s2 + $0xd0] sm:$0xff]  ;;  %v15687_v39 = vld [vmem:[%s21972_s2 + $0xc0] sm:$0xff] }
  0x2b   : > { %572 = vmatmul.bf16.vlgmr.msra.gmra.mxu0 %v493_v10  ;;  %592 = vmatmul.bf16.vlgmr.msra.gmra.mxu2 %v501_v12  ;;  %v647_v10 = vshll.u32 %v17457_v63, 16 }
  0x2c   : > { %925 = vmatpush.bf16.msrb.mxu2 %v15686_v8  ;;  %761 = vmatmul.bf16.vlgmr.msra.gmra.mxu1 %v633_v14  ;;  %v17465_v8 = vld [vmem:[#allocation2 + $0x3c] sm:$0xff]  ;;  %v15697_v14 = vld [vmem:[%s21972_s2 + $0x110] sm:$0xff] }
  0x2d   : > { %1203 = vmatpush.bf16.msrb.mxu3 %v15694_v9  ;;  %1349 = vmatpush.bf16.msrb.mxu0 %v15702_v13  ;;  %v644_v9 = vshrl.u32 %v17457_v63, 16  ;;  %v680_v12 = vshrl.u32 %v17465_v8, 16  ;;  %v683_v13 = vshll.u32 %v17465_v8, 16 }
  0x2e   : > { %781 = vmatmul.bf16.vlgmr.msra.gmra.mxu3 %v669_v15  ;;  %1616 = vmatpush.bf16.msrb.mxu1 %v15718_v16  ;;  %v15713_v15 = vld [vmem:[%s21972_s2 + $0x150] sm:$0xff]  ;;  %v832_v16 = vrot.slane %v626_v44, 3  ;;  %v649_v44 = vrot.slane %v647_v10, 3 }
  0x2f   : > { %v682_v37 = vrot.slane %v680_v12, 2 }
  0x30   : > { %926 = vmatpush.bf16.msrb.mxu2 %v15685_v21  ;;  %v833_v21 = vrot.slane %v629_v45, 4  ;;  %v685_v45 = vrot.slane %v683_v13, 3 }
  0x31   : > { %1204 = vmatpush.bf16.msrb.mxu3 %v15693_v22  ;;  %1350 = vmatpush.bf16.msrb.mxu0 %v15701_v29  ;;  %v15680_v22 = vld [vmem:[%s21972_s2 + $0x88] sm:$0xff] }
  0x32   : > { %1617 = vmatpush.bf16.msrb.mxu1 %v15717_v30  ;;  %v15688_v29 = vld [vmem:[%s21972_s2 + $0xc8] sm:$0xff]  ;;  %v17499_v30 = vor.u32 %v833_v21, %v832_v16  ;;  %v17047_v21 = vld [vmem:[#allocation2 + $0xc] sm:$0xf0]  }
  0x34   : > { %927 = vmatpush.bf16.msrb.mxu2 %v15684_v31  ;;  %v646_v31 = vrot.slane %v644_v9, 2 }
  0x35   : > { %1205 = vmatpush.bf16.msrb.mxu3 %v15692_v33  ;;  %1351 = vmatpush.bf16.msrb.mxu0 %v15700_v40  ;;  %v15696_v33 = vld [vmem:[%s21972_s2 + $0x108] sm:$0xff]  ;;  %v496_v40 = vrot.slane %v17457_v63, 3 }
  0x36   : > { %1618 = vmatpush.bf16.msrb.mxu1 %v15716_v41  ;;  %v504_v41 = vrot.slane %v17465_v8, 3 }
  0x38   : > { %928 = vmatpush.bf16.msrb.mxu2 %v15683_v42  ;;  %v650_v42 = vor.u32 %v649_v44, %v646_v31  ;;  %v499_v31 = vsel %vm490_vm0, %v496_v40, %v498_v1 }
  0x39   : > { %1206 = vmatpush.bf16.msrb.mxu3 %v15691_v48  ;;  %1352 = vmatpush.bf16.msrb.mxu0 %v15699_v56  ;;  %v686_v48 = vor.u32 %v685_v45, %v682_v37  ;;  %v480_v56 = vunpack.c.l.b16 %v412_v35  ;;  %v17049_v37 = vld [vmem:[#allocation2 + $0x14] sm:$0xff]   ;;  %v825_v35 = vshrl.u32 %v17318_v47, 16 }
  0x3a   : > { %1619 = vmatpush.bf16.msrb.mxu1 %v15715_v58  ;;  %v15695_v58 = vld [vmem:[%s21972_s2 + $0x100] sm:$0xff]  ;;  %v660_v45 = vsel %vm616_vm1, %v650_v42, %v17354_v6  ;;  %v1076_v1 = vshrl.u32 %v17049_v37, 16  ;;  %v15740_v6 = vld [vmem:[%s21972_s2 + $0x1f0] sm:$0xff] }
  0x3b   : > { %577 = vmatmul.bf16.gmra.mxu0 %v495_v61  ;;  %597 = vmatmul.bf16.gmra.mxu2 %v503_v62  ;;  %v505_v61 = vsel %vm490_vm0, %v502_v50, %v504_v41  ;;  %v651_v62 = vsel %vm616_vm1, %v17431_v54, %v650_v42  ;;  %v15741_v50 = vld [vmem:[%s21972_s2 + $0x1f8] sm:$0xff]  ;;  %v841_v42 = vrot.slane %v647_v10, 4 }
  0x3c   : > { %929 = vmatpush.bf16.msrb.mxu2 %v15682_v59  ;;  %766 = vmatmul.bf16.gmra.mxu1 %v642_v3  ;;  %v15711_v59 = vld [vmem:[%s21972_s2 + $0x140] sm:$0xff]  ;;  %v687_v3 = vsel %vm616_vm1, %v17433_v55, %v686_v48  ;;  %v15749_v54 = vld [vmem:[%s21972_s2 + $0x238] sm:$0xff]  ;;  %v836_v55 = vrot.slane %v635_v24, 3 }
  0x3d   : > { %1207 = vmatpush.bf16.msrb.mxu3 %v15690_v60  ;;  %1353 = vmatpush.bf16.msrb.mxu0 %v15698_v0  ;;  %v497_v60 = vsel %vm490_vm0, %v494_v49, %v496_v40  ;;  %v15733_v49 = vld [vmem:[%s21972_s2 + $0x1b8] sm:$0xff]  ;;  %v837_v0 = vrot.slane %v638_v25, 4  ;;  %v16798_v25 = vld [vmem:[#allocation2 + $0xc] sm:$0x8]  ;;  %v15732_v40 = vld [vmem:[%s21972_s2 + $0x1b0] sm:$0xff] }
  0x3e   : > { %786 = vmatmul.bf16.gmra.mxu3 %v678_v4  ;;  %1620 = vmatpush.bf16.msrb.mxu1 %v15714_v2  ;;  %v489_v4 = vpack.c.b16 %v480_v56, %v480_v56 }
  0x40   : > { %930 = vmatpush.bf16.msrb.mxu2 %v15681_v5  ;;  %v689_v2 = vshrl.u32 %v489_v4, 16  ;;  %v692_v5 = vshll.u32 %v489_v4, 16  ;;  %v506_v17 = vrot.slane %v489_v4, 3 }
  0x41   : > { %1208 = vmatpush.bf16.msrb.mxu3 %v15689_v7  ;;  %1354 = vmatpush.bf16.msrb.mxu0 %v15697_v14  ;;  %v15772_v7 = vld [vmem:[%s21972_s2 + $0x78] sm:$0xff]  ;;  %v838_v14 = vor.u32 %v837_v0, %v836_v55 }
  0x42   : > { %1621 = vmatpush.bf16.msrb.mxu1 %v15713_v15  ;;  %v691_v24 = vrot.slane %v689_v2, 2  ;;  %v694_v16 = vrot.slane %v692_v5, 3  ;;  %v507_v44 = vsel %vm490_vm0, %v504_v41, %v506_v17  ;;  %v15748_v41 = vld [vmem:[%s21972_s2 + $0x230] sm:$0xff] }
  0x43   : > { %v17557_v15 = vsel %vm823_vm2, %v17499_v30, %v838_v14 }
  0x44   : > { %931 = vmatpush.bf16.msrb.mxu2 %v15680_v22  ;;  %v695_v22 = vor.u32 %v694_v16, %v691_v24 }
  0x45   : > { %1209 = vmatpush.bf16.msrb.mxu3 %v15688_v29  ;;  %1355 = vmatpush.bf16.msrb.mxu0 %v15696_v33  ;;  %v16799_v29 = vor.u32 %v17047_v21, %v16798_v25  ;;  %v17051_v21 = vld [vmem:[#allocation2 + $0x1c] sm:$0xff]  }
  0x46   : > { %1622 = vmatpush.bf16.msrb.mxu1 %v15712_v34  ;;  %v696_v33 = vsel %vm616_vm1, %v686_v48, %v695_v22  ;;  %v15703_v34 = vld [vmem:[#allocation2 + $0x10] sm:$0xff]  ;;  %v1079_v48 = vshll.u32 %v17049_v37, 16  ;;  %v15739_v22 = vld [vmem:[%s21972_s2 + $0x1e8] sm:$0xff] }
  0x47   : > { %v1071_v56 = vshll.u32 %v16799_v29, 16 }
  0x48   : > { %932 = vmatpush.bf16.msrb.mxu2 %v15679_v38  ;;  %v828_v38 = vshll.u32 %v17318_v47, 16  ;;  %v840_v47 = vrot.slane %v644_v9, 3  ;;  %v1081_v10 = vrot.slane %v1079_v48, 4 }
  0x49   : > { %1210 = vmatpush.bf16.msrb.mxu3 %v15687_v39  ;;  %1356 = vmatpush.bf16.msrb.mxu0 %v15695_v58  ;;  %v1068_v39 = vshrl.u32 %v16799_v29, 16  ;;  %v15704_v58 = vld [vmem:[#allocation2 + $0x18] sm:$0xff]  ;;  %v1073_v9 = vrot.slane %v1071_v56, 4  ;;  %v1085_v29 = vshrl.u32 %v17051_v21, 16 }
  0x4a   : > { %1623 = vmatpush.bf16.msrb.mxu1 %v15711_v59  ;;  %v1495_v59 = vshll.u32 %v15703_v34, 16  ;;  %v1500_v55 = vshll.u32 %v15704_v58, 16 }
  0x4b   : > { %582 = vmatmul.bf16.gmra.mxu0 %v497_v60  ;;  %602 = vmatmul.bf16.gmra.mxu2 %v505_v61  ;;  %v15771_v60 = vld [vmem:[%s21972_s2 + $0x70] sm:$0xff]  ;;  %v17584_v61 = vor.u32 %v841_v42, %v840_v47  ;;  %v1070_v4 = vrot.slane %v1068_v39, 3  ;;  %v1087_v37 = vrot.slane %v1085_v29, 3  ;;  %v15746_v47 = vld [vmem:[%s21972_s2 + $0x220] sm:$0xff] }
  0x4c   : > { %771 = vmatmul.bf16.gmra.mxu1 %v651_v62  ;;  %1882 = vmatpush.bf16.msra.mxu2 %v15733_v49  ;;  %v827_v62 = vrot.slane %v825_v35, 3  ;;  %v1078_v49 = vrot.slane %v1076_v1, 3  ;;  %v1502_v24 = vrot.slane %v1500_v55, 1  ;;  %v15737_v55 = vld [vmem:[%s21972_s2 + $0x1d8] sm:$0xff] }
  0x4d   : > { %2042 = vmatpush.bf16.msra.mxu3 %v15741_v50  ;;  %2230 = vmatpush.bf16.msra.mxu0 %v15749_v54  ;;  %v17588_v63 = vsel %vm823_vm2, %v838_v14, %v17584_v61  ;;  %v1493_v50 = vshrl.u32 %v15703_v34, 16  ;;  %v1497_v54 = vrot.slane %v1495_v59, 1  ;;  %v1074_v2 = vor.u32 %v1073_v9, %v1070_v4  ;;  %v15731_v14 = vld [vmem:[%s21972_s2 + $0x1a8] sm:$0xff] }
  0x4e   : > { %791 = vmatmul.bf16.gmra.mxu3 %v687_v3  ;;  %2657 = vmatpush.bf16.msra.mxu1 %v15772_v7  ;;  %v830_v3 = vrot.slane %v828_v38, 4  ;;  %v1082_v5 = vor.u32 %v1081_v10, %v1078_v49 }
  0x4f   : > { %v1498_v7 = vor.u32 %v1497_v54, %v1493_v50  ;;  %v17055_v50 = vld [vmem:[#allocation2 + $0x2c] sm:$0xff]   ;;  %v15729_v54 = vld [vmem:[%s21972_s2 + $0x198] sm:$0xff] }
  0x50   : > { %1883 = vmatpush.bf16.msra.mxu2 %v15732_v40  ;;  %v831_v0 = vor.u32 %v830_v3, %v827_v62  ;;  %v1083_v17 = vsel %vm823_vm2, %v1074_v2, %v1082_v5  ;;  %v17053_v40 = vld [vmem:[#allocation2 + $0x24] sm:$0xff]   ;;  %v1106_v2 = vshll.u32 %v17055_v50, 16 }
  0x51   : > { %2043 = vmatpush.bf16.msra.mxu3 %v15740_v6  ;;  %2231 = vmatpush.bf16.msra.mxu0 %v15748_v41  ;;  %v1503_v25 = vsel %vm1491_vm3, %v1498_v7, %v1502_v24  ;;  %v15730_v6 = vld [vmem:[%s21972_s2 + $0x1a0] sm:$0xff]  ;;  %v1094_v42 = vshrl.u32 %v17053_v40, 16  ;;  %v1097_v48 = vshll.u32 %v17053_v40, 16 }
  0x52   : > { %2658 = vmatpush.bf16.msra.mxu1 %v15771_v60  ;;  %v835_v16 = vsel %vm823_vm2, %v831_v0, %v17499_v30  ;;  %v15747_v30 = vld [vmem:[%s21972_s2 + $0x228] sm:$0xff]  ;;  %v15738_v41 = vld [vmem:[%s21972_s2 + $0x1e0] sm:$0xff]  ;;  %v1103_v0 = vshrl.u32 %v17055_v50, 16 }
  0x53   : > { %v1099_v59 = vrot.slane %v1097_v48, 4 }
  0x54   : > { %1884 = vmatpush.bf16.msra.mxu2 %v15731_v14  ;;  %v1105_v7 = vrot.slane %v1103_v0, 3 }
  0x55   : > { %2044 = vmatpush.bf16.msra.mxu3 %v15739_v22  ;;  %2232 = vmatpush.bf16.msra.mxu0 %v15747_v30 }
  0x58   : > { %1885 = vmatpush.bf16.msra.mxu2 %v15730_v6  ;;  %v15744_v6 = vld [vmem:[%s21972_s2 + $0x210] sm:$0xff] }
  0x59   : > { %2045 = vmatpush.bf16.msra.mxu3 %v15738_v41  ;;  %2233 = vmatpush.bf16.msra.mxu0 %v15746_v47 }
  0x5b   : > { %587 = vmatmul.bf16.gmra.mxu0 %v499_v31  ;;  %607 = vmatmul.bf16.gmra.mxu2 %v507_v44  ;;  %v1088_v31 = vshll.u32 %v17051_v21, 16  ;;  %v15705_v44 = vld [vmem:[#allocation2 + $0x20] sm:$0xff] }
  0x5c   : > { %776 = vmatmul.bf16.gmra.mxu1 %v660_v45  ;;  %v1508_v34 = vshll.u32 %v15705_v44, 16  ;;  %v1512_v60 = vshrl.u32 %v15705_v44, 16  ;;  %1886 = vmatpush.bf16.msra.mxu2 %v15729_v54  ;;  %v266_v44 = vld [vmem:[%s17252_s14 + $0x70] sm:$0xff]  ;;  %v17683_v54 = vld [vmem:[#allocation2 + $0x40] sm:$0xff] }
  0x5d   : > { %v1090_v45 = vrot.slane %v1088_v31, 4  ;;  %2046 = vmatpush.bf16.msra.mxu3 %v15737_v55  ;;  %v17057_v31 = vld [vmem:[#allocation2 + $0x34] sm:$0xff]  }
  0x5e   : > { %796 = vmatmul.bf16.gmra.mxu3 %v696_v33  ;;  %v1504_v33 = vshrl.u32 %v15704_v58, 16  ;;  %v1510_v39 = vrot.slane %v1508_v34, 1  ;;  %v15706_v58 = vld [vmem:[#allocation2 + $0x28] sm:$0xff]  ;;  %v1115_v34 = vshll.u32 %v17057_v31, 16 }
  0x5f   : > { %v1091_v35 = vor.u32 %v1090_v45, %v1087_v37  ;;  %v1516_v62 = vshll.u32 %v15706_v58, 16  ;;  %v15736_v45 = vld [vmem:[%s21972_s2 + $0x1d0] sm:$0xff] }
  0x60   : > { %v1506_v38 = vor.u32 %v1504_v33, %v1502_v24  ;;  %v1514_v4 = vor.u32 %v1512_v60, %v1510_v39  ;;  %v1108_v24 = vrot.slane %v1106_v2, 4  ;;  %v1112_v33 = vshrl.u32 %v17057_v31, 16 }
  0x61   : > { %v1092_v56 = vsel %vm823_vm2, %v1082_v5, %v1091_v35  ;;  %v1518_v9 = vrot.slane %v1516_v62, 1  ;;  %v15707_v5 = vld [vmem:[#allocation2 + $0x30] sm:$0xff]  ;;  %2047 = vmatpush.bf16.msra.mxu3 %v15736_v45  ;;  %v17059_v62 = vld [vmem:[#allocation2 + $0x3c] sm:$0xff]  }
  0x62   : > { %v1511_v1 = vsel %vm1491_vm3, %v1506_v38, %v1510_v39  ;;  %v1109_v14 = vor.u32 %v1108_v24, %v1105_v7  ;;  %v849_v38 = vrot.slane %v665_v57, 4  ;;  %v1114_v39 = vrot.slane %v1112_v33, 3  ;;  %v300_v57 = vld [vmem:[%s17252_s14 + $0x80] sm:$0xff] }
  0x63   : > { %v1519_v10 = vsel %vm1491_vm3, %v1514_v4, %v1518_v9  ;;  %v1124_v50 = vshll.u32 %v17059_v62, 16  ;;  %v15726_v33 = vld [vmem:[%s21972_s2 + $0x180] sm:$0xff] }
  0x65   : > { %v1126_v24 = vrot.slane %v1124_v50, 4 }
  0x6b   : > { %933 = vmatmul.bf16.vlgmr.msrb.gmra.mxu2 %v835_v16  ;;  %1357 = vmatmul.bf16.vlgmr.msrb.gmra.mxu0 %v17259_v11  ;;  %v15770_v11 = vld [vmem:[%s21972_s2 + $0x68] sm:$0xff]  ;;  %v1520_v16 = vshrl.u32 %v15706_v58, 16 }
  0x6c   : > { %1624 = vmatmul.bf16.vlgmr.msrb.gmra.mxu1 %v1503_v25  ;;  %v15745_v25 = vld [vmem:[%s21972_s2 + $0x218] sm:$0xff] }
  0x6d   : > { %2659 = vmatpush.bf16.msra.mxu1 %v15770_v11  ;;  %2234 = vmatpush.bf16.msra.mxu0 %v15745_v25  ;;  %v1522_v22 = vor.u32 %v1520_v16, %v1518_v9  ;;  %v267_v11 = vld [vmem:[%s17252_s14 + $0x78] sm:$0xff]  ;;  %v15727_v9 = vld [vmem:[%s21972_s2 + $0x188] sm:$0xff] }
  0x6e   : > { %1211 = vmatmul.bf16.vlgmr.msrb.gmra.mxu3 %v1083_v17  ;;  %v1524_v17 = vshll.u32 %v15707_v5, 16  ;;  %v17649_v37 = vpack.c.bf16 %v267_v11, %v266_v44 }
  0x70   : > { %v1526_v30 = vrot.slane %v1524_v17, 1  ;;  %16683 = vst [vmem:[#allocation2 + $0x48] sm:$0xff] %v17649_v37   ;;  %v1540_v17 = vshll.u32 %v17683_v54, 16 }
  0x71   : > { %2235 = vmatpush.bf16.msra.mxu0 %v15744_v6  ;;  %v857_v6 = vrot.slane %v683_v13, 4 }
  0x72   : > { %v1527_v29 = vsel %vm1491_vm3, %v1522_v22, %v1526_v30 }
  0x7b   : > { %938 = vmatmul.bf16.gmra.mxu2 %v17557_v15  ;;  %1362 = vmatmul.bf16.gmra.mxu0 %v17285_v27  ;;  %v15769_v27 = vld [vmem:[%s21972_s2 + $0x60] sm:$0xff]  ;;  %v1096_v15 = vrot.slane %v1094_v42, 3 }
  0x7c   : > { %1629 = vmatmul.bf16.gmra.mxu1 %v1511_v1  ;;  %v1528_v1 = vshrl.u32 %v15707_v5, 16  ;;  %v852_v5 = vrot.slane %v671_v26, 3  ;;  %v1542_v26 = vrot.slane %v1540_v17, 1  ;;  %v15780_v17 = vld [vmem:[%s21972_s2 + $0xb8] sm:$0xff] }
  0x7d   : > { %2660 = vmatpush.bf16.msra.mxu1 %v15769_v27  ;;  %v1100_v3 = vor.u32 %v1099_v59, %v1096_v15  ;;  %v301_v27 = vld [vmem:[%s17252_s14 + $0x88] sm:$0xff] }
  0x7e   : > { %1216 = vmatmul.bf16.gmra.mxu3 %v1092_v56  ;;  %v1117_v56 = vrot.slane %v1115_v34, 4  ;;  %v1530_v42 = vor.u32 %v1528_v1, %v1526_v30  ;;  %v15734_v34 = vld [vmem:[%s21972_s2 + $0x1c0] sm:$0xff] }
  0x7f   : > { %v1101_v49 = vsel %vm823_vm2, %v1091_v35, %v1100_v3  ;;  %v15708_v35 = vld [vmem:[#allocation2 + $0x38] sm:$0xff] }
  0x80   : > { %v1532_v40 = vshll.u32 %v15708_v35, 16  ;;  %v1118_v47 = vor.u32 %v1117_v56, %v1114_v39  ;;  %v1536_v16 = vshrl.u32 %v15708_v35, 16 }
  0x81   : > { %2661 = vmatpush.bf16.msra.mxu1 %v15768_v43 }
  0x82   : > { %v1534_v48 = vrot.slane %v1532_v40, 1  ;;  %v1119_v59 = vsel %vm823_vm2, %v1109_v14, %v1118_v47  ;;  %v856_v40 = vrot.slane %v680_v12, 3 }
  0x84   : > { %v1535_v60 = vsel %vm1491_vm3, %v1530_v42, %v1534_v48  ;;  %v1538_v30 = vor.u32 %v1536_v16, %v1534_v48  ;;  %v1544_v48 = vshrl.u32 %v17683_v54, 16  ;;  %v15764_v16 = vld [vmem:[%s21972_s2 + $0x38] sm:$0xff] }
  0x85   : > { %2662 = vmatpush.bf16.msra.mxu1 %v15767_v46 }
  0x86   : > { %v1543_v11 = vsel %vm1491_vm3, %v1538_v30, %v1542_v26  ;;  %v1546_v13 = vor.u32 %v1544_v48, %v1542_v26  ;;  %v302_v30 = vld [vmem:[%s17252_s14 + $0x90] sm:$0xff]  ;;  %v303_v26 = vld [vmem:[%s17252_s14 + $0x98] sm:$0xff] }
  0x8b   : > { %943 = vmatmul.bf16.gmra.mxu2 %v17588_v63  ;;  %1367 = vmatmul.bf16.gmra.mxu0 %v17267_v18  ;;  %v844_v63 = vrot.slane %v653_v51, 3  ;;  %v845_v18 = vrot.slane %v656_v52, 4  ;;  %v1110_v52 = vsel %vm823_vm2, %v1100_v3, %v1109_v14  ;;  %v16263_v3 = vpack.c.bf16 %v301_v27, %v300_v57  ;;  %v15742_v57 = vld [vmem:[%s21972_s2 + $0x200] sm:$0xff] }
  0x8c   : > { %1634 = vmatmul.bf16.gmra.mxu1 %v1519_v10  ;;  %v1121_v10 = vshrl.u32 %v17059_v62, 16  ;;  %v17731_v27 = vor.u32 %v857_v6, %v856_v40 }
  0x8d   : > { %v846_v21 = vor.u32 %v845_v18, %v844_v63  ;;  %16684 = vst [vmem:[#allocation2 + $0x50] sm:$0xff] %v16263_v3   ;;  %v853_v63 = vrot.slane %v674_v28, 4 }
  0x8e   : > { %1221 = vmatmul.bf16.gmra.mxu3 %v1101_v49  ;;  %v15735_v49 = vld [vmem:[%s21972_s2 + $0x1c8] sm:$0xff]  ;;  %v1123_v7 = vrot.slane %v1121_v10, 3 }
  0x8f   : > { %v847_v51 = vsel %vm823_vm2, %v17584_v61, %v846_v21  ;;  %v15728_v61 = vld [vmem:[%s21972_s2 + $0x190] sm:$0xff]  ;;  %2048 = vmatpush.bf16.msra.mxu3 %v15735_v49  ;;  %v854_v14 = vor.u32 %v853_v63, %v852_v5 }
  0x90   : > { %1887 = vmatpush.bf16.msra.mxu2 %v15728_v61  ;;  %v1127_v22 = vor.u32 %v1126_v24, %v1123_v7  ;;  %v17060_v61 = vld [vmem:[#allocation2 + $0x44] sm:$0xff]  }
  0x91   : > { %v1130_v35 = vshrl.u32 %v17060_v61, 16  ;;  %v859_v50 = vsel %vm823_vm2, %v854_v14, %v17731_v27 }
  0x92   : > { %v1128_v44 = vsel %vm823_vm2, %v1118_v47, %v1127_v22 }
  0x93   : > { %2049 = vmatpush.bf16.msra.mxu3 %v15734_v34  ;;  %v1132_v47 = vrot.slane %v1130_v35, 3 }
  0x94   : > { %1888 = vmatpush.bf16.msra.mxu2 %v15727_v9  ;;  %v1430_v62 = vld [vmem:[#allocation2 + $0x50] sm:$0x1]  ;;  %v15765_v9 = vld [vmem:[%s21972_s2 + $0x40] sm:$0xff] }
  0x95   : > { %v1481_v63 = vunpack.c.l.b16 %v1430_v62 }
  0x97   : > { %3015 = vmatpush.bf16.msrb.mxu3 %v15780_v17 }
  0x98   : > { %1889 = vmatpush.bf16.msra.mxu2 %v15726_v33 }
  0x9b   : > { %948 = vmatmul.bf16.gmra.mxu2 %v847_v51  ;;  %1372 = vmatmul.bf16.gmra.mxu0 %v17269_v19  ;;  %v848_v19 = vrot.slane %v662_v53, 3 }
  0x9c   : > { %1639 = vmatmul.bf16.gmra.mxu1 %v1527_v29  ;;  %v15766_v29 = vld [vmem:[%s21972_s2 + $0x48] sm:$0xff]  ;;  %2845 = vmatpush.bf16.msrb.mxu2 %v15764_v16 }
  0x9d   : > { %v850_v41 = vor.u32 %v849_v38, %v848_v19  ;;  %2663 = vmatpush.bf16.msra.mxu1 %v15766_v29  ;;  %v1133_v19 = vshll.u32 %v17060_v61, 16  ;;  %v17714_v38 = vld [vmem:[#allocation2 + $0x48] sm:$0xff] }
  0x9e   : > { %1226 = vmatmul.bf16.gmra.mxu3 %v1110_v52  ;;  %v1552_v33 = vshrl.u32 %v17714_v38, 16 }
  0x9f   : > { %v851_v53 = vsel %vm823_vm2, %v846_v21, %v850_v41  ;;  %v15743_v21 = vld [vmem:[%s21972_s2 + $0x208] sm:$0xff]  ;;  %v855_v52 = vsel %vm823_vm2, %v850_v41, %v854_v14  ;;  %v1135_v42 = vrot.slane %v1133_v19, 4  ;;  %v15788_v19 = vld [vmem:[%s21972_s2 + $0xf8] sm:$0xff] }
  0xa0   : > { %2236 = vmatpush.bf16.msra.mxu0 %v15743_v21 }
  0xa1   : > { %v17734_v12 = vor.u32 %v1135_v42, %v1132_v47  ;;  %2664 = vmatpush.bf16.msra.mxu1 %v15765_v9 }
  0xa4   : > { %2237 = vmatpush.bf16.msra.mxu0 %v15742_v57 }
  0xa8   : > { %v573_v58 = vpop.f32.mrf.mxu0  ;;  %3292 = vmatpush.bf16.msrb.mxu0 %v15788_v19 }
  0xa9   : > { %v762_v15 = vpop.f32.mrf.mxu1 }
  0xaa   : > { %v17674_v4 = vadd.f32 %v762_v15, %v573_v58  ;;  %v1548_v58 = vshll.u32 %v17714_v38, 16 }
  0xab   : > { %953 = vmatmul.bf16.gmra.mxu2 %v851_v53  ;;  %1377 = vmatmul.bf16.gmra.mxu0 %v17278_v23  ;;  %v17724_v53 = vld [vmem:[#allocation2 + $0x44] sm:$0xff]  }
  0xac   : > { %1644 = vmatmul.bf16.gmra.mxu1 %v1535_v60  ;;  %v821_v8 = vunpack.c.l.b16 %v17724_v53  ;;  %v1550_v15 = vrot.slane %v1548_v58, 1 }
  0xae   : > { %1231 = vmatmul.bf16.gmra.mxu3 %v1119_v59  ;;  %v593_v55 = vpop.f32.mrf.mxu2  ;;  %v16371_v59 = vunpack.c.h.b16 %v17649_v37  ;;  %v822_v54 = vpack.c.b16 %v821_v8, %v821_v8  ;;  %v1554_v6 = vor.u32 %v1552_v33, %v1550_v15  ;;  %v16708_v8 = vld [vmem:[#allocation2 + $0x18] sm:$0xff]   ;;  %v2331_v33 = vld [vmem:[%s21971_s1] sm:$0xff] }
  0xaf   : > { %v1761_v9 = vshll.u32 %v16708_v8, 16  ;;  %v1759_v17 = vshrl.u32 %v16708_v8, 16  ;;  %vm2347_vm4 = vcmp.gt.f32.partialorder %v2331_v33, 0.5 }
  0xb0   : > { %v575_v2 = vpop.f32.mrf.mxu0  ;;  %v1066_v5 = vpack.c.b16 %v16371_v59, %v16371_v59  ;;  %v861_v7 = vshrl.u32 %v822_v54, 16  ;;  %v864_v24 = vshll.u32 %v822_v54, 16 }
  0xb1   : > { %v782_v0 = vpop.f32.mrf.mxu3  ;;  %v764_v18 = vpop.f32.mrf.mxu1 }
  0xb2   : > { %v17685_v23 = vadd.f32 %v782_v0, %v593_v55  ;;  %v17692_v25 = vadd.f32 %v764_v18, %v575_v2  ;;  %v1137_v0 = vsel %vm823_vm2, %v1127_v22, %v17734_v12  ;;  %v1551_v2 = vsel %vm1491_vm3, %v1546_v13, %v1550_v15  ;;  %v17772_v13 = vld [vmem:[#allocation2 + $0x20] sm:$0xff] }
  0xb3   : > { %v1139_v21 = vshrl.u32 %v1066_v5, 16  ;;  %v1142_v14 = vshll.u32 %v1066_v5, 16  ;;  %v1490_v22 = vpack.c.b16 %v1481_v63, %v1481_v63  ;;  %v863_v29 = vrot.slane %v861_v7, 3  ;;  %v304_v5 = vld [vmem:[%s17252_s14 + $0xa0] sm:$0xff]  ;;  %v305_v63 = vld [vmem:[%s17252_s14 + $0xa8] sm:$0xff] }
  0xb4   : > { %v1970_v19 = vrot.slane %v17772_v13, 1 }
  0xb5   : > { %v1144_v61 = vrot.slane %v1142_v14, 4  ;;  %v1556_v34 = vshll.u32 %v1490_v22, 16 }
  0xb6   : > { %v595_v51 = vpop.f32.mrf.mxu2 }
  0xb8   : > { %v578_v43 = vpop.f32.mrf.mxu0 }
  0xb9   : > { %v784_v20 = vpop.f32.mrf.mxu3  ;;  %v767_v31 = vpop.f32.mrf.mxu1 }
  0xba   : > { %v17697_v28 = vadd.f32 %v784_v20, %v595_v51  ;;  %v17705_v45 = vadd.f32 %v767_v31, %v578_v43  ;;  %v866_v31 = vrot.slane %v864_v24, 4  ;;  %v16273_v24 = vpack.c.bf16 %v305_v63, %v304_v5  ;;  %v307_v5 = vld [vmem:[%s17252_s14 + $0xb8] sm:$0xff] }
  0xbb   : > { %958 = vmatmul.bf16.gmra.mxu2 %v855_v52  ;;  %1382 = vmatmul.bf16.gmra.mxu0 %v17292_v32 }
  0xbc   : > { %1649 = vmatmul.bf16.gmra.mxu1 %v1543_v11  ;;  %v1141_v11 = vrot.slane %v1139_v21, 3  ;;  %v1763_v21 = vrot.slane %v1761_v9, 1  ;;  %16686 = vst [vmem:[#allocation2 + $0x60] sm:$0xff] %v16273_v24   ;;  %v15795_v9 = vld [vmem:[%s21972_s2 + $0x130] sm:$0xff] }
  0xbe   : > { %1236 = vmatmul.bf16.gmra.mxu3 %v1128_v44  ;;  %v598_v39 = vpop.f32.mrf.mxu2  ;;  %v1145_v40 = vor.u32 %v1144_v61, %v1141_v11 }
  0xc0   : > { %v580_v32 = vpop.f32.mrf.mxu0 }
  0xc1   : > { %v787_v56 = vpop.f32.mrf.mxu3  ;;  %v769_v41 = vpop.f32.mrf.mxu1 }
  0xc2   : > { %v17716_v1 = vadd.f32 %v787_v56, %v598_v39  ;;  %v17726_v46 = vadd.f32 %v769_v41, %v580_v32  ;;  %v867_v39 = vor.u32 %v866_v31, %v863_v29  ;;  %v16709_v56 = vld [vmem:[#allocation2 + $0x18] sm:$0xf0]  ;;  %v16710_v32 = vld [vmem:[#allocation2 + $0x18] sm:$0xe]  ;;  %v1558_v41 = vrot.slane %v1556_v34, 1  ;;  %v15787_v34 = vld [vmem:[%s21972_s2 + $0xf0] sm:$0xff] }
  0xc3   : > { %v17766_v48 = vor.u32 %v16710_v32, %v16709_v56  ;;  %v17182_v32 = vmov 0   ;;  %3293 = vmatpush.bf16.msrb.mxu0 %v15787_v34 }
  0xc4   : > { %v868_v57 = vsel %vm823_vm2, %v17731_v27, %v867_v39  ;;  %v1559_v15 = vsel %vm1491_vm3, %v1554_v6, %v1558_v41  ;;  %17146 = vset.pattern.permute.xlu0 %v17182_v32  ;;  %17147 = vset.pattern.permute.xlu1 %v17182_v32  ;;  %v2363_v41 = vsel %vm2347_vm4, 1, %v17182_v32 }
  0xc5   : > { %v2130_v27 = vshrl.u32 %v17766_v48, 16  ;;  %v2133_v54 = vshll.u32 %v17766_v48, 16  ;;  %v1969_v61 = vrot.slane %v17766_v48, 1  ;;  %17148 = vset.pattern.permute.xlu2 %v17182_v32  ;;  %2380 = vperm.xlu0 %17146, %v2363_v41  }
  0xc6   : > { %v600_v60 = vpop.f32.mrf.mxu2 }
  0xc7   : > { %v2132_v14 = vrot.slane %v2130_v27, 1  ;;  %v2332_v27 = vld [vmem:[%s21971_s1 + $0x8] sm:$0xff] }
  0xc8   : > { %v583_v10 = vpop.f32.mrf.mxu0  ;;  %vm2348_vm7 = vcmp.gt.f32.partialorder %v2332_v27, 0.5 }
  0xc9   : > { %v789_v3 = vpop.f32.mrf.mxu3  ;;  %v772_v55 = vpop.f32.mrf.mxu1 }
  0xca   : > { %v17740_v49 = vadd.f32 %v789_v3, %v600_v60  ;;  %v17747_v18 = vadd.f32 %v772_v55, %v583_v10  ;;  %v1146_v60 = vsel %vm823_vm2, %v17734_v12, %v1145_v40  ;;  %v2524_v3 = vld [vmem:[#allocation2 + $0x44] sm:$0x8]  ;;  %v15796_v10 = vld [vmem:[%s21972_s2 + $0x138] sm:$0xff]  ;;  %v1766_v12 = vshll.u32 %v17772_v13, 16  ;;  %v15763_v55 = vld [vmem:[%s21972_s2 + $0x30] sm:$0xff] }
  0xcb   : > { %963 = vmatmul.bf16.gmra.mxu2 %v859_v50  ;;  %1387 = vmatmul.bf16.gmra.mxu0 %v17301_v36  ;;  %v16268_v36 = vpack.c.bf16 %v303_v26, %v302_v30  ;;  %v1770_v50 = vshrl.u32 %v17772_v13, 16  ;;  %v2135_v26 = vrot.slane %v2133_v54, 2  ;;  %v15762_v54 = vld [vmem:[%s21972_s2 + $0x28] sm:$0xff]  ;;  %v2334_v13 = vld [vmem:[%s21971_s1 + $0x18] sm:$0xff] }
  0xcc   : > { %1654 = vmatmul.bf16.gmra.mxu1 %v1551_v2  ;;  %v2559_v2 = vunpack.c.h.b16 %v17724_v53  ;;  %2846 = vmatpush.bf16.msrb.mxu2 %v15763_v55  ;;  %v1768_v11 = vrot.slane %v1766_v12, 1  ;;  %v15778_v55 = vld [vmem:[%s21972_s2 + $0xa8] sm:$0xff]  ;;  %vm2350_vm9 = vcmp.gt.f32.partialorder %v2334_v13, 0.5  ;;  %v310_v13 = vld [vmem:[%s17252_s14 + $0xd0] sm:$0xff] }
  0xcd   : > { %16685 = vst [vmem:[#allocation2 + $0x58] sm:$0xff] %v16268_v36   ;;  %3437 = vmatpush.bf16.msrb.mxu1 %v15796_v10  ;;  %v2138_v36 = vrot.slane %v1766_v12, 2  ;;  %v2136_v39 = vor.u32 %v2135_v26, %v2132_v14 }
  0xce   : > { %1241 = vmatmul.bf16.gmra.mxu3 %v1137_v0  ;;  %v603_v51 = vpop.f32.mrf.mxu2  ;;  %v2558_v0 = vunpack.c.l.b16 %v2524_v3 }
  0xd0   : > { %v585_v52 = vpop.f32.mrf.mxu0  ;;  %v17804_v29 = vpack.c.b16 %v2559_v2, %v2558_v0  ;;  %v306_v0 = vld [vmem:[%s17252_s14 + $0xb0] sm:$0xff]  ;;  %2847 = vmatpush.bf16.msrb.mxu2 %v15762_v54  ;;  %v2366_v54 = vsel %vm2350_vm9, 1, %v17182_v32 }
  0xd1   : > { %v792_v20 = vpop.f32.mrf.mxu3  ;;  %v774_v44 = vpop.f32.mrf.mxu1  ;;  %3438 = vmatpush.bf16.msrb.mxu1 %v15795_v9 }
  0xd2   : > { %v17758_v43 = vadd.f32 %v792_v20, %v603_v51  ;;  %v17761_v35 = vadd.f32 %v774_v44, %v585_v52  ;;  %v2137_v51 = vrot.slane %v1770_v50, 1  ;;  %v17800_v52 = vld [vmem:[#allocation2 + $0x4c] sm:$0xff]  ;;  %v1764_v44 = vor.u32 %v1763_v21, %v1759_v17 }
  0xd3   : > { %v2584_v40 = vrot.slane %v17804_v29, 3  ;;  %v2585_v6 = vrot.slane %v17800_v52, 3 }
  0xd4   : > { %v17816_v56 = vor.u32 %v2138_v36, %v2137_v51  ;;  %v17857_v51 = vld [vmem:[#allocation2 + $0x54] sm:$0xff] }
  0xd5   : > { %v2586_v3 = vsel %vm490_vm0, %v2584_v40, %v2585_v6 }
  0xd6   : > { %v605_v47 = vpop.f32.mrf.mxu2  ;;  %v2140_v8 = vsel %vm2128_vm5, %v2136_v39, %v17816_v56  ;;  %v2587_v39 = vrot.slane %v17857_v51, 3 }
  0xd8   : > { %v588_v38 = vpop.f32.mrf.mxu0 }
  0xd9   : > { %v794_v42 = vpop.f32.mrf.mxu3  ;;  %v777_v59 = vpop.f32.mrf.mxu1 }
  0xda   : > { %v17768_v58 = vadd.f32 %v794_v42, %v605_v47  ;;  %v17777_v62 = vadd.f32 %v777_v59, %v588_v38  ;;  %v17829_v59 = vld [vmem:[#allocation2 + $0x28] sm:$0xff] }
  0xdb   : > { %968 = vmatmul.bf16.gmra.mxu2 %v868_v57  ;;  %1392 = vmatmul.bf16.gmra.mxu0 %v17649_v37  ;;  %v15779_v37 = vld [vmem:[%s21972_s2 + $0xb0] sm:$0xff]  ;;  %v1769_v57 = vsel %vm1491_vm3, %v1764_v44, %v1768_v11  ;;  %v1774_v10 = vshll.u32 %v17829_v59, 16  ;;  %v1778_v12 = vshrl.u32 %v17829_v59, 16  ;;  %v1772_v44 = vor.u32 %v1770_v50, %v1768_v11 }
  0xdc   : > { %1659 = vmatmul.bf16.gmra.mxu1 %v1559_v15  ;;  %3016 = vmatpush.bf16.msrb.mxu3 %v15779_v37  ;;  %v1971_v15 = vsel %vm1968_vm6, %v1969_v61, %v1970_v19  ;;  %v2364_v37 = vsel %vm2348_vm7, 1, %v17182_v32  ;;  %v1972_v34 = vrot.slane %v17829_v59, 1 }
  0xdd   : > { %2383 = vperm.xlu0 %17146, %v2364_v37   ;;  %v2141_v21 = vrot.slane %v1778_v12, 1  ;;  %v2142_v14 = vrot.slane %v1774_v10, 2  ;;  %v1776_v61 = vrot.slane %v1774_v10, 1  ;;  %v15777_v10 = vld [vmem:[%s21972_s2 + $0xa0] sm:$0xff]  ;;  %v309_v37 = vld [vmem:[%s17252_s14 + $0xc8] sm:$0xff] }
  0xde   : > { %1246 = vmatmul.bf16.gmra.mxu3 %v1146_v60  ;;  %v608_v7 = vpop.f32.mrf.mxu2 }
  0xdf   : > { %v17867_v33 = vor.u32 %v2142_v14, %v2141_v21  ;;  %v1777_v50 = vsel %vm1491_vm3, %v1772_v44, %v1776_v61 }
  0xe0   : > { %v590_v30 = vpop.f32.mrf.mxu0  ;;  %3017 = vmatpush.bf16.msrb.mxu3 %v15778_v55  ;;  %v308_v55 = vld [vmem:[%s17252_s14 + $0xc0] sm:$0xff] }
  0xe1   : > { %v797_v16 = vpop.f32.mrf.mxu3  ;;  %v779_v20 = vpop.f32.mrf.mxu1  ;;  %v2144_v11 = vsel %vm2128_vm5, %v17816_v56, %v17867_v33  ;;  %v15794_v56 = vld [vmem:[%s21972_s2 + $0x128] sm:$0xff] }
  0xe2   : > { %v17796_v22 = vadd.f32 %v797_v16, %v608_v7  ;;  %v17806_v31 = vadd.f32 %v779_v20, %v590_v30  ;;  %v16278_v7 = vpack.c.bf16 %v307_v5, %v306_v0  ;;  %v2333_v20 = vld [vmem:[%s21971_s1 + $0x10] sm:$0xff]  ;;  %3439 = vmatpush.bf16.msrb.mxu1 %v15794_v56 }
  0xe3   : > { %vm2349_vm8 = vcmp.gt.f32.partialorder %v2333_v20, 0.5  ;;  %v15785_v20 = vld [vmem:[%s21972_s2 + $0xe0] sm:$0xff] }
  0xe4   : > { %16687 = vst [vmem:[#allocation2 + $0x68] sm:$0xff] %v16278_v7   ;;  %v2365_v40 = vsel %vm2349_vm8, 1, %v17182_v32  ;;  %3018 = vmatpush.bf16.msrb.mxu3 %v15777_v10 }
  0xe5   : > { %2386 = vperm.xlu1 %17147, %v2365_v40  }
  0xe6   : > { %v610_v47 = vpop.f32.mrf.mxu2 }
  0xe8   : > { %v1358_v38 = vpop.f32.mrf.mxu0 }
  0xe9   : > { %v799_v42 = vpop.f32.mrf.mxu3  ;;  %v1625_v60 = vpop.f32.mrf.mxu1 }
  0xea   : > { %v17824_v48 = vadd.f32 %v799_v42, %v610_v47 }
  0xeb   : > { %1890 = vmatmul.bf16.vlgmr.msra.gmra.mxu2 %v1769_v57  ;;  %2238 = vmatmul.bf16.vlgmr.msra.gmra.mxu0 %v2140_v8  ;;  %v17879_v8 = vld [vmem:[#allocation2 + $0x30] sm:$0xff] }
  0xec   : > { %2665 = vmatmul.bf16.vlgmr.msra.gmra.mxu1 %v2586_v3  ;;  %v1786_v27 = vshrl.u32 %v17879_v8, 16  ;;  %v1974_v40 = vrot.slane %v17879_v8, 1 }
  0xed   : > { %2389 = vperm.xlu1 %17147, %v2366_v54  }
  0xee   : > { %2050 = vmatmul.bf16.vlgmr.msra.gmra.mxu3 %v1971_v15  ;;  %v934_v63 = vpop.f32.mrf.mxu2 }
  0xef   : > { %v974_v24 = vadd.f32 %v934_v63, %v17674_v4  ;;  %v15786_v4 = vld [vmem:[%s21972_s2 + $0xe8] sm:$0xff]  ;;  %v16283_v63 = vpack.c.bf16 %v309_v37, %v308_v55 }
  0xf0   : > { %v1360_v17 = vpop.f32.mrf.mxu0  ;;  %3294 = vmatpush.bf16.msrb.mxu0 %v15786_v4 }
  0xf1   : > { %v1212_v16 = vpop.f32.mrf.mxu3  ;;  %v1627_v26 = vpop.f32.mrf.mxu1  ;;  %16688 = vst [vmem:[#allocation2 + $0x70] sm:$0xff] %v16283_v63  }
  0xf2   : > { %v1252_v30 = vadd.f32 %v1212_v16, %v974_v24 }
  0xf4   : > { %v1398_v36 = vadd.f32 %v1358_v38, %v1252_v30  ;;  %3295 = vmatpush.bf16.msrb.mxu0 %v15785_v20 }
  0xf6   : > { %v17872_v41 = vadd.f32 %v1625_v60, %v1398_v36  ;;  %v936_v47 = vpop.f32.mrf.mxu2  ;;  %v1973_v60 = vsel %vm1968_vm6, %v1970_v19, %v1972_v34  ;;  %v1782_v19 = vshll.u32 %v17879_v8, 16  ;;  %v17913_v36 = vld [vmem:[#allocation2 + $0x5c] sm:$0xff] }
  0xf7   : > { %v975_v42 = vadd.f32 %v936_v47, %v17692_v25  ;;  %v2588_v25 = vsel %vm490_vm0, %v2585_v6, %v2587_v39  ;;  %v15761_v6 = vld [vmem:[%s21972_s2 + $0x20] sm:$0xff]  ;;  %v2589_v47 = vrot.slane %v17913_v36, 3 }
  0xf8   : > { %v1363_v57 = vpop.f32.mrf.mxu0  ;;  %2848 = vmatpush.bf16.msrb.mxu2 %v15761_v6  ;;  %v2146_v21 = vrot.slane %v1782_v19, 2  ;;  %v1784_v4 = vrot.slane %v1782_v19, 1  ;;  %v311_v19 = vld [vmem:[%s17252_s14 + $0xd8] sm:$0xff]  ;;  %v2335_v8 = vld [vmem:[%s21971_s1 + $0x20] sm:$0xff] }
  0xf9   : > { %v1214_v38 = vpop.f32.mrf.mxu3  ;;  %v1630_v3 = vpop.f32.mrf.mxu1  ;;  %v16288_v54 = vpack.c.bf16 %v311_v19, %v310_v13  ;;  %vm2351_vm11 = vcmp.gt.f32.partialorder %v2335_v8, 0.5 }
  0xfa   : > { %v1253_v15 = vadd.f32 %v1214_v38, %v975_v42  ;;  %v2367_v13 = vsel %vm2351_vm11, 1, %v17182_v32 }
  0xfb   : > { %1895 = vmatmul.bf16.gmra.mxu2 %v1777_v50  ;;  %2243 = vmatmul.bf16.gmra.mxu0 %v2144_v11  ;;  %16689 = vst [vmem:[#allocation2 + $0x78] sm:$0xff] %v16288_v54   ;;  %v313_v54 = vld [vmem:[%s17252_s14 + $0xe8] sm:$0xff] }
  0xfc   : > { %v1399_v9 = vadd.f32 %v1360_v17, %v1253_v15  ;;  %2670 = vmatmul.bf16.gmra.mxu1 %v2588_v25  ;;  %v2145_v17 = vrot.slane %v1786_v27, 1  ;;  %2392 = vperm.xlu2 %17148, %v2367_v13   ;;  %v2340_v13 = vld [vmem:[%s21971_s1 + $0x48] sm:$0xff] }
  0xfd   : > { %vm2356_vm14 = vcmp.gt.f32.partialorder %v2340_v13, 0.5 }
  0xfe   : > { %2055 = vmatmul.bf16.gmra.mxu3 %v1973_v60  ;;  %v17908_v0 = vadd.f32 %v1627_v26, %v1399_v9  ;;  %v939_v5 = vpop.f32.mrf.mxu2  ;;  %v2147_v44 = vor.u32 %v2146_v21, %v2145_v17  ;;  %v17958_v17 = vld [vmem:[#allocation2 + $0x64] sm:$0xff] }
  0xff   : > { %v976_v7 = vadd.f32 %v939_v5, %v17705_v45  ;;  %v1780_v45 = vor.u32 %v1778_v12, %v1776_v61  ;;  %v17928_v12 = vld [vmem:[#allocation2 + $0x38] sm:$0xff] }
 0x100   : > { %v1365_v16 = vpop.f32.mrf.mxu0  ;;  %v2148_v60 = vsel %vm2128_vm5, %v17867_v33, %v2147_v44  ;;  %v15793_v33 = vld [vmem:[%s21972_s2 + $0x120] sm:$0xff]  ;;  %v1790_v56 = vshll.u32 %v17928_v12, 16  ;;  %v1794_v59 = vshrl.u32 %v17928_v12, 16 }
 0x101   : > { %v1217_v24 = vpop.f32.mrf.mxu3  ;;  %v1632_v30 = vpop.f32.mrf.mxu1  ;;  %v1785_v15 = vsel %vm1491_vm3, %v1780_v45, %v1784_v4  ;;  %3440 = vmatpush.bf16.msrb.mxu1 %v15793_v33  ;;  %v1976_v45 = vrot.slane %v17928_v12, 1 }
 0x102   : > { %v1254_v14 = vadd.f32 %v1217_v24, %v976_v7  ;;  %v2149_v63 = vrot.slane %v1794_v59, 1  ;;  %v2150_v7 = vrot.slane %v1790_v56, 2 }
 0x104   : > { %v1400_v26 = vadd.f32 %v1363_v57, %v1254_v14  ;;  %v2337_v14 = vld [vmem:[%s21971_s1 + $0x30] sm:$0xff]  ;;  %v17968_v20 = vor.u32 %v2150_v7, %v2149_v63 }
 0x105   : > { %vm2353_vm10 = vcmp.gt.f32.partialorder %v2337_v14, 0.5 }
 0x106   : > { %v17922_v42 = vadd.f32 %v1630_v3, %v1400_v26  ;;  %v941_v38 = vpop.f32.mrf.mxu2  ;;  %v1975_v3 = vsel %vm1968_vm6, %v1972_v34, %v1974_v40  ;;  %v15760_v34 = vld [vmem:[%s21972_s2 + $0x18] sm:$0xff]  ;;  %v1792_v26 = vrot.slane %v1790_v56, 1 }
 0x107   : > { %v977_v50 = vadd.f32 %v941_v38, %v17726_v46  ;;  %v2590_v46 = vsel %vm490_vm0, %v2587_v39, %v2589_v47  ;;  %v15776_v39 = vld [vmem:[%s21972_s2 + $0x98] sm:$0xff]  ;;  %2849 = vmatpush.bf16.msrb.mxu2 %v15760_v34  ;;  %v2591_v38 = vrot.slane %v17958_v17, 3  ;;  %v15759_v34 = vld [vmem:[%s21972_s2 + $0x10] sm:$0xff] }
 0x108   : > { %v1368_v11 = vpop.f32.mrf.mxu0  ;;  %3019 = vmatpush.bf16.msrb.mxu3 %v15776_v39  ;;  %v15775_v39 = vld [vmem:[%s21972_s2 + $0x90] sm:$0xff] }
 0x109   : > { %v1219_v57 = vpop.f32.mrf.mxu3  ;;  %v1635_v25 = vpop.f32.mrf.mxu1 }
 0x10a   : > { %v1255_v61 = vadd.f32 %v1219_v57, %v977_v50  ;;  %v2369_v50 = vsel %vm2353_vm10, 1, %v17182_v32 }
 0x10b   : > { %1900 = vmatmul.bf16.gmra.mxu2 %v1785_v15  ;;  %2248 = vmatmul.bf16.gmra.mxu0 %v2148_v60 }
 0x10c   : > { %v1401_v9 = vadd.f32 %v1365_v16, %v1255_v61  ;;  %2675 = vmatmul.bf16.gmra.mxu1 %v2590_v46  ;;  %2398 = vperm.xlu0 %17146, %v2369_v50   ;;  %v18017_v50 = vld [vmem:[#allocation2 + $0x6c] sm:$0xff] }
 0x10d   : > { %2850 = vmatpush.bf16.msrb.mxu2 %v15759_v34  ;;  %3020 = vmatpush.bf16.msrb.mxu3 %v15775_v39 }
 0x10e   : > { %2060 = vmatmul.bf16.gmra.mxu3 %v1975_v3  ;;  %v17953_v6 = vadd.f32 %v1632_v30, %v1401_v9  ;;  %v944_v10 = vpop.f32.mrf.mxu2  ;;  %v1788_v30 = vor.u32 %v1786_v27, %v1784_v4  ;;  %v2152_v4 = vsel %vm2128_vm5, %v2147_v44, %v17968_v20  ;;  %v17979_v3 = vld [vmem:[#allocation2 + $0x40] sm:$0xff]  ;;  %v15792_v44 = vld [vmem:[%s21972_s2 + $0x118] sm:$0xff] }
 0x10f   : > { %v978_v55 = vadd.f32 %v944_v10, %v17747_v18  ;;  %v15784_v18 = vld [vmem:[%s21972_s2 + $0xd8] sm:$0xff]  ;;  %v1802_v56 = vshrl.u32 %v17979_v3, 16  ;;  %3441 = vmatpush.bf16.msrb.mxu1 %v15792_v44  ;;  %v312_v10 = vld [vmem:[%s17252_s14 + $0xe0] sm:$0xff] }
 0x110   : > { %v1370_v5 = vpop.f32.mrf.mxu0  ;;  %3296 = vmatpush.bf16.msrb.mxu0 %v15784_v18  ;;  %v1793_v27 = vsel %vm1491_vm3, %v1788_v30, %v1792_v26 }
 0x111   : > { %v1222_v37 = vpop.f32.mrf.mxu3  ;;  %v1637_v16 = vpop.f32.mrf.mxu1 }
 0x112   : > { %v1256_v24 = vadd.f32 %v1222_v37, %v978_v55 }
 0x114   : > { %v1402_v21 = vadd.f32 %v1368_v11, %v1256_v24 }
 0x116   : > { %v17973_v57 = vadd.f32 %v1635_v25, %v1402_v21  ;;  %v946_v11 = vpop.f32.mrf.mxu2  ;;  %v1977_v25 = vsel %vm1968_vm6, %v1974_v40, %v1976_v45  ;;  %v2338_v40 = vld [vmem:[%s21971_s1 + $0x38] sm:$0xff]  ;;  %v2153_v21 = vrot.slane %v1802_v56, 1 }
 0x117   : > { %v979_v15 = vadd.f32 %v946_v11, %v17761_v35  ;;  %v2592_v35 = vsel %vm490_vm0, %v2589_v47, %v2591_v38  ;;  %v1798_v47 = vshll.u32 %v17979_v3, 16  ;;  %vm2354_vm12 = vcmp.gt.f32.partialorder %v2338_v40, 0.5  ;;  %v2336_v11 = vld [vmem:[%s21971_s1 + $0x28] sm:$0xff] }
 0x118   : > { %v1373_v61 = vpop.f32.mrf.mxu0  ;;  %v2370_v19 = vsel %vm2354_vm12, 1, %v17182_v32  ;;  %vm2352_vm13 = vcmp.gt.f32.partialorder %v2336_v11, 0.5  ;;  %v18039_v40 = vld [vmem:[#allocation2 + $0x48] sm:$0xff] }
 0x119   : > { %v1224_v60 = vpop.f32.mrf.mxu3  ;;  %v1640_v9 = vpop.f32.mrf.mxu1  ;;  %2401 = vperm.xlu1 %17147, %v2370_v19   ;;  %v2154_v14 = vrot.slane %v1798_v47, 2  ;;  %v1806_v12 = vshll.u32 %v18039_v40, 16  ;;  %v15774_v19 = vld [vmem:[%s21972_s2 + $0x88] sm:$0xff] }
 0x11a   : > { %v1257_v46 = vadd.f32 %v1224_v60, %v979_v15  ;;  %v1796_v15 = vor.u32 %v1794_v59, %v1792_v26  ;;  %v1800_v60 = vrot.slane %v1798_v47, 1  ;;  %3021 = vmatpush.bf16.msrb.mxu3 %v15774_v19 }
 0x11b   : > { %1905 = vmatmul.bf16.gmra.mxu2 %v1793_v27  ;;  %2253 = vmatmul.bf16.gmra.mxu0 %v2152_v4  ;;  %v18027_v27 = vor.u32 %v2154_v14, %v2153_v21  ;;  %v1978_v4 = vrot.slane %v17979_v3, 1  ;;  %v2158_v21 = vrot.slane %v1806_v12, 2 }
 0x11c   : > { %v1403_v33 = vadd.f32 %v1370_v5, %v1257_v46  ;;  %2680 = vmatmul.bf16.gmra.mxu1 %v2592_v35  ;;  %v16293_v5 = vpack.c.bf16 %v313_v54, %v312_v10  ;;  %v2593_v46 = vrot.slane %v18017_v50, 3  ;;  %v1801_v59 = vsel %vm1491_vm3, %v1796_v15, %v1800_v60 }
 0x11d   : > { %v2156_v26 = vsel %vm2128_vm5, %v17968_v20, %v18027_v27  ;;  %v15791_v20 = vld [vmem:[%s21972_s2 + $0x110] sm:$0xff]  ;;  %v2372_v10 = vsel %vm2356_vm14, 1, %v17182_v32  ;;  %v1808_v15 = vrot.slane %v1806_v12, 1  ;;  %v2339_v12 = vld [vmem:[%s21971_s1 + $0x40] sm:$0xff] }
 0x11e   : > { %2065 = vmatmul.bf16.gmra.mxu3 %v1977_v25  ;;  %v18012_v55 = vadd.f32 %v1637_v16, %v1403_v33  ;;  %v949_v37 = vpop.f32.mrf.mxu2  ;;  %16690 = vst [vmem:[#allocation2 + $0x80] sm:$0xff] %v16293_v5   ;;  %3442 = vmatpush.bf16.msrb.mxu1 %v15791_v20  ;;  %vm2355_vm4 = vcmp.gt.f32.partialorder %v2339_v12, 0.5 }
 0x11f   : > { %v980_v63 = vadd.f32 %v949_v37, %v17777_v62  ;;  %v15783_v62 = vld [vmem:[%s21972_s2 + $0xd0] sm:$0xff]  ;;  %2407 = vperm.xlu0 %17146, %v2372_v10   ;;  %v2371_v19 = vsel %vm2355_vm4, 1, %v17182_v32 }
 0x120   : > { %v1375_v24 = vpop.f32.mrf.mxu0  ;;  %3297 = vmatpush.bf16.msrb.mxu0 %v15783_v62  ;;  %v1804_v62 = vor.u32 %v1802_v56, %v1800_v60 }
 0x121   : > { %v1227_v7 = vpop.f32.mrf.mxu3  ;;  %v1642_v30 = vpop.f32.mrf.mxu1 }
 0x122   : > { %v1258_v18 = vadd.f32 %v1227_v7, %v980_v63  ;;  %v1809_v56 = vsel %vm1491_vm3, %v1804_v62, %v1808_v15 }
 0x124   : > { %v1404_v16 = vadd.f32 %v1373_v61, %v1258_v18  ;;  %v2368_v61 = vsel %vm2352_vm13, 1, %v17182_v32 }
 0x125   : > { %2395 = vperm.xlu2 %17148, %v2368_v61  }
 0x126   : > { %v18032_v25 = vadd.f32 %v1640_v9, %v1404_v16  ;;  %v951_v35 = vpop.f32.mrf.mxu2  ;;  %v1979_v9 = vsel %vm1968_vm6, %v1976_v45, %v1978_v4  ;;  %v1810_v45 = vshrl.u32 %v18039_v40, 16  ;;  %v18071_v16 = vld [vmem:[#allocation2 + $0x74] sm:$0xff] }
 0x127   : > { %v981_v33 = vadd.f32 %v951_v35, %v17806_v31  ;;  %v2594_v31 = vsel %vm490_vm0, %v2591_v38, %v2593_v46  ;;  %v15758_v38 = vld [vmem:[%s21972_s2 + $0x8] sm:$0xff]  ;;  %v1980_v35 = vrot.slane %v18039_v40, 1 }
 0x128   : > { %v1378_v8 = vpop.f32.mrf.mxu0  ;;  %2851 = vmatpush.bf16.msrb.mxu2 %v15758_v38  ;;  %v15773_v38 = vld [vmem:[%s21972_s2 + $0x80] sm:$0xff] }
 0x129   : > { %v1229_v44 = vpop.f32.mrf.mxu3  ;;  %v1645_v34 = vpop.f32.mrf.mxu1  ;;  %3022 = vmatpush.bf16.msrb.mxu3 %v15773_v38 }
 0x12a   : > { %v1259_v47 = vadd.f32 %v1229_v44, %v981_v33  ;;  %v2595_v33 = vrot.slane %v18071_v16, 3 }
 0x12b   : > { %1910 = vmatmul.bf16.gmra.mxu2 %v1801_v59  ;;  %2258 = vmatmul.bf16.gmra.mxu0 %v2156_v26 }
 0x12c   : > { %v1405_v39 = vadd.f32 %v1375_v24, %v1259_v47  ;;  %2685 = vmatmul.bf16.gmra.mxu1 %v2594_v31  ;;  %v2157_v24 = vrot.slane %v1810_v45, 1  ;;  %v18093_v31 = vld [vmem:[#allocation2 + $0x50] sm:$0xff] }
 0x12d   : > { %v1814_v3 = vshll.u32 %v18093_v31, 16  ;;  %2404 = vperm.xlu2 %17148, %v2371_v19  }
 0x12e   : > { %2070 = vmatmul.bf16.gmra.mxu3 %v1979_v9  ;;  %v18066_v54 = vadd.f32 %v1642_v30, %v1405_v39  ;;  %v954_v37 = vpop.f32.mrf.mxu2  ;;  %v2341_v30 = vld [vmem:[%s21971_s1 + $0x50] sm:$0xff]  ;;  %v18081_v61 = vor.u32 %v2158_v21, %v2157_v24 }
 0x12f   : > { %v982_v5 = vadd.f32 %v954_v37, %v17685_v23  ;;  %v15782_v23 = vld [vmem:[%s21972_s2 + $0xc8] sm:$0xff]  ;;  %vm2357_vm15 = vcmp.gt.f32.partialorder %v2341_v30, 0.5  ;;  %v2162_v21 = vrot.slane %v1814_v3, 2  ;;  %v18127_v30 = vld [vmem:[#allocation2 + $0x7c] sm:$0xff] }
 0x130   : > { %v1380_v7 = vpop.f32.mrf.mxu0  ;;  %v2373_v44 = vsel %vm2357_vm15, 1, %v17182_v32  ;;  %3298 = vmatpush.bf16.msrb.mxu0 %v15782_v23  ;;  %v2160_v60 = vsel %vm2128_vm5, %v18027_v27, %v18081_v61  ;;  %v15790_v27 = vld [vmem:[%s21972_s2 + $0x108] sm:$0xff]  ;;  %v2107_v23 = vld [vmem:[#allocation2 + $0x58] sm:$0x3] }
 0x131   : > { %v1232_v63 = vpop.f32.mrf.mxu3  ;;  %v1647_v18 = vpop.f32.mrf.mxu1  ;;  %2410 = vperm.xlu1 %17147, %v2373_v44   ;;  %3443 = vmatpush.bf16.msrb.mxu1 %v15790_v27  ;;  %v15781_v44 = vld [vmem:[%s21972_s2 + $0xc0] sm:$0xff] }
 0x132   : > { %v1260_v14 = vadd.f32 %v1232_v63, %v982_v5 }
 0x134   : > { %v1406_v11 = vadd.f32 %v1378_v8, %v1260_v14  ;;  %3299 = vmatpush.bf16.msrb.mxu0 %v15781_v44  ;;  %v2491_v44 = vld [vmem:[#allocation2 + $0x44] sm:$0xc] }
 0x136   : > { %v956_v8 = vpop.f32.mrf.mxu2  ;;  %v18086_v59 = vadd.f32 %v1645_v34, %v1406_v11  ;;  %v1981_v34 = vsel %vm1968_vm6, %v1978_v4, %v1980_v35  ;;  %v1818_v4 = vshrl.u32 %v18093_v31, 16 }
 0x137   : > { %v983_v26 = vadd.f32 %v956_v8, %v17697_v28  ;;  %v2596_v28 = vsel %vm490_vm0, %v2593_v46, %v2595_v33  ;;  %v15757_v46 = vld [vmem:[%s21972_s2] sm:$0xff]  ;;  %v1816_v8 = vrot.slane %v1814_v3, 1 }
 0x138   : > { %v1383_v9 = vpop.f32.mrf.mxu0  ;;  %2852 = vmatpush.bf16.msrb.mxu2 %v15757_v46  ;;  %v2161_v24 = vrot.slane %v1818_v4, 1 }
 0x139   : > { %v1234_v47 = vpop.f32.mrf.mxu3  ;;  %v18095_v20 = vpop.f32.mrf.mxu1 }
 0x13a   : > { %v1261_v39 = vadd.f32 %v1234_v47, %v983_v26  ;;  %v18137_v26 = vor.u32 %v2162_v21, %v2161_v24  ;;  %v2126_v47 = vunpack.c.l.b16 %v2107_v23 }
 0x13b   : > { %1915 = vmatmul.bf16.gmra.mxu2 %v1809_v56  ;;  %2263 = vmatmul.bf16.gmra.mxu0 %v2160_v60  ;;  %v1982_v56 = vrot.slane %v18093_v31, 1  ;;  %v1697_v60 = vld [vmem:[#allocation2 + $0x58] sm:$0x1] }
 0x13c   : > { %v1407_v13 = vadd.f32 %v1380_v7, %v1261_v39  ;;  %2690 = vmatmul.bf16.gmra.mxu1 %v2596_v28  ;;  %v15789_v28 = vld [vmem:[%s21972_s2 + $0x100] sm:$0xff]  ;;  %v2164_v12 = vsel %vm2128_vm5, %v18081_v61, %v18137_v26  ;;  %v1748_v3 = vunpack.c.l.b16 %v1697_v60  ;;  %v2127_v46 = vpack.c.b16 %v2126_v47, %v2126_v47  ;;  %v2344_v61 = vld [vmem:[%s21971_s1 + $0x68] sm:$0xff]  ;;  %v15843_v31 = vld [vmem:[%s21972_s2 + $0x238] sm:$0xff] }
 0x13d   : > { %3444 = vmatpush.bf16.msrb.mxu1 %v15789_v28  ;;  %vm2360_vm8 = vcmp.gt.f32.partialorder %v2344_v61, 0.5 }
 0x13e   : > { %2075 = vmatmul.bf16.gmra.mxu3 %v1981_v34  ;;  %v18122_v10 = vadd.f32 %v1647_v18, %v1407_v13  ;;  %v959_v37 = vpop.f32.mrf.mxu2  ;;  %v1812_v18 = vor.u32 %v1810_v45, %v1808_v15  ;;  %v1757_v40 = vpack.c.b16 %v1748_v3, %v1748_v3  ;;  %v2169_v21 = vshll.u32 %v2127_v46, 16 }
 0x13f   : > { %v984_v5 = vadd.f32 %v959_v37, %v17716_v1  ;;  %v2343_v1 = vld [vmem:[%s21971_s1 + $0x60] sm:$0xff]  ;;  %v2376_v23 = vsel %vm2360_vm8, 1, %v17182_v32  ;;  %v1820_v3 = vor.u32 %v1818_v4, %v1816_v8 }
 0x140   : > { %v1385_v7 = vpop.f32.mrf.mxu0  ;;  %vm2359_vm7 = vcmp.gt.f32.partialorder %v2343_v1, 0.5  ;;  %v1817_v27 = vsel %vm1491_vm3, %v1812_v18, %v1816_v8  ;;  %2419 = vperm.xlu1 %17147, %v2376_v23   ;;  %v1822_v60 = vshll.u32 %v1757_v40, 16  ;;  %v17064_v23 = vld [vmem:[#allocation2 + $0x54] sm:$0xff]  }
 0x141   : > { %v1237_v63 = vpop.f32.mrf.mxu3  ;;  %v1652_v11 = vpop.f32.mrf.mxu1  ;;  %v2375_v45 = vsel %vm2359_vm7, 1, %v17182_v32  ;;  %4311 = vmatpush.bf16.msra.mxu1 %v15843_v31 }
 0x142   : > { %v1262_v14 = vadd.f32 %v1237_v63, %v984_v5  ;;  %2416 = vperm.xlu0 %17146, %v2375_v45   ;;  %v2507_v5 = vld [vmem:[#allocation2 + $0x84] sm:$0x7] }
 0x144   : > { %v1408_v62 = vadd.f32 %v1383_v9, %v1262_v14  ;;  %v2597_v9 = vrot.slane %v18127_v30, 3  ;;  %v2574_v14 = vunpack.c.l.b16 %v2507_v5  ;;  %v1984_v5 = vrot.slane %v1757_v40, 1 }
 0x146   : > { %v961_v15 = vpop.f32.mrf.mxu2  ;;  %v2598_v37 = vsel %vm490_vm0, %v2595_v33, %v2597_v9  ;;  %v18164_v24 = vadd.f32 %v18095_v20, %v1408_v62  ;;  %v15812_v33 = vld [vmem:[%s21972_s2 + $0x178] sm:$0xff]  ;;  %v18176_v28 = vpack.c.b16 %v2574_v14, %v2574_v14  ;;  %v1985_v53 = vsel %vm1968_vm6, %v1982_v56, %v1984_v5 }
 0x147   : > { %v985_v39 = vadd.f32 %v961_v15, %v17740_v49  ;;  %v1983_v49 = vsel %vm1968_vm6, %v1980_v35, %v1982_v56  ;;  %v2166_v35 = vshrl.u32 %v2127_v46, 16  ;;  %3702 = vmatpush.bf16.msra.mxu2 %v15812_v33  ;;  %v2171_v15 = vrot.slane %v2169_v21, 2  ;;  %v2346_v56 = vld [vmem:[%s21971_s1 + $0x78] sm:$0xff] }
 0x148   : > { %v1388_v13 = vpop.f32.mrf.mxu0  ;;  %v1824_v46 = vrot.slane %v1822_v60, 1  ;;  %v2915_v60 = vshrl.u32 %v17804_v29, 16  ;;  %vm2362_vm10 = vcmp.gt.f32.partialorder %v2346_v56, 0.5 }
 0x149   : > { %v1239_v34 = vpop.f32.mrf.mxu3  ;;  %v1655_v19 = vpop.f32.mrf.mxu1  ;;  %v2168_v45 = vrot.slane %v2166_v35, 1 }
 0x14a   : > { %v1263_v38 = vadd.f32 %v1239_v34, %v985_v39  ;;  %v1825_v14 = vsel %vm1491_vm3, %v1820_v3, %v1824_v46 }
 0x14b   : > { %1920 = vmatmul.bf16.gmra.mxu2 %v1817_v27  ;;  %2268 = vmatmul.bf16.gmra.mxu0 %v2164_v12  ;;  %v2707_v27 = vunpack.c.l.b16 %v2491_v44 }
 0x14c   : > { %v1409_v63 = vadd.f32 %v1385_v7, %v1263_v38  ;;  %2695 = vmatmul.bf16.gmra.mxu1 %v2598_v37  ;;  %v15827_v7 = vld [vmem:[%s21972_s2 + $0x1b8] sm:$0xff]  ;;  %v2172_v38 = vor.u32 %v2171_v15, %v2168_v45  ;;  %v17062_v37 = vld [vmem:[#allocation2 + $0x4c] sm:$0xf0]   ;;  %v3165_v15 = vshrl.u32 %v17064_v23, 16 }
 0x14d   : > { %3967 = vmatpush.bf16.msra.mxu3 %v15827_v7  ;;  %v2708_v35 = vpack.c.b16 %v2559_v2, %v2707_v27  ;;  %v2918_v27 = vshll.u32 %v17804_v29, 16 }
 0x14e   : > { %2080 = vmatmul.bf16.gmra.mxu3 %v1983_v49  ;;  %v18173_v18 = vadd.f32 %v1652_v11, %v1409_v63  ;;  %v964_v20 = vpop.f32.mrf.mxu2  ;;  %v2342_v11 = vld [vmem:[%s21971_s1 + $0x58] sm:$0xff]  ;;  %v16837_v49 = vld [vmem:[#allocation2 + $0x4c] sm:$0x8]  ;;  %v2599_v63 = vrot.slane %v18176_v28, 3  ;;  %v2173_v40 = vsel %vm2128_vm5, %v18137_v26, %v2172_v38  ;;  %v2721_v26 = vshll.u32 %v17800_v52, 16 }
 0x14f   : > { %v986_v62 = vadd.f32 %v964_v20, %v17758_v43  ;;  %v15835_v43 = vld [vmem:[%s21972_s2 + $0x1f8] sm:$0xff]  ;;  %vm2358_vm9 = vcmp.gt.f32.partialorder %v2342_v11, 0.5  ;;  %v16838_v33 = vor.u32 %v17062_v37, %v16837_v49 }
 0x150   : > { %v1390_v47 = vpop.f32.mrf.mxu0  ;;  %4125 = vmatpush.bf16.msra.mxu0 %v15835_v43  ;;  %v2600_v2 = vsel %vm490_vm0, %v2597_v9, %v2599_v63  ;;  %v2723_v5 = vrot.slane %v2721_v26, 3  ;;  %v2917_v63 = vrot.slane %v2915_v60, 3 }
 0x151   : > { %v1242_v1 = vpop.f32.mrf.mxu3  ;;  %v1657_v34 = vpop.f32.mrf.mxu1  ;;  %v3157_v45 = vshrl.u32 %v16838_v33, 16  ;;  %v3160_v9 = vshll.u32 %v16838_v33, 16  ;;  %v2920_v33 = vrot.slane %v2918_v27, 4  ;;  %v15842_v27 = vld [vmem:[%s21972_s2 + $0x230] sm:$0xff] }
 0x152   : > { %v1264_v39 = vadd.f32 %v1242_v1, %v986_v62  ;;  %v2718_v1 = vshrl.u32 %v17800_v52, 16  ;;  %v15811_v52 = vld [vmem:[%s21972_s2 + $0x170] sm:$0xff]  ;;  %4312 = vmatpush.bf16.msra.mxu1 %v15842_v27 }
 0x153   : > { %3703 = vmatpush.bf16.msra.mxu2 %v15811_v52  ;;  %v3162_v29 = vrot.slane %v3160_v9, 4  ;;  %v17066_v9 = vld [vmem:[#allocation2 + $0x5c] sm:$0xff]  }
 0x154   : > { %v1410_v12 = vadd.f32 %v1388_v13, %v1264_v39  ;;  %v2374_v13 = vsel %vm2358_vm9, 1, %v17182_v32  ;;  %v15826_v39 = vld [vmem:[%s21972_s2 + $0x1b0] sm:$0xff]  ;;  %v2720_v37 = vrot.slane %v2718_v1, 2 }
 0x155   : > { %2413 = vperm.xlu2 %17148, %v2374_v13   ;;  %3968 = vmatpush.bf16.msra.mxu3 %v15826_v39  ;;  %v16720_v39 = vld [vmem:[#allocation2 + $0x50] sm:$0xff]  }
 0x156   : > { %v966_v61 = vpop.f32.mrf.mxu2  ;;  %v18190_v21 = vadd.f32 %v1655_v19, %v1410_v12  ;;  %v2713_v19 = vshll.u32 %v2708_v35, 16  ;;  %v2378_v12 = vsel %vm2362_vm10, 1, %v17182_v32 }
 0x157   : > { %v987_v4 = vadd.f32 %v966_v61, %v17768_v58  ;;  %v2710_v58 = vshrl.u32 %v2708_v35, 16  ;;  %2425 = vperm.xlu0 %17146, %v2378_v12   ;;  %v3159_v61 = vrot.slane %v3157_v45, 3  ;;  %v3167_v35 = vrot.slane %v3165_v15, 3  ;;  %v2345_v12 = vld [vmem:[%s21971_s1 + $0x70] sm:$0xff] }
 0x158   : > { %v1393_v7 = vpop.f32.mrf.mxu0  ;;  %v2715_v46 = vrot.slane %v2713_v19, 3  ;;  %v2921_v19 = vor.u32 %v2920_v33, %v2917_v63  ;;  %vm2361_vm11 = vcmp.gt.f32.partialorder %v2345_v12, 0.5  ;;  %v2736_v12 = vshrl.u32 %v17913_v36, 16 }
 0x159   : > { %v1244_v8 = vpop.f32.mrf.mxu3  ;;  %v1660_v62 = vpop.f32.mrf.mxu1  ;;  %v2712_v3 = vrot.slane %v2710_v58, 2  ;;  %v15834_v58 = vld [vmem:[%s21972_s2 + $0x1f0] sm:$0xff] }
 0x15a   : > { %v1265_v20 = vadd.f32 %v1244_v8, %v987_v4  ;;  %4126 = vmatpush.bf16.msra.mxu0 %v15834_v58 }
 0x15b   : > { %1925 = vmatmul.bf16.gmra.mxu2 %v1825_v14  ;;  %2273 = vmatmul.bf16.gmra.mxu0 %v2173_v40  ;;  %v2922_v14 = vrot.slane %v2718_v1, 3  ;;  %v2923_v40 = vrot.slane %v2721_v26, 4 }
 0x15c   : > { %v1411_v44 = vadd.f32 %v1390_v47, %v1265_v20  ;;  %2700 = vmatmul.bf16.gmra.mxu1 %v2600_v2  ;;  %v3168_v47 = vshll.u32 %v17064_v23, 16  ;;  %v2716_v20 = vor.u32 %v2715_v46, %v2712_v3  ;;  %v3174_v3 = vshrl.u32 %v17066_v9, 16 }
 0x15d   : > { %v3177_v46 = vshll.u32 %v17066_v9, 16 }
 0x15e   : > { %2085 = vmatmul.bf16.gmra.mxu3 %v1985_v53  ;;  %v18219_v11 = vadd.f32 %v1657_v34, %v1411_v44  ;;  %v969_v43 = vpop.f32.mrf.mxu2  ;;  %v3170_v4 = vrot.slane %v3168_v47, 4  ;;  %v18222_v53 = vor.u32 %v2723_v5, %v2720_v37  ;;  %v18229_v44 = vor.u32 %v2923_v40, %v2922_v14  ;;  %v2381_v40 = vpop.permute.xlu0 %2380 }
 0x15f   : > { %v988_v38 = vadd.f32 %v969_v43, %v17796_v22  ;;  %v3163_v22 = vor.u32 %v3162_v29, %v3159_v61  ;;  %v2730_v43 = vshll.u32 %v17857_v51, 16  ;;  %v2377_v37 = vsel %vm2361_vm11, 1, %v17182_v32 }
 0x160   : > { %v1395_v13 = vpop.f32.mrf.mxu0  ;;  %v18224_v2 = vor.u32 %v3170_v4, %v3167_v35  ;;  %v2725_v31 = vsel %vm616_vm1, %v2716_v20, %v18222_v53  ;;  %v2925_v52 = vsel %vm823_vm2, %v2921_v19, %v18229_v44  ;;  %2422 = vperm.xlu2 %17148, %v2377_v37   ;;  %v3176_v4 = vrot.slane %v3174_v3, 3  ;;  %v18272_v19 = vld [vmem:[%s21973_s3] ss:$0 sm:$0xff] }
 0x161   : > { %v1247_v49 = vpop.f32.mrf.mxu3  ;;  %v1662_v34 = vpop.f32.mrf.mxu1  ;;  %v2732_v35 = vrot.slane %v2730_v43, 3  ;;  %v2927_v20 = vrot.slane %v2730_v43, 4  ;;  %v2739_v43 = vshll.u32 %v17913_v36, 16  ;;  %vm2427_vm12 = vcmp.eq.s32.totalorder %v2381_v40, 1 }
 0x162   : > { %v1266_v8 = vadd.f32 %v1247_v49, %v988_v38  ;;  %v3172_v56 = vsel %vm823_vm2, %v3163_v22, %v18224_v2  ;;  %v15810_v38 = vld [vmem:[%s21972_s2 + $0x168] sm:$0xff]  ;;  %v2387_v40 = vpop.permute.xlu1 %2386 }
 0x163   : > { %v15825_v49 = vld [vmem:[%s21972_s2 + $0x1a8] sm:$0xff]  ;;  %3704 = vmatpush.bf16.msra.mxu2 %v15810_v38  ;;  %v15824_v38 = vld [vmem:[%s21972_s2 + $0x1a0] sm:$0xff]  ;;  %vm2429_vm14 = vcmp.eq.s32.totalorder %v2387_v40, 1  ;;  %v2393_v40 = vpop.permute.xlu2 %2392 }
 0x164   : > { %v1412_v23 = vadd.f32 %v1393_v7, %v1266_v8  ;;  %3969 = vmatpush.bf16.msra.mxu3 %v15825_v49  ;;  %v3179_v8 = vrot.slane %v3177_v46, 4  ;;  %vm2431_vm4 = vcmp.eq.s32.totalorder %v2393_v40, 1 }
 0x166   : > { %v971_v60 = vpop.f32.mrf.mxu2  ;;  %v18231_v45 = vadd.f32 %v1660_v62, %v1412_v23  ;;  %v18264_v22 = vor.u32 %v3179_v8, %v3176_v4  ;;  %v2930_v4 = vrot.slane %v2736_v12, 3 }
 0x167   : > { %v989_v1 = vadd.f32 %v971_v60, %v17824_v48  ;;  %v2727_v48 = vshrl.u32 %v17857_v51, 16 }
 0x168   : > { %v2239_v26 = vpop.f32.mrf.mxu0  ;;  %3970 = vmatpush.bf16.msra.mxu3 %v15824_v38 }
 0x169   : > { %v1249_v7 = vpop.f32.mrf.mxu3  ;;  %v18238_v47 = vpop.f32.mrf.mxu1  ;;  %v2729_v29 = vrot.slane %v2727_v48, 2  ;;  %v2926_v23 = vrot.slane %v2727_v48, 3  ;;  %v18289_v48 = vld [vmem:[#allocation2 + $0x58] sm:$0xff]  }
 0x16a   : > { %v1267_v15 = vadd.f32 %v1249_v7, %v989_v1  ;;  %v2390_v38 = vpop.permute.xlu1 %2389 }
 0x16b   : > { %2853 = vmatmul.bf16.vlgmr.msrb.gmra.mxu2 %v2725_v31  ;;  %3300 = vmatmul.bf16.vlgmr.msrb.gmra.mxu0 %v3172_v56  ;;  %v18274_v60 = vor.u32 %v2927_v20, %v2926_v23  ;;  %vm2430_vm15 = vcmp.eq.s32.totalorder %v2390_v38, 1 }
 0x16c   : > { %v1413_v62 = vadd.f32 %v1395_v13, %v1267_v15  ;;  %3445 = vmatmul.bf16.vlgmr.msrb.gmra.mxu1 %v16720_v39  ;;  %v17068_v15 = vld [vmem:[#allocation2 + $0x64] sm:$0xff]  }
 0x16d   : > { %v3183_v3 = vshrl.u32 %v17068_v15, 16  ;;  %v3186_v46 = vshll.u32 %v17068_v15, 16 }
 0x16e   : > { %3023 = vmatmul.bf16.vlgmr.msrb.gmra.mxu3 %v2925_v52  ;;  %v18257_v5 = vadd.f32 %v1662_v34, %v1413_v62  ;;  %v1891_v63 = vpop.f32.mrf.mxu2  ;;  %v18262_v34 = vor.u32 %v2732_v35, %v2729_v29  ;;  %v2741_v35 = vrot.slane %v2739_v43, 3 }
 0x16f   : > { %v1931_v51 = vadd.f32 %v1891_v63, %v17872_v41  ;;  %v15833_v41 = vld [vmem:[%s21972_s2 + $0x1e8] sm:$0xff]  ;;  %v3185_v8 = vrot.slane %v3183_v3, 3 }
 0x170   : > { %v2241_v61 = vpop.f32.mrf.mxu0  ;;  %4127 = vmatpush.bf16.msra.mxu0 %v15833_v41  ;;  %v2734_v9 = vsel %vm616_vm1, %v18222_v53, %v18262_v34  ;;  %v2384_v53 = vpop.permute.xlu0 %2383 }
 0x171   : > { %v2051_v13 = vpop.f32.mrf.mxu3  ;;  %v18260_v14 = vpop.f32.mrf.mxu1  ;;  %vm2428_vm13 = vcmp.eq.s32.totalorder %v2384_v53, 1 }
 0x172   : > { %v2091_v33 = vadd.f32 %v2051_v13, %v1931_v51 }
 0x174   : > { %v2279_v58 = vadd.f32 %v2239_v26, %v2091_v33  ;;  %v3181_v26 = vsel %vm823_vm2, %v18224_v2, %v18264_v22  ;;  %v15841_v2 = vld [vmem:[%s21972_s2 + $0x228] sm:$0xff]  ;;  %v3188_v33 = vrot.slane %v3186_v46, 4  ;;  %v16722_v46 = vld [vmem:[#allocation2 + $0x60] sm:$0xff]  }
 0x175   : > { %4313 = vmatpush.bf16.msra.mxu1 %v15841_v2  ;;  %v17070_v2 = vld [vmem:[#allocation2 + $0x6c] sm:$0xff]  }
 0x176   : > { %v1893_v1 = vpop.f32.mrf.mxu2  ;;  %v2299_v39 = vadd.f32 %v18272_v19, %v2279_v58 }
 0x177   : > { %v1932_v7 = vadd.f32 %v1893_v1, %v17908_v0  ;;  %v2929_v0 = vsel %vm823_vm2, %v18229_v44, %v18274_v60  ;;  %v15809_v44 = vld [vmem:[%s21972_s2 + $0x160] sm:$0xff]  ;;  %v2931_v1 = vrot.slane %v2739_v43, 4 }
 0x178   : > { %v2244_v56 = vpop.f32.mrf.mxu0  ;;  %v2315_v49 = vmax.f32 %v2299_v39, 0.0  ;;  %3705 = vmatpush.bf16.msra.mxu2 %v15809_v44 }
 0x179   : > { %v2053_v31 = vpop.f32.mrf.mxu3  ;;  %v18284_v62 = vpop.f32.mrf.mxu1  ;;  %v18314_v15 = vor.u32 %v2931_v1, %v2930_v4 }
 0x17a   : > { %v2092_v52 = vadd.f32 %v2053_v31, %v1932_v7  ;;  %v2443_v23 = vsel %vm2427_vm12, %v2315_v49, 0.0  ;;  %v2748_v49 = vshll.u32 %v17958_v17, 16 }
 0x17b   : > { %2858 = vmatmul.bf16.gmra.mxu2 %v2734_v9  ;;  %3305 = vmatmul.bf16.gmra.mxu0 %v3181_v26  ;;  %v15832_v9 = vld [vmem:[%s21972_s2 + $0x1e0] sm:$0xff] }
 0x17c   : > { %v2280_v27 = vadd.f32 %v2241_v61, %v2092_v52  ;;  %3450 = vmatmul.bf16.gmra.mxu1 %v18289_v48  ;;  %v2738_v61 = vrot.slane %v2736_v12, 2  ;;  %4128 = vmatpush.bf16.msra.mxu0 %v15832_v9 }
 0x17e   : > { %3028 = vmatmul.bf16.gmra.mxu3 %v2929_v0  ;;  %v2300_v37 = vadd.f32 %v18272_v19, %v2280_v27  ;;  %v1896_v63 = vpop.f32.mrf.mxu2  ;;  %v18307_v31 = vor.u32 %v2741_v35, %v2738_v61 }
 0x17f   : > { %v1933_v36 = vadd.f32 %v1896_v63, %v17922_v42  ;;  %v18309_v42 = vor.u32 %v3188_v33, %v3185_v8  ;;  %v3195_v63 = vshll.u32 %v17070_v2, 16  ;;  %v2750_v33 = vrot.slane %v2748_v49, 3 }
 0x180   : > { %v2316_v13 = vmax.f32 %v2300_v37, 0.0  ;;  %v2246_v29 = vpop.f32.mrf.mxu0  ;;  %v2743_v53 = vsel %vm616_vm1, %v18262_v34, %v18307_v31  ;;  %v2745_v34 = vshrl.u32 %v17958_v17, 16  ;;  %v3192_v37 = vshrl.u32 %v17070_v2, 16 }
 0x181   : > { %v2056_v51 = vpop.f32.mrf.mxu3  ;;  %v18305_v58 = vpop.f32.mrf.mxu1  ;;  %v3190_v12 = vsel %vm823_vm2, %v18264_v22, %v18309_v42  ;;  %v15840_v22 = vld [vmem:[%s21972_s2 + $0x220] sm:$0xff] }
 0x182   : > { %v2093_v20 = vadd.f32 %v2056_v51, %v1933_v36  ;;  %v2444_v41 = vsel %vm2428_vm13, %v2316_v13, 0.0  ;;  %v15823_v36 = vld [vmem:[%s21972_s2 + $0x198] sm:$0xff]  ;;  %4314 = vmatpush.bf16.msra.mxu1 %v15840_v22  ;;  %v2747_v4 = vrot.slane %v2745_v34, 2 }
 0x183   : > { %v16379_v7 = vpack.c.bf16 %v2444_v41, %v2443_v23  ;;  %3971 = vmatpush.bf16.msra.mxu3 %v15823_v36  ;;  %v2934_v23 = vrot.slane %v2745_v34, 3  ;;  %v3197_v41 = vrot.slane %v3195_v63, 4  ;;  %v17072_v34 = vld [vmem:[#allocation2 + $0x74] sm:$0xff]   ;;  %v2757_v36 = vshll.u32 %v18017_v50, 16 }
 0x184   : > { %v2281_v26 = vadd.f32 %v2244_v56, %v2093_v20  ;;  %v3194_v20 = vrot.slane %v3192_v37, 3  ;;  %v16723_v37 = vld [vmem:[#allocation2 + $0x68] sm:$0xff]  }
 0x185   : > { %16712 = vst [vmem:[#allocation3 + $0x10] sm:$0xff] %v16379_v7  }
 0x186   : > { %v1898_v52 = vpop.f32.mrf.mxu2  ;;  %v2301_v56 = vadd.f32 %v18272_v19, %v2281_v26 }
 0x187   : > { %v1934_v39 = vadd.f32 %v1898_v52, %v17953_v6  ;;  %v2933_v6 = vsel %vm823_vm2, %v18274_v60, %v18314_v15  ;;  %v15808_v60 = vld [vmem:[%s21972_s2 + $0x158] sm:$0xff]  ;;  %v2935_v52 = vrot.slane %v2748_v49, 4 }
 0x188   : > { %v2249_v27 = vpop.f32.mrf.mxu0  ;;  %v2317_v51 = vmax.f32 %v2301_v56, 0.0  ;;  %3706 = vmatpush.bf16.msra.mxu2 %v15808_v60  ;;  %v2396_v60 = vpop.permute.xlu2 %2395 }
 0x189   : > { %v2058_v0 = vpop.f32.mrf.mxu3  ;;  %v18324_v3 = vpop.f32.mrf.mxu1  ;;  %v18351_v2 = vor.u32 %v2935_v52, %v2934_v23  ;;  %vm2432_vm7 = vcmp.eq.s32.totalorder %v2396_v60, 1 }
 0x18a   : > { %v2094_v43 = vadd.f32 %v2058_v0, %v1934_v39  ;;  %v2445_v1 = vsel %vm2429_vm14, %v2317_v51, 0.0  ;;  %v18344_v0 = vor.u32 %v2750_v33, %v2747_v4  ;;  %v3201_v51 = vshrl.u32 %v17072_v34, 16  ;;  %v315_v4 = vld [vmem:[%s17252_s14 + $0xf8] sm:$0xff] }
 0x18b   : > { %2863 = vmatmul.bf16.gmra.mxu2 %v2743_v53  ;;  %3310 = vmatmul.bf16.gmra.mxu0 %v3190_v12  ;;  %v15831_v53 = vld [vmem:[%s21972_s2 + $0x1d8] sm:$0xff] }
 0x18c   : > { %v2282_v44 = vadd.f32 %v2246_v29, %v2094_v43  ;;  %3455 = vmatmul.bf16.gmra.mxu1 %v16722_v46  ;;  %4129 = vmatpush.bf16.msra.mxu0 %v15831_v53  ;;  %v3203_v52 = vrot.slane %v3201_v51, 3 }
 0x18e   : > { %3033 = vmatmul.bf16.gmra.mxu3 %v2933_v6  ;;  %v2302_v13 = vadd.f32 %v18272_v19, %v2282_v44  ;;  %v1901_v61 = vpop.f32.mrf.mxu2  ;;  %v2752_v44 = vsel %vm616_vm1, %v18307_v31, %v18344_v0  ;;  %v2754_v31 = vshrl.u32 %v18017_v50, 16  ;;  %v314_v50 = vld [vmem:[%s17252_s14 + $0xf0] sm:$0xff] }
 0x18f   : > { %v1935_v17 = vadd.f32 %v1901_v61, %v17973_v57  ;;  %v18346_v57 = vor.u32 %v3197_v41, %v3194_v20  ;;  %v15822_v61 = vld [vmem:[%s21972_s2 + $0x190] sm:$0xff]  ;;  %v18381_v41 = vpack.c.bf16 %v315_v4, %v314_v50 }
 0x190   : > { %v2318_v35 = vmax.f32 %v2302_v13, 0.0  ;;  %v2251_v8 = vpop.f32.mrf.mxu0  ;;  %v3204_v13 = vshll.u32 %v17072_v34, 16  ;;  %3972 = vmatpush.bf16.msra.mxu3 %v15822_v61  ;;  %v2756_v20 = vrot.slane %v2754_v31, 2  ;;  %v15830_v34 = vld [vmem:[%s21972_s2 + $0x1d0] sm:$0xff]  ;;  %v2399_v61 = vpop.permute.xlu0 %2398 }
 0x191   : > { %v2061_v29 = vpop.f32.mrf.mxu3  ;;  %v18342_v26 = vpop.f32.mrf.mxu1  ;;  %v3199_v38 = vsel %vm823_vm2, %v18309_v42, %v18346_v57  ;;  %v15839_v42 = vld [vmem:[%s21972_s2 + $0x218] sm:$0xff]  ;;  %16691 = vst [vmem:[#allocation2 + $0x88] sm:$0xff] %v18381_v41   ;;  %4130 = vmatpush.bf16.msra.mxu0 %v15830_v34  ;;  %vm2433_vm8 = vcmp.eq.s32.totalorder %v2399_v61, 1 }
 0x192   : > { %v2095_v7 = vadd.f32 %v2061_v29, %v1935_v17  ;;  %v2446_v9 = vsel %vm2430_vm15, %v2318_v35, 0.0  ;;  %4315 = vmatpush.bf16.msra.mxu1 %v15839_v42  ;;  %v17074_v42 = vld [vmem:[#allocation2 + $0x7c] sm:$0xff]  }
 0x193   : > { %v16384_v39 = vpack.c.bf16 %v2446_v9, %v2445_v1  ;;  %v2938_v9 = vrot.slane %v2754_v31, 3  ;;  %v3213_v50 = vshll.u32 %v17074_v42, 16 }
 0x194   : > { %v2283_v12 = vadd.f32 %v2249_v27, %v2095_v7  ;;  %v2759_v7 = vrot.slane %v2757_v36, 3 }
 0x195   : > { %16713 = vst [vmem:[#allocation3 + $0x18] sm:$0xff] %v16384_v39   ;;  %v3206_v39 = vrot.slane %v3204_v13, 4  ;;  %v16724_v13 = vld [vmem:[#allocation2 + $0x70] sm:$0xff]  }
 0x196   : > { %v1903_v43 = vpop.f32.mrf.mxu2  ;;  %v2303_v27 = vadd.f32 %v18272_v19, %v2283_v12 }
 0x197   : > { %v1936_v56 = vadd.f32 %v1903_v43, %v18012_v55  ;;  %v2937_v55 = vsel %vm823_vm2, %v18314_v15, %v18351_v2  ;;  %v15807_v15 = vld [vmem:[%s21972_s2 + $0x150] sm:$0xff] }
 0x198   : > { %v2254_v46 = vpop.f32.mrf.mxu0  ;;  %v2319_v17 = vmax.f32 %v2303_v27, 0.0  ;;  %3707 = vmatpush.bf16.msra.mxu2 %v15807_v15  ;;  %v17075_v61 = vld [vmem:[#allocation2 + $0x84] sm:$0xff]  }
 0x199   : > { %v2063_v6 = vpop.f32.mrf.mxu3  ;;  %v18361_v49 = vpop.f32.mrf.mxu1 }
 0x19a   : > { %v2096_v22 = vadd.f32 %v2063_v6, %v1936_v56  ;;  %v2447_v53 = vsel %vm2431_vm4, %v2319_v17, 0.0  ;;  %v2939_v6 = vrot.slane %v2757_v36, 4  ;;  %v2763_v17 = vshrl.u32 %v18071_v16, 16 }
 0x19b   : > { %2868 = vmatmul.bf16.gmra.mxu2 %v2752_v44  ;;  %3315 = vmatmul.bf16.gmra.mxu0 %v3199_v38  ;;  %v18388_v44 = vor.u32 %v2759_v7, %v2756_v20  ;;  %v18390_v38 = vor.u32 %v3206_v39, %v3203_v52 }
 0x19c   : > { %v2284_v63 = vadd.f32 %v2251_v8, %v2096_v22  ;;  %3460 = vmatmul.bf16.gmra.mxu1 %v16723_v37  ;;  %v18395_v22 = vor.u32 %v2939_v6, %v2938_v9  ;;  %v2765_v7 = vrot.slane %v2763_v17, 2  ;;  %v2942_v39 = vrot.slane %v2763_v17, 3 }
 0x19d   : > { %v2761_v60 = vsel %vm616_vm1, %v18344_v0, %v18388_v44  ;;  %v3208_v31 = vsel %vm823_vm2, %v18346_v57, %v18390_v38  ;;  %v2402_v0 = vpop.permute.xlu1 %2401  ;;  %v15838_v57 = vld [vmem:[%s21972_s2 + $0x210] sm:$0xff] }
 0x19e   : > { %3038 = vmatmul.bf16.gmra.mxu3 %v2937_v55  ;;  %v2304_v29 = vadd.f32 %v18272_v19, %v2284_v63  ;;  %v1906_v35 = vpop.f32.mrf.mxu2  ;;  %4316 = vmatpush.bf16.msra.mxu1 %v15838_v57  ;;  %vm2434_vm9 = vcmp.eq.s32.totalorder %v2402_v0, 1  ;;  %v16725_v57 = vld [vmem:[#allocation2 + $0x78] sm:$0xff]  }
 0x19f   : > { %v1937_v8 = vadd.f32 %v1906_v35, %v18032_v25  ;;  %v3210_v35 = vshrl.u32 %v17074_v42, 16 }
 0x1a0   : > { %v2320_v23 = vmax.f32 %v2304_v29, 0.0  ;;  %v2256_v1 = vpop.f32.mrf.mxu0  ;;  %v2766_v29 = vshll.u32 %v18071_v16, 16 }
 0x1a1   : > { %v2066_v33 = vpop.f32.mrf.mxu3  ;;  %v18385_v56 = vpop.f32.mrf.mxu1 }
 0x1a2   : > { %v2097_v12 = vadd.f32 %v2066_v33, %v1937_v8  ;;  %v2448_v43 = vsel %vm2432_vm7, %v2320_v23, 0.0  ;;  %v15821_v33 = vld [vmem:[%s21972_s2 + $0x188] sm:$0xff]  ;;  %v2768_v52 = vrot.slane %v2766_v29, 3 }
 0x1a3   : > { %v16389_v25 = vpack.c.bf16 %v2448_v43, %v2447_v53  ;;  %3973 = vmatpush.bf16.msra.mxu3 %v15821_v33  ;;  %v3212_v53 = vrot.slane %v3210_v35, 3  ;;  %v2405_v35 = vpop.permute.xlu2 %2404  ;;  %v15820_v33 = vld [vmem:[%s21972_s2 + $0x180] sm:$0xff] }
 0x1a4   : > { %v2285_v40 = vadd.f32 %v2254_v46, %v2097_v12  ;;  %v3215_v12 = vrot.slane %v3213_v50, 4  ;;  %v2772_v50 = vshrl.u32 %v18127_v30, 16  ;;  %vm2435_vm10 = vcmp.eq.s32.totalorder %v2405_v35, 1 }
 0x1a5   : > { %16714 = vst [vmem:[#allocation3 + $0x20] sm:$0xff] %v16389_v25  }
 0x1a6   : > { %v1908_v27 = vpop.f32.mrf.mxu2  ;;  %v2305_v46 = vadd.f32 %v18272_v19, %v2285_v40  ;;  %v2943_v40 = vrot.slane %v2766_v29, 4 }
 0x1a7   : > { %v1938_v55 = vadd.f32 %v1908_v27, %v18066_v54  ;;  %v2941_v54 = vsel %vm823_vm2, %v18351_v2, %v18395_v22  ;;  %v15806_v2 = vld [vmem:[%s21972_s2 + $0x148] sm:$0xff]  ;;  %3974 = vmatpush.bf16.msra.mxu3 %v15820_v33  ;;  %v2411_v33 = vpop.permute.xlu1 %2410 }
 0x1a8   : > { %v2259_v63 = vpop.f32.mrf.mxu0  ;;  %v2321_v4 = vmax.f32 %v2305_v46, 0.0  ;;  %3708 = vmatpush.bf16.msra.mxu2 %v15806_v2  ;;  %v2775_v2 = vshll.u32 %v18127_v30, 16  ;;  %vm2437_vm12 = vcmp.eq.s32.totalorder %v2411_v33, 1 }
 0x1a9   : > { %v2068_v37 = vpop.f32.mrf.mxu3  ;;  %v18405_v51 = vpop.f32.mrf.mxu1 }
 0x1aa   : > { %v2098_v36 = vadd.f32 %v2068_v37, %v1938_v55  ;;  %v2449_v43 = vsel %vm2433_vm8, %v2321_v4, 0.0  ;;  %v18425_v55 = vor.u32 %v2768_v52, %v2765_v7  ;;  %v15829_v37 = vld [vmem:[%s21972_s2 + $0x1c8] sm:$0xff]  ;;  %v3219_v4 = vshrl.u32 %v17075_v61, 16 }
 0x1ab   : > { %2873 = vmatmul.bf16.gmra.mxu2 %v2761_v60  ;;  %3320 = vmatmul.bf16.gmra.mxu0 %v3208_v31  ;;  %v18432_v31 = vor.u32 %v2943_v40, %v2942_v39  ;;  %v2777_v39 = vrot.slane %v2775_v2, 3 }
 0x1ac   : > { %v2286_v15 = vadd.f32 %v2256_v1, %v2098_v36  ;;  %3465 = vmatmul.bf16.gmra.mxu1 %v16724_v13  ;;  %4131 = vmatpush.bf16.msra.mxu0 %v15829_v37  ;;  %v2770_v13 = vsel %vm616_vm1, %v18388_v44, %v18425_v55  ;;  %v2408_v44 = vpop.permute.xlu0 %2407  ;;  %v2947_v37 = vrot.slane %v2775_v2, 4 }
 0x1ad   : > { %vm2436_vm11 = vcmp.eq.s32.totalorder %v2408_v44, 1 }
 0x1ae   : > { %3043 = vmatmul.bf16.gmra.mxu3 %v2941_v54  ;;  %v2306_v8 = vadd.f32 %v18272_v19, %v2286_v15  ;;  %v1911_v23 = vpop.f32.mrf.mxu2 }
 0x1af   : > { %v1939_v16 = vadd.f32 %v1911_v23, %v18086_v59  ;;  %v18427_v59 = vor.u32 %v3215_v12, %v3212_v53  ;;  %v2946_v53 = vrot.slane %v2772_v50, 3  ;;  %v3221_v12 = vrot.slane %v3219_v4, 3 }
 0x1b0   : > { %v2322_v1 = vmax.f32 %v2306_v8, 0.0  ;;  %v2261_v9 = vpop.f32.mrf.mxu0  ;;  %v3222_v8 = vshll.u32 %v17075_v61, 16 }
 0x1b1   : > { %v2071_v20 = vpop.f32.mrf.mxu3  ;;  %v18423_v34 = vpop.f32.mrf.mxu1  ;;  %v3217_v15 = vsel %vm823_vm2, %v18390_v38, %v18427_v59  ;;  %v15837_v38 = vld [vmem:[%s21972_s2 + $0x208] sm:$0xff] }
 0x1b2   : > { %v2099_v6 = vadd.f32 %v2071_v20, %v1939_v16  ;;  %v2450_v25 = vsel %vm2434_vm9, %v2322_v1, 0.0  ;;  %4317 = vmatpush.bf16.msra.mxu1 %v15837_v38 }
 0x1b3   : > { %v16394_v27 = vpack.c.bf16 %v2450_v25, %v2449_v43  ;;  %v3224_v43 = vrot.slane %v3222_v8, 4  ;;  %v16726_v8 = vld [vmem:[#allocation2 + $0x80] sm:$0xff]  }
 0x1b4   : > { %v2287_v60 = vadd.f32 %v2259_v63, %v2099_v6 }
 0x1b5   : > { %16715 = vst [vmem:[#allocation3 + $0x28] sm:$0xff] %v16394_v27  }
 0x1b6   : > { %v1913_v42 = vpop.f32.mrf.mxu2  ;;  %v2307_v63 = vadd.f32 %v18272_v19, %v2287_v60  ;;  %v2894_v60 = vld [vmem:[#allocation2 + $0x84] sm:$0xf] }
 0x1b7   : > { %v1940_v36 = vadd.f32 %v1913_v42, %v18122_v10  ;;  %v2945_v10 = vsel %vm823_vm2, %v18395_v22, %v18432_v31  ;;  %v15805_v22 = vld [vmem:[%s21972_s2 + $0x140] sm:$0xff] }
 0x1b8   : > { %v2264_v54 = vpop.f32.mrf.mxu0  ;;  %v2323_v23 = vmax.f32 %v2307_v63, 0.0  ;;  %3709 = vmatpush.bf16.msra.mxu2 %v15805_v22 }
 0x1b9   : > { %v2073_v46 = vpop.f32.mrf.mxu3  ;;  %v18442_v17 = vpop.f32.mrf.mxu1 }
 0x1ba   : > { %v2100_v0 = vadd.f32 %v2073_v46, %v1940_v36  ;;  %v2451_v6 = vsel %vm2435_vm10, %v2323_v23, 0.0  ;;  %v2912_v46 = vunpack.c.l.b16 %v2894_v60  ;;  %v2781_v23 = vshrl.u32 %v18176_v28, 16 }
 0x1bb   : > { %2878 = vmatmul.bf16.gmra.mxu2 %v2770_v13  ;;  %3325 = vmatmul.bf16.gmra.mxu0 %v3217_v15  ;;  %v16447_v13 = vunpack.c.h.b16 %v18381_v41  ;;  %v15828_v15 = vld [vmem:[%s21972_s2 + $0x1c0] sm:$0xff] }
 0x1bc   : > { %v2288_v29 = vadd.f32 %v2261_v9, %v2100_v0  ;;  %3470 = vmatmul.bf16.gmra.mxu1 %v16725_v57  ;;  %v2774_v9 = vrot.slane %v2772_v50, 2  ;;  %v18470_v0 = vor.u32 %v2947_v37, %v2946_v53  ;;  %4132 = vmatpush.bf16.msra.mxu0 %v15828_v15  ;;  %v2913_v50 = vpack.c.b16 %v2912_v46, %v2912_v46 }
 0x1bd   : > { %v3155_v38 = vpack.c.b16 %v16447_v13, %v16447_v13 }
 0x1be   : > { %3048 = vmatmul.bf16.gmra.mxu3 %v2945_v10  ;;  %v2308_v16 = vadd.f32 %v18272_v19, %v2288_v29  ;;  %v1916_v20 = vpop.f32.mrf.mxu2  ;;  %v18462_v36 = vor.u32 %v2777_v39, %v2774_v9  ;;  %v2954_v39 = vshll.u32 %v2913_v50, 16 }
 0x1bf   : > { %v1941_v30 = vadd.f32 %v1916_v20, %v18164_v24  ;;  %v18464_v24 = vor.u32 %v3224_v43, %v3221_v12  ;;  %v2951_v20 = vshrl.u32 %v2913_v50, 16 }
 0x1c0   : > { %v2324_v7 = vmax.f32 %v2308_v16, 0.0  ;;  %v2266_v52 = vpop.f32.mrf.mxu0  ;;  %v2779_v35 = vsel %vm616_vm1, %v18425_v55, %v18462_v36  ;;  %v2414_v55 = vpop.permute.xlu2 %2413  ;;  %v2784_v16 = vshll.u32 %v18176_v28, 16 }
 0x1c1   : > { %v2076_v1 = vpop.f32.mrf.mxu3  ;;  %v18460_v27 = vpop.f32.mrf.mxu1  ;;  %v3226_v44 = vsel %vm823_vm2, %v18427_v59, %v18464_v24  ;;  %v15836_v59 = vld [vmem:[%s21972_s2 + $0x200] sm:$0xff]  ;;  %vm2438_vm13 = vcmp.eq.s32.totalorder %v2414_v55, 1  ;;  %v2953_v37 = vrot.slane %v2951_v20, 3 }
 0x1c2   : > { %v2101_v25 = vadd.f32 %v2076_v1, %v1941_v30  ;;  %v2452_v40 = vsel %vm2436_vm11, %v2324_v7, 0.0  ;;  %v3228_v30 = vshrl.u32 %v3155_v38, 16  ;;  %v3231_v1 = vshll.u32 %v3155_v38, 16  ;;  %v15858_v7 = vld [vmem:[%s21972_s2 + $0x38] sm:$0xff]  ;;  %4318 = vmatpush.bf16.msra.mxu1 %v15836_v59  ;;  %v18508_v59 = vld [vmem:[#allocation2 + $0x60] sm:$0xff] }
 0x1c3   : > { %v16399_v42 = vpack.c.bf16 %v2452_v40, %v2451_v6  ;;  %4926 = vmatpush.bf16.msrb.mxu3 %v15858_v7  ;;  %v2783_v6 = vrot.slane %v2781_v23, 2  ;;  %v2786_v40 = vrot.slane %v2784_v16, 3  ;;  %v16729_v38 = vld [vmem:[#allocation2 + $0x58] sm:$0xf0] }
 0x1c4   : > { %v2289_v61 = vadd.f32 %v2264_v54, %v2101_v25  ;;  %v3230_v60 = vrot.slane %v3228_v30, 3  ;;  %v18517_v7 = vld [vmem:[#allocation2 + $0x58] sm:$0xff] }
 0x1c5   : > { %16716 = vst [vmem:[#allocation3 + $0x30] sm:$0xff] %v16399_v42   ;;  %v3233_v42 = vrot.slane %v3231_v1, 4 }
 0x1c6   : > { %v1918_v63 = vpop.f32.mrf.mxu2  ;;  %v2309_v54 = vadd.f32 %v18272_v19, %v2289_v61 }
 0x1c7   : > { %v1942_v10 = vadd.f32 %v1918_v63, %v18173_v18  ;;  %v2949_v18 = vsel %vm823_vm2, %v18432_v31, %v18470_v0  ;;  %v15866_v31 = vld [vmem:[%s21972_s2 + $0x78] sm:$0xff]  ;;  %v2956_v63 = vrot.slane %v2954_v39, 4  ;;  %v3851_v39 = vshll.u32 %v18508_v59, 16 }
 0x1c8   : > { %v2269_v29 = vpop.f32.mrf.mxu0  ;;  %v2325_v9 = vmax.f32 %v2309_v54, 0.0  ;;  %4738 = vmatpush.bf16.msrb.mxu2 %v15866_v31  ;;  %v2417_v31 = vpop.permute.xlu0 %2416 }
 0x1c9   : > { %v2078_v57 = vpop.f32.mrf.mxu3  ;;  %v18480_v4 = vpop.f32.mrf.mxu1  ;;  %v2957_v50 = vor.u32 %v2956_v63, %v2953_v37  ;;  %vm2439_vm14 = vcmp.eq.s32.totalorder %v2417_v31, 1  ;;  %v3844_v37 = vshrl.u32 %v18289_v48, 16 }
 0x1ca   : > { %v2102_v2 = vadd.f32 %v2078_v57, %v1942_v10  ;;  %v2453_v46 = vsel %vm2437_vm12, %v2325_v9, 0.0  ;;  %v2787_v57 = vor.u32 %v2786_v40, %v2783_v6  ;;  %v15882_v9 = vld [vmem:[%s21972_s2 + $0xf8] sm:$0xff] }
 0x1cb   : > { %2883 = vmatmul.bf16.gmra.mxu2 %v2779_v35  ;;  %3330 = vmatmul.bf16.gmra.mxu0 %v3226_v44  ;;  %v3234_v35 = vor.u32 %v3233_v42, %v3230_v60 }
 0x1cc   : > { %v2290_v22 = vadd.f32 %v2266_v52, %v2102_v2  ;;  %3475 = vmatmul.bf16.gmra.mxu1 %v16726_v8  ;;  %v16730_v2 = vld [vmem:[#allocation2 + $0x58] sm:$0xe]  ;;  %v2788_v55 = vsel %vm616_vm1, %v18462_v36, %v2787_v57  ;;  %v2420_v36 = vpop.permute.xlu1 %2419 }
 0x1cd   : > { %v3235_v23 = vsel %vm823_vm2, %v18464_v24, %v3234_v35  ;;  %v18510_v16 = vor.u32 %v16730_v2, %v16729_v38  ;;  %5373 = vmatpush.bf16.msrb.mxu1 %v15882_v9  ;;  %vm2440_vm15 = vcmp.eq.s32.totalorder %v2420_v36, 1 }
 0x1ce   : > { %3053 = vmatmul.bf16.gmra.mxu3 %v2949_v18  ;;  %v2310_v52 = vadd.f32 %v18272_v19, %v2290_v22  ;;  %v1921_v53 = vpop.f32.mrf.mxu2  ;;  %v15797_v22 = vld [vmem:[#allocation2 + $0x50] sm:$0xff] }
 0x1cf   : > { %v1943_v28 = vadd.f32 %v1921_v53, %v18190_v21  ;;  %v15874_v21 = vld [vmem:[%s21972_s2 + $0xb8] sm:$0xff]  ;;  %v3581_v24 = vshll.u32 %v15797_v22, 16  ;;  %v4211_v53 = vshrl.u32 %v18510_v16, 16  ;;  %v3579_v40 = vshrl.u32 %v15797_v22, 16 }
 0x1d0   : > { %v2326_v43 = vmax.f32 %v2310_v52, 0.0  ;;  %v2271_v25 = vpop.f32.mrf.mxu0  ;;  %5096 = vmatpush.bf16.msrb.mxu0 %v15874_v21  ;;  %v3846_v52 = vshll.u32 %v18289_v48, 16  ;;  %v4219_v21 = vrot.slane %v3851_v39, 2 }
 0x1d1   : > { %v2081_v12 = vpop.f32.mrf.mxu3  ;;  %v18498_v61 = vpop.f32.mrf.mxu1  ;;  %v4213_v57 = vrot.slane %v4211_v53, 1 }
 0x1d2   : > { %v2103_v13 = vadd.f32 %v2081_v12, %v1943_v28  ;;  %v2454_v15 = vsel %vm2438_vm13, %v2326_v43, 0.0  ;;  %v15865_v28 = vld [vmem:[%s21972_s2 + $0x70] sm:$0xff] }
 0x1d3   : > { %v16404_v10 = vpack.c.bf16 %v2454_v15, %v2453_v46  ;;  %v15857_v12 = vld [vmem:[%s21972_s2 + $0x30] sm:$0xff]  ;;  %4739 = vmatpush.bf16.msrb.mxu2 %v15865_v28  ;;  %v3586_v15 = vshll.u32 %v18517_v7, 16 }
 0x1d4   : > { %v2291_v44 = vadd.f32 %v2269_v29, %v2103_v13  ;;  %4927 = vmatpush.bf16.msrb.mxu3 %v15857_v12  ;;  %v3583_v13 = vrot.slane %v3581_v24, 1 }
 0x1d5   : > { %16717 = vst [vmem:[#allocation3 + $0x38] sm:$0xff] %v16404_v10   ;;  %v3848_v10 = vrot.slane %v3846_v52, 1  ;;  %v3588_v22 = vrot.slane %v3586_v15, 1 }
 0x1d6   : > { %v1923_v54 = vpop.f32.mrf.mxu2  ;;  %v2311_v20 = vadd.f32 %v18272_v19, %v2291_v44 }
 0x1d7   : > { %v1944_v18 = vadd.f32 %v1923_v54, %v18219_v11  ;;  %v2958_v11 = vsel %vm823_vm2, %v18470_v0, %v2957_v50  ;;  %v3855_v0 = vshrl.u32 %v18508_v59, 16  ;;  %v18544_v54 = vrot.slane %v3851_v39, 1 }
 0x1d8   : > { %v2274_v33 = vpop.f32.mrf.mxu0  ;;  %v2327_v43 = vmax.f32 %v2311_v20, 0.0  ;;  %v3849_v20 = vor.u32 %v3848_v10, %v3844_v37  ;;  %v18571_v37 = vld [vmem:[#allocation2 + $0x60] sm:$0xff] }
 0x1d9   : > { %v2083_v8 = vpop.f32.mrf.mxu3  ;;  %v18513_v30 = vpop.f32.mrf.mxu1  ;;  %v4218_v35 = vrot.slane %v3855_v0, 1 }
 0x1da   : > { %v2104_v29 = vadd.f32 %v2083_v8, %v1944_v18  ;;  %v2455_v44 = vsel %vm2439_vm14, %v2327_v43, 0.0  ;;  %v15873_v18 = vld [vmem:[%s21972_s2 + $0xb0] sm:$0xff]  ;;  %v3584_v8 = vor.u32 %v3583_v13, %v3579_v40  ;;  %v3854_v12 = vsel %vm1491_vm3, %v3849_v20, %v18544_v54  ;;  %v4412_v43 = vld [vmem:[%s21971_s1 + $0x80] sm:$0xff]  ;;  %v15856_v13 = vld [vmem:[%s21972_s2 + $0x28] sm:$0xff] }
 0x1db   : > { %2888 = vmatmul.bf16.gmra.mxu2 %v2788_v55  ;;  %3335 = vmatmul.bf16.gmra.mxu0 %v3235_v23  ;;  %v4052_v55 = vrot.slane %v18510_v16, 1  ;;  %v4053_v23 = vrot.slane %v18508_v59, 1  ;;  %vm4428_vm4 = vcmp.gt.f32.partialorder %v4412_v43, 0.5  ;;  %v15881_v40 = vld [vmem:[%s21972_s2 + $0xf0] sm:$0xff]  ;;  %v15880_v59 = vld [vmem:[%s21972_s2 + $0xe8] sm:$0xff] }
 0x1dc   : > { %v2292_v1 = vadd.f32 %v2271_v25, %v2104_v29  ;;  %3480 = vmatmul.bf16.gmra.mxu1 %v18381_v41  ;;  %v4214_v41 = vshll.u32 %v18510_v16, 16  ;;  %5097 = vmatpush.bf16.msrb.mxu0 %v15873_v18  ;;  %v3589_v52 = vsel %vm1491_vm3, %v3584_v8, %v3588_v22  ;;  %v18558_v16 = vld [vmem:[#allocation2 + $0x68] sm:$0xff] }
 0x1dd   : > { %v4054_v39 = vsel %vm1968_vm6, %v4052_v55, %v4053_v23  ;;  %v3859_v10 = vshll.u32 %v18558_v16, 16  ;;  %5374 = vmatpush.bf16.msrb.mxu1 %v15881_v40  ;;  %4928 = vmatpush.bf16.msrb.mxu3 %v15856_v13  ;;  %v15863_v40 = vld [vmem:[%s21972_s2 + $0x60] sm:$0xff] }
 0x1de   : > { %3058 = vmatmul.bf16.gmra.mxu3 %v2958_v11  ;;  %v2312_v6 = vadd.f32 %v18272_v19, %v2292_v1  ;;  %v1926_v25 = vpop.f32.mrf.mxu2  ;;  %v18551_v1 = vor.u32 %v4219_v21, %v4218_v35 }
 0x1df   : > { %v1945_v60 = vadd.f32 %v1926_v25, %v18231_v45  ;;  %v4216_v45 = vrot.slane %v4214_v41, 2  ;;  %v2423_v41 = vpop.permute.xlu2 %2422  ;;  %v2426_v25 = vpop.permute.xlu0 %2425 }
 0x1e0   : > { %v2328_v46 = vmax.f32 %v2312_v6, 0.0  ;;  %v2276_v63 = vpop.f32.mrf.mxu0  ;;  %vm2441_vm7 = vcmp.eq.s32.totalorder %v2423_v41, 1  ;;  %vm2442_vm8 = vcmp.eq.s32.totalorder %v2426_v25, 1  ;;  %v18610_v41 = vld [vmem:[#allocation2 + $0x70] sm:$0xff] }
 0x1e1   : > { %v2086_v42 = vpop.f32.mrf.mxu3  ;;  %v18542_v38 = vpop.f32.mrf.mxu1  ;;  %v4217_v11 = vor.u32 %v4216_v45, %v4213_v57  ;;  %v3594_v45 = vshll.u32 %v18571_v37, 16  ;;  %v3871_v13 = vshrl.u32 %v18610_v41, 16  ;;  %5375 = vmatpush.bf16.msrb.mxu1 %v15880_v59 }
 0x1e2   : > { %v2105_v50 = vadd.f32 %v2086_v42, %v1945_v60  ;;  %v2456_v48 = vsel %vm2440_vm15, %v2328_v46, 0.0  ;;  %v3863_v60 = vshrl.u32 %v18558_v16, 16  ;;  %v4444_v42 = vsel %vm4428_vm4, 1, %v17182_v32  ;;  %v15864_v46 = vld [vmem:[%s21972_s2 + $0x68] sm:$0xff] }
 0x1e3   : > { %v16409_v2 = vpack.c.bf16 %v2456_v48, %v2455_v44  ;;  %4461 = vperm.xlu1 %17147, %v4444_v42   ;;  %4740 = vmatpush.bf16.msrb.mxu2 %v15864_v46  ;;  %v3590_v48 = vshrl.u32 %v18517_v7, 16  ;;  %v4055_v7 = vrot.slane %v18558_v16, 1  ;;  %v15855_v42 = vld [vmem:[%s21972_s2 + $0x20] sm:$0xff]  ;;  %v3867_v46 = vshll.u32 %v18610_v41, 16 }
 0x1e4   : > { %v2293_v29 = vadd.f32 %v2274_v33, %v2105_v50  ;;  %4929 = vmatpush.bf16.msrb.mxu3 %v15855_v42  ;;  %v15879_v16 = vld [vmem:[%s21972_s2 + $0xe0] sm:$0xff] }
 0x1e5   : > { %16718 = vst [vmem:[#allocation3 + $0x40] sm:$0xff] %v16409_v2   ;;  %v4056_v43 = vsel %vm1968_vm6, %v4053_v23, %v4055_v7  ;;  %v18618_v23 = vld [vmem:[#allocation2 + $0x68] sm:$0xff]  ;;  %5376 = vmatpush.bf16.msrb.mxu1 %v15879_v16 }
 0x1e6   : > { %v1928_v31 = vpop.f32.mrf.mxu2  ;;  %v2313_v33 = vadd.f32 %v18272_v19, %v2293_v29  ;;  %v4223_v29 = vrot.slane %v3859_v10, 2 }
 0x1e7   : > { %v1946_v36 = vadd.f32 %v1928_v31, %v18257_v5  ;;  %v4221_v5 = vsel %vm2128_vm5, %v4217_v11, %v18551_v1  ;;  %v3592_v31 = vor.u32 %v3590_v48, %v3588_v22  ;;  %4741 = vmatpush.bf16.msrb.mxu2 %v15863_v40 }
 0x1e8   : > { %v3301_v9 = vpop.f32.mrf.mxu0  ;;  %v2329_v15 = vmax.f32 %v2313_v33, 0.0 }
 0x1e9   : > { %v2088_v24 = vpop.f32.mrf.mxu3  ;;  %v3446_v28 = vpop.f32.mrf.mxu1 }
 0x1ea   : > { %v2106_v53 = vadd.f32 %v2088_v24, %v1946_v36  ;;  %v2457_v2 = vsel %vm2441_vm7, %v2329_v15, 0.0  ;;  %v3596_v36 = vrot.slane %v3594_v45, 1  ;;  %v3857_v24 = vor.u32 %v3855_v0, %v18544_v54 }
 0x1eb   : > { %3710 = vmatmul.bf16.vlgmr.msra.gmra.mxu2 %v3589_v52  ;;  %4133 = vmatmul.bf16.vlgmr.msra.gmra.mxu0 %v4054_v39  ;;  %v3861_v52 = vrot.slane %v3859_v10, 1  ;;  %v4226_v45 = vrot.slane %v3871_v13, 1 }
 0x1ec   : > { %v2294_v6 = vadd.f32 %v2276_v63, %v2106_v53  ;;  %4319 = vmatmul.bf16.vlgmr.msra.gmra.mxu1 %v4221_v5  ;;  %v3597_v22 = vsel %vm1491_vm3, %v3592_v31, %v3596_v36 }
 0x1ee   : > { %3975 = vmatmul.bf16.vlgmr.msra.gmra.mxu3 %v3854_v12  ;;  %v2314_v63 = vadd.f32 %v18272_v19, %v2294_v6  ;;  %v2854_v57 = vpop.f32.mrf.mxu2  ;;  %v4222_v19 = vrot.slane %v3863_v60, 1  ;;  %v3862_v6 = vsel %vm1491_vm3, %v3857_v24, %v3861_v52 }
 0x1ef   : > { %v2855_v35 = vadd.f32 %v2854_v57, %v18238_v47  ;;  %v15872_v47 = vld [vmem:[%s21972_s2 + $0xa8] sm:$0xff] }
 0x1f0   : > { %v2330_v44 = vmax.f32 %v2314_v63, 0.0  ;;  %v3303_v50 = vpop.f32.mrf.mxu0  ;;  %v18595_v39 = vor.u32 %v4223_v29, %v4222_v19  ;;  %5098 = vmatpush.bf16.msrb.mxu0 %v15872_v47  ;;  %v4227_v19 = vrot.slane %v3867_v46, 2 }
 0x1f1   : > { %v3024_v21 = vpop.f32.mrf.mxu3  ;;  %v3448_v55 = vpop.f32.mrf.mxu1 }
 0x1f2   : > { %v3064_v18 = vadd.f32 %v3024_v21, %v2855_v35  ;;  %v2458_v8 = vsel %vm2442_vm8, %v2330_v44, 0.0  ;;  %v3598_v21 = vshrl.u32 %v18571_v37, 16  ;;  %v3602_v44 = vshll.u32 %v18618_v23, 16 }
 0x1f3   : > { %v16414_v20 = vpack.c.bf16 %v2458_v8, %v2457_v2  ;;  %v4415_v2 = vld [vmem:[%s21971_s1 + $0x98] sm:$0xff]  ;;  %v18646_v47 = vor.u32 %v4227_v19, %v4226_v45 }
 0x1f4   : > { %v3341_v11 = vadd.f32 %v3301_v9, %v3064_v18  ;;  %vm4431_vm10 = vcmp.gt.f32.partialorder %v4415_v2, 0.5  ;;  %v3600_v8 = vor.u32 %v3598_v21, %v3596_v36  ;;  %v3604_v37 = vrot.slane %v3602_v44, 1 }
 0x1f5   : > { %16719 = vst [vmem:[#allocation3 + $0x48] sm:$0xff] %v16414_v20   ;;  %v4447_v29 = vsel %vm4431_vm10, 1, %v17182_v32  ;;  %v3865_v20 = vor.u32 %v3863_v60, %v3861_v52 }
 0x1f6   : > { %v18597_v53 = vadd.f32 %v3446_v28, %v3341_v11  ;;  %v2856_v9 = vpop.f32.mrf.mxu2  ;;  %v4225_v28 = vsel %vm2128_vm5, %v18551_v1, %v18595_v39  ;;  %v3869_v11 = vrot.slane %v3867_v46, 1  ;;  %4470 = vperm.xlu1 %17147, %v4447_v29  }
 0x1f7   : > { %v2857_v33 = vadd.f32 %v2856_v9, %v18260_v14  ;;  %v4414_v14 = vld [vmem:[%s21971_s1 + $0x90] sm:$0xff] }
 0x1f8   : > { %v3306_v5 = vpop.f32.mrf.mxu0  ;;  %vm4430_vm9 = vcmp.gt.f32.partialorder %v4414_v14, 0.5 }
 0x1f9   : > { %v3026_v12 = vpop.f32.mrf.mxu3  ;;  %v3451_v54 = vpop.f32.mrf.mxu1  ;;  %v4446_v1 = vsel %vm4430_vm9, 1, %v17182_v32 }
 0x1fa   : > { %v3065_v0 = vadd.f32 %v3026_v12, %v2857_v33  ;;  %4467 = vperm.xlu0 %17146, %v4446_v1   ;;  %v3605_v12 = vsel %vm1491_vm3, %v3600_v8, %v3604_v37 }
 0x1fb   : > { %3715 = vmatmul.bf16.gmra.mxu2 %v3597_v22  ;;  %4138 = vmatmul.bf16.gmra.mxu0 %v4056_v43  ;;  %v3870_v22 = vsel %vm1491_vm3, %v3865_v20, %v3869_v11  ;;  %v4229_v43 = vsel %vm2128_vm5, %v18595_v39, %v18646_v47 }
 0x1fc   : > { %v3342_v25 = vadd.f32 %v3303_v50, %v3065_v0  ;;  %4324 = vmatmul.bf16.gmra.mxu1 %v4225_v28  ;;  %v18661_v0 = vld [vmem:[#allocation2 + $0x78] sm:$0xff] }
 0x1fd   : > { %v15854_v28 = vld [vmem:[%s21972_s2 + $0x18] sm:$0xff]  ;;  %v3875_v14 = vshll.u32 %v18661_v0, 16  ;;  %v4059_v19 = vrot.slane %v18661_v0, 1 }
 0x1fe   : > { %3980 = vmatmul.bf16.gmra.mxu3 %v3862_v6  ;;  %v18629_v15 = vadd.f32 %v3448_v55, %v3342_v25  ;;  %v2859_v63 = vpop.f32.mrf.mxu2  ;;  %v4057_v55 = vrot.slane %v18610_v41, 1  ;;  %v15862_v6 = vld [vmem:[%s21972_s2 + $0x58] sm:$0xff]  ;;  %v3879_v25 = vshrl.u32 %v18661_v0, 16  ;;  %v15877_v0 = vld [vmem:[%s21972_s2 + $0xd0] sm:$0xff] }
 0x1ff   : > { %v2860_v10 = vadd.f32 %v2859_v63, %v18284_v62  ;;  %v15871_v62 = vld [vmem:[%s21972_s2 + $0xa0] sm:$0xff]  ;;  %4742 = vmatpush.bf16.msrb.mxu2 %v15862_v6  ;;  %4930 = vmatpush.bf16.msrb.mxu3 %v15854_v28  ;;  %v3606_v63 = vshrl.u32 %v18618_v23, 16  ;;  %v4231_v44 = vrot.slane %v3875_v14, 2  ;;  %v15878_v41 = vld [vmem:[%s21972_s2 + $0xd8] sm:$0xff]  ;;  %v349_v28 = vld [vmem:[%s17252_s14 + $0x108] sm:$0xff] }
 0x200   : > { %v3308_v35 = vpop.f32.mrf.mxu0  ;;  %5099 = vmatpush.bf16.msrb.mxu0 %v15871_v62  ;;  %v4058_v60 = vsel %vm1968_vm6, %v4055_v7, %v4057_v55  ;;  %v18669_v7 = vld [vmem:[#allocation2 + $0x70] sm:$0xff]  ;;  %v4230_v21 = vrot.slane %v3879_v25, 1  ;;  %v3877_v62 = vrot.slane %v3875_v14, 1  ;;  %5377 = vmatpush.bf16.msrb.mxu1 %v15878_v41  ;;  %v348_v6 = vld [vmem:[%s17252_s14 + $0x100] sm:$0xff] }
 0x201   : > { %v3029_v57 = vpop.f32.mrf.mxu3  ;;  %v3453_v48 = vpop.f32.mrf.mxu1  ;;  %v3608_v45 = vor.u32 %v3606_v63, %v3604_v37  ;;  %v18775_v41 = vld [vmem:[#allocation2 + $0x80] sm:$0xff] }
 0x202   : > { %v3066_v50 = vadd.f32 %v3029_v57, %v2860_v10  ;;  %v3610_v10 = vshll.u32 %v18669_v7, 16  ;;  %v18697_v8 = vor.u32 %v4231_v44, %v4230_v21  ;;  %v4416_v44 = vld [vmem:[%s21971_s1 + $0xa0] sm:$0xff] }
 0x203   : > { %vm4432_vm14 = vcmp.gt.f32.partialorder %v4416_v44, 0.5 }
 0x204   : > { %v3343_v18 = vadd.f32 %v3306_v5, %v3066_v50  ;;  %v4417_v50 = vld [vmem:[%s21971_s1 + $0xa8] sm:$0xff]  ;;  %v3612_v23 = vrot.slane %v3610_v10, 1  ;;  %5378 = vmatpush.bf16.msrb.mxu1 %v15877_v0  ;;  %v15851_v0 = vld [vmem:[%s21972_s2] sm:$0xff] }
 0x205   : > { %vm4433_vm12 = vcmp.gt.f32.partialorder %v4417_v50, 0.5 }
 0x206   : > { %v18648_v31 = vadd.f32 %v3451_v54, %v3343_v18  ;;  %v2861_v24 = vpop.f32.mrf.mxu2  ;;  %v4449_v2 = vsel %vm4433_vm12, 1, %v17182_v32  ;;  %v3873_v18 = vor.u32 %v3871_v13, %v3869_v11  ;;  %v4060_v13 = vsel %vm1968_vm6, %v4057_v55, %v4059_v19  ;;  %v18720_v55 = vld [vmem:[#allocation2 + $0x78] sm:$0xff] }
 0x207   : > { %v2862_v9 = vadd.f32 %v2861_v24, %v18305_v58  ;;  %v4413_v58 = vld [vmem:[%s21971_s1 + $0x88] sm:$0xff]  ;;  %4476 = vperm.xlu0 %17146, %v4449_v2   ;;  %v3618_v63 = vshll.u32 %v18720_v55, 16  ;;  %v3881_v2 = vor.u32 %v3879_v25, %v3877_v62 }
 0x208   : > { %v3311_v36 = vpop.f32.mrf.mxu0  ;;  %vm4429_vm11 = vcmp.gt.f32.partialorder %v4413_v58, 0.5 }
 0x209   : > { %v3031_v33 = vpop.f32.mrf.mxu3  ;;  %v3456_v5 = vpop.f32.mrf.mxu1  ;;  %v4445_v39 = vsel %vm4429_vm11, 1, %v17182_v32 }
 0x20a   : > { %v3067_v52 = vadd.f32 %v3031_v33, %v2862_v9  ;;  %4464 = vperm.xlu2 %17148, %v4445_v39   ;;  %v3613_v33 = vsel %vm1491_vm3, %v3608_v45, %v3612_v23  ;;  %v4448_v45 = vsel %vm4432_vm14, 1, %v17182_v32 }
 0x20b   : > { %3720 = vmatmul.bf16.gmra.mxu2 %v3605_v12  ;;  %4143 = vmatmul.bf16.gmra.mxu0 %v4058_v60  ;;  %v3878_v12 = vsel %vm1491_vm3, %v3873_v18, %v3877_v62  ;;  %v4233_v60 = vsel %vm2128_vm5, %v18646_v47, %v18697_v8 }
 0x20c   : > { %v3344_v54 = vadd.f32 %v3308_v35, %v3067_v52  ;;  %4329 = vmatmul.bf16.gmra.mxu1 %v4229_v43  ;;  %v18712_v52 = vld [vmem:[#allocation2 + $0x80] sm:$0xff]  ;;  %v15853_v43 = vld [vmem:[%s21972_s2 + $0x10] sm:$0xff] }
 0x20d   : > { %v3883_v58 = vshll.u32 %v18712_v52, 16  ;;  %4931 = vmatpush.bf16.msrb.mxu3 %v15853_v43 }
 0x20e   : > { %3985 = vmatmul.bf16.gmra.mxu3 %v3870_v22  ;;  %v18680_v59 = vadd.f32 %v3453_v48, %v3344_v54  ;;  %v2864_v1 = vpop.f32.mrf.mxu2  ;;  %v15861_v22 = vld [vmem:[%s21972_s2 + $0x50] sm:$0xff]  ;;  %v3887_v54 = vshrl.u32 %v18712_v52, 16 }
 0x20f   : > { %v2865_v40 = vadd.f32 %v2864_v1, %v18324_v3  ;;  %v15870_v3 = vld [vmem:[%s21972_s2 + $0x98] sm:$0xff]  ;;  %4743 = vmatpush.bf16.msrb.mxu2 %v15861_v22  ;;  %v4235_v21 = vrot.slane %v3883_v58, 2  ;;  %v3885_v18 = vrot.slane %v3883_v58, 1  ;;  %v15852_v22 = vld [vmem:[%s21972_s2 + $0x8] sm:$0xff] }
 0x210   : > { %v3313_v46 = vpop.f32.mrf.mxu0  ;;  %5100 = vmatpush.bf16.msrb.mxu0 %v15870_v3  ;;  %v4061_v3 = vrot.slane %v18712_v52, 1  ;;  %v15876_v52 = vld [vmem:[%s21972_s2 + $0xc8] sm:$0xff] }
 0x211   : > { %v3034_v42 = vpop.f32.mrf.mxu3  ;;  %v3458_v35 = vpop.f32.mrf.mxu1  ;;  %4932 = vmatpush.bf16.msrb.mxu3 %v15852_v22  ;;  %5379 = vmatpush.bf16.msrb.mxu1 %v15876_v52  ;;  %v4424_v52 = vld [vmem:[%s21971_s1 + $0xe0] sm:$0xff] }
 0x212   : > { %v3068_v57 = vadd.f32 %v3034_v42, %v2865_v40  ;;  %v16303_v40 = vpack.c.bf16 %v349_v28, %v348_v6  ;;  %4473 = vperm.xlu2 %17148, %v4448_v45   ;;  %v4062_v25 = vsel %vm1968_vm6, %v4059_v19, %v4061_v3  ;;  %v350_v19 = vld [vmem:[%s17252_s14 + $0x110] sm:$0xff]  ;;  %v3889_v45 = vor.u32 %v3887_v54, %v3885_v18 }
 0x213   : > { %vm4440_vm9 = vcmp.gt.f32.partialorder %v4424_v52, 0.5  ;;  %v16876_v52 = vld [vmem:[#allocation2 + $0x8c] sm:$0x8] }
 0x214   : > { %v3345_v48 = vadd.f32 %v3311_v36, %v3068_v57  ;;  %16692 = vst [vmem:[#allocation2 + $0x90] sm:$0xff] %v16303_v40  }
 0x215   : > { %4933 = vmatpush.bf16.msrb.mxu3 %v15851_v0  ;;  %v15906_v0 = vld [vmem:[%s21972_s2 + $0x178] sm:$0xff] }
 0x216   : > { %v18699_v29 = vadd.f32 %v3456_v5, %v3345_v48  ;;  %v2866_v20 = vpop.f32.mrf.mxu2  ;;  %v3620_v48 = vrot.slane %v3618_v63, 1 }
 0x217   : > { %v2867_v24 = vadd.f32 %v2866_v20, %v18342_v26  ;;  %v4418_v26 = vld [vmem:[%s21971_s1 + $0xb0] sm:$0xff] }
 0x218   : > { %v3316_v37 = vpop.f32.mrf.mxu0  ;;  %vm4434_vm13 = vcmp.gt.f32.partialorder %v4418_v26, 0.5 }
 0x219   : > { %v3036_v9 = vpop.f32.mrf.mxu3  ;;  %v3461_v36 = vpop.f32.mrf.mxu1  ;;  %v4450_v47 = vsel %vm4434_vm13, 1, %v17182_v32  ;;  %5783 = vmatpush.bf16.msra.mxu3 %v15906_v0 }
 0x21a   : > { %v3069_v11 = vadd.f32 %v3036_v9, %v2867_v24  ;;  %4479 = vperm.xlu1 %17147, %v4450_v47   ;;  %v15860_v47 = vld [vmem:[%s21972_s2 + $0x48] sm:$0xff] }
 0x21b   : > { %3725 = vmatmul.bf16.gmra.mxu2 %v3613_v33  ;;  %4148 = vmatmul.bf16.gmra.mxu0 %v4060_v13 }
 0x21c   : > { %v3346_v5 = vadd.f32 %v3313_v46, %v3069_v11  ;;  %4334 = vmatmul.bf16.gmra.mxu1 %v4233_v60  ;;  %v3614_v46 = vshrl.u32 %v18669_v7, 16  ;;  %v4420_v60 = vld [vmem:[%s21971_s1 + $0xc0] sm:$0xff]  ;;  %4744 = vmatpush.bf16.msrb.mxu2 %v15860_v47 }
 0x21d   : > { %vm4436_vm15 = vcmp.gt.f32.partialorder %v4420_v60, 0.5 }
 0x21e   : > { %3990 = vmatmul.bf16.gmra.mxu3 %v3878_v12  ;;  %v18731_v16 = vadd.f32 %v3458_v35, %v3346_v5  ;;  %v2869_v39 = vpop.f32.mrf.mxu2  ;;  %v4234_v35 = vrot.slane %v3887_v54, 1  ;;  %v3616_v7 = vor.u32 %v3614_v46, %v3612_v23  ;;  %v18765_v12 = vld [vmem:[#allocation2 + $0x88] sm:$0xff]  ;;  %v351_v5 = vld [vmem:[%s17252_s14 + $0x118] sm:$0xff]  ;;  %v3626_v46 = vshll.u32 %v18775_v41, 16 }
 0x21f   : > { %v2870_v14 = vadd.f32 %v2869_v39, %v18361_v49  ;;  %v15869_v49 = vld [vmem:[%s21972_s2 + $0x90] sm:$0xff]  ;;  %v3891_v43 = vshll.u32 %v18765_v12, 16  ;;  %v3895_v58 = vshrl.u32 %v18765_v12, 16  ;;  %v16308_v39 = vpack.c.bf16 %v351_v5, %v350_v19 }
 0x220   : > { %v3318_v42 = vpop.f32.mrf.mxu0  ;;  %v18750_v20 = vor.u32 %v4235_v21, %v4234_v35  ;;  %5101 = vmatpush.bf16.msrb.mxu0 %v15869_v49  ;;  %v3621_v13 = vsel %vm1491_vm3, %v3616_v7, %v3620_v48  ;;  %v4063_v49 = vrot.slane %v18765_v12, 1  ;;  %v15875_v12 = vld [vmem:[%s21972_s2 + $0xc0] sm:$0xff] }
 0x221   : > { %v3039_v1 = vpop.f32.mrf.mxu3  ;;  %v3463_v57 = vpop.f32.mrf.mxu1  ;;  %16693 = vst [vmem:[#allocation2 + $0x98] sm:$0xff] %v16308_v39   ;;  %v4238_v35 = vrot.slane %v3895_v58, 1  ;;  %v4239_v21 = vrot.slane %v3891_v43, 2  ;;  %5380 = vmatpush.bf16.msrb.mxu1 %v15875_v12  ;;  %v17077_v12 = vld [vmem:[#allocation2 + $0x8c] sm:$0xf0]  }
 0x222   : > { %v3070_v10 = vadd.f32 %v3039_v1, %v2870_v14  ;;  %v4064_v54 = vsel %vm1968_vm6, %v4061_v3, %v4063_v49  ;;  %v18826_v3 = vld [vmem:[#allocation2 + $0x88] sm:$0xff] }
 0x224   : > { %v3347_v50 = vadd.f32 %v3316_v37, %v3070_v10 }
 0x226   : > { %v18752_v24 = vadd.f32 %v3461_v36, %v3347_v50  ;;  %v2871_v9 = vpop.f32.mrf.mxu2  ;;  %v3886_v36 = vsel %vm1491_vm3, %v3881_v2, %v3885_v18  ;;  %v3893_v2 = vrot.slane %v3891_v43, 1 }
 0x227   : > { %v2872_v37 = vadd.f32 %v2871_v9, %v18385_v56  ;;  %v4237_v56 = vsel %vm2128_vm5, %v18697_v8, %v18750_v20  ;;  %v4452_v8 = vsel %vm4436_vm15, 1, %v17182_v32  ;;  %v18803_v9 = vor.u32 %v4239_v21, %v4238_v35 }
 0x228   : > { %v3321_v33 = vpop.f32.mrf.mxu0  ;;  %4485 = vperm.xlu0 %17146, %v4452_v8  }
 0x229   : > { %v3041_v23 = vpop.f32.mrf.mxu3  ;;  %v3466_v11 = vpop.f32.mrf.mxu1 }
 0x22a   : > { %v3071_v62 = vadd.f32 %v3041_v23, %v2872_v37 }
 0x22b   : > { %3730 = vmatmul.bf16.gmra.mxu2 %v3621_v13  ;;  %4153 = vmatmul.bf16.gmra.mxu0 %v4062_v25 }
 0x22c   : > { %v3348_v26 = vadd.f32 %v3318_v42, %v3071_v62  ;;  %4339 = vmatmul.bf16.gmra.mxu1 %v4237_v56  ;;  %v3622_v42 = vshrl.u32 %v18720_v55, 16  ;;  %v3628_v55 = vrot.slane %v3626_v46, 1  ;;  %v18818_v56 = vld [vmem:[#allocation2 + $0x90] sm:$0xff] }
 0x22d   : > { %v3899_v19 = vshll.u32 %v18818_v56, 16  ;;  %v3903_v5 = vshrl.u32 %v18818_v56, 16 }
 0x22e   : > { %3995 = vmatmul.bf16.gmra.mxu3 %v3886_v36  ;;  %v2874_v6 = vpop.f32.mrf.mxu2  ;;  %v18786_v28 = vadd.f32 %v3463_v57, %v3348_v26  ;;  %v4421_v57 = vld [vmem:[%s21971_s1 + $0xc8] sm:$0xff]  ;;  %v3624_v50 = vor.u32 %v3622_v42, %v3620_v48  ;;  %v3894_v36 = vsel %vm1491_vm3, %v3889_v45, %v3893_v2  ;;  %v15859_v26 = vld [vmem:[%s21972_s2 + $0x40] sm:$0xff]  ;;  %v3518_v45 = vld [vmem:[#allocation2 + $0x90] sm:$0x1] }
 0x22f   : > { %v2875_v14 = vadd.f32 %v2874_v6, %v18405_v51  ;;  %vm4437_vm4 = vcmp.gt.f32.partialorder %v4421_v57, 0.5  ;;  %v15868_v51 = vld [vmem:[%s21972_s2 + $0x88] sm:$0xff]  ;;  %4745 = vmatpush.bf16.msrb.mxu2 %v15859_v26  ;;  %v3630_v6 = vshrl.u32 %v18775_v41, 16  ;;  %v4242_v42 = vrot.slane %v3903_v5, 1  ;;  %v15867_v41 = vld [vmem:[%s21972_s2 + $0x80] sm:$0xff]  ;;  %v15890_v26 = vld [vmem:[%s21972_s2 + $0x138] sm:$0xff] }
 0x230   : > { %v3323_v40 = vpop.f32.mrf.mxu0  ;;  %v4453_v7 = vsel %vm4437_vm4, 1, %v17182_v32  ;;  %5102 = vmatpush.bf16.msrb.mxu0 %v15868_v51  ;;  %v3629_v25 = vsel %vm1491_vm3, %v3624_v50, %v3628_v55  ;;  %v4243_v46 = vrot.slane %v3899_v19, 2  ;;  %v18851_v21 = vrot.slane %v3899_v19, 1 }
 0x231   : > { %v3044_v1 = vpop.f32.mrf.mxu3  ;;  %v3468_v10 = vpop.f32.mrf.mxu1  ;;  %4488 = vperm.xlu1 %17147, %v4453_v7   ;;  %v3632_v57 = vor.u32 %v3630_v6, %v3628_v55  ;;  %v4065_v51 = vrot.slane %v18818_v56, 1  ;;  %v4426_v56 = vld [vmem:[%s21971_s1 + $0xf0] sm:$0xff] }
 0x232   : > { %v3072_v63 = vadd.f32 %v3044_v1, %v2875_v14  ;;  %v3634_v14 = vshll.u32 %v18826_v3, 16  ;;  %v18860_v7 = vor.u32 %v4243_v46, %v4242_v42  ;;  %v352_v42 = vld [vmem:[%s17252_s14 + $0x120] sm:$0xff]  ;;  %v353_v46 = vld [vmem:[%s17252_s14 + $0x128] sm:$0xff]  ;;  %vm4442_vm11 = vcmp.gt.f32.partialorder %v4426_v56, 0.5 }
 0x233   : > { %5518 = vmatpush.bf16.msra.mxu2 %v15890_v26 }
 0x234   : > { %v3349_v44 = vadd.f32 %v3321_v33, %v3072_v63  ;;  %v4190_v63 = vld [vmem:[#allocation2 + $0x98] sm:$0x3]  ;;  %5103 = vmatpush.bf16.msrb.mxu0 %v15867_v41 }
 0x236   : > { %v18805_v37 = vadd.f32 %v3466_v11, %v3349_v44  ;;  %v2876_v23 = vpop.f32.mrf.mxu2  ;;  %v4241_v11 = vsel %vm2128_vm5, %v18750_v20, %v18803_v9  ;;  %v18856_v44 = vrot.slane %v3634_v14, 1 }
 0x237   : > { %v2877_v33 = vadd.f32 %v2876_v23, %v18423_v34  ;;  %v4419_v34 = vld [vmem:[%s21971_s1 + $0xb8] sm:$0xff]  ;;  %v4208_v23 = vunpack.c.l.b16 %v4190_v63 }
 0x238   : > { %v3326_v48 = vpop.f32.mrf.mxu0  ;;  %vm4435_vm7 = vcmp.gt.f32.partialorder %v4419_v34, 0.5 }
 0x239   : > { %v3046_v13 = vpop.f32.mrf.mxu3  ;;  %v3471_v62 = vpop.f32.mrf.mxu1  ;;  %v4451_v20 = vsel %vm4435_vm7, 1, %v17182_v32 }
 0x23a   : > { %v3073_v18 = vadd.f32 %v3046_v13, %v2877_v33  ;;  %4482 = vperm.xlu2 %17148, %v4451_v20   ;;  %v3783_v33 = vld [vmem:[#allocation2 + $0x98] sm:$0x1] }
 0x23b   : > { %3735 = vmatmul.bf16.gmra.mxu2 %v3629_v25  ;;  %4158 = vmatmul.bf16.gmra.mxu0 %v4064_v54  ;;  %v3637_v25 = vsel %vm1491_vm3, %v3632_v57, %v18856_v44  ;;  %v3833_v34 = vunpack.c.l.b16 %v3783_v33 }
 0x23c   : > { %v3350_v60 = vadd.f32 %v3323_v40, %v3073_v18  ;;  %4344 = vmatmul.bf16.gmra.mxu1 %v4241_v11  ;;  %v4066_v18 = vsel %vm1968_vm6, %v4063_v49, %v4065_v51 }
 0x23d   : > { %v3842_v19 = vpack.c.b16 %v3833_v34, %v3833_v34 }
 0x23e   : > { %4000 = vmatmul.bf16.gmra.mxu3 %v3894_v36  ;;  %v18837_v8 = vadd.f32 %v3468_v10, %v3350_v60  ;;  %v2879_v47 = vpop.f32.mrf.mxu2  ;;  %v4423_v10 = vld [vmem:[%s21971_s1 + $0xd8] sm:$0xff]  ;;  %v4209_v60 = vpack.c.b16 %v4208_v23, %v4208_v23  ;;  %v4605_v23 = vld [vmem:[#allocation2 + $0x84] sm:$0x8] }
 0x23f   : > { %v2880_v22 = vadd.f32 %v2879_v47, %v18442_v17  ;;  %v3897_v17 = vor.u32 %v3895_v58, %v3893_v2  ;;  %vm4439_vm8 = vcmp.gt.f32.partialorder %v4423_v10, 0.5  ;;  %v3638_v10 = vshrl.u32 %v18826_v3, 16 }
 0x240   : > { %v3328_v39 = vpop.f32.mrf.mxu0  ;;  %v4455_v50 = vsel %vm4439_vm8, 1, %v17182_v32  ;;  %v4247_v47 = vshrl.u32 %v4209_v60, 16  ;;  %v3907_v57 = vshll.u32 %v3842_v19, 16  ;;  %v4067_v3 = vrot.slane %v3842_v19, 1 }
 0x241   : > { %v3049_v43 = vpop.f32.mrf.mxu3  ;;  %v18842_v40 = vpop.f32.mrf.mxu1  ;;  %4494 = vperm.xlu0 %17146, %v4455_v50   ;;  %v3902_v54 = vsel %vm1491_vm3, %v3897_v17, %v18851_v21 }
 0x242   : > { %v3074_v1 = vadd.f32 %v3049_v43, %v2880_v22  ;;  %v4250_v22 = vshll.u32 %v4209_v60, 16  ;;  %v4249_v50 = vrot.slane %v4247_v47, 1  ;;  %v3909_v34 = vrot.slane %v3907_v57, 1 }
 0x243   : > { %v4068_v0 = vsel %vm1968_vm6, %v4065_v51, %v4067_v3  ;;  %v16877_v47 = vor.u32 %v17077_v12, %v16876_v52  ;;  %v355_v3 = vld [vmem:[%s17252_s14 + $0x138] sm:$0xff] }
 0x244   : > { %v3351_v35 = vadd.f32 %v3326_v48, %v3074_v1  ;;  %v4572_v1 = vld [vmem:[#allocation2 + $0x84] sm:$0xc] }
 0x245   : > { %v4788_v33 = vunpack.c.l.b16 %v4572_v1 }
 0x246   : > { %v18862_v58 = vadd.f32 %v3471_v62, %v3351_v35  ;;  %v2881_v2 = vpop.f32.mrf.mxu2  ;;  %v3568_v62 = vunpack.c.l.b16 %v3518_v45  ;;  %v4252_v45 = vrot.slane %v4250_v22, 2 }
 0x247   : > { %v2882_v13 = vadd.f32 %v2881_v2, %v18460_v27  ;;  %v4245_v27 = vsel %vm2128_vm5, %v18803_v9, %v18860_v7  ;;  %v4456_v9 = vsel %vm4440_vm9, 1, %v17182_v32 }
 0x248   : > { %v3331_v55 = vpop.f32.mrf.mxu0  ;;  %v3577_v49 = vpack.c.b16 %v3568_v62, %v3568_v62  ;;  %4497 = vperm.xlu1 %17147, %v4456_v9   ;;  %v4639_v62 = vunpack.c.l.b16 %v4605_v23  ;;  %v4253_v60 = vor.u32 %v4252_v45, %v4249_v50  ;;  %v15889_v45 = vld [vmem:[%s21972_s2 + $0x130] sm:$0xff] }
 0x249   : > { %v3051_v48 = vpop.f32.mrf.mxu3  ;;  %v3476_v11 = vpop.f32.mrf.mxu1  ;;  %5519 = vmatpush.bf16.msra.mxu2 %v15889_v45  ;;  %v4425_v45 = vld [vmem:[%s21971_s1 + $0xe8] sm:$0xff] }
 0x24a   : > { %v3075_v36 = vadd.f32 %v3051_v48, %v2882_v13  ;;  %v3642_v35 = vshll.u32 %v3577_v49, 16  ;;  %v16313_v13 = vpack.c.bf16 %v353_v46, %v352_v42  ;;  %vm4441_vm13 = vcmp.gt.f32.partialorder %v4425_v45, 0.5 }
 0x24b   : > { %3740 = vmatmul.bf16.gmra.mxu2 %v3637_v25  ;;  %4163 = vmatmul.bf16.gmra.mxu0 %v4066_v18 }
 0x24c   : > { %v3352_v20 = vadd.f32 %v3328_v39, %v3075_v36  ;;  %4349 = vmatmul.bf16.gmra.mxu1 %v4245_v27  ;;  %v4573_v39 = vld [vmem:[#allocation2 + $0x88] sm:$0xf]  ;;  %v3644_v18 = vrot.slane %v3642_v35, 1  ;;  %16694 = vst [vmem:[#allocation2 + $0xa0] sm:$0xff] %v16313_v13   ;;  %v3905_v27 = vor.u32 %v3903_v5, %v18851_v21  ;;  %v4458_v35 = vsel %vm4442_vm11, 1, %v17182_v32  ;;  %v15905_v13 = vld [vmem:[%s21972_s2 + $0x170] sm:$0xff] }
 0x24d   : > { %v4640_v2 = vunpack.c.l.b16 %v4573_v39  ;;  %v17079_v39 = vld [vmem:[#allocation2 + $0x94] sm:$0xff]   ;;  %4503 = vperm.xlu0 %17146, %v4458_v35   ;;  %5784 = vmatpush.bf16.msra.mxu3 %v15905_v13 }
 0x24e   : > { %4005 = vmatmul.bf16.gmra.mxu3 %v3902_v54  ;;  %v2884_v43 = vpop.f32.mrf.mxu2  ;;  %v18900_v48 = vadd.f32 %v18842_v40, %v3352_v20  ;;  %v3640_v54 = vor.u32 %v3638_v10, %v18856_v44  ;;  %v15921_v40 = vld [vmem:[%s21972_s2 + $0x1b8] sm:$0xff]  ;;  %v18912_v20 = vld [vmem:[#allocation2 + $0x8c] sm:$0xff]  ;;  %v5238_v10 = vshrl.u32 %v16877_v47, 16  ;;  %v5246_v57 = vshrl.u32 %v17079_v39, 16 }
 0x24f   : > { %v2885_v6 = vadd.f32 %v2884_v43, %v18480_v4  ;;  %v4422_v4 = vld [vmem:[%s21971_s1 + $0xd0] sm:$0xff]  ;;  %v4789_v49 = vpack.c.b16 %v4640_v2, %v4788_v33  ;;  %6048 = vmatpush.bf16.msra.mxu0 %v15921_v40  ;;  %v18919_v19 = vpack.c.b16 %v4640_v2, %v4639_v62  ;;  %v3910_v43 = vsel %vm1491_vm3, %v3905_v27, %v3909_v34 }
 0x250   : > { %v3333_v63 = vpop.f32.mrf.mxu0  ;;  %vm4438_vm10 = vcmp.gt.f32.partialorder %v4422_v4, 0.5  ;;  %v3645_v21 = vsel %vm1491_vm3, %v3640_v54, %v3644_v18  ;;  %v4799_v1 = vshrl.u32 %v18912_v20, 16  ;;  %v4802_v42 = vshll.u32 %v18912_v20, 16 }
 0x251   : > { %v3054_v14 = vpop.f32.mrf.mxu3  ;;  %v18894_v41 = vpop.f32.mrf.mxu1  ;;  %v4454_v36 = vsel %vm4438_vm10, 1, %v17182_v32  ;;  %v4999_v46 = vshll.u32 %v18919_v19, 16  ;;  %v5249_v50 = vshll.u32 %v17079_v39, 16  ;;  %v5240_v40 = vrot.slane %v5238_v10, 3 }
 0x252   : > { %v3076_v17 = vadd.f32 %v3054_v14, %v2885_v6  ;;  %4491 = vperm.xlu2 %17148, %v4454_v36   ;;  %v4791_v6 = vshrl.u32 %v4789_v49, 16  ;;  %v4794_v14 = vshll.u32 %v4789_v49, 16  ;;  %v4801_v4 = vrot.slane %v4799_v1, 2 }
 0x253   : > { %v4804_v36 = vrot.slane %v4802_v42, 3  ;;  %v5003_v27 = vrot.slane %v4799_v1, 3  ;;  %v5004_v34 = vrot.slane %v4802_v42, 4  ;;  %v5001_v12 = vrot.slane %v4999_v46, 4 }
 0x254   : > { %v3353_v25 = vadd.f32 %v3331_v55, %v3076_v17  ;;  %v5241_v17 = vshll.u32 %v16877_v47, 16  ;;  %v4793_v2 = vrot.slane %v4791_v6, 2  ;;  %v4796_v33 = vrot.slane %v4794_v14, 3 }
 0x255   : > { %v4665_v47 = vrot.slane %v18919_v19, 3  ;;  %v18954_v39 = vor.u32 %v5004_v34, %v5003_v27  ;;  %v18957_v14 = vor.u32 %v4804_v36, %v4801_v4  ;;  %v4457_v4 = vsel %vm4441_vm13, 1, %v17182_v32  ;;  %v15904_v36 = vld [vmem:[%s21972_s2 + $0x168] sm:$0xff]  ;;  %v356_v27 = vld [vmem:[%s17252_s14 + $0x140] sm:$0xff] }
 0x256   : > { %v18910_v55 = vadd.f32 %v3476_v11, %v3353_v25  ;;  %v2886_v44 = vpop.f32.mrf.mxu2  ;;  %v354_v25 = vld [vmem:[%s17252_s14 + $0x130] sm:$0xff]  ;;  %v357_v34 = vld [vmem:[%s17252_s14 + $0x148] sm:$0xff]  ;;  %5785 = vmatpush.bf16.msra.mxu3 %v15904_v36 }
 0x257   : > { %v2887_v9 = vadd.f32 %v2886_v44, %v18498_v61  ;;  %v4254_v61 = vsel %vm2128_vm5, %v18860_v7, %v4253_v60  ;;  %v4996_v7 = vshrl.u32 %v18919_v19, 16  ;;  %v16318_v44 = vpack.c.bf16 %v355_v3, %v354_v25  ;;  %v15920_v19 = vld [vmem:[%s21972_s2 + $0x1b0] sm:$0xff] }
 0x258   : > { %v3336_v5 = vpop.f32.mrf.mxu0  ;;  %6049 = vmatpush.bf16.msra.mxu0 %v15920_v19  ;;  %v15928_v3 = vld [vmem:[%s21972_s2 + $0x1f0] sm:$0xff]  ;;  %v15919_v19 = vld [vmem:[%s21972_s2 + $0x1a8] sm:$0xff] }
 0x259   : > { %v3056_v26 = vpop.f32.mrf.mxu3  ;;  %v18921_v22 = vpop.f32.mrf.mxu1  ;;  %v4998_v52 = vrot.slane %v4996_v7, 3  ;;  %16695 = vst [vmem:[#allocation2 + $0xa8] sm:$0xff] %v16318_v44   ;;  %v358_v36 = vld [vmem:[%s17252_s14 + $0x150] sm:$0xff] }
 0x25a   : > { %v3077_v11 = vadd.f32 %v3056_v26, %v2887_v9  ;;  %v5243_v26 = vrot.slane %v5241_v17, 4  ;;  %v18973_v17 = vld [vmem:[#allocation2 + $0x94] sm:$0xff]  ;;  %4500 = vperm.xlu2 %17148, %v4457_v4  }
 0x25b   : > { %3745 = vmatmul.bf16.gmra.mxu2 %v3645_v21  ;;  %4168 = vmatmul.bf16.gmra.mxu0 %v4068_v0  ;;  %v5248_v21 = vrot.slane %v5246_v57, 3 }
 0x25c   : > { %v3354_v51 = vadd.f32 %v3333_v63, %v3077_v11  ;;  %4354 = vmatmul.bf16.gmra.mxu1 %v4254_v61  ;;  %v15929_v63 = vld [vmem:[%s21972_s2 + $0x1f8] sm:$0xff]  ;;  %v4666_v11 = vrot.slane %v18912_v20, 3  ;;  %v5002_v61 = vor.u32 %v5001_v12, %v4998_v52  ;;  %v5244_v1 = vor.u32 %v5243_v26, %v5240_v40  ;;  %6050 = vmatpush.bf16.msra.mxu0 %v15919_v19  ;;  %v4462_v20 = vpop.permute.xlu1 %4461 }
 0x25d   : > { %6206 = vmatpush.bf16.msra.mxu1 %v15929_v63  ;;  %v17081_v63 = vld [vmem:[#allocation2 + $0x9c] sm:$0xff]   ;;  %vm4508_vm14 = vcmp.eq.s32.totalorder %v4462_v20, 1 }
 0x25e   : > { %4010 = vmatmul.bf16.gmra.mxu3 %v3910_v43  ;;  %v2889_v23 = vpop.f32.mrf.mxu2  ;;  %v18946_v54 = vadd.f32 %v18894_v41, %v3354_v51  ;;  %v5251_v41 = vrot.slane %v5249_v50, 4  ;;  %v4797_v43 = vor.u32 %v4796_v33, %v4793_v2  ;;  %v4667_v10 = vsel %vm490_vm0, %v4665_v47, %v4666_v11 }
 0x25f   : > { %v2890_v18 = vadd.f32 %v2889_v23, %v18513_v30  ;;  %v4427_v30 = vld [vmem:[%s21971_s1 + $0xf8] sm:$0xff]  ;;  %v5006_v35 = vsel %vm823_vm2, %v5002_v61, %v18954_v39  ;;  %v4808_v2 = vshrl.u32 %v18973_v17, 16  ;;  %v4811_v33 = vshll.u32 %v18973_v17, 16 }
 0x260   : > { %v3338_v60 = vpop.f32.mrf.mxu0  ;;  %vm4443_vm12 = vcmp.gt.f32.partialorder %v4427_v30, 0.5  ;;  %v18959_v56 = vor.u32 %v5251_v41, %v5248_v21  ;;  %v4806_v50 = vsel %vm616_vm1, %v4797_v43, %v18957_v14  ;;  %v5255_v13 = vshrl.u32 %v17081_v63, 16  ;;  %v19060_v20 = vld [vmem:[#allocation2 + $0xa4] sm:$0xff] }
 0x261   : > { %v3059_v62 = vpop.f32.mrf.mxu3  ;;  %v3483_v9 = vpop.f32.mrf.mxu1  ;;  %v4459_v6 = vsel %vm4443_vm12, 1, %v17182_v32  ;;  %v5258_v25 = vshll.u32 %v17081_v63, 16  ;;  %6207 = vmatpush.bf16.msra.mxu1 %v15928_v3  ;;  %v4810_v44 = vrot.slane %v4808_v2, 2  ;;  %v5008_v26 = vrot.slane %v4811_v33, 4  ;;  %v15887_v3 = vld [vmem:[%s21972_s2 + $0x120] sm:$0xff] }
 0x262   : > { %v3078_v49 = vadd.f32 %v3059_v62, %v2890_v18  ;;  %4506 = vperm.xlu1 %17147, %v4459_v6   ;;  %v15888_v18 = vld [vmem:[%s21972_s2 + $0x128] sm:$0xff]  ;;  %v16323_v21 = vpack.c.bf16 %v357_v34, %v356_v27  ;;  %v5257_v47 = vrot.slane %v5255_v13, 3  ;;  %v359_v27 = vld [vmem:[%s17252_s14 + $0x158] sm:$0xff] }
 0x263   : > { %5520 = vmatpush.bf16.msra.mxu2 %v15888_v18  ;;  %v5260_v43 = vrot.slane %v5258_v25, 4  ;;  %v15903_v18 = vld [vmem:[%s21972_s2 + $0x160] sm:$0xff] }
 0x264   : > { %v3355_v0 = vadd.f32 %v3336_v5, %v3078_v49  ;;  %v5007_v49 = vrot.slane %v4808_v2, 3  ;;  %16696 = vst [vmem:[#allocation2 + $0xb0] sm:$0xff] %v16323_v21   ;;  %5786 = vmatpush.bf16.msra.mxu3 %v15903_v18 }
 0x266   : > { %v18962_v51 = vadd.f32 %v18921_v22, %v3355_v0  ;;  %v2891_v5 = vpop.f32.mrf.mxu2  ;;  %v4813_v0 = vrot.slane %v4811_v33, 3  ;;  %v19000_v6 = vor.u32 %v5008_v26, %v5007_v49 }
 0x267   : > { %v2892_v42 = vadd.f32 %v2891_v5, %v18542_v38  ;;  %v5253_v38 = vsel %vm823_vm2, %v5244_v1, %v18959_v56  ;;  %v19004_v1 = vor.u32 %v5260_v43, %v5257_v47  ;;  %5521 = vmatpush.bf16.msra.mxu2 %v15887_v3 }
 0x268   : > { %v4134_v46 = vpop.f32.mrf.mxu0 }
 0x269   : > { %v3061_v7 = vpop.f32.mrf.mxu3  ;;  %v4320_v57 = vpop.f32.mrf.mxu1  ;;  %v5262_v45 = vsel %vm823_vm2, %v18959_v56, %v19004_v1  ;;  %v15927_v56 = vld [vmem:[%s21972_s2 + $0x1e8] sm:$0xff] }
 0x26a   : > { %v3079_v22 = vadd.f32 %v3061_v7, %v2892_v42  ;;  %6208 = vmatpush.bf16.msra.mxu1 %v15927_v56  ;;  %v4826_v56 = vshrl.u32 %v19060_v20, 16 }
 0x26b   : > { %4746 = vmatmul.bf16.vlgmr.msrb.gmra.mxu2 %v4667_v10  ;;  %5104 = vmatmul.bf16.vlgmr.msrb.gmra.mxu0 %v5006_v35  ;;  %v19015_v35 = vld [vmem:[#allocation2 + $0x9c] sm:$0xff] }
 0x26c   : > { %v3356_v23 = vadd.f32 %v3338_v60, %v3079_v22  ;;  %5381 = vmatmul.bf16.vlgmr.msrb.gmra.mxu1 %v5253_v38  ;;  %v4817_v33 = vshrl.u32 %v19015_v35, 16 }
 0x26e   : > { %4934 = vmatmul.bf16.vlgmr.msrb.gmra.mxu3 %v4806_v50  ;;  %v3711_v62 = vpop.f32.mrf.mxu2  ;;  %v18996_v60 = vadd.f32 %v3483_v9, %v3356_v23  ;;  %v4668_v9 = vrot.slane %v18973_v17, 3  ;;  %v17083_v23 = vld [vmem:[#allocation2 + $0xa4] sm:$0xff]   ;;  %v5011_v21 = vrot.slane %v4817_v33, 3  ;;  %v4468_v17 = vpop.permute.xlu0 %4467 }
 0x26f   : > { %v3751_v52 = vadd.f32 %v3711_v62, %v18597_v53  ;;  %v19002_v53 = vor.u32 %v4813_v0, %v4810_v44  ;;  %v5264_v13 = vshrl.u32 %v17083_v23, 16  ;;  %v5267_v25 = vshll.u32 %v17083_v23, 16 }
 0x270   : > { %v4136_v40 = vpop.f32.mrf.mxu0  ;;  %v4669_v50 = vsel %vm490_vm0, %v4666_v11, %v4668_v9  ;;  %v4819_v44 = vrot.slane %v4817_v33, 2  ;;  %vm4510_vm4 = vcmp.eq.s32.totalorder %v4468_v17, 1 }
 0x271   : > { %v3976_v12 = vpop.f32.mrf.mxu3  ;;  %v4322_v30 = vpop.f32.mrf.mxu1  ;;  %v4815_v63 = vsel %vm616_vm1, %v18957_v14, %v19002_v53  ;;  %v4820_v14 = vshll.u32 %v19015_v35, 16 }
 0x272   : > { %v4016_v41 = vadd.f32 %v3976_v12, %v3751_v52 }
 0x273   : > { %v4822_v26 = vrot.slane %v4820_v14, 3 }
 0x274   : > { %v4174_v61 = vadd.f32 %v4134_v46, %v4016_v41  ;;  %v19013_v46 = vld [vmem:[%s21973_s3] ss:$0 sm:$0xff]  ;;  %v5012_v41 = vrot.slane %v4820_v14, 4 }
 0x276   : > { %v3713_v5 = vpop.f32.mrf.mxu2  ;;  %v4360_v42 = vadd.f32 %v4320_v57, %v4174_v61  ;;  %v5010_v57 = vsel %vm823_vm2, %v18954_v39, %v19000_v6  ;;  %v4465_v39 = vpop.permute.xlu2 %4464  ;;  %v5266_v61 = vrot.slane %v5264_v13, 3  ;;  %v17085_v13 = vld [vmem:[#allocation2 + $0xac] sm:$0xff]  }
 0x277   : > { %v3752_v7 = vadd.f32 %v3713_v5, %v18629_v15  ;;  %vm4509_vm15 = vcmp.eq.s32.totalorder %v4465_v39, 1  ;;  %v5269_v5 = vrot.slane %v5267_v25, 4  ;;  %v5273_v18 = vshrl.u32 %v17085_v13, 16 }
 0x278   : > { %v4139_v22 = vpop.f32.mrf.mxu0  ;;  %v4380_v11 = vadd.f32 %v19013_v46, %v4360_v42 }
 0x279   : > { %v3978_v10 = vpop.f32.mrf.mxu3  ;;  %v4325_v38 = vpop.f32.mrf.mxu1 }
 0x27a   : > { %v4017_v15 = vadd.f32 %v3978_v10, %v3752_v7  ;;  %v4396_v34 = vmax.f32 %v4380_v11, 0.0  ;;  %v4670_v10 = vrot.slane %v19015_v35, 3 }
 0x27b   : > { %4751 = vmatmul.bf16.gmra.mxu2 %v4669_v50  ;;  %5109 = vmatmul.bf16.gmra.mxu0 %v5010_v57  ;;  %v19050_v50 = vor.u32 %v5012_v41, %v5011_v21  ;;  %v19052_v57 = vor.u32 %v4822_v26, %v4819_v44  ;;  %v4828_v21 = vrot.slane %v4826_v56, 2 }
 0x27c   : > { %v4175_v2 = vadd.f32 %v4136_v40, %v4017_v15  ;;  %5386 = vmatmul.bf16.gmra.mxu1 %v5262_v45  ;;  %v19054_v15 = vor.u32 %v5269_v5, %v5266_v61  ;;  %v15918_v45 = vld [vmem:[%s21972_s2 + $0x1a0] sm:$0xff]  ;;  %v4671_v39 = vsel %vm490_vm0, %v4668_v9, %v4670_v10 }
 0x27d   : > { %v5014_v33 = vsel %vm823_vm2, %v19000_v6, %v19050_v50  ;;  %6051 = vmatpush.bf16.msra.mxu0 %v15918_v45  ;;  %v4471_v6 = vpop.permute.xlu1 %4470 }
 0x27e   : > { %4939 = vmatmul.bf16.gmra.mxu3 %v4815_v63  ;;  %v4361_v4 = vadd.f32 %v4322_v30, %v4175_v2  ;;  %v3716_v62 = vpop.f32.mrf.mxu2  ;;  %v16328_v30 = vpack.c.bf16 %v359_v27, %v358_v36  ;;  %v15886_v36 = vld [vmem:[%s21972_s2 + $0x118] sm:$0xff]  ;;  %vm4511_vm7 = vcmp.eq.s32.totalorder %v4471_v6, 1  ;;  %v4474_v35 = vpop.permute.xlu2 %4473 }
 0x27f   : > { %v3753_v52 = vadd.f32 %v3716_v62, %v18648_v31  ;;  %v4524_v31 = vsel %vm4508_vm14, %v4396_v34, 0.0  ;;  %v5276_v62 = vshll.u32 %v17085_v13, 16  ;;  %v15902_v27 = vld [vmem:[%s21972_s2 + $0x158] sm:$0xff]  ;;  %5522 = vmatpush.bf16.msra.mxu2 %v15886_v36  ;;  %v19105_v13 = vld [vmem:[#allocation2 + $0xac] sm:$0xff]  ;;  %vm4512_vm8 = vcmp.eq.s32.totalorder %v4474_v35, 1 }
 0x280   : > { %v4381_v40 = vadd.f32 %v19013_v46, %v4361_v4  ;;  %v4141_v49 = vpop.f32.mrf.mxu0  ;;  %16697 = vst [vmem:[#allocation2 + $0xb8] sm:$0xff] %v16328_v30   ;;  %5787 = vmatpush.bf16.msra.mxu3 %v15902_v27  ;;  %v15885_v27 = vld [vmem:[%s21972_s2 + $0x110] sm:$0xff] }
 0x281   : > { %v3981_v12 = vpop.f32.mrf.mxu3  ;;  %v4327_v47 = vpop.f32.mrf.mxu1 }
 0x282   : > { %v4018_v0 = vadd.f32 %v3981_v12, %v3753_v52  ;;  %v4397_v43 = vmax.f32 %v4381_v40, 0.0  ;;  %v360_v52 = vld [vmem:[%s17252_s14 + $0x160] sm:$0xff]  ;;  %v361_v12 = vld [vmem:[%s17252_s14 + $0x168] sm:$0xff] }
 0x283   : > { %5523 = vmatpush.bf16.msra.mxu2 %v15885_v27 }
 0x284   : > { %v4176_v19 = vadd.f32 %v4139_v22, %v4018_v0  ;;  %v4525_v42 = vsel %vm4509_vm15, %v4397_v43, 0.0  ;;  %v5015_v0 = vrot.slane %v4826_v56, 3  ;;  %v16333_v43 = vpack.c.bf16 %v361_v12, %v360_v52  ;;  %v362_v12 = vld [vmem:[%s17252_s14 + $0x170] sm:$0xff] }
 0x285   : > { %v16455_v7 = vpack.c.bf16 %v4525_v42, %v4524_v31  ;;  %v5278_v42 = vrot.slane %v5276_v62, 4 }
 0x286   : > { %v3718_v63 = vpop.f32.mrf.mxu2  ;;  %v4362_v23 = vadd.f32 %v4325_v38, %v4176_v19  ;;  %v5271_v38 = vsel %vm823_vm2, %v19004_v1, %v19054_v15  ;;  %v15926_v1 = vld [vmem:[%s21972_s2 + $0x1e0] sm:$0xff]  ;;  %v5275_v19 = vrot.slane %v5273_v18, 3  ;;  %16698 = vst [vmem:[#allocation2 + $0xc0] sm:$0xff] %v16333_v43   ;;  %v4835_v18 = vshrl.u32 %v19105_v13, 16 }
 0x287   : > { %16732 = vst [vmem:[#allocation3 + $0x50] sm:$0xff] %v16455_v7   ;;  %v3754_v22 = vadd.f32 %v3718_v63, %v18680_v59  ;;  %v4824_v59 = vsel %vm616_vm1, %v19002_v53, %v19052_v57  ;;  %v4829_v53 = vshll.u32 %v19060_v20, 16  ;;  %6209 = vmatpush.bf16.msra.mxu1 %v15926_v1 }
 0x288   : > { %v4144_v11 = vpop.f32.mrf.mxu0  ;;  %v4382_v9 = vadd.f32 %v19013_v46, %v4362_v23  ;;  %v4672_v23 = vrot.slane %v19060_v20, 3 }
 0x289   : > { %v3983_v2 = vpop.f32.mrf.mxu3  ;;  %v4330_v4 = vpop.f32.mrf.mxu1  ;;  %v4831_v30 = vrot.slane %v4829_v53, 3 }
 0x28a   : > { %v4019_v14 = vadd.f32 %v3983_v2, %v3754_v22  ;;  %v4398_v40 = vmax.f32 %v4382_v9, 0.0  ;;  %v4673_v17 = vsel %vm490_vm0, %v4670_v10, %v4672_v23 }
 0x28b   : > { %4756 = vmatmul.bf16.gmra.mxu2 %v4671_v39  ;;  %5114 = vmatmul.bf16.gmra.mxu0 %v5014_v33  ;;  %v19097_v2 = vor.u32 %v4831_v30, %v4828_v21  ;;  %v19099_v39 = vor.u32 %v5278_v42, %v5275_v19 }
 0x28c   : > { %v4177_v25 = vadd.f32 %v4141_v49, %v4019_v14  ;;  %5391 = vmatmul.bf16.gmra.mxu1 %v5271_v38  ;;  %v15917_v14 = vld [vmem:[%s21972_s2 + $0x198] sm:$0xff] }
 0x28d   : > { %6052 = vmatpush.bf16.msra.mxu0 %v15917_v14 }
 0x28e   : > { %4944 = vmatmul.bf16.gmra.mxu3 %v4824_v59  ;;  %v4363_v3 = vadd.f32 %v4327_v47, %v4177_v25  ;;  %v3721_v34 = vpop.f32.mrf.mxu2  ;;  %v5016_v47 = vrot.slane %v4829_v53, 4  ;;  %v17087_v53 = vld [vmem:[#allocation2 + $0xb4] sm:$0xff]  }
 0x28f   : > { %v3755_v44 = vadd.f32 %v3721_v34, %v18699_v29  ;;  %v4526_v29 = vsel %vm4510_vm4, %v4398_v40, 0.0  ;;  %v5282_v1 = vshrl.u32 %v17087_v53, 16  ;;  %v5285_v36 = vshll.u32 %v17087_v53, 16  ;;  %v15901_v34 = vld [vmem:[%s21972_s2 + $0x150] sm:$0xff]  ;;  %v363_v40 = vld [vmem:[%s17252_s14 + $0x178] sm:$0xff] }
 0x290   : > { %v4383_v26 = vadd.f32 %v19013_v46, %v4363_v3  ;;  %v4146_v41 = vpop.f32.mrf.mxu0  ;;  %v19095_v22 = vor.u32 %v5016_v47, %v5015_v0  ;;  %v5019_v47 = vrot.slane %v4835_v18, 3  ;;  %5788 = vmatpush.bf16.msra.mxu3 %v15901_v34  ;;  %v6497_v34 = vld [vmem:[%s21971_s1 + $0x120] sm:$0xff] }
 0x291   : > { %v3986_v49 = vpop.f32.mrf.mxu3  ;;  %v4332_v5 = vpop.f32.mrf.mxu1  ;;  %v5284_v42 = vrot.slane %v5282_v1, 3  ;;  %vm6513_vm13 = vcmp.gt.f32.partialorder %v6497_v34, 0.5 }
 0x292   : > { %v4020_v61 = vadd.f32 %v3986_v49, %v3755_v44  ;;  %v4399_v31 = vmax.f32 %v4383_v26, 0.0  ;;  %v5018_v9 = vsel %vm823_vm2, %v19050_v50, %v19095_v22  ;;  %v4477_v50 = vpop.permute.xlu0 %4476 }
 0x293   : > { %vm4513_vm9 = vcmp.eq.s32.totalorder %v4477_v50, 1 }
 0x294   : > { %v4178_v7 = vadd.f32 %v4144_v11, %v4020_v61  ;;  %v4527_v63 = vsel %vm4511_vm7, %v4399_v31, 0.0  ;;  %v19137_v61 = vpack.c.bf16 %v363_v40, %v362_v12  ;;  %v15900_v40 = vld [vmem:[%s21972_s2 + $0x148] sm:$0xff] }
 0x295   : > { %v16460_v45 = vpack.c.bf16 %v4527_v63, %v4526_v29  ;;  %v5287_v29 = vrot.slane %v5285_v36, 4  ;;  %5789 = vmatpush.bf16.msra.mxu3 %v15900_v40 }
 0x296   : > { %v3723_v33 = vpop.f32.mrf.mxu2  ;;  %v4364_v59 = vadd.f32 %v4330_v4, %v4178_v7  ;;  %v5280_v4 = vsel %vm823_vm2, %v19054_v15, %v19099_v39  ;;  %v15925_v15 = vld [vmem:[%s21972_s2 + $0x1d8] sm:$0xff]  ;;  %16699 = vst [vmem:[#allocation2 + $0xc8] sm:$0xff] %v19137_v61  }
 0x297   : > { %16733 = vst [vmem:[#allocation3 + $0x58] sm:$0xff] %v16460_v45   ;;  %v3756_v11 = vadd.f32 %v3723_v33, %v18731_v16  ;;  %v4833_v16 = vsel %vm616_vm1, %v19052_v57, %v19097_v2  ;;  %v4838_v57 = vshll.u32 %v19105_v13, 16  ;;  %6210 = vmatpush.bf16.msra.mxu1 %v15925_v15  ;;  %v4674_v33 = vrot.slane %v19105_v13, 3 }
 0x298   : > { %v4149_v25 = vpop.f32.mrf.mxu0  ;;  %v4384_v10 = vadd.f32 %v19013_v46, %v4364_v59 }
 0x299   : > { %v3988_v38 = vpop.f32.mrf.mxu3  ;;  %v4335_v56 = vpop.f32.mrf.mxu1  ;;  %v4840_v0 = vrot.slane %v4838_v57, 3  ;;  %v5020_v43 = vrot.slane %v4838_v57, 4 }
 0x29a   : > { %v4021_v6 = vadd.f32 %v3988_v38, %v3756_v11  ;;  %v4400_v44 = vmax.f32 %v4384_v10, 0.0  ;;  %v19147_v11 = vor.u32 %v5287_v29, %v5284_v42  ;;  %v6494_v38 = vld [vmem:[%s21971_s1 + $0x108] sm:$0xff]  ;;  %v19165_v10 = vld [vmem:[#allocation2 + $0xb4] sm:$0xff]  ;;  %v4480_v57 = vpop.permute.xlu1 %4479 }
 0x29b   : > { %4761 = vmatmul.bf16.gmra.mxu2 %v4673_v17  ;;  %5119 = vmatmul.bf16.gmra.mxu0 %v5018_v9  ;;  %v19143_v14 = vor.u32 %v5020_v43, %v5019_v47  ;;  %vm6510_vm10 = vcmp.gt.f32.partialorder %v6494_v38, 0.5  ;;  %v4844_v1 = vshrl.u32 %v19165_v10, 16  ;;  %v4847_v36 = vshll.u32 %v19165_v10, 16 }
 0x29c   : > { %v4179_v3 = vadd.f32 %v4146_v41, %v4021_v6  ;;  %5396 = vmatmul.bf16.gmra.mxu1 %v5280_v4  ;;  %v4837_v41 = vrot.slane %v4835_v18, 2  ;;  %v6526_v4 = vsel %vm6510_vm10, 1, %v17182_v32  ;;  %v5289_v20 = vsel %vm823_vm2, %v19099_v39, %v19147_v11  ;;  %v17089_v18 = vld [vmem:[#allocation2 + $0xbc] sm:$0xff]   ;;  %v15924_v39 = vld [vmem:[%s21972_s2 + $0x1d0] sm:$0xff] }
 0x29d   : > { %v5022_v35 = vsel %vm823_vm2, %v19095_v22, %v19143_v14  ;;  %6545 = vperm.xlu0 %17146, %v6526_v4   ;;  %v4483_v22 = vpop.permute.xlu2 %4482  ;;  %v5294_v27 = vshll.u32 %v17089_v18, 16  ;;  %vm4514_vm11 = vcmp.eq.s32.totalorder %v4480_v57, 1  ;;  %6211 = vmatpush.bf16.msra.mxu1 %v15924_v39  ;;  %v4849_v47 = vrot.slane %v4847_v36, 3 }
 0x29e   : > { %4949 = vmatmul.bf16.gmra.mxu3 %v4833_v16  ;;  %v4365_v62 = vadd.f32 %v4332_v5, %v4179_v3  ;;  %v3726_v52 = vpop.f32.mrf.mxu2  ;;  %v19145_v59 = vor.u32 %v4840_v0, %v4837_v41  ;;  %v4675_v3 = vsel %vm490_vm0, %v4672_v23, %v4674_v33  ;;  %vm4515_vm12 = vcmp.eq.s32.totalorder %v4483_v22, 1 }
 0x29f   : > { %v3757_v49 = vadd.f32 %v3726_v52, %v18752_v24  ;;  %v4528_v24 = vsel %vm4512_vm8, %v4400_v44, 0.0  ;;  %v15884_v52 = vld [vmem:[%s21972_s2 + $0x108] sm:$0xff]  ;;  %v6529_v41 = vsel %vm6513_vm13, 1, %v17182_v32  ;;  %v4846_v0 = vrot.slane %v4844_v1, 2 }
 0x2a0   : > { %v4385_v21 = vadd.f32 %v19013_v46, %v4365_v62  ;;  %v4151_v30 = vpop.f32.mrf.mxu0  ;;  %v4842_v50 = vsel %vm616_vm1, %v19097_v2, %v19145_v59  ;;  %v5291_v2 = vshrl.u32 %v17089_v18, 16  ;;  %5524 = vmatpush.bf16.msra.mxu2 %v15884_v52  ;;  %v5023_v43 = vrot.slane %v4844_v1, 3  ;;  %v6498_v52 = vld [vmem:[%s21971_s1 + $0x128] sm:$0xff] }
 0x2a1   : > { %v3991_v26 = vpop.f32.mrf.mxu3  ;;  %v4337_v31 = vpop.f32.mrf.mxu1  ;;  %v4676_v38 = vrot.slane %v19165_v10, 3  ;;  %vm6514_vm8 = vcmp.gt.f32.partialorder %v6498_v52, 0.5 }
 0x2a2   : > { %v4022_v5 = vadd.f32 %v3991_v26, %v3757_v49  ;;  %v4401_v19 = vmax.f32 %v4385_v21, 0.0  ;;  %v5293_v29 = vrot.slane %v5291_v2, 3 }
 0x2a4   : > { %v4180_v7 = vadd.f32 %v4149_v25, %v4022_v5  ;;  %v4529_v63 = vsel %vm4513_vm9, %v4401_v19, 0.0  ;;  %v15916_v25 = vld [vmem:[%s21972_s2 + $0x190] sm:$0xff]  ;;  %v5024_v5 = vrot.slane %v4847_v36, 4 }
 0x2a5   : > { %v16465_v45 = vpack.c.bf16 %v4529_v63, %v4528_v24  ;;  %6053 = vmatpush.bf16.msra.mxu0 %v15916_v25  ;;  %6554 = vperm.xlu0 %17146, %v6529_v41   ;;  %v5296_v24 = vrot.slane %v5294_v27, 4  ;;  %v19196_v25 = vor.u32 %v4849_v47, %v4846_v0  ;;  %v6530_v47 = vsel %vm6514_vm8, 1, %v17182_v32 }
 0x2a6   : > { %v3728_v17 = vpop.f32.mrf.mxu2  ;;  %v4366_v9 = vadd.f32 %v4335_v56, %v4180_v7 }
 0x2a7   : > { %16734 = vst [vmem:[#allocation3 + $0x60] sm:$0xff] %v16465_v45   ;;  %v3758_v6 = vadd.f32 %v3728_v17, %v18786_v28  ;;  %v19194_v17 = vor.u32 %v5024_v5, %v5023_v43  ;;  %v4851_v1 = vsel %vm616_vm1, %v19145_v59, %v19196_v25 }
 0x2a8   : > { %v4154_v53 = vpop.f32.mrf.mxu0  ;;  %v4386_v62 = vadd.f32 %v19013_v46, %v4366_v9  ;;  %v19198_v9 = vor.u32 %v5296_v24, %v5293_v29 }
 0x2a9   : > { %v3993_v16 = vpop.f32.mrf.mxu3  ;;  %v4340_v28 = vpop.f32.mrf.mxu1  ;;  %v5026_v57 = vsel %vm823_vm2, %v19143_v14, %v19194_v17 }
 0x2aa   : > { %v4023_v56 = vadd.f32 %v3993_v16, %v3758_v6  ;;  %v4402_v44 = vmax.f32 %v4386_v62, 0.0  ;;  %v6495_v6 = vld [vmem:[%s21971_s1 + $0x110] sm:$0xff]  ;;  %v6500_v16 = vld [vmem:[%s21971_s1 + $0x138] sm:$0xff]  ;;  %v17090_v62 = vld [vmem:[#allocation2 + $0xc4] sm:$0xff]   ;;  %v5298_v13 = vsel %vm823_vm2, %v19147_v11, %v19198_v9 }
 0x2ab   : > { %4766 = vmatmul.bf16.gmra.mxu2 %v4675_v3  ;;  %5124 = vmatmul.bf16.gmra.mxu0 %v5022_v35  ;;  %v19206_v3 = vld [vmem:[#allocation2 + $0xbc] sm:$0xff]  ;;  %vm6511_vm14 = vcmp.gt.f32.partialorder %v6495_v6, 0.5  ;;  %vm6516_vm15 = vcmp.gt.f32.partialorder %v6500_v16, 0.5  ;;  %v15915_v35 = vld [vmem:[%s21972_s2 + $0x188] sm:$0xff]  ;;  %v5300_v39 = vshrl.u32 %v17090_v62, 16  ;;  %v5303_v34 = vshll.u32 %v17090_v62, 16 }
 0x2ac   : > { %v4181_v23 = vadd.f32 %v4151_v30, %v4023_v56  ;;  %5401 = vmatmul.bf16.gmra.mxu1 %v5289_v20  ;;  %v6527_v20 = vsel %vm6511_vm14, 1, %v17182_v32  ;;  %v6532_v18 = vsel %vm6516_vm15, 1, %v17182_v32  ;;  %6054 = vmatpush.bf16.msra.mxu0 %v15915_v35  ;;  %v4853_v14 = vshrl.u32 %v19206_v3, 16  ;;  %v15923_v11 = vld [vmem:[%s21972_s2 + $0x1c8] sm:$0xff]  ;;  %v6501_v62 = vld [vmem:[%s21971_s1 + $0x140] sm:$0xff]  ;;  %v4492_v52 = vpop.permute.xlu2 %4491 }
 0x2ad   : > { %6548 = vperm.xlu1 %17147, %v6527_v20   ;;  %6563 = vperm.xlu0 %17146, %v6532_v18   ;;  %v4856_v27 = vshll.u32 %v19206_v3, 16  ;;  %v5302_v29 = vrot.slane %v5300_v39, 3  ;;  %vm6517_vm10 = vcmp.gt.f32.partialorder %v6501_v62, 0.5 }
 0x2ae   : > { %4954 = vmatmul.bf16.gmra.mxu3 %v4842_v50  ;;  %v4367_v15 = vadd.f32 %v4337_v31, %v4181_v23  ;;  %v3731_v12 = vpop.f32.mrf.mxu2  ;;  %6212 = vmatpush.bf16.msra.mxu1 %v15923_v11 }
 0x2af   : > { %v3759_v49 = vadd.f32 %v3731_v12, %v18805_v37  ;;  %v4530_v37 = vsel %vm4514_vm11, %v4402_v44, 0.0  ;;  %v6503_v12 = vld [vmem:[%s21971_s1 + $0x150] sm:$0xff] }
 0x2b0   : > { %v4387_v21 = vadd.f32 %v19013_v46, %v4367_v15  ;;  %v4156_v30 = vpop.f32.mrf.mxu0  ;;  %v4489_v15 = vpop.permute.xlu1 %4488  ;;  %vm6519_vm9 = vcmp.gt.f32.partialorder %v6503_v12, 0.5 }
 0x2b1   : > { %v3996_v26 = vpop.f32.mrf.mxu3  ;;  %v4342_v19 = vpop.f32.mrf.mxu1  ;;  %vm4517_vm7 = vcmp.eq.s32.totalorder %v4489_v15, 1  ;;  %v6535_v43 = vsel %vm6519_vm9, 1, %v17182_v32  ;;  %v6533_v15 = vsel %vm6517_vm10, 1, %v17182_v32 }
 0x2b2   : > { %v4024_v31 = vadd.f32 %v3996_v26, %v3759_v49  ;;  %v4403_v42 = vmax.f32 %v4387_v21, 0.0  ;;  %v4855_v49 = vrot.slane %v4853_v14, 2  ;;  %v15883_v26 = vld [vmem:[%s21972_s2 + $0x100] sm:$0xff] }
 0x2b3   : > { %v15899_v21 = vld [vmem:[%s21972_s2 + $0x140] sm:$0xff]  ;;  %5525 = vmatpush.bf16.msra.mxu2 %v15883_v26 }
 0x2b4   : > { %v4182_v7 = vadd.f32 %v4154_v53, %v4024_v31  ;;  %v4531_v63 = vsel %vm4515_vm12, %v4403_v42, 0.0  ;;  %v4858_v31 = vrot.slane %v4856_v27, 3  ;;  %v5028_v42 = vrot.slane %v4856_v27, 4  ;;  %5790 = vmatpush.bf16.msra.mxu3 %v15899_v21 }
 0x2b5   : > { %v16470_v45 = vpack.c.bf16 %v4531_v63, %v4530_v37  ;;  %6557 = vperm.xlu1 %17147, %v6530_v47   ;;  %6572 = vperm.xlu0 %17146, %v6535_v43   ;;  %v5305_v63 = vrot.slane %v5303_v34, 4  ;;  %vm4518_vm12 = vcmp.eq.s32.totalorder %v4492_v52, 1 }
 0x2b6   : > { %v4368_v4 = vadd.f32 %v4340_v28, %v4182_v7  ;;  %v3733_v53 = vpop.f32.mrf.mxu2  ;;  %v4677_v28 = vsel %vm490_vm0, %v4674_v33, %v4676_v38  ;;  %v4486_v33 = vpop.permute.xlu0 %4485  ;;  %v19257_v18 = vor.u32 %v4858_v31, %v4855_v49 }
 0x2b7   : > { %16735 = vst [vmem:[#allocation3 + $0x68] sm:$0xff] %v16470_v45   ;;  %v3760_v56 = vadd.f32 %v3733_v53, %v18837_v8  ;;  %vm4516_vm4 = vcmp.eq.s32.totalorder %v4486_v33, 1  ;;  %v4975_v45 = vld [vmem:[#allocation2 + $0xc4] sm:$0xf]  ;;  %v4678_v53 = vrot.slane %v19206_v3, 3 }
 0x2b8   : > { %v4159_v23 = vpop.f32.mrf.mxu0  ;;  %v4388_v36 = vadd.f32 %v19013_v46, %v4368_v4  ;;  %v4993_v20 = vunpack.c.l.b16 %v4975_v45  ;;  %v4860_v10 = vsel %vm616_vm1, %v19196_v25, %v19257_v18 }
 0x2b9   : > { %v3998_v50 = vpop.f32.mrf.mxu3  ;;  %v19222_v22 = vpop.f32.mrf.mxu1 }
 0x2ba   : > { %v4025_v8 = vadd.f32 %v3998_v50, %v3760_v56  ;;  %v4404_v40 = vmax.f32 %v4388_v36, 0.0  ;;  %v4679_v36 = vsel %vm490_vm0, %v4676_v38, %v4678_v53  ;;  %v4994_v39 = vpack.c.b16 %v4993_v20, %v4993_v20  ;;  %v6507_v20 = vld [vmem:[%s21971_s1 + $0x170] sm:$0xff] }
 0x2bb   : > { %4771 = vmatmul.bf16.gmra.mxu2 %v4677_v28  ;;  %5129 = vmatmul.bf16.gmra.mxu0 %v5026_v57  ;;  %v19259_v28 = vor.u32 %v5305_v63, %v5302_v29  ;;  %v16523_v57 = vunpack.c.h.b16 %v19137_v61 }
 0x2bc   : > { %v4183_v2 = vadd.f32 %v4156_v30, %v4025_v8  ;;  %5406 = vmatmul.bf16.gmra.mxu1 %v5298_v13  ;;  %v4532_v6 = vsel %vm4516_vm4, %v4404_v40, 0.0  ;;  %v15914_v13 = vld [vmem:[%s21972_s2 + $0x180] sm:$0xff]  ;;  %v5032_v25 = vshrl.u32 %v4994_v39, 16  ;;  %v5035_v49 = vshll.u32 %v4994_v39, 16 }
 0x2bd   : > { %6566 = vperm.xlu1 %17147, %v6533_v15   ;;  %v5307_v38 = vsel %vm823_vm2, %v19198_v9, %v19259_v28  ;;  %v5236_v34 = vpack.c.b16 %v16523_v57, %v16523_v57  ;;  %6055 = vmatpush.bf16.msra.mxu0 %v15914_v13  ;;  %v15922_v9 = vld [vmem:[%s21972_s2 + $0x1c0] sm:$0xff]  ;;  %v19318_v57 = vld [vmem:[#allocation3 + $0x48] sm:$0xf]  ;;  %vm6523_vm4 = vcmp.gt.f32.partialorder %v6507_v20, 0.5 }
 0x2be   : > { %4959 = vmatmul.bf16.gmra.mxu3 %v4851_v1  ;;  %v4369_v59 = vadd.f32 %v4342_v19, %v4183_v2  ;;  %v3736_v44 = vpop.f32.mrf.mxu2  ;;  %v5027_v19 = vrot.slane %v4853_v14, 3  ;;  %v4495_v12 = vpop.permute.xlu0 %4494  ;;  %6213 = vmatpush.bf16.msra.mxu1 %v15922_v9  ;;  %v5034_v63 = vrot.slane %v5032_v25, 3  ;;  %v15968_v25 = vld [vmem:[%s21974_s4 + $0xb8] sm:$0xff] }
 0x2bf   : > { %v3761_v41 = vadd.f32 %v3736_v44, %v18862_v58  ;;  %v4588_v58 = vld [vmem:[#allocation2 + $0xc4] sm:$0x7]  ;;  %v5309_v21 = vshrl.u32 %v5236_v34, 16  ;;  %vm4519_vm14 = vcmp.eq.s32.totalorder %v4495_v12, 1  ;;  %v19359_v9 = vld [vmem:[#allocation2 + $0x98] sm:$0xff] }
 0x2c0   : > { %v4389_v0 = vadd.f32 %v19013_v46, %v4369_v59  ;;  %v4161_v5 = vpop.f32.mrf.mxu0  ;;  %v19255_v56 = vor.u32 %v5028_v42, %v5027_v19  ;;  %v4655_v50 = vunpack.c.l.b16 %v4588_v58  ;;  %v5037_v58 = vrot.slane %v5035_v49, 4 }
 0x2c1   : > { %v4001_v30 = vpop.f32.mrf.mxu3  ;;  %v4347_v37 = vpop.f32.mrf.mxu1 }
 0x2c2   : > { %v4026_v24 = vadd.f32 %v4001_v30, %v3761_v41  ;;  %v4405_v7 = vmax.f32 %v4389_v0, 0.0  ;;  %v5030_v2 = vsel %vm823_vm2, %v19194_v17, %v19255_v56  ;;  %v19283_v27 = vpack.c.b16 %v4655_v50, %v4655_v50  ;;  %v6504_v30 = vld [vmem:[%s21971_s1 + $0x158] sm:$0xff]  ;;  %v6493_v50 = vld [vmem:[%s21971_s1 + $0x100] sm:$0xff]  ;;  %7179 = vmatpush.bf16.msrb.mxu1 %v15968_v25 }
 0x2c3   : > { %v5312_v41 = vshll.u32 %v5236_v34, 16  ;;  %v15937_v0 = vld [vmem:[%s21972_s2 + $0x238] sm:$0xff]  ;;  %vm6520_vm13 = vcmp.gt.f32.partialorder %v6504_v30, 0.5  ;;  %vm6509_vm15 = vcmp.gt.f32.partialorder %v6493_v50, 0.5  ;;  %v5038_v13 = vor.u32 %v5037_v58, %v5034_v63 }
 0x2c4   : > { %v4184_v16 = vadd.f32 %v4159_v23, %v4026_v24  ;;  %v4533_v4 = vsel %vm4517_vm7, %v4405_v7, 0.0  ;;  %v6506_v23 = vld [vmem:[%s21971_s1 + $0x168] sm:$0xff]  ;;  %v4862_v40 = vshrl.u32 %v19283_v27, 16  ;;  %v4865_v44 = vshll.u32 %v19283_v27, 16  ;;  %6392 = vmatpush.bf16.msrb.mxu2 %v15937_v0  ;;  %v15936_v0 = vld [vmem:[%s21972_s2 + $0x230] sm:$0xff] }
 0x2c5   : > { %v16475_v35 = vpack.c.bf16 %v4533_v4, %v4532_v6  ;;  %vm6522_vm11 = vcmp.gt.f32.partialorder %v6506_v23, 0.5  ;;  %v6536_v29 = vsel %vm6520_vm13, 1, %v17182_v32  ;;  %v5311_v4 = vrot.slane %v5309_v21, 3  ;;  %v4501_v21 = vpop.permute.xlu2 %4500  ;;  %v16750_v63 = vld [vmem:[#allocation2 + $0x98] sm:$0xe] }
 0x2c6   : > { %v4370_v8 = vadd.f32 %v19222_v22, %v4184_v16  ;;  %v3738_v1 = vpop.f32.mrf.mxu2  ;;  %v6538_v22 = vsel %vm6522_vm11, 1, %v17182_v32  ;;  %v4867_v7 = vrot.slane %v4865_v44, 3  ;;  %6575 = vperm.xlu1 %17147, %v6536_v29   ;;  %v19345_v44 = vld [vmem:[#allocation2 + $0x98] sm:$0xff]   ;;  %vm4521_vm9 = vcmp.eq.s32.totalorder %v4501_v21, 1 }
 0x2c7   : > { %16736 = vst [vmem:[#allocation3 + $0x70] sm:$0xff] %v16475_v35   ;;  %v3762_v61 = vadd.f32 %v3738_v1, %v18900_v48  ;;  %6581 = vperm.xlu0 %17146, %v6538_v22   ;;  %v5314_v35 = vrot.slane %v5312_v41, 4  ;;  %v4680_v1 = vrot.slane %v19283_v27, 3  ;;  %v6539_v22 = vsel %vm6523_vm4, 1, %v17182_v32  ;;  %v15952_v27 = vld [vmem:[%s21974_s4 + $0x38] sm:$0xff] }
 0x2c8   : > { %v4164_v14 = vpop.f32.mrf.mxu0  ;;  %v4390_v17 = vadd.f32 %v19013_v46, %v4370_v8  ;;  %7008 = vmatpush.bf16.msrb.mxu0 %v15952_v27  ;;  %v5927_v41 = vshll.u32 %v19345_v44, 16  ;;  %6393 = vmatpush.bf16.msrb.mxu2 %v15936_v0  ;;  %v15967_v0 = vld [vmem:[%s21974_s4 + $0xb0] sm:$0xff] }
 0x2c9   : > { %v4003_v33 = vpop.f32.mrf.mxu3  ;;  %v19285_v59 = vpop.f32.mrf.mxu1  ;;  %v5315_v15 = vor.u32 %v5314_v35, %v5311_v4  ;;  %v5925_v35 = vshrl.u32 %v19345_v44, 16  ;;  %7180 = vmatpush.bf16.msrb.mxu1 %v15967_v0 }
 0x2ca   : > { %v4027_v48 = vadd.f32 %v4003_v33, %v3762_v61  ;;  %v4406_v47 = vmax.f32 %v4390_v17, 0.0  ;;  %v6525_v61 = vsel %vm6509_vm15, 1, %v17182_v32  ;;  %v8663_v33 = vld [vmem:[#allocation3 + $0x44] sm:$0x8] }
 0x2cb   : > { %4776 = vmatmul.bf16.gmra.mxu2 %v4679_v36  ;;  %5134 = vmatmul.bf16.gmra.mxu0 %v5030_v2  ;;  %v21989_v2 = vunpack.c.l.b16 %v19318_v57  ;;  %v8697_v34 = vunpack.c.l.b16 %v8663_v33  ;;  %v15951_v33 = vld [vmem:[%s21974_s4 + $0x30] sm:$0xff] }
 0x2cc   : > { %v4185_v11 = vadd.f32 %v4161_v5, %v4027_v48  ;;  %5411 = vmatmul.bf16.gmra.mxu1 %v5307_v38  ;;  %v15960_v5 = vld [vmem:[%s21974_s4 + $0x78] sm:$0xff]  ;;  %6542 = vperm.xlu2 %17148, %v6525_v61   ;;  %v19326_v48 = vld [vmem:[#allocation2 + $0x90] sm:$0xff] }
 0x2cd   : > { %6820 = vmatpush.bf16.msrb.mxu3 %v15960_v5  ;;  %v19349_v3 = vpack.c.b16 %v21989_v2, %v8697_v34  ;;  %v6499_v61 = vld [vmem:[%s21971_s1 + $0x130] sm:$0xff]  ;;  %7009 = vmatpush.bf16.msrb.mxu0 %v15951_v33  ;;  %v5671_v33 = vshrl.u32 %v19359_v9, 16 }
 0x2ce   : > { %4964 = vmatmul.bf16.gmra.mxu3 %v4860_v10  ;;  %v4371_v26 = vadd.f32 %v4347_v37, %v4185_v11  ;;  %v3741_v43 = vpop.f32.mrf.mxu2  ;;  %v4864_v37 = vrot.slane %v4862_v40, 2  ;;  %v4681_v11 = vsel %vm490_vm0, %v4678_v53, %v4680_v1  ;;  %6584 = vperm.xlu1 %17147, %v6539_v22   ;;  %vm6515_vm10 = vcmp.gt.f32.partialorder %v6499_v61, 0.5 }
 0x2cf   : > { %v3763_v31 = vadd.f32 %v3741_v43, %v18910_v55  ;;  %v4534_v55 = vsel %vm4518_vm12, %v4406_v47, 0.0  ;;  %v15959_v47 = vld [vmem:[%s21974_s4 + $0x70] sm:$0xff] }
 0x2d0   : > { %v4391_v42 = vadd.f32 %v19013_v46, %v4371_v26  ;;  %v4166_v24 = vpop.f32.mrf.mxu0  ;;  %v4868_v36 = vor.u32 %v4867_v7, %v4864_v37  ;;  %v19361_v26 = vld [vmem:[#allocation2 + $0xa0] sm:$0xff]  ;;  %v19371_v43 = vld [vmem:[#allocation3 + $0x4c] sm:$0xff]  ;;  %v5660_v37 = vshrl.u32 %v19326_v48, 16 }
 0x2d1   : > { %v4006_v19 = vpop.f32.mrf.mxu3  ;;  %v4352_v6 = vpop.f32.mrf.mxu1  ;;  %6821 = vmatpush.bf16.msrb.mxu3 %v15959_v47  ;;  %v22003_v50 = vshll.u32 %v19361_v26, 16  ;;  %v21986_v20 = vshrl.u32 %v19371_v43, 16  ;;  %v6502_v47 = vld [vmem:[%s21971_s1 + $0x148] sm:$0xff] }
 0x2d2   : > { %v4028_v45 = vadd.f32 %v4006_v19, %v3763_v31  ;;  %v4407_v16 = vmax.f32 %v4391_v42, 0.0  ;;  %v4869_v40 = vsel %vm616_vm1, %v19257_v18, %v4868_v36  ;;  %v6496_v18 = vld [vmem:[%s21971_s1 + $0x118] sm:$0xff]  ;;  %v9054_v19 = vshrl.u32 %v19349_v3, 16 }
 0x2d3   : > { %vm6512_vm7 = vcmp.gt.f32.partialorder %v6496_v18, 0.5  ;;  %v16749_v31 = vld [vmem:[#allocation2 + $0x98] sm:$0xf0]  ;;  %v9057_v42 = vshll.u32 %v19349_v3, 16  ;;  %vm6518_vm11 = vcmp.gt.f32.partialorder %v6502_v47, 0.5 }
 0x2d4   : > { %v4186_v62 = vadd.f32 %v4164_v14, %v4028_v45  ;;  %v4535_v23 = vsel %vm4519_vm14, %v4407_v16, 0.0  ;;  %v6528_v30 = vsel %vm6512_vm7, 1, %v17182_v32  ;;  %v5667_v16 = vshll.u32 %v19359_v9, 16 }
 0x2d5   : > { %v16480_v8 = vpack.c.bf16 %v4535_v23, %v4534_v55  ;;  %6551 = vperm.xlu2 %17148, %v6528_v30   ;;  %v5929_v55 = vrot.slane %v5927_v41, 1  ;;  %v19382_v1 = vor.u32 %v16750_v63, %v16749_v31  ;;  %v9056_v36 = vrot.slane %v9054_v19, 3  ;;  %v17155_v31 = vld [vmem:[%s21973_s3] ss:$0 sm:$0xff]  ;;  %v4504_v63 = vpop.permute.xlu0 %4503 }
 0x2d6   : > { %v4372_v14 = vadd.f32 %v19285_v59, %v4186_v62  ;;  %v3743_v39 = vpop.f32.mrf.mxu2  ;;  %v5039_v59 = vsel %vm823_vm2, %v19255_v56, %v5038_v13  ;;  %v5662_v56 = vshll.u32 %v19326_v48, 16  ;;  %v19401_v34 = vrot.slane %v5667_v16, 1  ;;  %v19442_v16 = vld [vmem:[#allocation3 + $0x54] sm:$0xff] }
 0x2d7   : > { %16737 = vst [vmem:[#allocation3 + $0x78] sm:$0xff] %v16480_v8   ;;  %v3764_v10 = vadd.f32 %v3743_v39, %v18946_v54  ;;  %v5316_v54 = vsel %vm823_vm2, %v19259_v28, %v5315_v15  ;;  %v4498_v28 = vpop.permute.xlu1 %4497  ;;  %v9059_v15 = vrot.slane %v9057_v42, 4  ;;  %v9061_v39 = vrot.slane %v21986_v20, 3  ;;  %v19431_v42 = vld [vmem:[#allocation2 + $0xa8] sm:$0xff] }
 0x2d8   : > { %v19332_v17 = vpop.f32.mrf.mxu0  ;;  %v4392_v53 = vadd.f32 %v19013_v46, %v4372_v14  ;;  %vm4520_vm8 = vcmp.eq.s32.totalorder %v4498_v28, 1  ;;  %v5664_v7 = vrot.slane %v5662_v56, 1  ;;  %v5930_v27 = vor.u32 %v5929_v55, %v5925_v35 }
 0x2d9   : > { %v4008_v38 = vpop.f32.mrf.mxu3  ;;  %v19339_v12 = vpop.f32.mrf.mxu1  ;;  %v9060_v56 = vor.u32 %v9059_v15, %v9056_v36  ;;  %vm4522_vm12 = vcmp.eq.s32.totalorder %v4504_v63, 1 }
 0x2da   : > { %v4029_v52 = vadd.f32 %v4008_v38, %v3764_v10  ;;  %v4408_v29 = vmax.f32 %v4392_v53, 0.0  ;;  %v5665_v13 = vor.u32 %v5664_v7, %v5660_v37  ;;  %v19398_v10 = vrot.slane %v22003_v50, 1  ;;  %v15958_v37 = vld [vmem:[%s21974_s4 + $0x68] sm:$0xff]  ;;  %v6653_v50 = vld [vmem:[#allocation3 + $0x4] sm:$0xc] }
 0x2db   : > { %4781 = vmatmul.bf16.gmra.mxu2 %v4681_v11  ;;  %5139 = vmatmul.bf16.gmra.mxu0 %v5039_v59  ;;  %v6531_v38 = vsel %vm6515_vm10, 1, %v17182_v32  ;;  %v6133_v11 = vrot.slane %v19382_v1, 1 }
 0x2dc   : > { %v4187_v49 = vadd.f32 %v4166_v24, %v4029_v52  ;;  %5416 = vmatmul.bf16.gmra.mxu1 %v5316_v54  ;;  %v5935_v28 = vsel %vm1491_vm3, %v5930_v27, %v19398_v10  ;;  %v5670_v30 = vsel %vm1491_vm3, %v5665_v13, %v19401_v34  ;;  %6822 = vmatpush.bf16.msrb.mxu3 %v15958_v37 }
 0x2dd   : > { %6560 = vperm.xlu2 %17148, %v6531_v38  }
 0x2de   : > { %4969 = vmatmul.bf16.gmra.mxu3 %v4869_v40  ;;  %v4373_v5 = vadd.f32 %v4352_v6, %v4187_v49  ;;  %v3746_v24 = vpop.f32.mrf.mxu2  ;;  %v16740_v49 = vld [vmem:[#allocation2 + $0x90] sm:$0xff]  }
 0x2df   : > { %v3765_v58 = vadd.f32 %v3746_v24, %v18962_v51  ;;  %v21985_v51 = vshll.u32 %v19371_v43, 16  ;;  %v15935_v24 = vld [vmem:[%s21972_s2 + $0x228] sm:$0xff] }
 0x2e0   : > { %v4393_v6 = vadd.f32 %v19013_v46, %v4373_v5  ;;  %v4171_v4 = vpop.f32.mrf.mxu0  ;;  %v4536_v46 = vsel %vm4520_vm8, %v4408_v29, 0.0  ;;  %v6534_v29 = vsel %vm6518_vm11, 1, %v17182_v32  ;;  %6394 = vmatpush.bf16.msrb.mxu2 %v15935_v24  ;;  %v19488_v24 = vld [vmem:[#allocation3 + $0x5c] sm:$0xff] }
 0x2e1   : > { %v4011_v45 = vpop.f32.mrf.mxu3  ;;  %v4357_v23 = vpop.f32.mrf.mxu1  ;;  %v9062_v59 = vrot.slane %v21985_v51, 4 }
 0x2e2   : > { %v4030_v62 = vadd.f32 %v4011_v45, %v3765_v58  ;;  %v4409_v8 = vmax.f32 %v4393_v6, 0.0  ;;  %v4507_v58 = vpop.permute.xlu1 %4506  ;;  %v19440_v45 = vld [vmem:[#allocation2 + $0xa0] sm:$0xff] }
 0x2e3   : > { %v19409_v25 = vor.u32 %v9062_v59, %v9061_v39  ;;  %vm4523_vm13 = vcmp.eq.s32.totalorder %v4507_v58, 1  ;;  %v5675_v36 = vshll.u32 %v19440_v45, 16  ;;  %v21984_v39 = vshrl.u32 %v19442_v16, 16 }
 0x2e4   : > { %v4188_v22 = vadd.f32 %v19332_v17, %v4030_v62  ;;  %v4537_v14 = vsel %vm4521_vm9, %v4409_v8, 0.0  ;;  %v6134_v17 = vrot.slane %v19361_v26, 1  ;;  %v22004_v62 = vshrl.u32 %v19361_v26, 16 }
 0x2e5   : > { %v16485_v48 = vpack.c.bf16 %v4537_v14, %v4536_v46  ;;  %6569 = vperm.xlu2 %17148, %v6534_v29   ;;  %v15950_v14 = vld [vmem:[%s21974_s4 + $0x28] sm:$0xff] }
 0x2e6   : > { %v3748_v52 = vpop.f32.mrf.mxu2  ;;  %v4374_v40 = vadd.f32 %v19339_v12, %v4188_v22  ;;  %v6135_v12 = vsel %vm1968_vm6, %v6133_v11, %v6134_v17  ;;  %v6505_v22 = vld [vmem:[%s21971_s1 + $0x160] sm:$0xff]  ;;  %v5938_v9 = vor.u32 %v22004_v62, %v19398_v10  ;;  %7010 = vmatpush.bf16.msrb.mxu0 %v15950_v14  ;;  %v9065_v10 = vrot.slane %v21984_v39, 3 }
 0x2e7   : > { %16738 = vst [vmem:[#allocation3 + $0x80] sm:$0xff] %v16485_v48   ;;  %v3766_v54 = vadd.f32 %v3748_v52, %v18996_v60  ;;  %v19420_v60 = vsel %vm823_vm2, %v9060_v56, %v19409_v25  ;;  %v21983_v48 = vshll.u32 %v19442_v16, 16  ;;  %vm6521_vm14 = vcmp.gt.f32.partialorder %v6505_v22, 0.5 }
 0x2e8   : > { %v5105_v18 = vpop.f32.mrf.mxu0  ;;  %22035 = vst [vmem:[#allocation4_spill] sm:$0xff] %v19420_v60  ;;  %v4394_v19 = vadd.f32 %v17155_v31, %v4374_v40  ;;  %v6537_v52 = vsel %vm6521_vm14, 1, %v17182_v32  ;;  %v6136_v56 = vrot.slane %v19431_v42, 1 }
 0x2e9   : > { %v4013_v53 = vpop.f32.mrf.mxu3  ;;  %v5382_v41 = vpop.f32.mrf.mxu1 }
 0x2ea   : > { %v4031_v21 = vadd.f32 %v4013_v53, %v3766_v54  ;;  %v5673_v54 = vor.u32 %v5671_v33, %v19401_v34  ;;  %v5677_v53 = vrot.slane %v5675_v36, 1  ;;  %v6137_v47 = vsel %vm1968_vm6, %v6134_v17, %v6136_v56  ;;  %v19490_v17 = vld [vmem:[#allocation2 + $0xb0] sm:$0xff] }
 0x2eb   : > { %5526 = vmatmul.bf16.vlgmr.msra.gmra.mxu2 %v16740_v49  ;;  %6056 = vmatmul.bf16.vlgmr.msra.gmra.mxu0 %v5935_v28  ;;  %v9066_v49 = vrot.slane %v21983_v48, 4 }
 0x2ec   : > { %v4189_v5 = vadd.f32 %v4171_v4, %v4031_v21  ;;  %6214 = vmatmul.bf16.vlgmr.msra.gmra.mxu1 %v6135_v12  ;;  %v4410_v4 = vmax.f32 %v4394_v19, 0.0  ;;  %v5678_v34 = vsel %vm1491_vm3, %v5673_v54, %v5677_v53  ;;  %v6508_v19 = vld [vmem:[%s21971_s1 + $0x178] sm:$0xff] }
 0x2ed   : > { %6578 = vperm.xlu2 %17148, %v6537_v52   ;;  %v9067_v12 = vor.u32 %v9066_v49, %v9065_v10  ;;  %vm6524_vm15 = vcmp.gt.f32.partialorder %v6508_v19, 0.5  ;;  %v6138_v52 = vrot.slane %v19490_v17, 1 }
 0x2ee   : > { %5791 = vmatmul.bf16.vlgmr.msra.gmra.mxu3 %v5670_v30  ;;  %v4375_v7 = vadd.f32 %v4357_v23, %v4189_v5  ;;  %v4747_v6 = vpop.f32.mrf.mxu2  ;;  %v22000_v23 = vshll.u32 %v19431_v42, 16  ;;  %v4538_v27 = vsel %vm4522_vm12, %v4410_v4, 0.0  ;;  %v6540_v37 = vsel %vm6524_vm15, 1, %v17182_v32 }
 0x2ef   : > { %v19485_v29 = vsel %vm823_vm2, %v19409_v25, %v9067_v12  ;;  %v15957_v25 = vld [vmem:[%s21974_s4 + $0x60] sm:$0xff]  ;;  %v21981_v4 = vshll.u32 %v19488_v24, 16 }
 0x2f0   : > { %v4395_v55 = vadd.f32 %v17155_v31, %v4375_v7  ;;  %v5107_v46 = vpop.f32.mrf.mxu0  ;;  %v5942_v59 = vrot.slane %v22000_v23, 1  ;;  %v15966_v31 = vld [vmem:[%s21974_s4 + $0xa8] sm:$0xff]  ;;  %22036 = vst [vmem:[#allocation5_spill] sm:$0xff] %v19485_v29  ;;  %v15934_v7 = vld [vmem:[%s21972_s2 + $0x220] sm:$0xff]  ;;  %6823 = vmatpush.bf16.msrb.mxu3 %v15957_v25 }
 0x2f1   : > { %v4935_v35 = vpop.f32.mrf.mxu3  ;;  %v5384_v13 = vpop.f32.mrf.mxu1  ;;  %7181 = vmatpush.bf16.msrb.mxu1 %v15966_v31  ;;  %6395 = vmatpush.bf16.msrb.mxu2 %v15934_v7  ;;  %v9070_v14 = vrot.slane %v21981_v4, 4  ;;  %v15933_v31 = vld [vmem:[%s21972_s2 + $0x218] sm:$0xff] }
 0x2f2   : > { %v4936_v8 = vadd.f32 %v4935_v35, %v4747_v6  ;;  %v4411_v61 = vmax.f32 %v4395_v55, 0.0  ;;  %v21982_v6 = vshrl.u32 %v19488_v24, 16 }
 0x2f4   : > { %v5145_v15 = vadd.f32 %v5105_v18, %v4936_v8  ;;  %v4539_v38 = vsel %vm4523_vm13, %v4411_v61, 0.0  ;;  %v22002_v8 = vshrl.u32 %v19431_v42, 16  ;;  %v5679_v61 = vshrl.u32 %v19440_v45, 16 }
 0x2f5   : > { %v16490_v11 = vpack.c.bf16 %v4539_v38, %v4538_v27  ;;  %6587 = vperm.xlu2 %17148, %v6540_v37   ;;  %v9069_v22 = vrot.slane %v21982_v6, 3  ;;  %v19546_v37 = vld [vmem:[#allocation2 + $0xb0] sm:$0xff]  ;;  %6396 = vmatpush.bf16.msrb.mxu2 %v15933_v31 }
 0x2f6   : > { %v19462_v40 = vadd.f32 %v5382_v41, %v5145_v15  ;;  %v4749_v18 = vpop.f32.mrf.mxu2  ;;  %v5943_v41 = vsel %vm1491_vm3, %v5938_v9, %v5942_v59  ;;  %v15949_v15 = vld [vmem:[%s21974_s4 + $0x20] sm:$0xff]  ;;  %v5946_v27 = vor.u32 %v22002_v8, %v5942_v59  ;;  %v5681_v9 = vor.u32 %v5679_v61, %v5677_v53  ;;  %v16744_v6 = vld [vmem:[#allocation2 + $0xb0] sm:$0xff]  }
 0x2f7   : > { %16739 = vst [vmem:[#allocation3 + $0x88] sm:$0xff] %v16490_v11   ;;  %7011 = vmatpush.bf16.msrb.mxu0 %v15949_v15  ;;  %v9071_v54 = vor.u32 %v9070_v14, %v9069_v22  ;;  %v6139_v53 = vsel %vm1968_vm6, %v6136_v56, %v6138_v52  ;;  %v15956_v56 = vld [vmem:[%s21974_s4 + $0x58] sm:$0xff]  ;;  %v21998_v61 = vshrl.u32 %v19490_v17, 16  ;;  %v5691_v15 = vshll.u32 %v19546_v37, 16 }
 0x2f8   : > { %v5110_v30 = vpop.f32.mrf.mxu0  ;;  %6824 = vmatpush.bf16.msrb.mxu3 %v15956_v56  ;;  %v15948_v14 = vld [vmem:[%s21974_s4 + $0x18] sm:$0xff]  ;;  %v16743_v56 = vld [vmem:[#allocation2 + $0xa8] sm:$0xff]  }
 0x2f9   : > { %v4937_v28 = vpop.f32.mrf.mxu3  ;;  %v5387_v0 = vpop.f32.mrf.mxu1  ;;  %v19524_v49 = vsel %vm823_vm2, %v9067_v12, %v9071_v54  ;;  %v19534_v12 = vld [vmem:[#allocation3 + $0x64] sm:$0xff] }
 0x2fa   : > { %v4938_v21 = vadd.f32 %v4937_v28, %v4749_v18  ;;  %22037 = vst [vmem:[#allocation6_spill] sm:$0xff] %v19524_v49  ;;  %v21979_v25 = vshrl.u32 %v19534_v12, 16 }
 0x2fb   : > { %5531 = vmatmul.bf16.gmra.mxu2 %v19345_v44  ;;  %6061 = vmatmul.bf16.gmra.mxu0 %v5943_v41  ;;  %v19501_v44 = vld [vmem:[#allocation2 + $0xa8] sm:$0xff] }
 0x2fc   : > { %v5146_v5 = vadd.f32 %v5107_v46, %v4938_v21  ;;  %6219 = vmatmul.bf16.gmra.mxu1 %v6137_v47  ;;  %v21995_v46 = vshll.u32 %v19490_v17, 16  ;;  %v5683_v33 = vshll.u32 %v19501_v44, 16  ;;  %v15965_v47 = vld [vmem:[%s21974_s4 + $0xa0] sm:$0xff]  ;;  %7012 = vmatpush.bf16.msrb.mxu0 %v15948_v14 }
 0x2fd   : > { %7182 = vmatpush.bf16.msrb.mxu1 %v15965_v47 }
 0x2fe   : > { %5796 = vmatmul.bf16.gmra.mxu3 %v5678_v34  ;;  %v19499_v63 = vadd.f32 %v5384_v13, %v5146_v5  ;;  %v4752_v58 = vpop.f32.mrf.mxu2  ;;  %v5950_v38 = vrot.slane %v21995_v46, 1  ;;  %v5685_v11 = vrot.slane %v5683_v33, 1  ;;  %v19536_v5 = vld [vmem:[#allocation2 + $0xb8] sm:$0xff] }
 0x2ff   : > { %v21993_v33 = vshll.u32 %v19536_v5, 16 }
 0x300   : > { %v5112_v55 = vpop.f32.mrf.mxu0  ;;  %v5951_v59 = vsel %vm1491_vm3, %v5946_v27, %v5950_v38  ;;  %v5686_v34 = vsel %vm1491_vm3, %v5681_v9, %v5685_v11  ;;  %v9073_v27 = vrot.slane %v21979_v25, 3 }
 0x301   : > { %v4940_v32 = vpop.f32.mrf.mxu3  ;;  %v5389_v13 = vpop.f32.mrf.mxu1 }
 0x302   : > { %v4941_v35 = vadd.f32 %v4940_v32, %v4752_v58  ;;  %v21977_v58 = vshll.u32 %v19534_v12, 16 }
 0x304   : > { %v5147_v36 = vadd.f32 %v5110_v30, %v4941_v35  ;;  %v16742_v30 = vld [vmem:[#allocation2 + $0xa0] sm:$0xff]   ;;  %v9074_v9 = vrot.slane %v21977_v58, 4 }
 0x306   : > { %v19520_v45 = vadd.f32 %v5387_v0, %v5147_v36  ;;  %v4754_v18 = vpop.f32.mrf.mxu2 }
 0x308   : > { %v5115_v21 = vpop.f32.mrf.mxu0 }
 0x309   : > { %v4942_v10 = vpop.f32.mrf.mxu3  ;;  %v5392_v41 = vpop.f32.mrf.mxu1 }
 0x30a   : > { %v4943_v28 = vadd.f32 %v4942_v10, %v4754_v18  ;;  %v5954_v18 = vor.u32 %v21998_v61, %v5950_v38  ;;  %v5958_v10 = vrot.slane %v21993_v33, 1 }
 0x30b   : > { %5536 = vmatmul.bf16.gmra.mxu2 %v16742_v30  ;;  %6066 = vmatmul.bf16.gmra.mxu0 %v5951_v59  ;;  %v5693_v30 = vrot.slane %v5691_v15, 1  ;;  %v6140_v59 = vrot.slane %v19536_v5, 1  ;;  %v15932_v15 = vld [vmem:[%s21972_s2 + $0x210] sm:$0xff] }
 0x30c   : > { %v5148_v0 = vadd.f32 %v5112_v55, %v4943_v28  ;;  %6224 = vmatmul.bf16.gmra.mxu1 %v6139_v53  ;;  %v9075_v28 = vor.u32 %v9074_v9, %v9073_v27  ;;  %v5959_v38 = vsel %vm1491_vm3, %v5954_v18, %v5958_v10  ;;  %6397 = vmatpush.bf16.msrb.mxu2 %v15932_v15 }
 0x30e   : > { %5801 = vmatmul.bf16.gmra.mxu3 %v5686_v34  ;;  %v19544_v19 = vadd.f32 %v5389_v13, %v5148_v0  ;;  %v4757_v7 = vpop.f32.mrf.mxu2  ;;  %v5687_v13 = vshrl.u32 %v19501_v44, 16  ;;  %v19569_v53 = vsel %vm823_vm2, %v9071_v54, %v9075_v28  ;;  %v19577_v54 = vld [vmem:[#allocation3 + $0x6c] sm:$0xff] }
 0x30f   : > { %22038 = vst [vmem:[#allocation7_spill] sm:$0xff] %v19569_v53  ;;  %v21978_v27 = vshrl.u32 %v19577_v54, 16  ;;  %v21980_v9 = vshll.u32 %v19577_v54, 16 }
 0x310   : > { %v5117_v55 = vpop.f32.mrf.mxu0 }
 0x311   : > { %v4945_v32 = vpop.f32.mrf.mxu3  ;;  %v5394_v36 = vpop.f32.mrf.mxu1 }
 0x312   : > { %v4946_v35 = vadd.f32 %v4945_v32, %v4757_v7 }
 0x314   : > { %v5149_v22 = vadd.f32 %v5115_v21, %v4946_v35  ;;  %v5689_v21 = vor.u32 %v5687_v13, %v5685_v11  ;;  %v15964_v11 = vld [vmem:[%s21974_s4 + $0x98] sm:$0xff]  ;;  %v19579_v13 = vld [vmem:[#allocation2 + $0xc0] sm:$0xff] }
 0x315   : > { %7183 = vmatpush.bf16.msrb.mxu1 %v15964_v11  ;;  %v9078_v11 = vrot.slane %v21980_v9, 4 }
 0x316   : > { %v19565_v44 = vadd.f32 %v5392_v41, %v5149_v22  ;;  %v4759_v34 = vpop.f32.mrf.mxu2  ;;  %v5694_v32 = vsel %vm1491_vm3, %v5689_v21, %v5693_v30  ;;  %v6141_v41 = vsel %vm1968_vm6, %v6138_v52, %v6140_v59  ;;  %v15955_v52 = vld [vmem:[%s21974_s4 + $0x50] sm:$0xff]  ;;  %v19589_v22 = vld [vmem:[#allocation2 + $0xb8] sm:$0xff] }
 0x317   : > { %6825 = vmatpush.bf16.msrb.mxu3 %v15955_v52 }
 0x318   : > { %v5120_v31 = vpop.f32.mrf.mxu0 }
 0x319   : > { %v4947_v0 = vpop.f32.mrf.mxu3  ;;  %v5397_v7 = vpop.f32.mrf.mxu1 }
 0x31a   : > { %v4948_v47 = vadd.f32 %v4947_v0, %v4759_v34  ;;  %v21994_v0 = vshrl.u32 %v19536_v5, 16 }
 0x31b   : > { %5541 = vmatmul.bf16.gmra.mxu2 %v16743_v56  ;;  %6071 = vmatmul.bf16.gmra.mxu0 %v5959_v38  ;;  %v5699_v38 = vshll.u32 %v19589_v22, 16 }
 0x31c   : > { %v5150_v35 = vadd.f32 %v5117_v55, %v4948_v47  ;;  %6229 = vmatmul.bf16.gmra.mxu1 %v6141_v41  ;;  %v21990_v47 = vshll.u32 %v19579_v13, 16  ;;  %v15947_v41 = vld [vmem:[%s21974_s4 + $0x10] sm:$0xff]  ;;  %v5962_v15 = vor.u32 %v21994_v0, %v5958_v10  ;;  %v5864_v0 = vld [vmem:[#allocation2 + $0xd8] sm:$0x1] }
 0x31d   : > { %7013 = vmatpush.bf16.msrb.mxu0 %v15947_v41 }
 0x31e   : > { %5806 = vmatmul.bf16.gmra.mxu3 %v5694_v32  ;;  %v19587_v55 = vadd.f32 %v5394_v36, %v5150_v35  ;;  %v4762_v14 = vpop.f32.mrf.mxu2  ;;  %v5695_v36 = vshrl.u32 %v19546_v37, 16  ;;  %v9077_v35 = vrot.slane %v21978_v27, 3  ;;  %v5966_v52 = vrot.slane %v21990_v47, 1  ;;  %v16745_v47 = vld [vmem:[#allocation2 + $0xb8] sm:$0xff]  }
 0x320   : > { %v5122_v34 = vpop.f32.mrf.mxu0  ;;  %v5967_v10 = vsel %vm1491_vm3, %v5962_v15, %v5966_v52 }
 0x321   : > { %v4950_v18 = vpop.f32.mrf.mxu3  ;;  %v5399_v56 = vpop.f32.mrf.mxu1 }
 0x322   : > { %v4951_v21 = vadd.f32 %v4950_v18, %v4762_v14  ;;  %v5697_v14 = vor.u32 %v5695_v36, %v5693_v30  ;;  %v5701_v18 = vrot.slane %v5699_v38, 1  ;;  %v15963_v30 = vld [vmem:[%s21974_s4 + $0x90] sm:$0xff] }
 0x323   : > { %7184 = vmatpush.bf16.msrb.mxu1 %v15963_v30  ;;  %v15946_v30 = vld [vmem:[%s21974_s4 + $0x8] sm:$0xff] }
 0x324   : > { %v5151_v32 = vadd.f32 %v5120_v31, %v4951_v21  ;;  %v9079_v31 = vor.u32 %v9078_v11, %v9077_v35  ;;  %v6142_v21 = vrot.slane %v19579_v13, 1  ;;  %v5702_v41 = vsel %vm1491_vm3, %v5697_v14, %v5701_v18  ;;  %7014 = vmatpush.bf16.msrb.mxu0 %v15946_v30 }
 0x325   : > { %v21992_v14 = vshrl.u32 %v19579_v13, 16 }
 0x326   : > { %v19608_v37 = vadd.f32 %v5397_v7, %v5151_v32  ;;  %v4764_v58 = vpop.f32.mrf.mxu2  ;;  %v19612_v27 = vsel %vm823_vm2, %v9075_v28, %v9079_v31  ;;  %v6143_v7 = vsel %vm1968_vm6, %v6140_v59, %v6142_v21  ;;  %v19620_v28 = vld [vmem:[#allocation3 + $0x74] sm:$0xff]  ;;  %v15954_v59 = vld [vmem:[%s21974_s4 + $0x48] sm:$0xff] }
 0x327   : > { %22039 = vst [vmem:[#allocation8_spill] sm:$0xff] %v19612_v27  ;;  %6826 = vmatpush.bf16.msrb.mxu3 %v15954_v59  ;;  %v21987_v36 = vshrl.u32 %v19620_v28, 16  ;;  %v21988_v38 = vshll.u32 %v19620_v28, 16 }
 0x328   : > { %v5125_v4 = vpop.f32.mrf.mxu0  ;;  %22040 = vst [vmem:[#allocation9_spill] sm:$0xff] %v19620_v28 }
 0x329   : > { %v4952_v25 = vpop.f32.mrf.mxu3  ;;  %v5402_v48 = vpop.f32.mrf.mxu1  ;;  %v9082_v59 = vrot.slane %v21988_v38, 4 }
 0x32a   : > { %v4953_v9 = vadd.f32 %v4952_v25, %v4764_v58  ;;  %v19622_v25 = vld [vmem:[#allocation2 + $0xc8] sm:$0xff] }
 0x32b   : > { %5546 = vmatmul.bf16.gmra.mxu2 %v16744_v6  ;;  %6076 = vmatmul.bf16.gmra.mxu0 %v5967_v10  ;;  %v15931_v58 = vld [vmem:[%s21972_s2 + $0x208] sm:$0xff]  ;;  %v21991_v10 = vshll.u32 %v19622_v25, 16  ;;  %v6144_v51 = vrot.slane %v19622_v25, 1 }
 0x32c   : > { %v5152_v32 = vadd.f32 %v5122_v34, %v4953_v9  ;;  %6234 = vmatmul.bf16.gmra.mxu1 %v6143_v7  ;;  %v19632_v34 = vld [vmem:[#allocation2 + $0xc0] sm:$0xff]  ;;  %6398 = vmatpush.bf16.msrb.mxu2 %v15931_v58  ;;  %v9081_v58 = vrot.slane %v21987_v36, 3 }
 0x32d   : > { %v5707_v7 = vshll.u32 %v19632_v34, 16 }
 0x32e   : > { %5811 = vmatmul.bf16.gmra.mxu3 %v5702_v41  ;;  %v19630_v9 = vadd.f32 %v5399_v56, %v5152_v32  ;;  %v4767_v6 = vpop.f32.mrf.mxu2  ;;  %v5703_v56 = vshrl.u32 %v19589_v22, 16 }
 0x32f   : > { %v5709_v39 = vrot.slane %v5707_v7, 1 }
 0x330   : > { %v5127_v15 = vpop.f32.mrf.mxu0 }
 0x331   : > { %v4955_v35 = vpop.f32.mrf.mxu3  ;;  %v5404_v41 = vpop.f32.mrf.mxu1 }
 0x332   : > { %v4956_v11 = vadd.f32 %v4955_v35, %v4767_v6  ;;  %v5970_v6 = vor.u32 %v21992_v14, %v5966_v52  ;;  %v5974_v35 = vrot.slane %v21991_v10, 1 }
 0x334   : > { %v5153_v32 = vadd.f32 %v5125_v4, %v4956_v11  ;;  %v19653_v4 = vor.u32 %v9082_v59, %v9081_v58  ;;  %v5705_v11 = vor.u32 %v5703_v56, %v5701_v18  ;;  %v5975_v10 = vsel %vm1491_vm3, %v5970_v6, %v5974_v35  ;;  %v15962_v56 = vld [vmem:[%s21974_s4 + $0x88] sm:$0xff] }
 0x335   : > { %7185 = vmatpush.bf16.msrb.mxu1 %v15962_v56  ;;  %v5711_v59 = vshrl.u32 %v19632_v34, 16  ;;  %v21996_v6 = vshrl.u32 %v19622_v25, 16 }
 0x336   : > { %v19651_v22 = vadd.f32 %v5402_v48, %v5153_v32  ;;  %v4769_v20 = vpop.f32.mrf.mxu2  ;;  %v19658_v36 = vsel %vm823_vm2, %v9079_v31, %v19653_v4  ;;  %v5710_v48 = vsel %vm1491_vm3, %v5705_v11, %v5709_v39  ;;  %v6145_v32 = vsel %vm1968_vm6, %v6142_v21, %v6144_v51  ;;  %v19666_v31 = vld [vmem:[#allocation2 + $0xd0] sm:$0xff]  ;;  %v19674_v21 = vld [vmem:[#allocation2 + $0xc8] sm:$0xff] }
 0x337   : > { %22041 = vst [vmem:[#allocation10_spill] sm:$0xff] %v19658_v36  ;;  %v21997_v11 = vshll.u32 %v19666_v31, 16  ;;  %v5978_v34 = vor.u32 %v21996_v6, %v5974_v35  ;;  %v22005_v33 = vrot.slane %v19666_v31, 1 }
 0x338   : > { %v5130_v52 = vpop.f32.mrf.mxu0 }
 0x339   : > { %v4957_v38 = vpop.f32.mrf.mxu3  ;;  %v5407_v30 = vpop.f32.mrf.mxu1 }
 0x33a   : > { %v4958_v2 = vadd.f32 %v4957_v38, %v4769_v20  ;;  %v15930_v20 = vld [vmem:[%s21972_s2 + $0x200] sm:$0xff] }
 0x33b   : > { %5551 = vmatmul.bf16.gmra.mxu2 %v16745_v47  ;;  %6081 = vmatmul.bf16.gmra.mxu0 %v5975_v10  ;;  %v15953_v38 = vld [vmem:[%s21974_s4 + $0x40] sm:$0xff] }
 0x33c   : > { %v5154_v18 = vadd.f32 %v5127_v15, %v4958_v2  ;;  %6239 = vmatmul.bf16.gmra.mxu1 %v6145_v32  ;;  %v19678_v15 = vld [vmem:[#allocation3 + $0x7c] sm:$0xff]  ;;  %6399 = vmatpush.bf16.msrb.mxu2 %v15930_v20  ;;  %v5715_v32 = vshll.u32 %v19674_v21, 16 }
 0x33d   : > { %22042 = vst [vmem:[#allocation11_spill] sm:$0xff] %v19678_v15  ;;  %6827 = vmatpush.bf16.msrb.mxu3 %v15953_v38  ;;  %v15945_v20 = vld [vmem:[%s21974_s4] sm:$0xff]  ;;  %v5713_v38 = vor.u32 %v5711_v59, %v5709_v39  ;;  %v5599_v59 = vld [vmem:[#allocation2 + $0xd0] sm:$0x1] }
 0x33e   : > { %5816 = vmatmul.bf16.gmra.mxu3 %v5710_v48  ;;  %v19676_v2 = vadd.f32 %v5404_v41, %v5154_v18  ;;  %v4772_v47 = vpop.f32.mrf.mxu2  ;;  %v21999_v41 = vshrl.u32 %v19678_v15, 16  ;;  %v22001_v18 = vshll.u32 %v19678_v15, 16  ;;  %7015 = vmatpush.bf16.msrb.mxu0 %v15945_v20  ;;  %v5717_v14 = vrot.slane %v5715_v32, 1  ;;  %v16746_v20 = vld [vmem:[#allocation2 + $0xc0] sm:$0xff]  }
 0x33f   : > { %v5914_v32 = vunpack.c.l.b16 %v5864_v0  ;;  %v5649_v23 = vunpack.c.l.b16 %v5599_v59 }
 0x340   : > { %v5132_v58 = vpop.f32.mrf.mxu0  ;;  %v5718_v61 = vsel %vm1491_vm3, %v5713_v38, %v5717_v14  ;;  %v15984_v38 = vld [vmem:[%s21974_s4 + $0x138] sm:$0xff] }
 0x341   : > { %v4960_v10 = vpop.f32.mrf.mxu3  ;;  %v5409_v48 = vpop.f32.mrf.mxu1  ;;  %v5923_v0 = vpack.c.b16 %v5914_v32, %v5914_v32  ;;  %7603 = vmatpush.bf16.msra.mxu3 %v15984_v38  ;;  %v6654_v32 = vld [vmem:[#allocation3 + $0x8] sm:$0xf] }
 0x342   : > { %v4961_v7 = vadd.f32 %v4960_v10, %v4772_v47  ;;  %v5982_v47 = vrot.slane %v21997_v11, 1 }
 0x343   : > { %v6148_v62 = vrot.slane %v5923_v0, 1 }
 0x344   : > { %v5155_v56 = vadd.f32 %v5130_v52, %v4961_v7  ;;  %v9085_v52 = vrot.slane %v21999_v41, 3  ;;  %v9086_v7 = vrot.slane %v22001_v18, 4  ;;  %v6147_v41 = vsel %vm1968_vm6, %v6144_v51, %v22005_v33  ;;  %v15976_v51 = vld [vmem:[%s21974_s4 + $0xf8] sm:$0xff] }
 0x345   : > { %7457 = vmatpush.bf16.msra.mxu2 %v15976_v51  ;;  %v6722_v51 = vunpack.c.l.b16 %v6654_v32  ;;  %v6292_v32 = vshrl.u32 %v19382_v1, 16 }
 0x346   : > { %v19693_v10 = vadd.f32 %v5407_v30, %v5155_v56  ;;  %v4774_v39 = vpop.f32.mrf.mxu2  ;;  %v19700_v35 = vor.u32 %v9086_v7, %v9085_v52  ;;  %v5983_v30 = vsel %vm1491_vm3, %v5978_v34, %v5982_v47 }
 0x348   : > { %22043 = vst [vmem:[#allocation12_spill] sm:$0xff] %v19700_v35  ;;  %v5135_v11 = vpop.f32.mrf.mxu0  ;;  %v19710_v18 = vsel %vm823_vm2, %v19653_v4, %v19700_v35 }
 0x349   : > { %v4962_v46 = vpop.f32.mrf.mxu3  ;;  %v5412_v56 = vpop.f32.mrf.mxu1  ;;  %22044 = vst [vmem:[#allocation13_spill] sm:$0xff] %v19710_v18 }
 0x34a   : > { %v4963_v6 = vadd.f32 %v4962_v46, %v4774_v39  ;;  %v15961_v46 = vld [vmem:[%s21974_s4 + $0x80] sm:$0xff]  ;;  %v5988_v39 = vshll.u32 %v5923_v0, 16 }
 0x34b   : > { %5556 = vmatmul.bf16.gmra.mxu2 %v16746_v20  ;;  %6086 = vmatmul.bf16.gmra.mxu0 %v5983_v30  ;;  %v5719_v20 = vshrl.u32 %v19674_v21, 16  ;;  %v6870_v21 = vunpack.c.l.b16 %v6653_v50  ;;  %v17156_v50 = vld [vmem:[#allocation2 + $0xc8] sm:$0xff] }
 0x34c   : > { %v5156_v52 = vadd.f32 %v5132_v58, %v4963_v6  ;;  %6244 = vmatmul.bf16.gmra.mxu1 %v6147_v41  ;;  %v5658_v58 = vpack.c.b16 %v5649_v23, %v5649_v23  ;;  %v22007_v41 = vshrl.u32 %v19666_v31, 16  ;;  %v16000_v23 = vld [vmem:[%s21974_s4 + $0x178] sm:$0xff] }
 0x34d   : > { %7186 = vmatpush.bf16.msrb.mxu1 %v15961_v46  ;;  %v6686_v46 = vld [vmem:[#allocation3 + $0x4] sm:$0x8]  ;;  %7869 = vmatpush.bf16.msra.mxu0 %v16000_v23  ;;  %v6295_v23 = vshll.u32 %v19382_v1, 16  ;;  %v22046_v1 = vshrl.u32 %v19361_v26, 16 }
 0x34e   : > { %5821 = vmatmul.bf16.gmra.mxu3 %v5718_v61  ;;  %v19721_v4 = vadd.f32 %v5409_v48, %v5156_v52  ;;  %v4777_v6 = vpop.f32.mrf.mxu2  ;;  %v5723_v30 = vshll.u32 %v5658_v58, 16  ;;  %v5986_v48 = vor.u32 %v22007_v41, %v5982_v47  ;;  %v5990_v52 = vrot.slane %v5988_v39, 1 }
 0x34f   : > { %v22045_v39 = vrot.slane %v19666_v31, 1 }
 0x350   : > { %v5137_v61 = vpop.f32.mrf.mxu0  ;;  %v5991_v18 = vsel %vm1491_vm3, %v5986_v48, %v5990_v52 }
 0x351   : > { %v4965_v34 = vpop.f32.mrf.mxu3  ;;  %v5414_v59 = vpop.f32.mrf.mxu1 }
 0x352   : > { %v4966_v7 = vadd.f32 %v4965_v34, %v4777_v6  ;;  %v5721_v6 = vor.u32 %v5719_v20, %v5717_v14  ;;  %v5725_v34 = vrot.slane %v5723_v30, 1  ;;  %v19737_v20 = vld [vmem:[#allocation3 + $0xc] sm:$0xff]  ;;  %v16015_v30 = vld [vmem:[%s21974_s4 + $0x1b8] sm:$0xff] }
 0x353   : > { %8135 = vmatpush.bf16.msra.mxu1 %v16015_v30 }
 0x354   : > { %v5157_v8 = vadd.f32 %v5135_v11, %v4966_v7  ;;  %v6721_v7 = vunpack.c.l.b16 %v6686_v46  ;;  %v5726_v47 = vsel %vm1491_vm3, %v5721_v6, %v5725_v34  ;;  %v6881_v46 = vshrl.u32 %v19737_v20, 16 }
 0x355   : > { %v6299_v6 = vrot.slane %v22046_v1, 1 }
 0x356   : > { %v19730_v38 = vadd.f32 %v5412_v56, %v5157_v8  ;;  %v4779_v58 = vpop.f32.mrf.mxu2  ;;  %v6149_v8 = vsel %vm1968_vm6, %v22045_v39, %v6148_v62  ;;  %v6871_v56 = vpack.c.b16 %v6722_v51, %v6870_v21  ;;  %v6738_v0 = vpack.c.b16 %v6722_v51, %v6721_v7  ;;  %v15975_v62 = vld [vmem:[%s21974_s4 + $0xf0] sm:$0xff] }
 0x357   : > { %v6884_v51 = vshll.u32 %v19737_v20, 16  ;;  %7458 = vmatpush.bf16.msra.mxu2 %v15975_v62  ;;  %v22047_v39 = vshll.u32 %v19361_v26, 16  ;;  %v6883_v41 = vrot.slane %v6881_v46, 2  ;;  %v7086_v53 = vrot.slane %v6881_v46, 3 }
 0x358   : > { %v5140_v35 = vpop.f32.mrf.mxu0  ;;  %v6876_v52 = vshll.u32 %v6871_v56, 16  ;;  %v7079_v21 = vshrl.u32 %v6738_v0, 16 }
 0x359   : > { %v4967_v11 = vpop.f32.mrf.mxu3  ;;  %v5417_v36 = vpop.f32.mrf.mxu1  ;;  %v6886_v62 = vrot.slane %v6884_v51, 3  ;;  %v7087_v1 = vrot.slane %v6884_v51, 4 }
 0x35a   : > { %v4968_v33 = vadd.f32 %v4967_v11, %v4779_v58  ;;  %v7082_v58 = vshll.u32 %v6738_v0, 16  ;;  %v6878_v30 = vrot.slane %v6876_v52, 3  ;;  %v6747_v52 = vrot.slane %v6738_v0, 3 }
 0x35b   : > { %5561 = vmatmul.bf16.gmra.mxu2 %v17156_v50  ;;  %6091 = vmatmul.bf16.gmra.mxu0 %v5991_v18 }
 0x35c   : > { %v5158_v14 = vadd.f32 %v5137_v61, %v4968_v33  ;;  %6249 = vmatmul.bf16.gmra.mxu1 %v6149_v8  ;;  %v15983_v33 = vld [vmem:[%s21974_s4 + $0x130] sm:$0xff]  ;;  %v6873_v61 = vshrl.u32 %v6871_v56, 16  ;;  %v6300_v8 = vrot.slane %v22047_v39, 2  ;;  %v7084_v27 = vrot.slane %v7082_v58, 4 }
 0x35d   : > { %7604 = vmatpush.bf16.msra.mxu3 %v15983_v33  ;;  %v7081_v33 = vrot.slane %v7079_v21, 3  ;;  %v7088_v58 = vor.u32 %v7087_v1, %v7086_v53  ;;  %v16014_v53 = vld [vmem:[%s21974_s4 + $0x1b0] sm:$0xff] }
 0x35e   : > { %5826 = vmatmul.bf16.gmra.mxu3 %v5726_v47  ;;  %v19750_v18 = vadd.f32 %v5414_v59, %v5158_v14  ;;  %v4782_v48 = vpop.f32.mrf.mxu2  ;;  %v6294_v59 = vrot.slane %v6292_v32, 1  ;;  %v6297_v47 = vrot.slane %v6295_v23, 2  ;;  %v6875_v14 = vrot.slane %v6873_v61, 2  ;;  %8136 = vmatpush.bf16.msra.mxu1 %v16014_v53 }
 0x35f   : > { %v6301_v32 = vor.u32 %v6300_v8, %v6299_v6  ;;  %v6887_v61 = vor.u32 %v6886_v62, %v6883_v41  ;;  %v7085_v21 = vor.u32 %v7084_v27, %v7081_v33  ;;  %v15974_v27 = vld [vmem:[%s21974_s4 + $0xe8] sm:$0xff]  ;;  %v22049_v33 = vshll.u32 %v19431_v42, 16 }
 0x360   : > { %v5142_v7 = vpop.f32.mrf.mxu0  ;;  %v6879_v39 = vor.u32 %v6878_v30, %v6875_v14  ;;  %7459 = vmatpush.bf16.msra.mxu2 %v15974_v27  ;;  %v22048_v30 = vshrl.u32 %v19431_v42, 16 }
 0x361   : > { %v4970_v34 = vpop.f32.mrf.mxu3  ;;  %v5419_v56 = vpop.f32.mrf.mxu1  ;;  %v7089_v41 = vsel %vm823_vm2, %v7085_v21, %v7088_v58  ;;  %v6304_v1 = vrot.slane %v22049_v33, 2 }
 0x362   : > { %v4971_v11 = vadd.f32 %v4970_v34, %v4782_v48  ;;  %v15999_v48 = vld [vmem:[%s21974_s4 + $0x170] sm:$0xff]  ;;  %v6298_v34 = vor.u32 %v6297_v47, %v6294_v59  ;;  %v6888_v6 = vsel %vm616_vm1, %v6879_v39, %v6887_v61  ;;  %v6303_v62 = vrot.slane %v22048_v30, 1 }
 0x363   : > { %7870 = vmatpush.bf16.msra.mxu0 %v15999_v48 }
 0x364   : > { %v5159_v50 = vadd.f32 %v5140_v35, %v4971_v11  ;;  %v6748_v11 = vrot.slane %v19737_v20, 3  ;;  %v6302_v49 = vsel %vm2128_vm5, %v6298_v34, %v6301_v32  ;;  %v15982_v20 = vld [vmem:[%s21974_s4 + $0x128] sm:$0xff] }
 0x365   : > { %7605 = vmatpush.bf16.msra.mxu3 %v15982_v20 }
 0x366   : > { %v19761_v23 = vadd.f32 %v5417_v36, %v5159_v50  ;;  %v4784_v26 = vpop.f32.mrf.mxu2  ;;  %v19766_v36 = vld [vmem:[#allocation3 + $0x14] sm:$0xff]  ;;  %v6749_v59 = vsel %vm490_vm0, %v6747_v52, %v6748_v11  ;;  %v15998_v52 = vld [vmem:[%s21974_s4 + $0x168] sm:$0xff] }
 0x367   : > { %v6893_v47 = vshll.u32 %v19766_v36, 16  ;;  %7871 = vmatpush.bf16.msra.mxu0 %v15998_v52 }
 0x368   : > { %v6057_v51 = vpop.f32.mrf.mxu0 }
 0x369   : > { %v4972_v35 = vpop.f32.mrf.mxu3  ;;  %v6215_v29 = vpop.f32.mrf.mxu1  ;;  %v6895_v34 = vrot.slane %v6893_v47, 3 }
 0x36a   : > { %v4973_v46 = vadd.f32 %v4972_v35, %v4784_v26  ;;  %v7091_v35 = vrot.slane %v6893_v47, 4  ;;  %v19797_v47 = vld [vmem:[#allocation3 + $0x1c] sm:$0xff] }
 0x36b   : > { %6400 = vmatmul.bf16.vlgmr.msrb.gmra.mxu2 %v6302_v49  ;;  %7016 = vmatmul.bf16.vlgmr.msrb.gmra.mxu0 %v6888_v6 }
 0x36c   : > { %v5160_v60 = vadd.f32 %v5142_v7, %v4973_v46  ;;  %7187 = vmatmul.bf16.vlgmr.msrb.gmra.mxu1 %v7089_v41  ;;  %v6890_v7 = vshrl.u32 %v19766_v36, 16  ;;  %v6750_v41 = vrot.slane %v19766_v36, 3  ;;  %v16013_v36 = vld [vmem:[%s21974_s4 + $0x1a8] sm:$0xff] }
 0x36d   : > { %8137 = vmatpush.bf16.msra.mxu1 %v16013_v36 }
 0x36e   : > { %6828 = vmatmul.bf16.vlgmr.msrb.gmra.mxu3 %v6749_v59  ;;  %v19779_v49 = vadd.f32 %v5419_v56, %v5160_v60  ;;  %v5527_v0 = vpop.f32.mrf.mxu2  ;;  %v6892_v48 = vrot.slane %v6890_v7, 2  ;;  %v7090_v39 = vrot.slane %v6890_v7, 3 }
 0x36f   : > { %v5567_v8 = vadd.f32 %v5527_v0, %v19462_v40  ;;  %v6305_v40 = vor.u32 %v6304_v1, %v6303_v62  ;;  %v22050_v1 = vshrl.u32 %v19490_v17, 16 }
 0x370   : > { %v6059_v50 = vpop.f32.mrf.mxu0  ;;  %v6896_v6 = vor.u32 %v6895_v34, %v6892_v48  ;;  %v7092_v53 = vor.u32 %v7091_v35, %v7090_v39  ;;  %v22051_v48 = vshll.u32 %v19490_v17, 16 }
 0x371   : > { %v5792_v14 = vpop.f32.mrf.mxu3  ;;  %v6217_v56 = vpop.f32.mrf.mxu1 }
 0x372   : > { %v5832_v60 = vadd.f32 %v5792_v14, %v5567_v8  ;;  %v6897_v7 = vsel %vm616_vm1, %v6887_v61, %v6896_v6  ;;  %v15981_v61 = vld [vmem:[%s21974_s4 + $0x120] sm:$0xff]  ;;  %v6308_v34 = vrot.slane %v22051_v48, 2  ;;  %v22052_v48 = vshrl.u32 %v19536_v5, 16 }
 0x373   : > { %7606 = vmatpush.bf16.msra.mxu3 %v15981_v61 }
 0x374   : > { %v6097_v26 = vadd.f32 %v6057_v51, %v5832_v60  ;;  %v6306_v51 = vsel %vm2128_vm5, %v6301_v32, %v6305_v40  ;;  %v15973_v32 = vld [vmem:[%s21974_s4 + $0xe0] sm:$0xff]  ;;  %v6307_v60 = vrot.slane %v22050_v1, 1 }
 0x375   : > { %7460 = vmatpush.bf16.msra.mxu2 %v15973_v32 }
 0x376   : > { %v19791_v21 = vadd.f32 %v6215_v29, %v6097_v26  ;;  %v5529_v46 = vpop.f32.mrf.mxu2  ;;  %v6751_v29 = vsel %vm490_vm0, %v6748_v11, %v6750_v41 }
 0x377   : > { %v5568_v42 = vadd.f32 %v5529_v46, %v19499_v63  ;;  %v7093_v63 = vsel %vm823_vm2, %v7088_v58, %v7092_v53  ;;  %v6899_v58 = vshrl.u32 %v19797_v47, 16 }
 0x378   : > { %v6062_v27 = vpop.f32.mrf.mxu0 }
 0x379   : > { %v5794_v59 = vpop.f32.mrf.mxu3  ;;  %v6220_v0 = vpop.f32.mrf.mxu1  ;;  %v6901_v39 = vrot.slane %v6899_v58, 2  ;;  %v7094_v46 = vrot.slane %v6899_v58, 3  ;;  %v19828_v58 = vld [vmem:[#allocation3 + $0x24] sm:$0xff] }
 0x37a   : > { %v5833_v20 = vadd.f32 %v5794_v59, %v5568_v42  ;;  %v15997_v59 = vld [vmem:[%s21974_s4 + $0x160] sm:$0xff] }
 0x37b   : > { %6405 = vmatmul.bf16.gmra.mxu2 %v6306_v51  ;;  %7021 = vmatmul.bf16.gmra.mxu0 %v6897_v7 }
 0x37c   : > { %v6098_v8 = vadd.f32 %v6059_v50, %v5833_v20  ;;  %7192 = vmatmul.bf16.gmra.mxu1 %v7093_v63  ;;  %v6902_v50 = vshll.u32 %v19797_v47, 16  ;;  %7872 = vmatpush.bf16.msra.mxu0 %v15997_v59 }
 0x37e   : > { %6833 = vmatmul.bf16.gmra.mxu3 %v6751_v29  ;;  %v19810_v14 = vadd.f32 %v6217_v56, %v6098_v8  ;;  %v5532_v11 = vpop.f32.mrf.mxu2  ;;  %v6904_v35 = vrot.slane %v6902_v50, 3  ;;  %v7095_v42 = vrot.slane %v6902_v50, 4  ;;  %v6752_v29 = vrot.slane %v19797_v47, 3  ;;  %v16012_v47 = vld [vmem:[%s21974_s4 + $0x1a0] sm:$0xff] }
 0x37f   : > { %v5569_v30 = vadd.f32 %v5532_v11, %v19520_v45  ;;  %v6309_v45 = vor.u32 %v6308_v34, %v6307_v60  ;;  %8138 = vmatpush.bf16.msra.mxu1 %v16012_v47  ;;  %v6311_v34 = vrot.slane %v22052_v48, 1 }
 0x380   : > { %v6064_v33 = vpop.f32.mrf.mxu0  ;;  %v6905_v7 = vor.u32 %v6904_v35, %v6901_v39  ;;  %v7096_v63 = vor.u32 %v7095_v42, %v7094_v46 }
 0x381   : > { %v5797_v62 = vpop.f32.mrf.mxu3  ;;  %v6222_v56 = vpop.f32.mrf.mxu1 }
 0x382   : > { %v5834_v26 = vadd.f32 %v5797_v62, %v5569_v30  ;;  %v6906_v11 = vsel %vm616_vm1, %v6896_v6, %v6905_v7  ;;  %v15980_v6 = vld [vmem:[%s21974_s4 + $0x118] sm:$0xff]  ;;  %v6911_v62 = vshll.u32 %v19828_v58, 16 }
 0x383   : > { %7607 = vmatpush.bf16.msra.mxu3 %v15980_v6 }
 0x384   : > { %v6099_v52 = vadd.f32 %v6062_v27, %v5834_v26  ;;  %v6310_v27 = vsel %vm2128_vm5, %v6305_v40, %v6309_v45  ;;  %v15972_v40 = vld [vmem:[%s21974_s4 + $0xd8] sm:$0xff]  ;;  %v22053_v26 = vshll.u32 %v19536_v5, 16  ;;  %v6913_v46 = vrot.slane %v6911_v62, 3 }
 0x385   : > { %7461 = vmatpush.bf16.msra.mxu2 %v15972_v40 }
 0x386   : > { %v19822_v51 = vadd.f32 %v6220_v0, %v6099_v52  ;;  %v5534_v20 = vpop.f32.mrf.mxu2  ;;  %v6753_v0 = vsel %vm490_vm0, %v6750_v41, %v6752_v29  ;;  %v6312_v39 = vrot.slane %v22053_v26, 2 }
 0x387   : > { %v5570_v17 = vadd.f32 %v5534_v20, %v19544_v19  ;;  %v7097_v19 = vsel %vm823_vm2, %v7092_v53, %v7096_v63  ;;  %v6908_v53 = vshrl.u32 %v19828_v58, 16  ;;  %v7099_v20 = vrot.slane %v6911_v62, 4 }
 0x388   : > { %v6067_v36 = vpop.f32.mrf.mxu0 }
 0x389   : > { %v5799_v8 = vpop.f32.mrf.mxu3  ;;  %v6225_v61 = vpop.f32.mrf.mxu1  ;;  %v6910_v52 = vrot.slane %v6908_v53, 2  ;;  %v7098_v59 = vrot.slane %v6908_v53, 3 }
 0x38a   : > { %v5835_v32 = vadd.f32 %v5799_v8, %v5570_v17  ;;  %v15996_v17 = vld [vmem:[%s21974_s4 + $0x158] sm:$0xff] }
 0x38b   : > { %6410 = vmatmul.bf16.gmra.mxu2 %v6310_v27  ;;  %7026 = vmatmul.bf16.gmra.mxu0 %v6906_v11 }
 0x38c   : > { %v6100_v50 = vadd.f32 %v6064_v33, %v5835_v32  ;;  %7197 = vmatmul.bf16.gmra.mxu1 %v7097_v19  ;;  %7873 = vmatpush.bf16.msra.mxu0 %v15996_v17  ;;  %v6914_v32 = vor.u32 %v6913_v46, %v6910_v52 }
 0x38e   : > { %6838 = vmatmul.bf16.gmra.mxu3 %v6753_v0  ;;  %v19841_v30 = vadd.f32 %v6222_v56, %v6100_v50  ;;  %v5537_v41 = vpop.f32.mrf.mxu2  ;;  %v6754_v50 = vrot.slane %v19828_v58, 3  ;;  %v7100_v0 = vor.u32 %v7099_v20, %v7098_v59  ;;  %v6915_v6 = vsel %vm616_vm1, %v6905_v7, %v6914_v32  ;;  %v16011_v58 = vld [vmem:[%s21974_s4 + $0x198] sm:$0xff]  ;;  %v15979_v7 = vld [vmem:[%s21974_s4 + $0x110] sm:$0xff] }
 0x38f   : > { %v5571_v33 = vadd.f32 %v5537_v41, %v19565_v44  ;;  %v6313_v44 = vor.u32 %v6312_v39, %v6311_v34  ;;  %v19859_v41 = vld [vmem:[#allocation3 + $0x2c] sm:$0xff]  ;;  %8139 = vmatpush.bf16.msra.mxu1 %v16011_v58  ;;  %7608 = vmatpush.bf16.msra.mxu3 %v15979_v7  ;;  %v22054_v34 = vshrl.u32 %v19579_v13, 16  ;;  %v22055_v39 = vshll.u32 %v19579_v13, 16  ;;  %v19890_v7 = vld [vmem:[#allocation3 + $0x34] sm:$0xff] }
 0x390   : > { %v6069_v60 = vpop.f32.mrf.mxu0 }
 0x391   : > { %v5802_v1 = vpop.f32.mrf.mxu3  ;;  %v6227_v56 = vpop.f32.mrf.mxu1  ;;  %v6315_v26 = vrot.slane %v22054_v34, 1  ;;  %v22056_v34 = vshrl.u32 %v19622_v25, 16 }
 0x392   : > { %v5836_v35 = vadd.f32 %v5802_v1, %v5571_v33  ;;  %v6920_v33 = vshll.u32 %v19859_v41, 16 }
 0x394   : > { %v6101_v42 = vadd.f32 %v6067_v36, %v5836_v35  ;;  %v6314_v36 = vsel %vm2128_vm5, %v6309_v45, %v6313_v44  ;;  %v15971_v45 = vld [vmem:[%s21974_s4 + $0xd0] sm:$0xff]  ;;  %v6316_v35 = vrot.slane %v22055_v39, 2  ;;  %v7103_v17 = vrot.slane %v6920_v33, 4 }
 0x395   : > { %7462 = vmatpush.bf16.msra.mxu2 %v15971_v45  ;;  %v22057_v39 = vshll.u32 %v19622_v25, 16 }
 0x396   : > { %v19853_v8 = vadd.f32 %v6225_v61, %v6101_v42  ;;  %v5539_v27 = vpop.f32.mrf.mxu2  ;;  %v6755_v61 = vsel %vm490_vm0, %v6752_v29, %v6754_v50  ;;  %v6922_v42 = vrot.slane %v6920_v33, 3  ;;  %v6929_v33 = vshll.u32 %v19890_v7, 16 }
 0x397   : > { %v5572_v5 = vadd.f32 %v5539_v27, %v19587_v55  ;;  %v7101_v55 = vsel %vm823_vm2, %v7096_v63, %v7100_v0  ;;  %v6917_v63 = vshrl.u32 %v19859_v41, 16  ;;  %v15995_v27 = vld [vmem:[%s21974_s4 + $0x150] sm:$0xff] }
 0x398   : > { %v6072_v19 = vpop.f32.mrf.mxu0  ;;  %7874 = vmatpush.bf16.msra.mxu0 %v15995_v27  ;;  %v15994_v27 = vld [vmem:[%s21974_s4 + $0x148] sm:$0xff] }
 0x399   : > { %v5804_v11 = vpop.f32.mrf.mxu3  ;;  %v6230_v40 = vpop.f32.mrf.mxu1  ;;  %v6919_v46 = vrot.slane %v6917_v63, 2  ;;  %v7102_v20 = vrot.slane %v6917_v63, 3 }
 0x39a   : > { %v5837_v47 = vadd.f32 %v5804_v11, %v5572_v5 }
 0x39b   : > { %6415 = vmatmul.bf16.gmra.mxu2 %v6314_v36  ;;  %7031 = vmatmul.bf16.gmra.mxu0 %v6915_v6  ;;  %v6923_v36 = vor.u32 %v6922_v42, %v6919_v46  ;;  %v6756_v6 = vrot.slane %v19859_v41, 3  ;;  %v16010_v41 = vld [vmem:[%s21974_s4 + $0x190] sm:$0xff]  ;;  %v6931_v42 = vrot.slane %v6929_v33, 3 }
 0x39c   : > { %v6102_v53 = vadd.f32 %v6069_v60, %v5837_v47  ;;  %7202 = vmatmul.bf16.gmra.mxu1 %v7101_v55  ;;  %7875 = vmatpush.bf16.msra.mxu0 %v15994_v27  ;;  %v6669_v27 = vld [vmem:[#allocation3 + $0x44] sm:$0x7] }
 0x39d   : > { %v6924_v45 = vsel %vm616_vm1, %v6914_v32, %v6923_v36  ;;  %v15978_v32 = vld [vmem:[%s21974_s4 + $0x108] sm:$0xff]  ;;  %8140 = vmatpush.bf16.msra.mxu1 %v16010_v41 }
 0x39e   : > { %6843 = vmatmul.bf16.gmra.mxu3 %v6755_v61  ;;  %v19872_v62 = vadd.f32 %v6227_v56, %v6102_v53  ;;  %v5542_v29 = vpop.f32.mrf.mxu2  ;;  %v7104_v53 = vor.u32 %v7103_v17, %v7102_v20  ;;  %v7107_v17 = vrot.slane %v6929_v33, 4 }
 0x39f   : > { %v5573_v1 = vadd.f32 %v5542_v29, %v19608_v37  ;;  %v6317_v37 = vor.u32 %v6316_v35, %v6315_v26  ;;  %7609 = vmatpush.bf16.msra.mxu3 %v15978_v32  ;;  %v6319_v26 = vrot.slane %v22056_v34, 1  ;;  %v6320_v35 = vrot.slane %v22057_v39, 2 }
 0x3a0   : > { %v6074_v48 = vpop.f32.mrf.mxu0 }
 0x3a1   : > { %v5807_v60 = vpop.f32.mrf.mxu3  ;;  %v6232_v56 = vpop.f32.mrf.mxu1 }
 0x3a2   : > { %v5838_v52 = vadd.f32 %v5807_v60, %v5573_v1 }
 0x3a4   : > { %v6103_v59 = vadd.f32 %v6072_v19, %v5838_v52  ;;  %v6318_v19 = vsel %vm2128_vm5, %v6313_v44, %v6317_v37  ;;  %v15970_v44 = vld [vmem:[%s21974_s4 + $0xc8] sm:$0xff] }
 0x3a5   : > { %7463 = vmatpush.bf16.msra.mxu2 %v15970_v44 }
 0x3a6   : > { %v19884_v5 = vadd.f32 %v6230_v40, %v6103_v59  ;;  %v5544_v11 = vpop.f32.mrf.mxu2  ;;  %v6757_v40 = vsel %vm490_vm0, %v6754_v50, %v6756_v6 }
 0x3a7   : > { %v5574_v13 = vadd.f32 %v5544_v11, %v19630_v9  ;;  %v7105_v9 = vsel %vm823_vm2, %v7100_v0, %v7104_v53  ;;  %v6926_v0 = vshrl.u32 %v19890_v7, 16 }
 0x3a8   : > { %v6077_v61 = vpop.f32.mrf.mxu0 }
 0x3a9   : > { %v5809_v47 = vpop.f32.mrf.mxu3  ;;  %v6235_v58 = vpop.f32.mrf.mxu1  ;;  %v6928_v46 = vrot.slane %v6926_v0, 2  ;;  %v7106_v20 = vrot.slane %v6926_v0, 3 }
 0x3aa   : > { %v5839_v55 = vadd.f32 %v5809_v47, %v5574_v13 }
 0x3ab   : > { %6420 = vmatmul.bf16.gmra.mxu2 %v6318_v19  ;;  %7036 = vmatmul.bf16.gmra.mxu0 %v6924_v45  ;;  %v19917_v47 = vor.u32 %v6931_v42, %v6928_v46  ;;  %v19921_v45 = vor.u32 %v7107_v17, %v7106_v20 }
 0x3ac   : > { %v6104_v29 = vadd.f32 %v6074_v48, %v5839_v55  ;;  %7207 = vmatmul.bf16.gmra.mxu1 %v7105_v9  ;;  %v6758_v55 = vrot.slane %v19890_v7, 3  ;;  %v16009_v7 = vld [vmem:[%s21974_s4 + $0x188] sm:$0xff] }
 0x3ad   : > { %v6933_v41 = vsel %vm616_vm1, %v6923_v36, %v19917_v47  ;;  %v15977_v36 = vld [vmem:[%s21974_s4 + $0x100] sm:$0xff]  ;;  %8141 = vmatpush.bf16.msra.mxu1 %v16009_v7 }
 0x3ae   : > { %6848 = vmatmul.bf16.gmra.mxu3 %v6757_v40  ;;  %v19903_v63 = vadd.f32 %v6232_v56, %v6104_v29  ;;  %v5547_v50 = vpop.f32.mrf.mxu2  ;;  %v6759_v32 = vsel %vm490_vm0, %v6756_v6, %v6758_v55 }
 0x3af   : > { %v5575_v1 = vadd.f32 %v5547_v50, %v19651_v22  ;;  %v6321_v22 = vor.u32 %v6320_v35, %v6319_v26  ;;  %7610 = vmatpush.bf16.msra.mxu3 %v15977_v36  ;;  %v22059_v26 = vshll.u32 %v19666_v31, 16 }
 0x3b0   : > { %v6079_v48 = vpop.f32.mrf.mxu0 }
 0x3b1   : > { %v5812_v60 = vpop.f32.mrf.mxu3  ;;  %v6237_v56 = vpop.f32.mrf.mxu1  ;;  %v6322_v29 = vsel %vm2128_vm5, %v6317_v37, %v6321_v22  ;;  %v15969_v37 = vld [vmem:[%s21974_s4 + $0xc0] sm:$0xff]  ;;  %v6324_v39 = vrot.slane %v22059_v26, 2 }
 0x3b2   : > { %v5840_v52 = vadd.f32 %v5812_v60, %v5575_v1  ;;  %7464 = vmatpush.bf16.msra.mxu2 %v15969_v37 }
 0x3b4   : > { %v6105_v59 = vadd.f32 %v6077_v61, %v5840_v52 }
 0x3b6   : > { %v19915_v11 = vadd.f32 %v6235_v58, %v6105_v59  ;;  %v5549_v13 = vpop.f32.mrf.mxu2  ;;  %v19926_v58 = vld [vmem:[#allocation3 + $0x3c] sm:$0xff] }
 0x3b7   : > { %v5576_v25 = vadd.f32 %v5549_v13, %v19676_v2  ;;  %v7109_v2 = vsel %vm823_vm2, %v7104_v53, %v19921_v45  ;;  %v6935_v53 = vshrl.u32 %v19926_v58, 16  ;;  %v6938_v0 = vshll.u32 %v19926_v58, 16 }
 0x3b8   : > { %v6082_v61 = vpop.f32.mrf.mxu0 }
 0x3b9   : > { %v5814_v19 = vpop.f32.mrf.mxu3  ;;  %v6240_v9 = vpop.f32.mrf.mxu1  ;;  %v6937_v46 = vrot.slane %v6935_v53, 2  ;;  %v6940_v42 = vrot.slane %v6938_v0, 3  ;;  %v7110_v20 = vrot.slane %v6935_v53, 3  ;;  %v7111_v17 = vrot.slane %v6938_v0, 4 }
 0x3ba   : > { %v5841_v40 = vadd.f32 %v5814_v19, %v5576_v25  ;;  %v7057_v19 = vld [vmem:[#allocation3 + $0x44] sm:$0xf] }
 0x3bb   : > { %6425 = vmatmul.bf16.gmra.mxu2 %v6322_v29  ;;  %7041 = vmatmul.bf16.gmra.mxu0 %v6933_v41  ;;  %v19957_v41 = vor.u32 %v6940_v42, %v6937_v46  ;;  %v7076_v7 = vunpack.c.l.b16 %v7057_v19 }
 0x3bc   : > { %v6106_v44 = vadd.f32 %v6079_v48, %v5841_v40  ;;  %7212 = vmatmul.bf16.gmra.mxu1 %v7109_v2  ;;  %v22058_v48 = vshrl.u32 %v19666_v31, 16  ;;  %v6760_v40 = vrot.slane %v19926_v58, 3  ;;  %v19960_v2 = vor.u32 %v7111_v17, %v7110_v20 }
 0x3be   : > { %6853 = vmatmul.bf16.gmra.mxu3 %v6759_v32  ;;  %v19940_v6 = vadd.f32 %v6237_v56, %v6106_v44  ;;  %v5552_v50 = vpop.f32.mrf.mxu2  ;;  %v6323_v34 = vrot.slane %v22058_v48, 1  ;;  %v6271_v56 = vld [vmem:[#allocation2 + $0xd8] sm:$0x3]  ;;  %v6761_v0 = vsel %vm490_vm0, %v6758_v55, %v6760_v40  ;;  %v7113_v48 = vsel %vm823_vm2, %v19921_v45, %v19960_v2 }
 0x3bf   : > { %v5577_v33 = vadd.f32 %v5552_v50, %v19693_v10  ;;  %v15993_v10 = vld [vmem:[%s21974_s4 + $0x140] sm:$0xff]  ;;  %v6289_v25 = vunpack.c.l.b16 %v6271_v56 }
 0x3c0   : > { %v6084_v60 = vpop.f32.mrf.mxu0  ;;  %v19952_v13 = vor.u32 %v6324_v39, %v6323_v34  ;;  %7876 = vmatpush.bf16.msra.mxu0 %v15993_v10  ;;  %v16008_v34 = vld [vmem:[%s21974_s4 + $0x180] sm:$0xff] }
 0x3c1   : > { %v5817_v1 = vpop.f32.mrf.mxu3  ;;  %v6242_v52 = vpop.f32.mrf.mxu1  ;;  %v6290_v50 = vpack.c.b16 %v6289_v25, %v6289_v25  ;;  %8142 = vmatpush.bf16.msra.mxu1 %v16008_v34 }
 0x3c2   : > { %v5842_v35 = vadd.f32 %v5817_v1, %v5577_v33  ;;  %v6326_v36 = vsel %vm2128_vm5, %v6321_v22, %v19952_v13  ;;  %v6942_v33 = vsel %vm616_vm1, %v19917_v47, %v19957_v41  ;;  %v7077_v22 = vpack.c.b16 %v7076_v7, %v7076_v7  ;;  %v16023_v47 = vld [vmem:[%s21974_s4 + $0x1f8] sm:$0xff] }
 0x3c3   : > { %v6328_v55 = vshrl.u32 %v6290_v50, 16  ;;  %v6331_v26 = vshll.u32 %v6290_v50, 16  ;;  %8294 = vmatpush.bf16.msrb.mxu2 %v16023_v47  ;;  %v17092_v47 = vld [vmem:[#allocation3 + $0xc] sm:$0xf0]  }
 0x3c4   : > { %v6107_v59 = vadd.f32 %v6082_v61, %v5842_v35  ;;  %v6737_v61 = vunpack.c.l.b16 %v6669_v27  ;;  %v7118_v20 = vshll.u32 %v7077_v22, 16 }
 0x3c5   : > { %v6330_v27 = vrot.slane %v6328_v55, 1  ;;  %v6333_v10 = vrot.slane %v6331_v26, 2  ;;  %v16915_v26 = vld [vmem:[#allocation3 + $0xc] sm:$0x8] }
 0x3c6   : > { %v19954_v31 = vadd.f32 %v6240_v9, %v6107_v59  ;;  %v5554_v29 = vpop.f32.mrf.mxu2  ;;  %v7115_v59 = vshrl.u32 %v7077_v22, 16 }
 0x3c7   : > { %v5578_v44 = vadd.f32 %v5554_v29, %v19721_v4  ;;  %v6746_v4 = vpack.c.b16 %v6737_v61, %v6737_v61  ;;  %v6334_v7 = vor.u32 %v6333_v10, %v6330_v27 }
 0x3c8   : > { %v6087_v37 = vpop.f32.mrf.mxu0 }
 0x3c9   : > { %v5819_v32 = vpop.f32.mrf.mxu3  ;;  %v6245_v9 = vpop.f32.mrf.mxu1  ;;  %v6944_v35 = vshrl.u32 %v6746_v4, 16  ;;  %v6947_v56 = vshll.u32 %v6746_v4, 16 }
 0x3ca   : > { %v5843_v53 = vadd.f32 %v5819_v32, %v5578_v44  ;;  %v7120_v32 = vrot.slane %v7118_v20, 4  ;;  %v20004_v20 = vld [vmem:[#allocation3 + $0x18] sm:$0xff]  }
 0x3cb   : > { %6430 = vmatmul.bf16.gmra.mxu2 %v6326_v36  ;;  %7046 = vmatmul.bf16.gmra.mxu0 %v6942_v33  ;;  %v6946_v29 = vrot.slane %v6944_v35, 2  ;;  %v6949_v61 = vrot.slane %v6947_v56, 3  ;;  %v16054_v36 = vld [vmem:[%s21974_s4 + $0x78] sm:$0xff]  ;;  %v15985_v35 = vld [vmem:[#allocation3 + $0x10] sm:$0xff] }
 0x3cc   : > { %v6108_v1 = vadd.f32 %v6084_v60, %v5843_v53  ;;  %7217 = vmatmul.bf16.gmra.mxu1 %v7113_v48  ;;  %v16031_v60 = vld [vmem:[%s21974_s4 + $0x238] sm:$0xff]  ;;  %8796 = vmatpush.bf16.msrb.mxu0 %v16054_v36 }
 0x3cd   : > { %8481 = vmatpush.bf16.msrb.mxu3 %v16031_v60  ;;  %v6950_v53 = vor.u32 %v6949_v61, %v6946_v29  ;;  %v17094_v60 = vld [vmem:[#allocation3 + $0x14] sm:$0xff]  }
 0x3ce   : > { %6858 = vmatmul.bf16.gmra.mxu3 %v6761_v0  ;;  %v19982_v39 = vadd.f32 %v6242_v52, %v6108_v1  ;;  %v5557_v45 = vpop.f32.mrf.mxu2  ;;  %v7117_v52 = vrot.slane %v7115_v59, 3  ;;  %v6762_v1 = vrot.slane %v6746_v4, 3  ;;  %v20002_v59 = vld [vmem:[#allocation3 + $0x18] sm:$0xff]  ;;  %v16022_v29 = vld [vmem:[%s21974_s4 + $0x1f0] sm:$0xff] }
 0x3cf   : > { %v5579_v46 = vadd.f32 %v5557_v45, %v19730_v38  ;;  %v16030_v61 = vld [vmem:[%s21974_s4 + $0x230] sm:$0xff]  ;;  %v7753_v36 = vshll.u32 %v20002_v59, 16  ;;  %8295 = vmatpush.bf16.msrb.mxu2 %v16022_v29 }
 0x3d0   : > { %v6089_v17 = vpop.f32.mrf.mxu0  ;;  %v7121_v48 = vor.u32 %v7120_v32, %v7117_v52  ;;  %v8014_v52 = vshll.u32 %v20004_v20, 16 }
 0x3d1   : > { %v5822_v42 = vpop.f32.mrf.mxu3  ;;  %v6247_v19 = vpop.f32.mrf.mxu1  ;;  %8482 = vmatpush.bf16.msrb.mxu3 %v16030_v61 }
 0x3d2   : > { %v5844_v25 = vadd.f32 %v5822_v42, %v5579_v46  ;;  %v7122_v4 = vsel %vm823_vm2, %v19960_v2, %v7121_v48  ;;  %v7330_v42 = vshrl.u32 %v17094_v60, 16  ;;  %v8016_v48 = vrot.slane %v8014_v52, 1  ;;  %v20040_v52 = vld [vmem:[#allocation3 + $0x20] sm:$0xff] }
 0x3d4   : > { %v6109_v44 = vadd.f32 %v6087_v37, %v5844_v25  ;;  %v6335_v37 = vsel %vm2128_vm5, %v19952_v13, %v6334_v7  ;;  %v16916_v13 = vor.u32 %v17092_v47, %v16915_v26  ;;  %v7748_v25 = vshll.u32 %v15985_v35, 16 }
 0x3d5   : > { %v7332_v32 = vrot.slane %v7330_v42, 3 }
 0x3d6   : > { %v19988_v50 = vadd.f32 %v6245_v9, %v6109_v44  ;;  %v5559_v38 = vpop.f32.mrf.mxu2  ;;  %v6951_v9 = vsel %vm616_vm1, %v19957_v41, %v6950_v53  ;;  %v7333_v41 = vshll.u32 %v17094_v60, 16  ;;  %v7322_v2 = vshrl.u32 %v16916_v13, 16 }
 0x3d7   : > { %v5580_v0 = vadd.f32 %v5559_v38, %v19750_v18  ;;  %v6763_v18 = vsel %vm490_vm0, %v6760_v40, %v6762_v1  ;;  %v7325_v10 = vshll.u32 %v16916_v13, 16  ;;  %v7750_v1 = vrot.slane %v7748_v25, 1 }
 0x3d8   : > { %v6092_v22 = vpop.f32.mrf.mxu0  ;;  %v7335_v7 = vrot.slane %v7333_v41, 4  ;;  %v7755_v60 = vrot.slane %v7753_v36, 1 }
 0x3d9   : > { %v5824_v33 = vpop.f32.mrf.mxu3  ;;  %v6250_v55 = vpop.f32.mrf.mxu1 }
 0x3da   : > { %v5845_v34 = vadd.f32 %v5824_v33, %v5580_v0  ;;  %v7324_v0 = vrot.slane %v7322_v2, 3  ;;  %v7327_v33 = vrot.slane %v7325_v10, 4  ;;  %v20026_v47 = vor.u32 %v7335_v7, %v7332_v32  ;;  %v16760_v10 = vld [vmem:[#allocation3 + $0x10] sm:$0xff]   ;;  %v20042_v7 = vld [vmem:[#allocation3 + $0x28] sm:$0xff] }
 0x3db   : > { %6435 = vmatmul.bf16.gmra.mxu2 %v6335_v37  ;;  %7051 = vmatmul.bf16.gmra.mxu0 %v6951_v9  ;;  %v16053_v37 = vld [vmem:[%s21974_s4 + $0x70] sm:$0xff]  ;;  %v7746_v9 = vshrl.u32 %v15985_v35, 16 }
 0x3dc   : > { %v6110_v45 = vadd.f32 %v6089_v17, %v5845_v34  ;;  %7222 = vmatmul.bf16.gmra.mxu1 %v7122_v4  ;;  %v20007_v17 = vld [vmem:[#allocation3 + $0x20] sm:$0xff]  ;;  %8797 = vmatpush.bf16.msrb.mxu0 %v16053_v37 }
 0x3dd   : > { %v22015_v53 = vshll.u32 %v20007_v17, 16  ;;  %v7751_v42 = vor.u32 %v7750_v1, %v7746_v9  ;;  %v20059_v1 = vld [vmem:[%s21973_s3] ss:$0 sm:$0xff]  ;;  %v7761_v9 = vshll.u32 %v20040_v52, 16 }
 0x3de   : > { %6863 = vmatmul.bf16.gmra.mxu3 %v6763_v18  ;;  %v20000_v56 = vadd.f32 %v6247_v19, %v6110_v45  ;;  %v5562_v46 = vpop.f32.mrf.mxu2  ;;  %v16046_v19 = vld [vmem:[%s21974_s4 + $0x38] sm:$0xff]  ;;  %v8012_v18 = vshrl.u32 %v20004_v20, 16 }
 0x3df   : > { %v5581_v58 = vadd.f32 %v5562_v46, %v19761_v23  ;;  %8984 = vmatpush.bf16.msrb.mxu1 %v16046_v19  ;;  %v8021_v4 = vrot.slane %v22015_v53, 1  ;;  %v7328_v46 = vor.u32 %v7327_v33, %v7324_v0  ;;  %v16029_v0 = vld [vmem:[%s21974_s4 + $0x228] sm:$0xff]  ;;  %v20248_v53 = vld [vmem:[#allocation3 + $0x40] sm:$0xff] }
 0x3e0   : > { %v6094_v27 = vpop.f32.mrf.mxu0  ;;  %8483 = vmatpush.bf16.msrb.mxu3 %v16029_v0 }
 0x3e1   : > { %v5827_v40 = vpop.f32.mrf.mxu3  ;;  %v6252_v44 = vpop.f32.mrf.mxu1  ;;  %v7337_v35 = vsel %vm823_vm2, %v7328_v46, %v20026_v47  ;;  %v7757_v46 = vshrl.u32 %v20002_v59, 16 }
 0x3e2   : > { %v5846_v23 = vadd.f32 %v5827_v40, %v5581_v58  ;;  %v8017_v58 = vor.u32 %v8016_v48, %v8012_v18  ;;  %v7756_v40 = vsel %vm1491_vm3, %v7751_v42, %v7755_v60  ;;  %v20072_v42 = vrot.slane %v7761_v9, 1  ;;  %v20095_v9 = vld [vmem:[#allocation3 + $0x28] sm:$0xff] }
 0x3e4   : > { %v6111_v38 = vadd.f32 %v6092_v22, %v5846_v23  ;;  %v8022_v25 = vsel %vm1491_vm3, %v8017_v58, %v8021_v4 }
 0x3e6   : > { %v20024_v34 = vadd.f32 %v6250_v55, %v6111_v38  ;;  %v5564_v26 = vpop.f32.mrf.mxu2  ;;  %v16045_v38 = vld [vmem:[%s21974_s4 + $0x30] sm:$0xff] }
 0x3e7   : > { %v5582_v22 = vadd.f32 %v5564_v26, %v19779_v49  ;;  %v17096_v49 = vld [vmem:[#allocation3 + $0x1c] sm:$0xff]   ;;  %8985 = vmatpush.bf16.msrb.mxu1 %v16045_v38  ;;  %v6543_v38 = vpop.permute.xlu2 %6542 }
 0x3e8   : > { %v7017_v13 = vpop.f32.mrf.mxu0  ;;  %v7339_v61 = vshrl.u32 %v17096_v49, 16  ;;  %v7342_v23 = vshll.u32 %v17096_v49, 16  ;;  %vm6589_vm7 = vcmp.eq.s32.totalorder %v6543_v38, 1 }
 0x3e9   : > { %v5829_v45 = vpop.f32.mrf.mxu3  ;;  %v20032_v55 = vpop.f32.mrf.mxu1 }
 0x3ea   : > { %v5847_v41 = vadd.f32 %v5829_v45, %v5582_v22  ;;  %v7341_v37 = vrot.slane %v7339_v61, 3  ;;  %v7344_v26 = vrot.slane %v7342_v23, 4  ;;  %v22011_v22 = vshll.u32 %v20042_v7, 16 }
 0x3eb   : > { %7465 = vmatmul.bf16.vlgmr.msra.gmra.mxu2 %v7337_v35  ;;  %7877 = vmatmul.bf16.vlgmr.msra.gmra.mxu0 %v7756_v40  ;;  %v22016_v35 = vshrl.u32 %v20007_v17, 16 }
 0x3ec   : > { %v6112_v2 = vadd.f32 %v6094_v27, %v5847_v41  ;;  %8143 = vmatmul.bf16.vlgmr.msra.gmra.mxu1 %v8022_v25  ;;  %v20078_v40 = vrot.slane %v22011_v22, 1 }
 0x3ee   : > { %7611 = vmatmul.bf16.vlgmr.msra.gmra.mxu3 %v16760_v10  ;;  %v20038_v19 = vadd.f32 %v6252_v44, %v6112_v2  ;;  %v6401_v29 = vpop.f32.mrf.mxu2  ;;  %v16021_v44 = vld [vmem:[%s21974_s4 + $0x1e8] sm:$0xff]  ;;  %v7759_v10 = vor.u32 %v7757_v46, %v7755_v60 }
 0x3ef   : > { %v6441_v33 = vadd.f32 %v6401_v29, %v19791_v21  ;;  %8296 = vmatpush.bf16.msrb.mxu2 %v16021_v44  ;;  %v16052_v21 = vld [vmem:[%s21974_s4 + $0x68] sm:$0xff] }
 0x3f0   : > { %v7019_v27 = vpop.f32.mrf.mxu0  ;;  %8798 = vmatpush.bf16.msrb.mxu0 %v16052_v21  ;;  %v7764_v23 = vsel %vm1491_vm3, %v7759_v10, %v20072_v42  ;;  %v20097_v21 = vld [vmem:[#allocation3 + $0x30] sm:$0xff] }
 0x3f1   : > { %v6829_v32 = vpop.f32.mrf.mxu3  ;;  %v20061_v48 = vpop.f32.mrf.mxu1  ;;  %v6461_v45 = vadd.f32 %v20059_v1, %v6441_v33 }
 0x3f2   : > { %v20044_v36 = vadd.f32 %v7017_v13, %v6829_v32  ;;  %v20069_v13 = vor.u32 %v7344_v26, %v7341_v37  ;;  %v17098_v32 = vld [vmem:[#allocation3 + $0x24] sm:$0xff]  }
 0x3f3   : > { %v6477_v25 = vmax.f32 %v6461_v45, 0.0  ;;  %v7348_v37 = vshrl.u32 %v17098_v32, 16  ;;  %v7351_v26 = vshll.u32 %v17098_v32, 16  ;;  %v16051_v32 = vld [vmem:[%s21974_s4 + $0x60] sm:$0xff] }
 0x3f4   : > { %v7346_v61 = vsel %vm823_vm2, %v20026_v47, %v20069_v13  ;;  %8799 = vmatpush.bf16.msrb.mxu0 %v16051_v32 }
 0x3f6   : > { %v6403_v18 = vpop.f32.mrf.mxu2 }
 0x3f7   : > { %v6442_v41 = vadd.f32 %v6403_v18, %v19810_v14  ;;  %v8025_v14 = vor.u32 %v22016_v35, %v8021_v4  ;;  %v6605_v4 = vsel %vm6589_vm7, %v6477_v25, 0.0 }
 0x3f8   : > { %v7022_v2 = vpop.f32.mrf.mxu0 }
 0x3f9   : > { %v6831_v58 = vpop.f32.mrf.mxu3  ;;  %v6462_v29 = vadd.f32 %v20059_v1, %v6442_v41  ;;  %v20083_v59 = vpop.f32.mrf.mxu1  ;;  %v8030_v60 = vsel %vm1491_vm3, %v8025_v14, %v20078_v40  ;;  %v16020_v41 = vld [vmem:[%s21974_s4 + $0x1e0] sm:$0xff]  ;;  %v7769_v14 = vshll.u32 %v20095_v9, 16 }
 0x3fa   : > { %v20080_v49 = vadd.f32 %v7019_v27, %v6831_v58  ;;  %v6546_v27 = vpop.permute.xlu0 %6545  ;;  %v16028_v58 = vld [vmem:[%s21974_s4 + $0x220] sm:$0xff]  ;;  %8297 = vmatpush.bf16.msrb.mxu2 %v16020_v41 }
 0x3fb   : > { %v6478_v44 = vmax.f32 %v6462_v29, 0.0  ;;  %7470 = vmatmul.bf16.gmra.mxu2 %v7346_v61  ;;  %7882 = vmatmul.bf16.gmra.mxu0 %v7764_v23  ;;  %vm6590_vm4 = vcmp.eq.s32.totalorder %v6546_v27, 1  ;;  %v7350_v29 = vrot.slane %v7348_v37, 3  ;;  %v22009_v61 = vshll.u32 %v20097_v21, 16 }
 0x3fc   : > { %8148 = vmatmul.bf16.gmra.mxu1 %v8030_v60  ;;  %8484 = vmatpush.bf16.msrb.mxu3 %v16028_v58  ;;  %v17100_v58 = vld [vmem:[#allocation3 + $0x2c] sm:$0xff]  }
 0x3fd   : > { %v6606_v0 = vsel %vm6590_vm4, %v6478_v44, 0.0  ;;  %v20122_v44 = vrot.slane %v7769_v14, 1 }
 0x3fe   : > { %7616 = vmatmul.bf16.gmra.mxu3 %v20004_v20  ;;  %v16531_v47 = vpack.c.bf16 %v6606_v0, %v6605_v4  ;;  %v6406_v33 = vpop.f32.mrf.mxu2  ;;  %v16044_v20 = vld [vmem:[%s21974_s4 + $0x28] sm:$0xff]  ;;  %v22014_v0 = vshrl.u32 %v20042_v7, 16 }
 0x3ff   : > { %v6443_v10 = vadd.f32 %v6406_v33, %v19822_v51  ;;  %8986 = vmatpush.bf16.msrb.mxu1 %v16044_v20  ;;  %v7765_v51 = vshrl.u32 %v20040_v52, 16 }
 0x400   : > { %16752 = vst [vmem:[#allocation3 + $0x90] sm:$0xff] %v16531_v47   ;;  %v7024_v46 = vpop.f32.mrf.mxu0  ;;  %v20128_v47 = vrot.slane %v22009_v61, 1 }
 0x401   : > { %v6834_v45 = vpop.f32.mrf.mxu3  ;;  %v20111_v25 = vpop.f32.mrf.mxu1  ;;  %v6463_v23 = vadd.f32 %v20059_v1, %v6443_v10 }
 0x402   : > { %v20099_v18 = vadd.f32 %v7022_v2, %v6834_v45  ;;  %v7353_v2 = vrot.slane %v7351_v26, 4  ;;  %v7767_v26 = vor.u32 %v7765_v51, %v20072_v42  ;;  %v6549_v10 = vpop.permute.xlu1 %6548  ;;  %v7360_v51 = vshll.u32 %v17100_v58, 16 }
 0x403   : > { %v6479_v45 = vmax.f32 %v6463_v23, 0.0  ;;  %vm6591_vm8 = vcmp.eq.s32.totalorder %v6549_v10, 1 }
 0x404   : > { %v20119_v38 = vor.u32 %v7353_v2, %v7350_v29  ;;  %v6552_v29 = vpop.permute.xlu2 %6551  ;;  %v16762_v2 = vld [vmem:[#allocation3 + $0x20] sm:$0xff]  }
 0x405   : > { %vm6592_vm9 = vcmp.eq.s32.totalorder %v6552_v29, 1 }
 0x406   : > { %v6408_v27 = vpop.f32.mrf.mxu2  ;;  %v7355_v41 = vsel %vm823_vm2, %v20069_v13, %v20119_v38 }
 0x407   : > { %v6444_v60 = vadd.f32 %v6408_v27, %v19841_v30  ;;  %v8033_v30 = vor.u32 %v22014_v0, %v20078_v40  ;;  %v6607_v40 = vsel %vm6591_vm8, %v6479_v45, 0.0  ;;  %v7357_v27 = vshrl.u32 %v17100_v58, 16  ;;  %v16019_v45 = vld [vmem:[%s21974_s4 + $0x1d8] sm:$0xff] }
 0x408   : > { %v7027_v37 = vpop.f32.mrf.mxu0  ;;  %8298 = vmatpush.bf16.msrb.mxu2 %v16019_v45 }
 0x409   : > { %v6836_v4 = vpop.f32.mrf.mxu3  ;;  %v6464_v52 = vadd.f32 %v20059_v1, %v6444_v60  ;;  %v20134_v20 = vpop.f32.mrf.mxu1  ;;  %v8038_v14 = vsel %vm1491_vm3, %v8033_v30, %v20128_v47  ;;  %v20146_v60 = vld [vmem:[#allocation3 + $0x30] sm:$0xff]  ;;  %v16043_v30 = vld [vmem:[%s21974_s4 + $0x20] sm:$0xff]  ;;  %v7359_v29 = vrot.slane %v7357_v27, 3 }
 0x40a   : > { %v20130_v33 = vadd.f32 %v7024_v46, %v6836_v4  ;;  %v7772_v46 = vsel %vm1491_vm3, %v7767_v26, %v20122_v44  ;;  %v20148_v26 = vld [vmem:[#allocation3 + $0x38] sm:$0xff]  ;;  %8987 = vmatpush.bf16.msrb.mxu1 %v16043_v30 }
 0x40b   : > { %v6480_v42 = vmax.f32 %v6464_v52, 0.0  ;;  %7475 = vmatmul.bf16.gmra.mxu2 %v7355_v41  ;;  %7887 = vmatmul.bf16.gmra.mxu0 %v7772_v46  ;;  %v16027_v46 = vld [vmem:[%s21974_s4 + $0x218] sm:$0xff] }
 0x40c   : > { %8153 = vmatmul.bf16.gmra.mxu1 %v8038_v14  ;;  %8485 = vmatpush.bf16.msrb.mxu3 %v16027_v46 }
 0x40d   : > { %v6608_v23 = vsel %vm6592_vm9, %v6480_v42, 0.0  ;;  %v7777_v42 = vshll.u32 %v20146_v60, 16 }
 0x40e   : > { %7621 = vmatmul.bf16.gmra.mxu3 %v16762_v2  ;;  %v16536_v13 = vpack.c.bf16 %v6608_v23, %v6607_v40  ;;  %v6411_v32 = vpop.f32.mrf.mxu2  ;;  %v22008_v2 = vshll.u32 %v20148_v26, 16  ;;  %v16050_v40 = vld [vmem:[%s21974_s4 + $0x58] sm:$0xff] }
 0x40f   : > { %v6445_v58 = vadd.f32 %v6411_v32, %v19853_v8  ;;  %v7773_v8 = vshrl.u32 %v20095_v9, 16  ;;  %v20173_v32 = vrot.slane %v7777_v42, 1  ;;  %8800 = vmatpush.bf16.msrb.mxu0 %v16050_v40  ;;  %v17102_v40 = vld [vmem:[#allocation3 + $0x34] sm:$0xff]  }
 0x410   : > { %16753 = vst [vmem:[#allocation3 + $0x98] sm:$0xff] %v16536_v13   ;;  %v7029_v41 = vpop.f32.mrf.mxu0  ;;  %v20179_v30 = vrot.slane %v22008_v2, 1  ;;  %v7366_v61 = vshrl.u32 %v17102_v40, 16 }
 0x411   : > { %v6839_v4 = vpop.f32.mrf.mxu3  ;;  %v20162_v10 = vpop.f32.mrf.mxu1  ;;  %v6465_v14 = vadd.f32 %v20059_v1, %v6445_v58  ;;  %v7775_v58 = vor.u32 %v7773_v8, %v20122_v44 }
 0x412   : > { %v20150_v52 = vadd.f32 %v7027_v37, %v6839_v4  ;;  %v7362_v37 = vrot.slane %v7360_v51, 4  ;;  %v22010_v4 = vshrl.u32 %v20097_v21, 16 }
 0x414   : > { %v20170_v13 = vor.u32 %v7362_v37, %v7359_v29  ;;  %v6481_v29 = vmax.f32 %v6465_v14, 0.0  ;;  %v16763_v14 = vld [vmem:[#allocation3 + $0x28] sm:$0xff]  }
 0x416   : > { %v6413_v23 = vpop.f32.mrf.mxu2  ;;  %v7364_v42 = vsel %vm823_vm2, %v20119_v38, %v20170_v13 }
 0x417   : > { %v6446_v27 = vadd.f32 %v6413_v23, %v19872_v62  ;;  %v8041_v62 = vor.u32 %v22010_v4, %v20128_v47  ;;  %v6555_v23 = vpop.permute.xlu0 %6554  ;;  %v20197_v4 = vld [vmem:[#allocation3 + $0x38] sm:$0xff] }
 0x418   : > { %v7032_v46 = vpop.f32.mrf.mxu0  ;;  %vm6593_vm10 = vcmp.eq.s32.totalorder %v6555_v23, 1 }
 0x419   : > { %v6841_v51 = vpop.f32.mrf.mxu3  ;;  %v6466_v9 = vadd.f32 %v20059_v1, %v6446_v27  ;;  %v20185_v37 = vpop.f32.mrf.mxu1  ;;  %v8046_v8 = vsel %vm1491_vm3, %v8041_v62, %v20179_v30  ;;  %v6609_v47 = vsel %vm6593_vm10, %v6481_v29, 0.0  ;;  %v16042_v62 = vld [vmem:[%s21974_s4 + $0x18] sm:$0xff]  ;;  %v16018_v29 = vld [vmem:[%s21974_s4 + $0x1d0] sm:$0xff] }
 0x41a   : > { %v20181_v45 = vadd.f32 %v7029_v41, %v6841_v51  ;;  %v7780_v41 = vsel %vm1491_vm3, %v7775_v58, %v20173_v32  ;;  %v6558_v51 = vpop.permute.xlu1 %6557  ;;  %v7369_v58 = vshll.u32 %v17102_v40, 16  ;;  %v16026_v40 = vld [vmem:[%s21974_s4 + $0x210] sm:$0xff]  ;;  %8988 = vmatpush.bf16.msrb.mxu1 %v16042_v62  ;;  %8299 = vmatpush.bf16.msrb.mxu2 %v16018_v29  ;;  %v22013_v62 = vshrl.u32 %v20148_v26, 16 }
 0x41b   : > { %v6482_v44 = vmax.f32 %v6466_v9, 0.0  ;;  %7480 = vmatmul.bf16.gmra.mxu2 %v7364_v42  ;;  %7892 = vmatmul.bf16.gmra.mxu0 %v7780_v41  ;;  %vm6594_vm11 = vcmp.eq.s32.totalorder %v6558_v51, 1  ;;  %v20199_v9 = vld [vmem:[#allocation3 + $0x40] sm:$0xff] }
 0x41c   : > { %8158 = vmatmul.bf16.gmra.mxu1 %v8046_v8  ;;  %8486 = vmatpush.bf16.msrb.mxu3 %v16026_v40 }
 0x41d   : > { %v6610_v27 = vsel %vm6594_vm11, %v6482_v44, 0.0  ;;  %v7368_v44 = vrot.slane %v7366_v61, 3 }
 0x41e   : > { %7626 = vmatmul.bf16.gmra.mxu3 %v16763_v14  ;;  %v16541_v38 = vpack.c.bf16 %v6610_v27, %v6609_v47  ;;  %v6416_v2 = vpop.f32.mrf.mxu2  ;;  %v22012_v14 = vshll.u32 %v20199_v9, 16  ;;  %v16049_v47 = vld [vmem:[%s21974_s4 + $0x50] sm:$0xff] }
 0x41f   : > { %v6447_v23 = vadd.f32 %v6416_v2, %v19884_v5  ;;  %v7781_v5 = vshrl.u32 %v20146_v60, 16  ;;  %8801 = vmatpush.bf16.msrb.mxu0 %v16049_v47  ;;  %v17104_v47 = vld [vmem:[#allocation3 + $0x3c] sm:$0xff]  }
 0x420   : > { %16754 = vst [vmem:[#allocation3 + $0xa0] sm:$0xff] %v16541_v38   ;;  %v7034_v41 = vpop.f32.mrf.mxu0  ;;  %v20230_v29 = vrot.slane %v22012_v14, 1  ;;  %v6561_v14 = vpop.permute.xlu2 %6560  ;;  %v7375_v0 = vshrl.u32 %v17104_v47, 16 }
 0x421   : > { %v6844_v22 = vpop.f32.mrf.mxu3  ;;  %v20213_v51 = vpop.f32.mrf.mxu1  ;;  %v6467_v8 = vadd.f32 %v20059_v1, %v6447_v23  ;;  %vm6595_vm13 = vcmp.eq.s32.totalorder %v6561_v14, 1  ;;  %v16041_v14 = vld [vmem:[%s21974_s4 + $0x10] sm:$0xff] }
 0x422   : > { %v20201_v42 = vadd.f32 %v7032_v46, %v6844_v22  ;;  %22060 = vst [vmem:[#allocation14_spill] sm:$0xff] %v20213_v51  ;;  %v7371_v22 = vrot.slane %v7369_v58, 4  ;;  %v7785_v46 = vshll.u32 %v20197_v4, 16  ;;  %8989 = vmatpush.bf16.msrb.mxu1 %v16041_v14  ;;  %v22018_v14 = vshrl.u32 %v20199_v9, 16 }
 0x424   : > { %v20221_v38 = vor.u32 %v7371_v22, %v7368_v44  ;;  %v20224_v61 = vrot.slane %v7785_v46, 1  ;;  %v7783_v44 = vor.u32 %v7781_v5, %v20173_v32  ;;  %v6483_v22 = vmax.f32 %v6467_v8, 0.0  ;;  %v16764_v8 = vld [vmem:[#allocation3 + $0x30] sm:$0xff]  }
 0x426   : > { %v6418_v27 = vpop.f32.mrf.mxu2 }
 0x427   : > { %v6448_v2 = vadd.f32 %v6418_v27, %v19903_v63  ;;  %v8049_v63 = vor.u32 %v22013_v62, %v20179_v30  ;;  %v7373_v27 = vsel %vm823_vm2, %v20170_v13, %v20221_v38  ;;  %v6611_v30 = vsel %vm6595_vm13, %v6483_v22, 0.0  ;;  %v16017_v22 = vld [vmem:[%s21974_s4 + $0x1c8] sm:$0xff] }
 0x428   : > { %v7037_v23 = vpop.f32.mrf.mxu0  ;;  %8300 = vmatpush.bf16.msrb.mxu2 %v16017_v22 }
 0x429   : > { %v6846_v58 = vpop.f32.mrf.mxu3  ;;  %v6468_v60 = vadd.f32 %v20059_v1, %v6448_v2  ;;  %v20236_v46 = vpop.f32.mrf.mxu1  ;;  %v8054_v5 = vsel %vm1491_vm3, %v8049_v63, %v20230_v29  ;;  %v16025_v63 = vld [vmem:[%s21974_s4 + $0x208] sm:$0xff] }
 0x42a   : > { %v20232_v40 = vadd.f32 %v7034_v41, %v6846_v58  ;;  %22061 = vst [vmem:[#allocation15_spill] sm:$0xff] %v20236_v46  ;;  %v7788_v41 = vsel %vm1491_vm3, %v7783_v44, %v20224_v61  ;;  %v6564_v58 = vpop.permute.xlu0 %6563  ;;  %v7378_v44 = vshll.u32 %v17104_v47, 16  ;;  %8487 = vmatpush.bf16.msrb.mxu3 %v16025_v63 }
 0x42b   : > { %v6484_v32 = vmax.f32 %v6468_v60, 0.0  ;;  %7485 = vmatmul.bf16.gmra.mxu2 %v7373_v27  ;;  %7897 = vmatmul.bf16.gmra.mxu0 %v7788_v41  ;;  %vm6596_vm12 = vcmp.eq.s32.totalorder %v6564_v58, 1  ;;  %v20250_v60 = vld [vmem:[#allocation3 + $0x48] sm:$0xff] }
 0x42c   : > { %8163 = vmatmul.bf16.gmra.mxu1 %v8054_v5  ;;  %22062 = vst [vmem:[#allocation16_spill] sm:$0xff] %v20250_v60 }
 0x42d   : > { %v6612_v2 = vsel %vm6596_vm12, %v6484_v32, 0.0  ;;  %v7377_v32 = vrot.slane %v7375_v0, 3 }
 0x42e   : > { %7631 = vmatmul.bf16.gmra.mxu3 %v16764_v8  ;;  %v16546_v13 = vpack.c.bf16 %v6612_v2, %v6611_v30  ;;  %v6421_v62 = vpop.f32.mrf.mxu2  ;;  %v22017_v8 = vshll.u32 %v20250_v60, 16  ;;  %v16048_v30 = vld [vmem:[%s21974_s4 + $0x48] sm:$0xff] }
 0x42f   : > { %v6449_v47 = vadd.f32 %v6421_v62, %v19915_v11  ;;  %v7789_v11 = vshrl.u32 %v20197_v4, 16  ;;  %8802 = vmatpush.bf16.msrb.mxu0 %v16048_v30  ;;  %v17105_v30 = vld [vmem:[#allocation3 + $0x44] sm:$0xff]  }
 0x430   : > { %16755 = vst [vmem:[#allocation3 + $0xa8] sm:$0xff] %v16546_v13   ;;  %v7039_v41 = vpop.f32.mrf.mxu0  ;;  %v20281_v22 = vrot.slane %v22017_v8, 1  ;;  %v6570_v8 = vpop.permute.xlu2 %6569  ;;  %v7384_v15 = vshrl.u32 %v17105_v30, 16 }
 0x431   : > { %v6849_v35 = vpop.f32.mrf.mxu3  ;;  %v20264_v58 = vpop.f32.mrf.mxu1  ;;  %v6469_v5 = vadd.f32 %v20059_v1, %v6449_v47  ;;  %vm6598_vm15 = vcmp.eq.s32.totalorder %v6570_v8, 1  ;;  %v16040_v8 = vld [vmem:[%s21974_s4 + $0x8] sm:$0xff] }
 0x432   : > { %v20252_v27 = vadd.f32 %v7037_v23, %v6849_v35  ;;  %22064 = vst [vmem:[#allocation18_spill] sm:$0xff] %v20264_v58  ;;  %v7380_v35 = vrot.slane %v7378_v44, 4  ;;  %v7793_v23 = vshll.u32 %v20248_v53, 16  ;;  %8990 = vmatpush.bf16.msrb.mxu1 %v16040_v8  ;;  %v22023_v8 = vshrl.u32 %v20250_v60, 16 }
 0x434   : > { %22063 = vst [vmem:[#allocation17_spill] sm:$0xff] %v20252_v27  ;;  %v20272_v13 = vor.u32 %v7380_v35, %v7377_v32  ;;  %v20275_v0 = vrot.slane %v7793_v23, 1  ;;  %v7791_v32 = vor.u32 %v7789_v11, %v20224_v61  ;;  %v6485_v35 = vmax.f32 %v6469_v5, 0.0  ;;  %v16765_v5 = vld [vmem:[#allocation3 + $0x38] sm:$0xff]  }
 0x436   : > { %v6423_v2 = vpop.f32.mrf.mxu2 }
 0x437   : > { %v6450_v62 = vadd.f32 %v6423_v2, %v19940_v6  ;;  %v8057_v6 = vor.u32 %v22018_v14, %v20230_v29  ;;  %v7382_v2 = vsel %vm823_vm2, %v20221_v38, %v20272_v13 }
 0x438   : > { %v7042_v47 = vpop.f32.mrf.mxu0  ;;  %v6579_v60 = vpop.permute.xlu2 %6578 }
 0x439   : > { %v6851_v44 = vpop.f32.mrf.mxu3  ;;  %v6470_v4 = vadd.f32 %v20059_v1, %v6450_v62  ;;  %v20287_v23 = vpop.f32.mrf.mxu1  ;;  %v8062_v11 = vsel %vm1491_vm3, %v8057_v6, %v20281_v22  ;;  %v16024_v6 = vld [vmem:[%s21974_s4 + $0x200] sm:$0xff]  ;;  %vm6601_vm9 = vcmp.eq.s32.totalorder %v6579_v60, 1 }
 0x43a   : > { %v20283_v63 = vadd.f32 %v7039_v41, %v6851_v44  ;;  %22066 = vst [vmem:[#allocation20_spill] sm:$0xff] %v20287_v23  ;;  %v7796_v41 = vsel %vm1491_vm3, %v7791_v32, %v20275_v0  ;;  %v6567_v44 = vpop.permute.xlu1 %6566  ;;  %v7387_v32 = vshll.u32 %v17105_v30, 16  ;;  %v20299_v23 = vld [vmem:[#allocation3 + $0x48] sm:$0xff]  ;;  %8488 = vmatpush.bf16.msrb.mxu3 %v16024_v6 }
 0x43b   : > { %v6486_v61 = vmax.f32 %v6470_v4, 0.0  ;;  %7490 = vmatmul.bf16.gmra.mxu2 %v7382_v2  ;;  %7902 = vmatmul.bf16.gmra.mxu0 %v7796_v41  ;;  %vm6597_vm14 = vcmp.eq.s32.totalorder %v6567_v44, 1  ;;  %v20301_v4 = vld [vmem:[#allocation3 + $0x50] sm:$0xff] }
 0x43c   : > { %22065 = vst [vmem:[#allocation19_spill] sm:$0xff] %v20283_v63  ;;  %8168 = vmatmul.bf16.gmra.mxu1 %v8062_v11  ;;  %v6613_v29 = vsel %vm6597_vm14, %v6485_v35, 0.0  ;;  %v16016_v35 = vld [vmem:[%s21974_s4 + $0x1c0] sm:$0xff]  ;;  %v7950_v11 = vld [vmem:[#allocation3 + $0x58] sm:$0x1] }
 0x43d   : > { %v6614_v62 = vsel %vm6598_vm15, %v6486_v61, 0.0  ;;  %22067 = vst [vmem:[#allocation21_spill] sm:$0xff] %v20301_v4  ;;  %v20317_v61 = vld [vmem:[#allocation3 + $0x48] sm:$0xff]   ;;  %8301 = vmatpush.bf16.msrb.mxu2 %v16016_v35  ;;  %v7684_v35 = vld [vmem:[#allocation3 + $0x50] sm:$0x1]  ;;  %v8001_v27 = vunpack.c.l.b16 %v7950_v11 }
 0x43e   : > { %7636 = vmatmul.bf16.gmra.mxu3 %v16765_v5  ;;  %v16551_v38 = vpack.c.bf16 %v6614_v62, %v6613_v29  ;;  %v6426_v14 = vpop.f32.mrf.mxu2  ;;  %v7801_v5 = vshll.u32 %v20299_v23, 16  ;;  %v16599_v29 = vunpack.c.h.b16 %v20317_v61 }
 0x43f   : > { %v6451_v30 = vadd.f32 %v6426_v14, %v19954_v31  ;;  %v16047_v31 = vld [vmem:[%s21974_s4 + $0x40] sm:$0xff] }
 0x440   : > { %16756 = vst [vmem:[#allocation3 + $0xb0] sm:$0xff] %v16551_v38   ;;  %v7044_v41 = vpop.f32.mrf.mxu0  ;;  %v7797_v38 = vshrl.u32 %v20248_v53, 16  ;;  %8803 = vmatpush.bf16.msrb.mxu0 %v16047_v31 }
 0x441   : > { %v6854_v58 = vpop.f32.mrf.mxu3  ;;  %v20315_v44 = vpop.f32.mrf.mxu1  ;;  %v6471_v62 = vadd.f32 %v20059_v1, %v6451_v30  ;;  %v22070_v30 = vshll.u32 %v20301_v4, 16 }
 0x442   : > { %v20303_v2 = vadd.f32 %v7042_v47, %v6854_v58  ;;  %22069 = vst [vmem:[#allocation23_spill] sm:$0xff] %v20315_v44  ;;  %v7386_v58 = vrot.slane %v7384_v15, 3  ;;  %v7389_v47 = vrot.slane %v7387_v32, 4  ;;  %v20329_v32 = vrot.slane %v7801_v5, 1 }
 0x443   : > { %v7320_v5 = vpack.c.b16 %v16599_v29, %v16599_v29  ;;  %v6487_v28 = vmax.f32 %v6471_v62, 0.0  ;;  %v9033_v62 = vld [vmem:[#allocation3 + $0x84] sm:$0xff]  }
 0x444   : > { %22068 = vst [vmem:[#allocation22_spill] sm:$0xff] %v20303_v2  ;;  %v20327_v15 = vor.u32 %v7389_v47, %v7386_v58  ;;  %v20335_v2 = vrot.slane %v22070_v30, 1  ;;  %v7799_v58 = vor.u32 %v7797_v38, %v20275_v0  ;;  %v8065_v47 = vor.u32 %v22023_v8, %v20281_v22  ;;  %v6573_v0 = vpop.permute.xlu0 %6572  ;;  %v6576_v38 = vpop.permute.xlu1 %6575  ;;  %v16766_v22 = vld [vmem:[#allocation3 + $0x40] sm:$0xff]  }
 0x445   : > { %vm6599_vm4 = vcmp.eq.s32.totalorder %v6573_v0, 1  ;;  %vm6600_vm7 = vcmp.eq.s32.totalorder %v6576_v38, 1  ;;  %v7393_v11 = vshrl.u32 %v7320_v5, 16  ;;  %v10599_v8 = vld [vmem:[#allocation3 + $0x84] sm:$0xc] }
 0x446   : > { %v6428_v14 = vpop.f32.mrf.mxu2  ;;  %v8070_v29 = vsel %vm1491_vm3, %v8065_v47, %v20335_v2 }
 0x447   : > { %v6452_v6 = vadd.f32 %v6428_v14, %v19982_v39  ;;  %v7735_v14 = vunpack.c.l.b16 %v7684_v35  ;;  %v7396_v35 = vshll.u32 %v7320_v5, 16  ;;  %v7395_v38 = vrot.slane %v7393_v11, 3  ;;  %v16070_v5 = vld [vmem:[%s21974_s4 + $0xf8] sm:$0xff] }
 0x448   : > { %v7047_v63 = vpop.f32.mrf.mxu0  ;;  %9431 = vmatpush.bf16.msra.mxu3 %v16070_v5 }
 0x449   : > { %v6856_v44 = vpop.f32.mrf.mxu3  ;;  %v6472_v46 = vadd.f32 %v20059_v1, %v6452_v6  ;;  %v20344_v39 = vpop.f32.mrf.mxu1  ;;  %v7744_v30 = vpack.c.b16 %v7735_v14, %v7735_v14  ;;  %v10815_v14 = vunpack.c.l.b16 %v10599_v8  ;;  %v7805_v8 = vshrl.u32 %v20299_v23, 16 }
 0x44a   : > { %v20337_v53 = vadd.f32 %v7044_v41, %v6856_v44  ;;  %22072 = vst [vmem:[#allocation25_spill] sm:$0xff] %v20344_v39  ;;  %v7391_v41 = vsel %vm823_vm2, %v20272_v13, %v20327_v15  ;;  %v7804_v44 = vsel %vm1491_vm3, %v7799_v58, %v20329_v32  ;;  %v6615_v13 = vsel %vm6599_vm4, %v6487_v28, 0.0  ;;  %v10632_v39 = vld [vmem:[#allocation3 + $0x84] sm:$0x8] }
 0x44b   : > { %v6488_v31 = vmax.f32 %v6472_v46, 0.0  ;;  %7495 = vmatmul.bf16.gmra.mxu2 %v7391_v41  ;;  %7907 = vmatmul.bf16.gmra.mxu0 %v7804_v44  ;;  %v20353_v58 = vpack.c.b16 %v8001_v27, %v8001_v27  ;;  %v10667_v44 = vunpack.c.h.b16 %v9033_v62  ;;  %v16039_v28 = vld [vmem:[%s21974_s4] sm:$0xff]  ;;  %v16062_v27 = vld [vmem:[%s21974_s4 + $0xb8] sm:$0xff]  ;;  %v10666_v62 = vunpack.c.l.b16 %v10632_v39 }
 0x44c   : > { %22071 = vst [vmem:[#allocation24_spill] sm:$0xff] %v20337_v53  ;;  %8173 = vmatmul.bf16.gmra.mxu1 %v8070_v29  ;;  %9154 = vmatpush.bf16.msra.mxu2 %v16062_v27  ;;  %v16770_v27 = vld [vmem:[#allocation3 + $0x18] sm:$0xe] }
 0x44d   : > { %v6616_v6 = vsel %vm6600_vm7, %v6488_v31, 0.0  ;;  %22073 = vst [vmem:[#allocation26_spill] sm:$0xff] %v20353_v58  ;;  %v8075_v29 = vshll.u32 %v20353_v58, 16  ;;  %8991 = vmatpush.bf16.msrb.mxu1 %v16039_v28  ;;  %v10816_v11 = vpack.c.b16 %v10667_v44, %v10815_v14  ;;  %v8630_v14 = vld [vmem:[#allocation3 + $0x44] sm:$0xc]  ;;  %v7807_v58 = vor.u32 %v7805_v8, %v20329_v32 }
 0x44e   : > { %7641 = vmatmul.bf16.gmra.mxu3 %v16766_v22  ;;  %v16556_v46 = vpack.c.bf16 %v6616_v6, %v6615_v13  ;;  %v6431_v41 = vpop.f32.mrf.mxu2  ;;  %v7398_v22 = vrot.slane %v7396_v35, 4  ;;  %v16078_v35 = vld [vmem:[%s21974_s4 + $0x138] sm:$0xff]  ;;  %v20373_v13 = vpack.c.b16 %v10667_v44, %v10666_v62 }
 0x44f   : > { %v6453_v31 = vadd.f32 %v6431_v41, %v19988_v50  ;;  %v22025_v50 = vshrl.u32 %v20301_v4, 16  ;;  %v8077_v28 = vrot.slane %v8075_v29, 1  ;;  %9576 = vmatpush.bf16.msra.mxu0 %v16078_v35  ;;  %v10821_v23 = vshll.u32 %v10816_v11, 16 }
 0x450   : > { %16757 = vst [vmem:[#allocation3 + $0xb8] sm:$0xff] %v16556_v46   ;;  %v7049_v0 = vpop.f32.mrf.mxu0  ;;  %v7399_v6 = vor.u32 %v7398_v22, %v7395_v38  ;;  %v16769_v46 = vld [vmem:[#allocation3 + $0x18] sm:$0xf0]  ;;  %v10818_v38 = vshrl.u32 %v10816_v11, 16 }
 0x451   : > { %v6859_v53 = vpop.f32.mrf.mxu3  ;;  %22076 = vst [vmem:[#allocation29_spill] sm:$0xff] %v20373_v13  ;;  %v6473_v41 = vadd.f32 %v20059_v1, %v6453_v31  ;;  %v8073_v44 = vor.u32 %v22025_v50, %v20335_v2  ;;  %v11023_v31 = vshrl.u32 %v20373_v13, 16  ;;  %v20389_v8 = vor.u32 %v16770_v27, %v16769_v46  ;;  %v6582_v2 = vpop.permute.xlu0 %6581 }
 0x452   : > { %v20355_v47 = vadd.f32 %v7047_v63, %v6859_v53  ;;  %v20367_v63 = vpop.f32.mrf.mxu1  ;;  %v7809_v53 = vshll.u32 %v7744_v30, 16  ;;  %v16126_v30 = vld [vmem:[#allocation3 + $0x8c] sm:$0xff]  ;;  %v7400_v32 = vsel %vm823_vm2, %v20327_v15, %v7399_v6  ;;  %v16094_v15 = vld [vmem:[%s21974_s4 + $0x178] sm:$0xff]  ;;  %vm6602_vm8 = vcmp.eq.s32.totalorder %v6582_v2, 1 }
 0x453   : > { %22075 = vst [vmem:[#allocation28_spill] sm:$0xff] %v20367_v63  ;;  %v10826_v63 = vshrl.u32 %v16126_v30, 16  ;;  %v6489_v50 = vmax.f32 %v6473_v41, 0.0  ;;  %v8078_v4 = vsel %vm1491_vm3, %v8073_v44, %v8077_v28  ;;  %v11025_v6 = vrot.slane %v11023_v31, 3  ;;  %9841 = vmatpush.bf16.msra.mxu1 %v16094_v15 }
 0x454   : > { %22074 = vst [vmem:[#allocation27_spill] sm:$0xff] %v20355_v47  ;;  %v7811_v39 = vrot.slane %v7809_v53, 1  ;;  %v11026_v53 = vshll.u32 %v20373_v13, 16  ;;  %v8846_v47 = vunpack.c.l.b16 %v8630_v14  ;;  %v10820_v13 = vrot.slane %v10818_v38, 2 }
 0x455   : > { %v11030_v41 = vrot.slane %v10826_v63, 3  ;;  %v6617_v27 = vsel %vm6601_vm9, %v6489_v50, 0.0  ;;  %v22078_v44 = vunpack.c.l.b16 %v19318_v57  ;;  %v8384_v57 = vshll.u32 %v20389_v8, 16 }
 0x456   : > { %v6433_v5 = vpop.f32.mrf.mxu2  ;;  %v11028_v46 = vrot.slane %v11026_v53, 4  ;;  %v22081_v15 = vshrl.u32 %v19371_v43, 16 }
 0x457   : > { %v6454_v22 = vadd.f32 %v6433_v5, %v20000_v56  ;;  %v7812_v5 = vsel %vm1491_vm3, %v7807_v58, %v7811_v39  ;;  %v16061_v58 = vld [vmem:[%s21974_s4 + $0xb0] sm:$0xff] }
 0x458   : > { %v7052_v35 = vpop.f32.mrf.mxu0  ;;  %9155 = vmatpush.bf16.msra.mxu2 %v16061_v58 }
 0x459   : > { %v6861_v62 = vpop.f32.mrf.mxu3  ;;  %v6474_v11 = vadd.f32 %v20059_v1, %v6454_v22  ;;  %v11029_v22 = vor.u32 %v11028_v46, %v11025_v6  ;;  %v8859_v6 = vrot.slane %v22081_v15, 2  ;;  %v22082_v46 = vshll.u32 %v19371_v43, 16 }
 0x45a   : > { %v20385_v29 = vadd.f32 %v7049_v0, %v6861_v62  ;;  %v20392_v56 = vpop.f32.mrf.mxu1  ;;  %v10823_v0 = vrot.slane %v10821_v23, 3  ;;  %v10828_v62 = vrot.slane %v10826_v63, 2  ;;  %v8847_v63 = vpack.c.b16 %v22078_v44, %v8846_v47 }
 0x45b   : > { %v6490_v51 = vmax.f32 %v6474_v11, 0.0  ;;  %7500 = vmatmul.bf16.gmra.mxu2 %v7400_v32  ;;  %7912 = vmatmul.bf16.gmra.mxu0 %v7812_v5 }
 0x45c   : > { %22077 = vst [vmem:[#allocation30_spill] sm:$0xff] %v20385_v29  ;;  %v10829_v29 = vshll.u32 %v16126_v30, 16  ;;  %8178 = vmatmul.bf16.gmra.mxu1 %v8078_v4  ;;  %v16069_v30 = vld [vmem:[%s21974_s4 + $0xf0] sm:$0xff]  ;;  %v10824_v4 = vor.u32 %v10823_v0, %v10820_v13  ;;  %v8849_v32 = vshrl.u32 %v8847_v63, 16  ;;  %v8852_v2 = vshll.u32 %v8847_v63, 16 }
 0x45d   : > { %v6618_v14 = vsel %vm6602_vm8, %v6490_v51, 0.0  ;;  %9432 = vmatpush.bf16.msra.mxu3 %v16069_v30  ;;  %v8381_v51 = vshrl.u32 %v20389_v8, 16  ;;  %v22080_v0 = vshll.u32 %v20007_v17, 16  ;;  %v16127_v30 = vld [vmem:[#allocation3 + $0x94] sm:$0xff]  ;;  %v8222_v63 = vrot.slane %v20007_v17, 1 }
 0x45e   : > { %7646 = vmatmul.bf16.gmra.mxu3 %v20317_v61  ;;  %v10831_v39 = vrot.slane %v10829_v29, 3  ;;  %v11031_v28 = vrot.slane %v10829_v29, 4  ;;  %v16561_v60 = vpack.c.bf16 %v6618_v14, %v6617_v27  ;;  %v6436_v38 = vpop.f32.mrf.mxu2  ;;  %v8851_v27 = vrot.slane %v8849_v32, 2 }
 0x45f   : > { %v6455_v13 = vadd.f32 %v6436_v38, %v20024_v34  ;;  %v8862_v34 = vrot.slane %v22082_v46, 3  ;;  %v8383_v58 = vrot.slane %v8381_v51, 1  ;;  %v8854_v14 = vrot.slane %v8852_v2, 3  ;;  %v6588_v46 = vpop.permute.xlu2 %6587 }
 0x460   : > { %v20408_v61 = vor.u32 %v10831_v39, %v10828_v62  ;;  %v20410_v31 = vor.u32 %v11031_v28, %v11030_v41  ;;  %16758 = vst [vmem:[#allocation3 + $0xc0] sm:$0xff] %v16561_v60   ;;  %v7054_v50 = vpop.f32.mrf.mxu0  ;;  %v8389_v62 = vrot.slane %v22080_v0, 2  ;;  %v16077_v41 = vld [vmem:[%s21974_s4 + $0x130] sm:$0xff]  ;;  %v8386_v28 = vrot.slane %v8384_v57, 2  ;;  %v6585_v57 = vpop.permute.xlu1 %6584 }
 0x461   : > { %v6864_v23 = vpop.f32.mrf.mxu3  ;;  %v6475_v39 = vadd.f32 %v20059_v1, %v6455_v13  ;;  %9577 = vmatpush.bf16.msra.mxu0 %v16077_v41  ;;  %v20440_v60 = vld [vmem:[#allocation3 + $0x4c] sm:$0xff]  ;;  %v10835_v38 = vshrl.u32 %v16127_v30, 16  ;;  %v8221_v2 = vrot.slane %v20389_v8, 1  ;;  %v8723_v0 = vrot.slane %v19349_v3, 3 }
 0x462   : > { %v20412_v53 = vadd.f32 %v7052_v35, %v6864_v23  ;;  %v20418_v47 = vsel %vm616_vm1, %v10824_v4, %v20408_v61  ;;  %v20421_v29 = vpop.f32.mrf.mxu1  ;;  %v20425_v11 = vsel %vm823_vm2, %v11029_v22, %v20410_v31  ;;  %v22079_v35 = vshrl.u32 %v20007_v17, 16 }
 0x463   : > { %v10838_v4 = vshll.u32 %v16127_v30, 16  ;;  %v10837_v15 = vrot.slane %v10835_v38, 2  ;;  %v6491_v41 = vmax.f32 %v6475_v39, 0.0  ;;  %vm6603_vm10 = vcmp.eq.s32.totalorder %v6585_v57, 1  ;;  %v16060_v39 = vld [vmem:[%s21974_s4 + $0xa8] sm:$0xff] }
 0x464   : > { %v8388_v5 = vrot.slane %v22079_v35, 1  ;;  %v20446_v35 = vor.u32 %v8862_v34, %v8859_v6  ;;  %vm6604_vm11 = vcmp.eq.s32.totalorder %v6588_v46, 1  ;;  %9156 = vmatpush.bf16.msra.mxu2 %v16060_v39 }
 0x465   : > { %v10840_v8 = vrot.slane %v10838_v4, 3  ;;  %v11035_v57 = vrot.slane %v10838_v4, 4 }
 0x466   : > { %v6438_v44 = vpop.f32.mrf.mxu2  ;;  %v20444_v51 = vor.u32 %v8389_v62, %v8388_v5  ;;  %v8855_v5 = vor.u32 %v8854_v14, %v8851_v27  ;;  %v8223_v62 = vsel %vm1968_vm6, %v8221_v2, %v8222_v63  ;;  %v11034_v14 = vrot.slane %v10835_v38, 3 }
 0x467   : > { %v6456_v23 = vadd.f32 %v6438_v44, %v20038_v19  ;;  %v8387_v19 = vor.u32 %v8386_v28, %v8383_v58  ;;  %v16093_v58 = vld [vmem:[%s21974_s4 + $0x170] sm:$0xff]  ;;  %v16068_v28 = vld [vmem:[%s21974_s4 + $0xe8] sm:$0xff]  ;;  %v20474_v27 = vor.u32 %v10840_v8, %v10837_v15  ;;  %v6619_v44 = vsel %vm6603_vm10, %v6491_v41, 0.0 }
 0x468   : > { %v7878_v32 = vpop.f32.mrf.mxu0  ;;  %9842 = vmatpush.bf16.msra.mxu1 %v16093_v58  ;;  %9433 = vmatpush.bf16.msra.mxu3 %v16068_v28  ;;  %v11036_v15 = vor.u32 %v11035_v57, %v11034_v14  ;;  %v7229_v58 = vadd.f32 %v20061_v48, %v20080_v49  ;;  %v20509_v14 = vld [vmem:[#allocation3 + $0x54] sm:$0xff] }
 0x469   : > { %v6866_v22 = vpop.f32.mrf.mxu3  ;;  %v6476_v30 = vadd.f32 %v20059_v1, %v6456_v23  ;;  %v8391_v3 = vsel %vm2128_vm5, %v8387_v19, %v20444_v51  ;;  %v8864_v1 = vsel %vm616_vm1, %v8855_v5, %v20446_v35  ;;  %v20481_v19 = vsel %vm616_vm1, %v20408_v61, %v20474_v27 }
 0x46a   : > { %v20448_v13 = vadd.f32 %v7054_v50, %v6866_v22  ;;  %v20453_v43 = vpop.f32.mrf.mxu1  ;;  %v22083_v50 = vrot.slane %v20440_v60, 3  ;;  %v7228_v22 = vadd.f32 %v20032_v55, %v20044_v36  ;;  %22084 = vst [vmem:[#allocation31_spill] sm:$0xff] %v20481_v19  ;;  %v20487_v55 = vsel %vm823_vm2, %v20410_v31, %v11036_v15  ;;  %v16128_v31 = vld [vmem:[#allocation3 + $0x9c] sm:$0xff] }
 0x46b   : > { %v6492_v34 = vmax.f32 %v6476_v30, 0.0  ;;  %8302 = vmatmul.bf16.vlgmr.msrb.gmra.mxu2 %v8223_v62  ;;  %22085 = vst [vmem:[#allocation32_spill] sm:$0xff] %v20487_v55  ;;  %v22086_v36 = vshrl.u32 %v20042_v7, 16  ;;  %v22087_v62 = vshll.u32 %v20042_v7, 16  ;;  %v22088_v61 = vshrl.u32 %v19442_v16, 16  ;;  %v20504_v7 = vld [vmem:[#allocation3 + $0x28] sm:$0xff] }
 0x46c   : > { %v8725_v6 = vsel %vm490_vm0, %v8723_v0, %v22083_v50  ;;  %8992 = vmatmul.bf16.vlgmr.msrb.gmra.mxu1 %v8864_v1  ;;  %v16076_v1 = vld [vmem:[%s21974_s4 + $0x128] sm:$0xff]  ;;  %v10844_v57 = vshrl.u32 %v16128_v31, 16 }
 0x46d   : > { %8804 = vmatmul.bf16.vlgmr.msrb.gmra.mxu0 %v8725_v6  ;;  %v6620_v23 = vsel %vm6604_vm11, %v6492_v34, 0.0  ;;  %v8392_v4 = vrot.slane %v22086_v36, 1  ;;  %v8393_v50 = vrot.slane %v22087_v62, 2  ;;  %v8868_v8 = vrot.slane %v22088_v61, 2 }
 0x46e   : > { %8489 = vmatmul.bf16.vlgmr.msrb.gmra.mxu3 %v8391_v3  ;;  %v16566_v2 = vpack.c.bf16 %v6620_v23, %v6619_v44  ;;  %v7466_v0 = vpop.f32.mrf.mxu2  ;;  %v22089_v34 = vshll.u32 %v19442_v16, 16  ;;  %9578 = vmatpush.bf16.msra.mxu0 %v16076_v1  ;;  %v8726_v16 = vrot.slane %v20509_v14, 3  ;;  %v22090_v62 = vrot.slane %v20440_v60, 3  ;;  %v16059_v60 = vld [vmem:[%s21974_s4 + $0xa0] sm:$0xff]  ;;  %v16058_v14 = vld [vmem:[%s21974_s4 + $0x98] sm:$0xff] }
 0x46f   : > { %v7506_v46 = vadd.f32 %v7466_v0, %v7228_v22  ;;  %v20507_v28 = vor.u32 %v8393_v50, %v8392_v4  ;;  %9157 = vmatpush.bf16.msra.mxu2 %v16059_v60 }
 0x470   : > { %16759 = vst [vmem:[#allocation3 + $0xc8] sm:$0xff] %v16566_v2   ;;  %v7880_v38 = vpop.f32.mrf.mxu0  ;;  %v8871_v3 = vrot.slane %v22089_v34, 3  ;;  %v10847_v2 = vshll.u32 %v16128_v31, 16  ;;  %v8727_v50 = vsel %vm490_vm0, %v22090_v62, %v8726_v16  ;;  %v7231_v62 = vadd.f32 %v20111_v25, %v20130_v33 }
 0x471   : > { %v7612_v30 = vpop.f32.mrf.mxu3  ;;  %v8395_v4 = vsel %vm2128_vm5, %v20444_v51, %v20507_v28 }
 0x472   : > { %v7652_v41 = vadd.f32 %v7612_v30, %v7506_v46  ;;  %v20483_v5 = vpop.f32.mrf.mxu1  ;;  %v20512_v22 = vor.u32 %v8871_v3, %v8868_v8  ;;  %v10846_v46 = vrot.slane %v10844_v57, 2  ;;  %v10849_v30 = vrot.slane %v10847_v2, 3 }
 0x473   : > { %v11039_v61 = vrot.slane %v10847_v2, 4  ;;  %v7230_v3 = vadd.f32 %v20083_v59, %v20099_v18  ;;  %v22093_v2 = vshrl.u32 %v20097_v21, 16  ;;  %v22094_v18 = vshll.u32 %v20097_v21, 16  ;;  %v20569_v21 = vld [vmem:[#allocation3 + $0x30] sm:$0xff]  ;;  %9158 = vmatpush.bf16.msra.mxu2 %v16058_v14 }
 0x474   : > { %v20493_v6 = vadd.f32 %v7878_v32, %v7652_v41  ;;  %v8224_v32 = vrot.slane %v20504_v7, 1  ;;  %v11038_v41 = vrot.slane %v10844_v57, 3  ;;  %v8873_v17 = vsel %vm616_vm1, %v20446_v35, %v20512_v22 }
 0x475   : > { %v10850_v51 = vor.u32 %v10849_v30, %v10846_v46  ;;  %v8396_v59 = vrot.slane %v22093_v2, 1  ;;  %v22095_v46 = vshrl.u32 %v19488_v24, 16 }
 0x476   : > { %v7468_v39 = vpop.f32.mrf.mxu2  ;;  %v8225_v36 = vsel %vm1968_vm6, %v8222_v63, %v8224_v32  ;;  %v16092_v63 = vld [vmem:[%s21974_s4 + $0x168] sm:$0xff]  ;;  %v11040_v34 = vor.u32 %v11039_v61, %v11038_v41 }
 0x477   : > { %v7507_v44 = vadd.f32 %v7468_v39, %v7229_v58  ;;  %9843 = vmatpush.bf16.msra.mxu1 %v16092_v63  ;;  %v20547_v35 = vsel %vm616_vm1, %v20474_v27, %v10850_v51  ;;  %v8877_v30 = vrot.slane %v22095_v46, 2 }
 0x478   : > { %v7883_v0 = vpop.f32.mrf.mxu0  ;;  %22091 = vst [vmem:[#allocation33_spill] sm:$0xff] %v20547_v35  ;;  %v20550_v31 = vsel %vm823_vm2, %v11036_v15, %v11040_v34  ;;  %v22096_v15 = vshll.u32 %v19488_v24, 16 }
 0x479   : > { %v7614_v23 = vpop.f32.mrf.mxu3  ;;  %22092 = vst [vmem:[#allocation34_spill] sm:$0xff] %v20550_v31 }
 0x47a   : > { %v7653_v48 = vadd.f32 %v7614_v23, %v7507_v44  ;;  %v20514_v49 = vpop.f32.mrf.mxu1  ;;  %v8880_v41 = vrot.slane %v22096_v15, 3  ;;  %v7232_v15 = vadd.f32 %v20134_v20, %v20150_v52  ;;  %v22100_v20 = vshll.u32 %v20148_v26, 16 }
 0x47b   : > { %8307 = vmatmul.bf16.gmra.mxu2 %v8225_v36  ;;  %v16075_v36 = vld [vmem:[%s21974_s4 + $0x120] sm:$0xff] }
 0x47c   : > { %v20529_v8 = vadd.f32 %v7880_v38, %v7653_v48  ;;  %8997 = vmatmul.bf16.gmra.mxu1 %v8873_v17  ;;  %v16067_v38 = vld [vmem:[%s21974_s4 + $0xe0] sm:$0xff]  ;;  %v8397_v48 = vrot.slane %v22094_v18, 2  ;;  %9579 = vmatpush.bf16.msra.mxu0 %v16075_v36  ;;  %v8401_v52 = vrot.slane %v22100_v20, 2 }
 0x47d   : > { %8809 = vmatmul.bf16.gmra.mxu0 %v8727_v50  ;;  %9434 = vmatpush.bf16.msra.mxu3 %v16067_v38  ;;  %v20574_v17 = vld [vmem:[#allocation3 + $0x5c] sm:$0xff]  ;;  %v20577_v38 = vor.u32 %v8880_v41, %v8877_v30 }
 0x47e   : > { %8494 = vmatmul.bf16.gmra.mxu3 %v8395_v4  ;;  %v7471_v1 = vpop.f32.mrf.mxu2  ;;  %v16129_v4 = vld [vmem:[#allocation3 + $0xa4] sm:$0xff]  ;;  %v20572_v61 = vor.u32 %v8397_v48, %v8396_v59  ;;  %v8728_v24 = vrot.slane %v20574_v17, 3  ;;  %v16057_v17 = vld [vmem:[%s21974_s4 + $0x90] sm:$0xff] }
 0x47f   : > { %v7508_v58 = vadd.f32 %v7471_v1, %v7230_v3  ;;  %v10853_v3 = vshrl.u32 %v16129_v4, 16  ;;  %v10856_v1 = vshll.u32 %v16129_v4, 16  ;;  %v8882_v7 = vsel %vm616_vm1, %v20512_v22, %v20577_v38  ;;  %9159 = vmatpush.bf16.msra.mxu2 %v16057_v17 }
 0x480   : > { %v7885_v44 = vpop.f32.mrf.mxu0  ;;  %v8399_v18 = vsel %vm2128_vm5, %v20507_v28, %v20572_v61  ;;  %v8729_v48 = vsel %vm490_vm0, %v8726_v16, %v8728_v24  ;;  %v16066_v16 = vld [vmem:[%s21974_s4 + $0xd8] sm:$0xff] }
 0x481   : > { %v7617_v39 = vpop.f32.mrf.mxu3  ;;  %v11042_v2 = vrot.slane %v10853_v3, 3  ;;  %v11043_v46 = vrot.slane %v10856_v1, 4  ;;  %9435 = vmatpush.bf16.msra.mxu3 %v16066_v16 }
 0x482   : > { %v7654_v23 = vadd.f32 %v7617_v39, %v7508_v58  ;;  %v20552_v57 = vpop.f32.mrf.mxu1  ;;  %v10855_v39 = vrot.slane %v10853_v3, 2  ;;  %v22099_v3 = vshrl.u32 %v20148_v26, 16 }
 0x484   : > { %v20558_v27 = vadd.f32 %v7883_v0, %v7654_v23  ;;  %v8226_v0 = vrot.slane %v20569_v21, 1  ;;  %v10858_v23 = vrot.slane %v10856_v1, 3  ;;  %v8400_v1 = vrot.slane %v22099_v3, 1 }
 0x486   : > { %v7473_v50 = vpop.f32.mrf.mxu2  ;;  %v8227_v59 = vsel %vm1968_vm6, %v8224_v32, %v8226_v0  ;;  %v16091_v32 = vld [vmem:[%s21974_s4 + $0x160] sm:$0xff]  ;;  %v10859_v28 = vor.u32 %v10858_v23, %v10855_v39 }
 0x487   : > { %v7509_v63 = vadd.f32 %v7473_v50, %v7231_v62  ;;  %9844 = vmatpush.bf16.msra.mxu1 %v16091_v32 }
 0x488   : > { %v7888_v58 = vpop.f32.mrf.mxu0  ;;  %v20611_v22 = vsel %vm616_vm1, %v10850_v51, %v10859_v28 }
 0x489   : > { %v7619_v60 = vpop.f32.mrf.mxu3  ;;  %22097 = vst [vmem:[#allocation35_spill] sm:$0xff] %v20611_v22 }
 0x48a   : > { %v7655_v25 = vadd.f32 %v7619_v60, %v7509_v63  ;;  %v20579_v33 = vpop.f32.mrf.mxu1 }
 0x48b   : > { %8312 = vmatmul.bf16.gmra.mxu2 %v8227_v59  ;;  %v16130_v59 = vld [vmem:[#allocation3 + $0xac] sm:$0xff] }
 0x48c   : > { %v20594_v30 = vadd.f32 %v7885_v44, %v7655_v25  ;;  %9002 = vmatmul.bf16.gmra.mxu1 %v8882_v7  ;;  %v11044_v44 = vor.u32 %v11043_v46, %v11042_v2  ;;  %v22101_v25 = vshrl.u32 %v19534_v12, 16  ;;  %v16074_v2 = vld [vmem:[%s21974_s4 + $0x118] sm:$0xff]  ;;  %v8228_v46 = vrot.slane %v20148_v26, 1  ;;  %v20636_v7 = vld [vmem:[#allocation3 + $0x64] sm:$0xff] }
 0x48d   : > { %8814 = vmatmul.bf16.gmra.mxu0 %v8729_v48  ;;  %v8730_v32 = vrot.slane %v20636_v7, 3  ;;  %v16056_v7 = vld [vmem:[%s21974_s4 + $0x88] sm:$0xff] }
 0x48e   : > { %8499 = vmatmul.bf16.gmra.mxu3 %v8399_v18  ;;  %v7476_v41 = vpop.f32.mrf.mxu2  ;;  %v20614_v36 = vsel %vm823_vm2, %v11040_v34, %v11044_v44  ;;  %v8886_v39 = vrot.slane %v22101_v25, 2  ;;  %v22102_v34 = vshll.u32 %v19534_v12, 16  ;;  %v7233_v18 = vadd.f32 %v20162_v10, %v20181_v45  ;;  %9580 = vmatpush.bf16.msra.mxu0 %v16074_v2 }
 0x48f   : > { %22098 = vst [vmem:[#allocation36_spill] sm:$0xff] %v20614_v36  ;;  %v7510_v4 = vadd.f32 %v7476_v41, %v7232_v15  ;;  %v10862_v15 = vshrl.u32 %v16130_v59, 16  ;;  %v10865_v41 = vshll.u32 %v16130_v59, 16  ;;  %9160 = vmatpush.bf16.msra.mxu2 %v16056_v7  ;;  %v16072_v7 = vld [vmem:[%s21974_s4 + $0x108] sm:$0xff] }
 0x490   : > { %v7890_v50 = vpop.f32.mrf.mxu0  ;;  %v8889_v23 = vrot.slane %v22102_v34, 3  ;;  %v7234_v34 = vadd.f32 %v20185_v37, %v20201_v42  ;;  %v22106_v37 = vshll.u32 %v20199_v9, 16 }
 0x491   : > { %v7622_v62 = vpop.f32.mrf.mxu3  ;;  %v10864_v10 = vrot.slane %v10862_v15, 2  ;;  %v10867_v45 = vrot.slane %v10865_v41, 3  ;;  %v11046_v3 = vrot.slane %v10862_v15, 3  ;;  %v11047_v25 = vrot.slane %v10865_v41, 4 }
 0x492   : > { %v7656_v63 = vadd.f32 %v7622_v62, %v7510_v4  ;;  %v20616_v60 = vpop.f32.mrf.mxu1  ;;  %v20639_v16 = vor.u32 %v8889_v23, %v8886_v39  ;;  %v22105_v15 = vshrl.u32 %v20199_v9, 16  ;;  %v8405_v42 = vrot.slane %v22106_v37, 2 }
 0x494   : > { %v20622_v51 = vadd.f32 %v7888_v58, %v7656_v63  ;;  %v20634_v58 = vor.u32 %v8401_v52, %v8400_v1  ;;  %v8229_v1 = vsel %vm1968_vm6, %v8226_v0, %v8228_v46  ;;  %v8731_v52 = vsel %vm490_vm0, %v8728_v24, %v8730_v32  ;;  %v16090_v0 = vld [vmem:[%s21974_s4 + $0x158] sm:$0xff]  ;;  %v16065_v24 = vld [vmem:[%s21974_s4 + $0xd0] sm:$0xff] }
 0x495   : > { %v8891_v21 = vsel %vm616_vm1, %v20577_v38, %v20639_v16  ;;  %9845 = vmatpush.bf16.msra.mxu1 %v16090_v0  ;;  %9436 = vmatpush.bf16.msra.mxu3 %v16065_v24  ;;  %v8404_v41 = vrot.slane %v22105_v15, 1  ;;  %v20698_v0 = vld [vmem:[#allocation3 + $0x6c] sm:$0xff] }
 0x496   : > { %v7478_v48 = vpop.f32.mrf.mxu2  ;;  %v8403_v20 = vsel %vm2128_vm5, %v20572_v61, %v20634_v58  ;;  %v10868_v61 = vor.u32 %v10867_v45, %v10864_v10  ;;  %v22031_v17 = vrot.slane %v20698_v0, 3 }
 0x497   : > { %v7511_v12 = vadd.f32 %v7478_v48, %v7233_v18 }
 0x498   : > { %v7893_v4 = vpop.f32.mrf.mxu0  ;;  %v20673_v38 = vsel %vm616_vm1, %v10859_v28, %v10868_v61 }
 0x499   : > { %v7624_v14 = vpop.f32.mrf.mxu3  ;;  %22103 = vst [vmem:[#allocation37_spill] sm:$0xff] %v20673_v38 }
 0x49a   : > { %v7657_v62 = vadd.f32 %v7624_v14, %v7511_v12  ;;  %v20641_v63 = vpop.f32.mrf.mxu1 }
 0x49b   : > { %8317 = vmatmul.bf16.gmra.mxu2 %v8229_v1  ;;  %v16131_v1 = vld [vmem:[#allocation3 + $0xb4] sm:$0xff] }
 0x49c   : > { %v20656_v39 = vadd.f32 %v7890_v50, %v7657_v62  ;;  %9007 = vmatmul.bf16.gmra.mxu1 %v8891_v21  ;;  %v11048_v50 = vor.u32 %v11047_v25, %v11046_v3  ;;  %v22107_v62 = vshrl.u32 %v19577_v54, 16  ;;  %v16073_v3 = vld [vmem:[%s21974_s4 + $0x110] sm:$0xff]  ;;  %v22032_v21 = vrot.slane %v20199_v9, 1 }
 0x49d   : > { %8819 = vmatmul.bf16.gmra.mxu0 %v8731_v52 }
 0x49e   : > { %8504 = vmatmul.bf16.gmra.mxu3 %v8403_v20  ;;  %v7481_v23 = vpop.f32.mrf.mxu2  ;;  %v20676_v2 = vsel %vm823_vm2, %v11044_v44, %v11048_v50  ;;  %v8895_v10 = vrot.slane %v22107_v62, 2  ;;  %v22108_v44 = vshll.u32 %v19577_v54, 16  ;;  %v22109_v20 = vld [vmem:[#allocation14_spill] sm:$0xff]  ;;  %9581 = vmatpush.bf16.msra.mxu0 %v16073_v3  ;;  %v22110_v3 = vld [vmem:[#allocation17_spill] sm:$0xff] }
 0x49f   : > { %22104 = vst [vmem:[#allocation38_spill] sm:$0xff] %v20676_v2  ;;  %v7512_v59 = vadd.f32 %v7481_v23, %v7234_v34  ;;  %v7235_v52 = vadd.f32 %v22109_v20, %v20232_v40  ;;  %v10871_v23 = vshrl.u32 %v16131_v1, 16 }
 0x4a0   : > { %v7895_v48 = vpop.f32.mrf.mxu0  ;;  %v8898_v45 = vrot.slane %v22108_v44, 3 }
 0x4a1   : > { %v7627_v18 = vpop.f32.mrf.mxu3  ;;  %v10873_v40 = vrot.slane %v10871_v23, 2  ;;  %v11050_v62 = vrot.slane %v10871_v23, 3 }
 0x4a2   : > { %v7658_v12 = vadd.f32 %v7627_v18, %v7512_v59  ;;  %v20678_v14 = vpop.f32.mrf.mxu1  ;;  %v20701_v34 = vor.u32 %v8898_v45, %v8895_v10  ;;  %v10874_v59 = vshll.u32 %v16131_v1, 16  ;;  %v8733_v10 = vsel %vm490_vm0, %v8730_v32, %v22031_v17  ;;  %v16064_v32 = vld [vmem:[%s21974_s4 + $0xc8] sm:$0xff]  ;;  %9582 = vmatpush.bf16.msra.mxu0 %v16072_v7 }
 0x4a3   : > { %9437 = vmatpush.bf16.msra.mxu3 %v16064_v32 }
 0x4a4   : > { %v20684_v28 = vadd.f32 %v7893_v4, %v7658_v12  ;;  %v20696_v4 = vor.u32 %v8405_v42, %v8404_v41  ;;  %v10876_v37 = vrot.slane %v10874_v59, 3  ;;  %v8231_v41 = vsel %vm1968_vm6, %v8228_v46, %v22032_v21  ;;  %v16089_v46 = vld [vmem:[%s21974_s4 + $0x150] sm:$0xff] }
 0x4a5   : > { %v11051_v44 = vrot.slane %v10874_v59, 4  ;;  %v8900_v26 = vsel %vm616_vm1, %v20639_v16, %v20701_v34  ;;  %v22111_v16 = vld [vmem:[#allocation15_spill] sm:$0xff]  ;;  %9846 = vmatpush.bf16.msra.mxu1 %v16089_v46 }
 0x4a6   : > { %v7483_v25 = vpop.f32.mrf.mxu2  ;;  %v8407_v42 = vsel %vm2128_vm5, %v20634_v58, %v20696_v4  ;;  %v20726_v58 = vor.u32 %v10876_v37, %v10873_v40  ;;  %v7236_v1 = vadd.f32 %v22111_v16, %v22110_v3  ;;  %v22114_v40 = vld [vmem:[#allocation16_spill] sm:$0xff] }
 0x4a7   : > { %v7513_v54 = vadd.f32 %v7483_v25, %v7235_v52  ;;  %v22115_v37 = vshrl.u32 %v22114_v40, 16  ;;  %v16132_v3 = vld [vmem:[#allocation3 + $0xbc] sm:$0xff]  ;;  %v10615_v16 = vld [vmem:[#allocation3 + $0xc4] sm:$0x7]  ;;  %v22139_v22 = vrot.slane %v22114_v40, 1 }
 0x4a8   : > { %v7898_v18 = vpop.f32.mrf.mxu0  ;;  %v20740_v20 = vsel %vm616_vm1, %v10868_v61, %v20726_v58  ;;  %v10880_v21 = vshrl.u32 %v16132_v3, 16  ;;  %v10883_v32 = vshll.u32 %v16132_v3, 16  ;;  %v22124_v3 = vrot.slane %v20698_v0, 3 }
 0x4a9   : > { %v7629_v24 = vpop.f32.mrf.mxu3  ;;  %22112 = vst [vmem:[#allocation14_spill] sm:$0xff] %v20740_v20 }
 0x4aa   : > { %v7659_v12 = vadd.f32 %v7629_v24, %v7513_v54  ;;  %v20703_v15 = vpop.f32.mrf.mxu1 }
 0x4ab   : > { %8322 = vmatmul.bf16.gmra.mxu2 %v8231_v41  ;;  %v22116_v41 = vshll.u32 %v22114_v40, 16 }
 0x4ac   : > { %v20718_v45 = vadd.f32 %v7895_v48, %v7659_v12  ;;  %9012 = vmatmul.bf16.gmra.mxu1 %v8900_v26  ;;  %v20734_v48 = vor.u32 %v11051_v44, %v11050_v62  ;;  %v8408_v62 = vrot.slane %v22115_v37, 1  ;;  %v10682_v37 = vunpack.c.l.b16 %v10615_v16 }
 0x4ad   : > { %8824 = vmatmul.bf16.gmra.mxu0 %v8733_v10  ;;  %v8409_v61 = vrot.slane %v22116_v41, 2 }
 0x4ae   : > { %8509 = vmatmul.bf16.gmra.mxu3 %v8407_v42  ;;  %v7486_v52 = vpop.f32.mrf.mxu2  ;;  %v20744_v25 = vsel %vm823_vm2, %v11048_v50, %v20734_v48  ;;  %v22117_v42 = vld [vmem:[#allocation9_spill] sm:$0xff]  ;;  %v20771_v17 = vpack.c.b16 %v10682_v37, %v10682_v37  ;;  %v11054_v37 = vrot.slane %v10880_v21, 3 }
 0x4af   : > { %22113 = vst [vmem:[#allocation17_spill] sm:$0xff] %v20744_v25  ;;  %v7514_v54 = vadd.f32 %v7486_v52, %v7236_v1  ;;  %v22118_v10 = vshrl.u32 %v22117_v42, 16  ;;  %v22119_v26 = vshll.u32 %v22117_v42, 16  ;;  %v22120_v1 = vld [vmem:[#allocation19_spill] sm:$0xff]  ;;  %v22121_v52 = vld [vmem:[#allocation18_spill] sm:$0xff] }
 0x4b0   : > { %v7900_v23 = vpop.f32.mrf.mxu0  ;;  %v20766_v42 = vld [vmem:[#allocation3 + $0x74] sm:$0xff]  ;;  %v10892_v0 = vshll.u32 %v20771_v17, 16 }
 0x4b1   : > { %v7632_v24 = vpop.f32.mrf.mxu3  ;;  %v8904_v44 = vrot.slane %v22118_v10, 2  ;;  %v8907_v46 = vrot.slane %v22119_v26, 3 }
 0x4b2   : > { %v7660_v59 = vadd.f32 %v7632_v24, %v7514_v54  ;;  %v20746_v12 = vpop.f32.mrf.mxu1  ;;  %v7237_v54 = vadd.f32 %v22121_v52, %v22120_v1  ;;  %v20764_v24 = vor.u32 %v8409_v61, %v8408_v62  ;;  %v22122_v1 = vrot.slane %v22114_v40, 1  ;;  %v16109_v40 = vld [vmem:[%s21974_s4 + $0x1b8] sm:$0xff] }
 0x4b3   : > { %v22123_v62 = vrot.slane %v20199_v9, 1  ;;  %v10885_v52 = vrot.slane %v10883_v32, 3  ;;  %v10889_v9 = vshrl.u32 %v20771_v17, 16 }
 0x4b4   : > { %v20756_v50 = vadd.f32 %v7898_v18, %v7660_v59  ;;  %v22033_v18 = vrot.slane %v20766_v42, 3  ;;  %v20769_v59 = vor.u32 %v8907_v46, %v8904_v44  ;;  %v8411_v44 = vsel %vm2128_vm5, %v20696_v4, %v20764_v24 }
 0x4b5   : > { %v8233_v61 = vsel %vm1968_vm6, %v22123_v62, %v22122_v1  ;;  %v10882_v46 = vrot.slane %v10880_v21, 2  ;;  %v16055_v21 = vld [vmem:[%s21974_s4 + $0x80] sm:$0xff]  ;;  %v22126_v62 = vld [vmem:[#allocation22_spill] sm:$0xff] }
 0x4b6   : > { %v7488_v41 = vpop.f32.mrf.mxu2  ;;  %v8909_v4 = vsel %vm616_vm1, %v20701_v34, %v20769_v59  ;;  %v10891_v34 = vrot.slane %v10889_v9, 2  ;;  %9161 = vmatpush.bf16.msra.mxu2 %v16055_v21 }
 0x4b7   : > { %v7515_v10 = vadd.f32 %v7488_v41, %v7237_v54  ;;  %v8735_v54 = vsel %vm490_vm0, %v22124_v3, %v22033_v18  ;;  %v11055_v41 = vrot.slane %v10883_v32, 4 }
 0x4b8   : > { %v7903_v25 = vpop.f32.mrf.mxu0 }
 0x4b9   : > { %v7634_v26 = vpop.f32.mrf.mxu3  ;;  %v20804_v32 = vor.u32 %v11055_v41, %v11054_v37 }
 0x4ba   : > { %v7661_v7 = vadd.f32 %v7634_v26, %v7515_v10  ;;  %v20778_v16 = vpop.f32.mrf.mxu1  ;;  %v16088_v10 = vld [vmem:[%s21974_s4 + $0x148] sm:$0xff]  ;;  %v10886_v26 = vor.u32 %v10885_v52, %v10882_v46  ;;  %10106 = vmatpush.bf16.msrb.mxu2 %v16109_v40 }
 0x4bb   : > { %8327 = vmatmul.bf16.gmra.mxu2 %v8233_v61  ;;  %22125 = vst [vmem:[#allocation15_spill] sm:$0xff] %v20804_v32  ;;  %v22127_v61 = vld [vmem:[#allocation20_spill] sm:$0xff]  ;;  %9847 = vmatpush.bf16.msra.mxu1 %v16088_v10  ;;  %v20815_v3 = vsel %vm823_vm2, %v20734_v48, %v20804_v32  ;;  %v22134_v48 = vld [vmem:[#allocation11_spill] sm:$0xff] }
 0x4bc   : > { %v20789_v1 = vadd.f32 %v7900_v23, %v7661_v7  ;;  %9017 = vmatmul.bf16.gmra.mxu1 %v8909_v4  ;;  %v16063_v23 = vld [vmem:[%s21974_s4 + $0xc0] sm:$0xff]  ;;  %v7238_v7 = vadd.f32 %v22127_v61, %v22126_v62  ;;  %v20810_v46 = vsel %vm616_vm1, %v20726_v58, %v10886_v26  ;;  %22129 = vst [vmem:[#allocation9_spill] sm:$0xff] %v20815_v3  ;;  %v22131_v58 = vld [vmem:[#allocation21_spill] sm:$0xff]  ;;  %v22135_v32 = vshrl.u32 %v22134_v48, 16 }
 0x4bd   : > { %8829 = vmatmul.bf16.gmra.mxu0 %v8735_v54  ;;  %22128 = vst [vmem:[#allocation16_spill] sm:$0xff] %v20810_v46  ;;  %9438 = vmatpush.bf16.msra.mxu3 %v16063_v23  ;;  %v22133_v21 = vshll.u32 %v22131_v58, 16 }
 0x4be   : > { %8514 = vmatmul.bf16.gmra.mxu3 %v8411_v44  ;;  %v10894_v44 = vrot.slane %v10892_v0, 3  ;;  %v7491_v52 = vpop.f32.mrf.mxu2  ;;  %v22132_v0 = vshrl.u32 %v22131_v58, 16 }
 0x4bf   : > { %v7516_v54 = vadd.f32 %v7491_v52, %v7238_v7  ;;  %v8413_v23 = vrot.slane %v22133_v21, 2  ;;  %v8913_v7 = vrot.slane %v22135_v32, 2  ;;  %v8359_v52 = vld [vmem:[#allocation3 + $0x58] sm:$0x3]  ;;  %v17165_v21 = vld [vmem:[#allocation3 + $0x7c] sm:$0xff] }
 0x4c0   : > { %v10895_v41 = vor.u32 %v10894_v44, %v10891_v34  ;;  %v7905_v9 = vpop.f32.mrf.mxu0  ;;  %v8412_v61 = vrot.slane %v22132_v0, 1  ;;  %v22136_v34 = vshll.u32 %v22134_v48, 16  ;;  %v8736_v3 = vrot.slane %v17165_v21, 3 }
 0x4c1   : > { %v7637_v37 = vpop.f32.mrf.mxu3  ;;  %v8378_v32 = vunpack.c.l.b16 %v8359_v52 }
 0x4c2   : > { %v7662_v4 = vadd.f32 %v7637_v37, %v7516_v54  ;;  %v20817_v62 = vpop.f32.mrf.mxu1  ;;  %v20820_v10 = vsel %vm616_vm1, %v10886_v26, %v10895_v41  ;;  %v8916_v44 = vrot.slane %v22136_v34, 3  ;;  %v16071_v26 = vld [vmem:[%s21974_s4 + $0x100] sm:$0xff]  ;;  %v22138_v41 = vld [vmem:[#allocation23_spill] sm:$0xff] }
 0x4c3   : > { %22130 = vst [vmem:[#allocation19_spill] sm:$0xff] %v20820_v10  ;;  %v8646_v54 = vld [vmem:[#allocation3 + $0x84] sm:$0x7]  ;;  %9583 = vmatpush.bf16.msra.mxu0 %v16071_v26 }
 0x4c4   : > { %v20826_v18 = vadd.f32 %v7903_v25, %v7662_v4  ;;  %v22137_v37 = vld [vmem:[#allocation24_spill] sm:$0xff]  ;;  %v8234_v25 = vrot.slane %v22131_v58, 1  ;;  %v8414_v4 = vor.u32 %v8413_v23, %v8412_v61  ;;  %v8917_v34 = vor.u32 %v8916_v44, %v8913_v7 }
 0x4c5   : > { %v7239_v0 = vadd.f32 %v22138_v41, %v22137_v37  ;;  %v8713_v20 = vunpack.c.l.b16 %v8646_v54  ;;  %v22140_v58 = vrot.slane %v20766_v42, 3  ;;  %v8379_v23 = vpack.c.b16 %v8378_v32, %v8378_v32  ;;  %v22142_v42 = vld [vmem:[#allocation25_spill] sm:$0xff] }
 0x4c6   : > { %v7493_v10 = vpop.f32.mrf.mxu2  ;;  %v8235_v37 = vsel %vm1968_vm6, %v22139_v22, %v8234_v25  ;;  %v8415_v26 = vsel %vm2128_vm5, %v20764_v24, %v8414_v4  ;;  %v16087_v22 = vld [vmem:[%s21974_s4 + $0x140] sm:$0xff]  ;;  %v22141_v24 = vld [vmem:[#allocation27_spill] sm:$0xff] }
 0x4c7   : > { %v7517_v46 = vadd.f32 %v7493_v10, %v7239_v0  ;;  %v8737_v61 = vsel %vm490_vm0, %v22140_v58, %v8736_v3  ;;  %v8722_v7 = vpack.c.b16 %v8713_v20, %v8713_v20  ;;  %9848 = vmatpush.bf16.msra.mxu1 %v16087_v22  ;;  %v8417_v20 = vshrl.u32 %v8379_v23, 16  ;;  %v22143_v22 = vld [vmem:[#allocation30_spill] sm:$0xff] }
 0x4c8   : > { %v7908_v2 = vpop.f32.mrf.mxu0  ;;  %v8420_v54 = vshll.u32 %v8379_v23, 16 }
 0x4c9   : > { %v7639_v48 = vpop.f32.mrf.mxu3  ;;  %v8920_v41 = vshrl.u32 %v8722_v7, 16  ;;  %v8923_v0 = vshll.u32 %v8722_v7, 16 }
 0x4ca   : > { %v7663_v38 = vadd.f32 %v7639_v48, %v7517_v46  ;;  %v20838_v36 = vpop.f32.mrf.mxu1  ;;  %v8918_v46 = vsel %vm616_vm1, %v20769_v59, %v8917_v34  ;;  %v8422_v58 = vrot.slane %v8420_v54, 2 }
 0x4cb   : > { %8332 = vmatmul.bf16.gmra.mxu2 %v8235_v37  ;;  %v8419_v37 = vrot.slane %v8417_v20, 1 }
 0x4cc   : > { %v20848_v10 = vadd.f32 %v7905_v9, %v7663_v38  ;;  %9022 = vmatmul.bf16.gmra.mxu1 %v8918_v46  ;;  %v16117_v38 = vld [vmem:[%s21974_s4 + $0x1f8] sm:$0xff]  ;;  %v7240_v9 = vadd.f32 %v22142_v42, %v22141_v24  ;;  %v8925_v46 = vrot.slane %v8923_v0, 3  ;;  %v22144_v24 = vld [vmem:[#allocation28_spill] sm:$0xff] }
 0x4cd   : > { %8834 = vmatmul.bf16.gmra.mxu0 %v8737_v61  ;;  %10264 = vmatpush.bf16.msrb.mxu3 %v16117_v38  ;;  %v8922_v61 = vrot.slane %v8920_v41, 2  ;;  %v7241_v42 = vadd.f32 %v22144_v24, %v22143_v22  ;;  %v22145_v38 = vld [vmem:[#allocation26_spill] sm:$0xff]  ;;  %v8423_v35 = vor.u32 %v8422_v58, %v8419_v37  ;;  %v16954_v37 = vld [vmem:[#allocation3 + $0x4c] sm:$0x8]  ;;  %v7242_v58 = vadd.f32 %v20392_v56, %v20412_v53  ;;  %v16148_v56 = vld [vmem:[%s21974_s4 + $0x78] sm:$0xff] }
 0x4ce   : > { %8519 = vmatmul.bf16.gmra.mxu3 %v8415_v26  ;;  %v7496_v59 = vpop.f32.mrf.mxu2  ;;  %v17107_v41 = vld [vmem:[#allocation3 + $0x4c] sm:$0xf0]   ;;  %10765 = vmatpush.bf16.msrb.mxu1 %v16148_v56  ;;  %v17111_v56 = vld [vmem:[#allocation3 + $0x5c] sm:$0xff]  }
 0x4cf   : > { %v7518_v44 = vadd.f32 %v7496_v59, %v7240_v9  ;;  %v8236_v9 = vrot.slane %v22145_v38, 1  ;;  %v8738_v59 = vrot.slane %v8722_v7, 3  ;;  %v8926_v55 = vor.u32 %v8925_v46, %v8922_v61  ;;  %v16108_v53 = vld [vmem:[%s21974_s4 + $0x1b0] sm:$0xff] }
 0x4d0   : > { %v7910_v21 = vpop.f32.mrf.mxu0  ;;  %v8424_v7 = vsel %vm2128_vm5, %v8414_v4, %v8423_v35  ;;  %v16955_v61 = vor.u32 %v17107_v41, %v16954_v37  ;;  %10107 = vmatpush.bf16.msrb.mxu2 %v16108_v53  ;;  %v8184_v53 = vadd.f32 %v20453_v43, %v20493_v6  ;;  %v16147_v43 = vld [vmem:[%s21974_s4 + $0x70] sm:$0xff]  ;;  %v16107_v6 = vld [vmem:[%s21974_s4 + $0x1a8] sm:$0xff] }
 0x4d1   : > { %v7642_v52 = vpop.f32.mrf.mxu3  ;;  %v8237_v20 = vsel %vm1968_vm6, %v8234_v25, %v8236_v9  ;;  %v8739_v54 = vsel %vm490_vm0, %v8736_v3, %v8738_v59  ;;  %v16079_v25 = vld [vmem:[#allocation3 + $0x50] sm:$0xff] }
 0x4d2   : > { %v7664_v32 = vadd.f32 %v7642_v52, %v7518_v44  ;;  %v20863_v48 = vpop.f32.mrf.mxu1  ;;  %v9720_v38 = vshll.u32 %v16079_v25, 16  ;;  %v16116_v9 = vld [vmem:[%s21974_s4 + $0x1f0] sm:$0xff]  ;;  %10766 = vmatpush.bf16.msrb.mxu1 %v16147_v43 }
 0x4d3   : > { %10265 = vmatpush.bf16.msrb.mxu3 %v16116_v9 }
 0x4d4   : > { %v20865_v26 = vadd.f32 %v7908_v2, %v7664_v32  ;;  %v16125_v2 = vld [vmem:[%s21974_s4 + $0x238] sm:$0xff]  ;;  %v8927_v32 = vsel %vm616_vm1, %v8917_v34, %v8926_v55  ;;  %v9296_v34 = vshrl.u32 %v16955_v61, 16  ;;  %10108 = vmatpush.bf16.msrb.mxu2 %v16107_v6  ;;  %v17113_v6 = vld [vmem:[#allocation3 + $0x64] sm:$0xff]  }
 0x4d5   : > { %10450 = vmatpush.bf16.msrb.mxu0 %v16125_v2 }
 0x4d6   : > { %v7498_v40 = vpop.f32.mrf.mxu2 }
 0x4d7   : > { %v7519_v23 = vadd.f32 %v7498_v40, %v7241_v42  ;;  %v20883_v42 = vld [vmem:[#allocation3 + $0x58] sm:$0xff]  ;;  %v9299_v40 = vshll.u32 %v16955_v61, 16 }
 0x4d8   : > { %v7913_v44 = vpop.f32.mrf.mxu0  ;;  %v9725_v2 = vshll.u32 %v20883_v42, 16 }
 0x4d9   : > { %v7644_v31 = vpop.f32.mrf.mxu3  ;;  %v9301_v41 = vrot.slane %v9299_v40, 4  ;;  %v22146_v40 = vld [vmem:[#allocation4_spill] sm:$0xff] }
 0x4da   : > { %v7665_v52 = vadd.f32 %v7644_v31, %v7519_v23  ;;  %v20870_v19 = vpop.f32.mrf.mxu1  ;;  %v17109_v31 = vld [vmem:[#allocation3 + $0x54] sm:$0xff]   ;;  %v9727_v61 = vrot.slane %v9725_v2, 1  ;;  %v9313_v2 = vshrl.u32 %v17111_v56, 16 }
 0x4db   : > { %8337 = vmatmul.bf16.gmra.mxu2 %v8237_v20  ;;  %v9304_v22 = vshrl.u32 %v17109_v31, 16  ;;  %v9307_v24 = vshll.u32 %v17109_v31, 16  ;;  %v7243_v20 = vadd.f32 %v20421_v29, %v20448_v13  ;;  %v16772_v13 = vld [vmem:[#allocation3 + $0x50] sm:$0xff]  }
 0x4dc   : > { %v20877_v0 = vadd.f32 %v7910_v21, %v7665_v52  ;;  %9027 = vmatmul.bf16.gmra.mxu1 %v8927_v32 }
 0x4dd   : > { %8839 = vmatmul.bf16.gmra.mxu0 %v8739_v54  ;;  %v9306_v23 = vrot.slane %v9304_v22, 3  ;;  %v9309_v52 = vrot.slane %v9307_v24, 4  ;;  %v9298_v54 = vrot.slane %v9296_v34, 3 }
 0x4de   : > { %8524 = vmatmul.bf16.gmra.mxu3 %v8424_v7  ;;  %v7501_v3 = vpop.f32.mrf.mxu2  ;;  %v9722_v7 = vrot.slane %v9720_v38, 1 }
 0x4df   : > { %v7520_v46 = vadd.f32 %v7501_v3, %v7242_v58  ;;  %v20901_v58 = vor.u32 %v9309_v52, %v9306_v23  ;;  %v9302_v22 = vor.u32 %v9301_v41, %v9298_v54  ;;  %v20919_v52 = vld [vmem:[%s21975_s5] ss:$0 sm:$0xff] }
 0x4e0   : > { %v7915_v35 = vpop.f32.mrf.mxu0  ;;  %v20921_v54 = vld [vmem:[#allocation3 + $0x60] sm:$0xff] }
 0x4e1   : > { %v7647_v21 = vpop.f32.mrf.mxu3 }
 0x4e2   : > { %v7666_v4 = vadd.f32 %v7647_v21, %v7520_v46  ;;  %v20885_v55 = vpop.f32.mrf.mxu1 }
 0x4e4   : > { %v20896_v59 = vadd.f32 %v7913_v44, %v7666_v4  ;;  %v9718_v44 = vshrl.u32 %v16079_v25, 16  ;;  %v16124_v4 = vld [vmem:[%s21974_s4 + $0x230] sm:$0xff]  ;;  %v9311_v25 = vsel %vm823_vm2, %v9302_v22, %v20901_v58  ;;  %v9733_v22 = vshll.u32 %v20921_v54, 16 }
 0x4e5   : > { %10451 = vmatpush.bf16.msrb.mxu0 %v16124_v4  ;;  %v8185_v4 = vadd.f32 %v20483_v5, %v20529_v8 }
 0x4e6   : > { %v7503_v32 = vpop.f32.mrf.mxu2  ;;  %v9723_v24 = vor.u32 %v9722_v7, %v9718_v44 }
 0x4e7   : > { %v7521_v31 = vadd.f32 %v7503_v32, %v7243_v20  ;;  %v9316_v20 = vshll.u32 %v17111_v56, 16 }
 0x4e8   : > { %v9728_v38 = vsel %vm1491_vm3, %v9723_v24, %v9727_v61 }
 0x4e9   : > { %v7649_v37 = vpop.f32.mrf.mxu3 }
 0x4ea   : > { %v8805_v3 = vpop.f32.mrf.mxu0  ;;  %v7667_v46 = vadd.f32 %v7649_v37, %v7521_v31  ;;  %v8993_v21 = vpop.f32.mrf.mxu1  ;;  %v16115_v31 = vld [vmem:[%s21974_s4 + $0x1e8] sm:$0xff]  ;;  %v8546_v37 = vld [vmem:[%s17252_s14] sm:$0xff] }
 0x4eb   : > { %v20906_v29 = vadd.f32 %v8993_v21, %v8805_v3  ;;  %9162 = vmatmul.bf16.vlgmr.msra.gmra.mxu2 %v22146_v40  ;;  %v9318_v21 = vrot.slane %v9316_v20, 4  ;;  %10266 = vmatpush.bf16.msrb.mxu3 %v16115_v31  ;;  %v9729_v40 = vshrl.u32 %v20883_v42, 16  ;;  %v8547_v20 = vld [vmem:[%s17252_s14 + $0x8] sm:$0xff] }
 0x4ec   : > { %v20908_v34 = vadd.f32 %v7915_v35, %v7667_v46  ;;  %9849 = vmatmul.bf16.vlgmr.msra.gmra.mxu1 %v9728_v38  ;;  %v9315_v46 = vrot.slane %v9313_v2, 3  ;;  %v16123_v2 = vld [vmem:[%s21974_s4 + $0x228] sm:$0xff] }
 0x4ed   : > { %9584 = vmatmul.bf16.vlgmr.msra.gmra.mxu0 %v16772_v13  ;;  %v9731_v8 = vor.u32 %v9729_v40, %v9727_v61 }
 0x4ee   : > { %9439 = vmatmul.bf16.vlgmr.msra.gmra.mxu3 %v9311_v25  ;;  %v8303_v9 = vpop.f32.mrf.mxu2  ;;  %10452 = vmatpush.bf16.msrb.mxu0 %v16123_v2 }
 0x4ef   : > { %v8343_v23 = vadd.f32 %v8303_v9, %v8184_v53  ;;  %v20947_v53 = vor.u32 %v9318_v21, %v9315_v46  ;;  %v9735_v9 = vrot.slane %v9733_v22, 1 }
 0x4f1   : > { %v8490_v35 = vpop.f32.mrf.mxu3  ;;  %v9320_v43 = vsel %vm823_vm2, %v20901_v58, %v20947_v53  ;;  %v9736_v61 = vsel %vm1491_vm3, %v9731_v8, %v9735_v9  ;;  %v9325_v58 = vshll.u32 %v17113_v6, 16 }
 0x4f2   : > { %v8807_v41 = vpop.f32.mrf.mxu0  ;;  %v8530_v7 = vadd.f32 %v8490_v35, %v8343_v23  ;;  %v8995_v32 = vpop.f32.mrf.mxu1 }
 0x4f3   : > { %v20933_v44 = vadd.f32 %v8995_v32, %v8807_v41  ;;  %v22147_v32 = vld [vmem:[#allocation5_spill] sm:$0xff]  ;;  %v9327_v8 = vrot.slane %v9325_v58, 4  ;;  %v16122_v58 = vld [vmem:[%s21974_s4 + $0x220] sm:$0xff] }
 0x4f4   : > { %v8566_v3 = vadd.f32 %v20919_v52, %v8530_v7  ;;  %v20956_v7 = vld [vmem:[#allocation3 + $0x58] sm:$0xff]   ;;  %10453 = vmatpush.bf16.msrb.mxu0 %v16122_v58 }
 0x4f6   : > { %v8582_v24 = vadd.f32 %v8566_v3, %v8546_v37  ;;  %v8305_v13 = vpop.f32.mrf.mxu2  ;;  %v8186_v37 = vadd.f32 %v20514_v49, %v20558_v27  ;;  %v16106_v49 = vld [vmem:[%s21974_s4 + $0x1a0] sm:$0xff] }
 0x4f7   : > { %v8344_v38 = vadd.f32 %v8305_v13, %v8185_v4  ;;  %v20967_v4 = vld [vmem:[#allocation3 + $0x68] sm:$0xff]  ;;  %v16114_v27 = vld [vmem:[%s21974_s4 + $0x1e0] sm:$0xff]  ;;  %10109 = vmatpush.bf16.msrb.mxu2 %v16106_v49 }
 0x4f8   : > { %v8598_v25 = vmax.f32 %v8582_v24, 0.0  ;;  %v9322_v24 = vshrl.u32 %v17113_v6, 16  ;;  %v9741_v2 = vshll.u32 %v20967_v4, 16  ;;  %10267 = vmatpush.bf16.msrb.mxu3 %v16114_v27  ;;  %v8188_v27 = vadd.f32 %v20579_v33, %v20622_v51  ;;  %v16105_v33 = vld [vmem:[%s21974_s4 + $0x198] sm:$0xff] }
 0x4f9   : > { %v8492_v56 = vpop.f32.mrf.mxu3  ;;  %v16113_v51 = vld [vmem:[%s21974_s4 + $0x1d8] sm:$0xff] }
 0x4fa   : > { %v8810_v23 = vpop.f32.mrf.mxu0  ;;  %8614 = vst [vmem:[%s20944_s25] sm:$0xff] %v8598_v25  ;;  %v8531_v35 = vadd.f32 %v8492_v56, %v8344_v38  ;;  %v8998_v5 = vpop.f32.mrf.mxu1  ;;  %v16146_v38 = vld [vmem:[%s21974_s4 + $0x68] sm:$0xff]  ;;  %v8548_v56 = vld [vmem:[%s17252_s14 + $0x10] sm:$0xff] }
 0x4fb   : > { %v20954_v41 = vadd.f32 %v8998_v5, %v8810_v23  ;;  %9167 = vmatmul.bf16.gmra.mxu2 %v22147_v32  ;;  %v9324_v5 = vrot.slane %v9322_v24, 3  ;;  %10767 = vmatpush.bf16.msrb.mxu1 %v16146_v38  ;;  %v17115_v38 = vld [vmem:[#allocation3 + $0x6c] sm:$0xff]  }
 0x4fc   : > { %v8567_v42 = vadd.f32 %v20919_v52, %v8531_v35  ;;  %9854 = vmatmul.bf16.gmra.mxu1 %v9736_v61  ;;  %10110 = vmatpush.bf16.msrb.mxu2 %v16105_v33 }
 0x4fd   : > { %9589 = vmatmul.bf16.gmra.mxu0 %v20956_v7  ;;  %10268 = vmatpush.bf16.msrb.mxu3 %v16113_v51 }
 0x4fe   : > { %9444 = vmatmul.bf16.gmra.mxu3 %v9320_v43  ;;  %v8583_v31 = vadd.f32 %v8567_v42, %v8547_v20  ;;  %v8308_v3 = vpop.f32.mrf.mxu2  ;;  %v8187_v42 = vadd.f32 %v20552_v57, %v20594_v30  ;;  %v9737_v43 = vshrl.u32 %v20921_v54, 16  ;;  %v16774_v30 = vld [vmem:[#allocation3 + $0x60] sm:$0xff]  }
 0x4ff   : > { %v8345_v21 = vadd.f32 %v8308_v3, %v8186_v37  ;;  %v20987_v37 = vor.u32 %v9327_v8, %v9324_v5  ;;  %v9743_v3 = vrot.slane %v9741_v2, 1  ;;  %v9331_v2 = vshrl.u32 %v17115_v38, 16 }
 0x500   : > { %v8599_v46 = vmax.f32 %v8583_v31, 0.0  ;;  %v9739_v24 = vor.u32 %v9737_v43, %v9735_v9 }
 0x501   : > { %v8495_v22 = vpop.f32.mrf.mxu3 }
 0x502   : > { %v8812_v13 = vpop.f32.mrf.mxu0  ;;  %8615 = vst [vmem:[%s20944_s25 + $0x8] sm:$0xff] %v8599_v46  ;;  %v8532_v40 = vadd.f32 %v8495_v22, %v8345_v21  ;;  %v9000_v25 = vpop.f32.mrf.mxu1  ;;  %v9744_v9 = vsel %vm1491_vm3, %v9739_v24, %v9743_v3 }
 0x503   : > { %v20980_v23 = vadd.f32 %v9000_v25, %v8812_v13  ;;  %v8549_v13 = vld [vmem:[%s17252_s14 + $0x18] sm:$0xff]  ;;  %v9329_v25 = vsel %vm823_vm2, %v20947_v53, %v20987_v37  ;;  %v21004_v53 = vld [vmem:[#allocation3 + $0x70] sm:$0xff] }
 0x504   : > { %v8568_v35 = vadd.f32 %v20919_v52, %v8532_v40  ;;  %v22148_v40 = vld [vmem:[#allocation6_spill] sm:$0xff]  ;;  %v9749_v24 = vshll.u32 %v21004_v53, 16 }
 0x506   : > { %v8584_v20 = vadd.f32 %v8568_v35, %v8548_v56  ;;  %v8310_v32 = vpop.f32.mrf.mxu2 }
 0x507   : > { %v8346_v6 = vadd.f32 %v8310_v32, %v8187_v42 }
 0x508   : > { %v8600_v61 = vmax.f32 %v8584_v20, 0.0  ;;  %v9334_v20 = vshll.u32 %v17115_v38, 16 }
 0x509   : > { %v8497_v31 = vpop.f32.mrf.mxu3 }
 0x50a   : > { %v8815_v46 = vpop.f32.mrf.mxu0  ;;  %8616 = vst [vmem:[%s20944_s25 + $0x10] sm:$0xff] %v8600_v61  ;;  %v8533_v21 = vadd.f32 %v8497_v31, %v8346_v6  ;;  %v9003_v22 = vpop.f32.mrf.mxu1  ;;  %v16145_v61 = vld [vmem:[%s21974_s4 + $0x60] sm:$0xff] }
 0x50b   : > { %v20994_v57 = vadd.f32 %v9003_v22, %v8815_v46  ;;  %9172 = vmatmul.bf16.gmra.mxu2 %v22148_v40  ;;  %v8550_v6 = vld [vmem:[%s17252_s14 + $0x20] sm:$0xff]  ;;  %v9336_v22 = vrot.slane %v9334_v20, 4  ;;  %10768 = vmatpush.bf16.msrb.mxu1 %v16145_v61  ;;  %v22149_v20 = vld [vmem:[#allocation7_spill] sm:$0xff]  ;;  %v8190_v61 = vadd.f32 %v20641_v63, %v20684_v28  ;;  %v16104_v63 = vld [vmem:[%s21974_s4 + $0x190] sm:$0xff] }
 0x50c   : > { %v8569_v54 = vadd.f32 %v20919_v52, %v8533_v21  ;;  %9859 = vmatmul.bf16.gmra.mxu1 %v9744_v9  ;;  %v9333_v21 = vrot.slane %v9331_v2, 3  ;;  %v8551_v2 = vld [vmem:[%s17252_s14 + $0x28] sm:$0xff]  ;;  %v16112_v28 = vld [vmem:[%s21974_s4 + $0x1d0] sm:$0xff]  ;;  %10111 = vmatpush.bf16.msrb.mxu2 %v16104_v63 }
 0x50d   : > { %9594 = vmatmul.bf16.gmra.mxu0 %v16774_v30  ;;  %10269 = vmatpush.bf16.msrb.mxu3 %v16112_v28 }
 0x50e   : > { %9449 = vmatmul.bf16.gmra.mxu3 %v9329_v25  ;;  %v8585_v49 = vadd.f32 %v8569_v54, %v8549_v13  ;;  %v8313_v56 = vpop.f32.mrf.mxu2  ;;  %v8189_v13 = vadd.f32 %v20616_v60, %v20656_v39  ;;  %v9745_v54 = vshrl.u32 %v20967_v4, 16  ;;  %v21024_v38 = vor.u32 %v9336_v22, %v9333_v21  ;;  %v16775_v39 = vld [vmem:[#allocation3 + $0x68] sm:$0xff]  }
 0x50f   : > { %v8347_v5 = vadd.f32 %v8313_v56, %v8188_v27 }
 0x510   : > { %v8601_v35 = vmax.f32 %v8585_v49, 0.0  ;;  %v9751_v49 = vrot.slane %v9749_v24, 1 }
 0x511   : > { %v8500_v8 = vpop.f32.mrf.mxu3 }
 0x512   : > { %v8817_v42 = vpop.f32.mrf.mxu0  ;;  %8617 = vst [vmem:[%s20944_s25 + $0x18] sm:$0xff] %v8601_v35  ;;  %v8534_v32 = vadd.f32 %v8500_v8, %v8347_v5  ;;  %v9005_v43 = vpop.f32.mrf.mxu1  ;;  %v9747_v5 = vor.u32 %v9745_v54, %v9743_v3  ;;  %v16121_v8 = vld [vmem:[%s21974_s4 + $0x218] sm:$0xff]  ;;  %v8552_v54 = vld [vmem:[%s17252_s14 + $0x30] sm:$0xff] }
 0x513   : > { %v21017_v31 = vadd.f32 %v9005_v43, %v8817_v42  ;;  %v9338_v42 = vsel %vm823_vm2, %v20987_v37, %v21024_v38  ;;  %10454 = vmatpush.bf16.msrb.mxu0 %v16121_v8  ;;  %v21041_v37 = vld [vmem:[#allocation3 + $0x78] sm:$0xff] }
 0x514   : > { %v8570_v46 = vadd.f32 %v20919_v52, %v8534_v32  ;;  %v9752_v3 = vsel %vm1491_vm3, %v9747_v5, %v9751_v49  ;;  %v17117_v32 = vld [vmem:[#allocation3 + $0x74] sm:$0xff]   ;;  %v8191_v5 = vadd.f32 %v20678_v14, %v20718_v45 }
 0x515   : > { %v9340_v21 = vshrl.u32 %v17117_v32, 16  ;;  %v9343_v22 = vshll.u32 %v17117_v32, 16  ;;  %v16776_v45 = vld [vmem:[#allocation3 + $0x70] sm:$0xff]  }
 0x516   : > { %v8586_v58 = vadd.f32 %v8570_v46, %v8550_v6  ;;  %v8315_v30 = vpop.f32.mrf.mxu2 }
 0x517   : > { %v8348_v25 = vadd.f32 %v8315_v30, %v8189_v13  ;;  %v16144_v30 = vld [vmem:[%s21974_s4 + $0x58] sm:$0xff] }
 0x518   : > { %v8602_v40 = vmax.f32 %v8586_v58, 0.0  ;;  %10769 = vmatpush.bf16.msrb.mxu1 %v16144_v30 }
 0x519   : > { %v8502_v9 = vpop.f32.mrf.mxu3 }
 0x51a   : > { %v8820_v27 = vpop.f32.mrf.mxu0  ;;  %8618 = vst [vmem:[%s20944_s25 + $0x20] sm:$0xff] %v8602_v40  ;;  %v8535_v56 = vadd.f32 %v8502_v9, %v8348_v25  ;;  %v9008_v35 = vpop.f32.mrf.mxu1  ;;  %v9342_v9 = vrot.slane %v9340_v21, 3 }
 0x51b   : > { %v21031_v60 = vadd.f32 %v9008_v35, %v8820_v27  ;;  %9177 = vmatmul.bf16.gmra.mxu2 %v22149_v20  ;;  %v9345_v27 = vrot.slane %v9343_v22, 4  ;;  %v17119_v22 = vld [vmem:[#allocation3 + $0x7c] sm:$0xff]  }
 0x51c   : > { %v8571_v4 = vadd.f32 %v20919_v52, %v8535_v56  ;;  %9864 = vmatmul.bf16.gmra.mxu1 %v9752_v3  ;;  %v9757_v56 = vshll.u32 %v21041_v37, 16 }
 0x51d   : > { %9599 = vmatmul.bf16.gmra.mxu0 %v16775_v39 }
 0x51e   : > { %9454 = vmatmul.bf16.gmra.mxu3 %v9338_v42  ;;  %v8587_v43 = vadd.f32 %v8571_v4, %v8551_v2  ;;  %v8318_v33 = vpop.f32.mrf.mxu2  ;;  %v9753_v2 = vshrl.u32 %v21004_v53, 16  ;;  %v21061_v42 = vor.u32 %v9345_v27, %v9342_v9  ;;  %v9759_v3 = vrot.slane %v9757_v56, 1 }
 0x51f   : > { %v8349_v6 = vadd.f32 %v8318_v33, %v8190_v61 }
 0x520   : > { %v8603_v51 = vmax.f32 %v8587_v43, 0.0  ;;  %v9755_v33 = vor.u32 %v9753_v2, %v9751_v49  ;;  %v9347_v21 = vsel %vm823_vm2, %v21024_v38, %v21061_v42  ;;  %v21078_v38 = vld [vmem:[#allocation3 + $0x80] sm:$0xff] }
 0x521   : > { %v8505_v46 = vpop.f32.mrf.mxu3 }
 0x522   : > { %v8822_v24 = vpop.f32.mrf.mxu0  ;;  %8619 = vst [vmem:[%s20944_s25 + $0x28] sm:$0xff] %v8603_v51  ;;  %v8536_v58 = vadd.f32 %v8505_v46, %v8349_v6  ;;  %v9010_v13 = vpop.f32.mrf.mxu1  ;;  %v16120_v51 = vld [vmem:[%s21974_s4 + $0x210] sm:$0xff]  ;;  %v8553_v6 = vld [vmem:[%s17252_s14 + $0x38] sm:$0xff]  ;;  %v22150_v46 = vld [vmem:[#allocation8_spill] sm:$0xff]  ;;  %v9760_v49 = vsel %vm1491_vm3, %v9755_v33, %v9759_v3  ;;  %v9761_v33 = vshrl.u32 %v21041_v37, 16 }
 0x523   : > { %v21054_v40 = vadd.f32 %v9010_v13, %v8822_v24  ;;  %10455 = vmatpush.bf16.msrb.mxu0 %v16120_v51 }
 0x524   : > { %v8572_v25 = vadd.f32 %v20919_v52, %v8536_v58  ;;  %v8192_v58 = vadd.f32 %v20703_v15, %v20756_v50  ;;  %v16103_v15 = vld [vmem:[%s21974_s4 + $0x188] sm:$0xff] }
 0x525   : > { %v16111_v50 = vld [vmem:[%s21974_s4 + $0x1c8] sm:$0xff]  ;;  %10112 = vmatpush.bf16.msrb.mxu2 %v16103_v15 }
 0x526   : > { %v8588_v35 = vadd.f32 %v8572_v25, %v8552_v54  ;;  %v8320_v8 = vpop.f32.mrf.mxu2  ;;  %v9349_v54 = vshrl.u32 %v17119_v22, 16  ;;  %v9352_v25 = vshll.u32 %v17119_v22, 16  ;;  %10270 = vmatpush.bf16.msrb.mxu3 %v16111_v50 }
 0x527   : > { %v8350_v4 = vadd.f32 %v8320_v8, %v8191_v5  ;;  %v8554_v5 = vld [vmem:[%s17252_s14 + $0x40] sm:$0xff] }
 0x528   : > { %v8604_v39 = vmax.f32 %v8588_v35, 0.0  ;;  %v16143_v35 = vld [vmem:[%s21974_s4 + $0x50] sm:$0xff] }
 0x529   : > { %v8507_v20 = vpop.f32.mrf.mxu3  ;;  %10770 = vmatpush.bf16.msrb.mxu1 %v16143_v35 }
 0x52a   : > { %v8825_v32 = vpop.f32.mrf.mxu0  ;;  %8620 = vst [vmem:[%s20944_s25 + $0x30] sm:$0xff] %v8604_v39  ;;  %v8537_v43 = vadd.f32 %v8507_v20, %v8350_v4  ;;  %v9013_v61 = vpop.f32.mrf.mxu1  ;;  %v9351_v39 = vrot.slane %v9349_v54, 3  ;;  %v9354_v4 = vrot.slane %v9352_v25, 4  ;;  %v9765_v20 = vshll.u32 %v21078_v38, 16 }
 0x52b   : > { %v21068_v14 = vadd.f32 %v9013_v61, %v8825_v32  ;;  %9182 = vmatmul.bf16.gmra.mxu2 %v22150_v46  ;;  %v8194_v25 = vadd.f32 %v20778_v16, %v20826_v18  ;;  %v16102_v18 = vld [vmem:[%s21974_s4 + $0x180] sm:$0xff] }
 0x52c   : > { %v8573_v53 = vadd.f32 %v20919_v52, %v8537_v43  ;;  %9869 = vmatmul.bf16.gmra.mxu1 %v9760_v49  ;;  %v8193_v43 = vadd.f32 %v20746_v12, %v20789_v1  ;;  %v9767_v46 = vrot.slane %v9765_v20, 1  ;;  %v16777_v1 = vld [vmem:[#allocation3 + $0x78] sm:$0xff]   ;;  %v16110_v16 = vld [vmem:[%s21974_s4 + $0x1c0] sm:$0xff]  ;;  %v8556_v20 = vld [vmem:[%s17252_s14 + $0x50] sm:$0xff]  ;;  %10113 = vmatpush.bf16.msrb.mxu2 %v16102_v18  ;;  %v8196_v18 = vadd.f32 %v20838_v36, %v20865_v26 }
 0x52d   : > { %9604 = vmatmul.bf16.gmra.mxu0 %v16776_v45  ;;  %10271 = vmatpush.bf16.msrb.mxu3 %v16110_v16  ;;  %v16140_v36 = vld [vmem:[%s21974_s4 + $0x38] sm:$0xff] }
 0x52e   : > { %9459 = vmatmul.bf16.gmra.mxu3 %v9347_v21  ;;  %v8589_v24 = vadd.f32 %v8573_v53, %v8553_v6  ;;  %v8323_v13 = vpop.f32.mrf.mxu2  ;;  %v21098_v53 = vor.u32 %v9354_v4, %v9351_v39  ;;  %v16142_v4 = vld [vmem:[%s21974_s4 + $0x48] sm:$0xff]  ;;  %v16156_v26 = vld [vmem:[%s21974_s4 + $0xb8] sm:$0xff] }
 0x52f   : > { %v8351_v63 = vadd.f32 %v8323_v13, %v8192_v58  ;;  %v16119_v58 = vld [vmem:[%s21974_s4 + $0x208] sm:$0xff]  ;;  %10771 = vmatpush.bf16.msrb.mxu1 %v16142_v4 }
 0x530   : > { %v8605_v30 = vmax.f32 %v8589_v24, 0.0  ;;  %v9763_v24 = vor.u32 %v9761_v33, %v9759_v3  ;;  %v8555_v13 = vld [vmem:[%s17252_s14 + $0x48] sm:$0xff]  ;;  %10456 = vmatpush.bf16.msrb.mxu0 %v16119_v58  ;;  %10953 = vmatpush.bf16.msra.mxu2 %v16140_v36 }
 0x531   : > { %v8510_v28 = vpop.f32.mrf.mxu3  ;;  %11123 = vmatpush.bf16.msra.mxu3 %v16156_v26 }
 0x532   : > { %v8827_v9 = vpop.f32.mrf.mxu0  ;;  %8621 = vst [vmem:[%s20944_s25 + $0x38] sm:$0xff] %v8605_v30  ;;  %v8538_v27 = vadd.f32 %v8510_v28, %v8351_v63  ;;  %v9015_v56 = vpop.f32.mrf.mxu1  ;;  %v22151_v30 = vld [vmem:[#allocation10_spill] sm:$0xff]  ;;  %v9356_v63 = vsel %vm823_vm2, %v21061_v42, %v21098_v53  ;;  %v9768_v3 = vsel %vm1491_vm3, %v9763_v24, %v9767_v46  ;;  %v17120_v28 = vld [vmem:[#allocation3 + $0x84] sm:$0xff]  }
 0x533   : > { %v21091_v8 = vadd.f32 %v9015_v56, %v8827_v9  ;;  %v9358_v15 = vshrl.u32 %v17120_v28, 16  ;;  %v9361_v50 = vshll.u32 %v17120_v28, 16  ;;  %v21115_v42 = vld [vmem:[#allocation3 + $0x88] sm:$0xff] }
 0x534   : > { %v8574_v2 = vadd.f32 %v20919_v52, %v8538_v27  ;;  %v17166_v24 = vld [vmem:[#allocation3 + $0x84] sm:$0xff]  }
 0x535   : > { %v9363_v33 = vrot.slane %v9361_v50, 4  ;;  %v9051_v58 = vunpack.c.l.b16 %v17166_v24 }
 0x536   : > { %v8590_v32 = vadd.f32 %v8574_v2, %v8554_v5  ;;  %v8325_v61 = vpop.f32.mrf.mxu2 }
 0x537   : > { %v8352_v6 = vadd.f32 %v8325_v61, %v8193_v43  ;;  %v9360_v61 = vrot.slane %v9358_v15, 3 }
 0x538   : > { %v8606_v51 = vmax.f32 %v8590_v32, 0.0 }
 0x539   : > { %v8512_v45 = vpop.f32.mrf.mxu3 }
 0x53a   : > { %v8830_v21 = vpop.f32.mrf.mxu0  ;;  %8622 = vst [vmem:[%s20944_s25 + $0x40] sm:$0xff] %v8606_v51  ;;  %v8539_v49 = vadd.f32 %v8512_v45, %v8352_v6  ;;  %v9018_v22 = vpop.f32.mrf.mxu1  ;;  %v9773_v51 = vshll.u32 %v21115_v42, 16  ;;  %v21132_v6 = vld [vmem:[#allocation3 + $0x88] sm:$0xff]  }
 0x53b   : > { %v21105_v12 = vadd.f32 %v9018_v22, %v8830_v21  ;;  %9187 = vmatmul.bf16.gmra.mxu2 %v22151_v30  ;;  %v8195_v21 = vadd.f32 %v20817_v62, %v20848_v10  ;;  %v9769_v22 = vshrl.u32 %v21078_v38, 16  ;;  %v16118_v38 = vld [vmem:[%s21974_s4 + $0x200] sm:$0xff] }
 0x53c   : > { %v8575_v37 = vadd.f32 %v20919_v52, %v8539_v49  ;;  %9874 = vmatmul.bf16.gmra.mxu1 %v9768_v3  ;;  %v21140_v3 = vrot.slane %v9773_v51, 1  ;;  %10457 = vmatpush.bf16.msrb.mxu0 %v16118_v38 }
 0x53d   : > { %9609 = vmatmul.bf16.gmra.mxu0 %v16777_v1  ;;  %v9771_v10 = vor.u32 %v9769_v22, %v9767_v46 }
 0x53e   : > { %9464 = vmatmul.bf16.gmra.mxu3 %v9356_v63  ;;  %v8591_v54 = vadd.f32 %v8575_v37, %v8555_v13  ;;  %v8328_v9 = vpop.f32.mrf.mxu2  ;;  %v16635_v13 = vunpack.c.h.b16 %v21132_v6  ;;  %v21138_v63 = vor.u32 %v9363_v33, %v9360_v61 }
 0x53f   : > { %v8353_v56 = vadd.f32 %v8328_v9, %v8194_v25  ;;  %v8557_v9 = vld [vmem:[%s17252_s14 + $0x58] sm:$0xff]  ;;  %v9776_v46 = vsel %vm1491_vm3, %v9771_v10, %v21140_v3 }
 0x540   : > { %v8607_v27 = vmax.f32 %v8591_v54, 0.0  ;;  %v9657_v54 = vld [vmem:[#allocation3 + $0x90] sm:$0x1]  ;;  %v9294_v15 = vpack.c.b16 %v16635_v13, %v16635_v13  ;;  %v8558_v13 = vld [vmem:[%s17252_s14 + $0x60] sm:$0xff]  ;;  %v16164_v10 = vld [vmem:[%s21974_s4 + $0xf8] sm:$0xff] }
 0x541   : > { %v8515_v35 = vpop.f32.mrf.mxu3  ;;  %11400 = vmatpush.bf16.msra.mxu0 %v16164_v10 }
 0x542   : > { %v8832_v5 = vpop.f32.mrf.mxu0  ;;  %8623 = vst [vmem:[%s20944_s25 + $0x48] sm:$0xff] %v8607_v27  ;;  %v8540_v2 = vadd.f32 %v8515_v35, %v8353_v56  ;;  %v9020_v39 = vpop.f32.mrf.mxu1  ;;  %v16778_v56 = vld [vmem:[#allocation3 + $0x80] sm:$0xff]   ;;  %v9052_v35 = vpack.c.b16 %v9051_v58, %v9051_v58  ;;  %v9367_v61 = vshrl.u32 %v9294_v15, 16 }
 0x543   : > { %v21128_v32 = vadd.f32 %v9020_v39, %v8832_v5  ;;  %v22152_v5 = vld [vmem:[#allocation13_spill] sm:$0xff]  ;;  %v9707_v39 = vunpack.c.l.b16 %v9657_v54  ;;  %v16141_v58 = vld [vmem:[%s21974_s4 + $0x40] sm:$0xff] }
 0x544   : > { %v8576_v43 = vadd.f32 %v20919_v52, %v8540_v2  ;;  %v9365_v2 = vsel %vm823_vm2, %v21098_v53, %v21138_v63  ;;  %v9369_v54 = vrot.slane %v9367_v61, 3  ;;  %10772 = vmatpush.bf16.msrb.mxu1 %v16141_v58  ;;  %v16782_v61 = vld [vmem:[#allocation3 + $0x58] sm:$0xe] }
 0x546   : > { %v8592_v45 = vadd.f32 %v8576_v43, %v8556_v20  ;;  %v8330_v49 = vpop.f32.mrf.mxu2  ;;  %v9090_v20 = vshrl.u32 %v9052_v35, 16  ;;  %v9093_v43 = vshll.u32 %v9052_v35, 16 }
 0x547   : > { %v8354_v37 = vadd.f32 %v8330_v49, %v8195_v21  ;;  %v9716_v21 = vpack.c.b16 %v9707_v39, %v9707_v39 }
 0x548   : > { %v8608_v1 = vmax.f32 %v8592_v45, 0.0  ;;  %v9370_v45 = vshll.u32 %v9294_v15, 16  ;;  %v9777_v15 = vshrl.u32 %v21115_v42, 16  ;;  %v21185_v42 = vld [vmem:[#allocation3 + $0x60] sm:$0xff] }
 0x549   : > { %v8517_v30 = vpop.f32.mrf.mxu3  ;;  %v9990_v36 = vshll.u32 %v21185_v42, 16  ;;  %v9994_v26 = vshrl.u32 %v21185_v42, 16 }
 0x54a   : > { %v8835_v28 = vpop.f32.mrf.mxu0  ;;  %8624 = vst [vmem:[%s20944_s25 + $0x50] sm:$0xff] %v8608_v1  ;;  %v8541_v25 = vadd.f32 %v8517_v30, %v8354_v37  ;;  %v9023_v62 = vpop.f32.mrf.mxu1  ;;  %v9092_v37 = vrot.slane %v9090_v20, 3  ;;  %v9095_v30 = vrot.slane %v9093_v43, 4  ;;  %v9779_v20 = vor.u32 %v9777_v15, %v21140_v3  ;;  %v16781_v43 = vld [vmem:[#allocation3 + $0x58] sm:$0xf0]  ;;  %v16163_v15 = vld [vmem:[%s21974_s4 + $0xf0] sm:$0xff] }
 0x54b   : > { %v21147_v27 = vadd.f32 %v9023_v62, %v8835_v28  ;;  %9192 = vmatmul.bf16.gmra.mxu2 %v22152_v5  ;;  %v9781_v62 = vshll.u32 %v9716_v21, 16  ;;  %v16172_v21 = vld [vmem:[%s21974_s4 + $0x138] sm:$0xff]  ;;  %11401 = vmatpush.bf16.msra.mxu0 %v16163_v15 }
 0x54c   : > { %v8577_v50 = vadd.f32 %v20919_v52, %v8541_v25  ;;  %9879 = vmatmul.bf16.gmra.mxu1 %v9776_v46  ;;  %v9372_v25 = vrot.slane %v9370_v45, 4  ;;  %v9096_v35 = vor.u32 %v9095_v30, %v9092_v37 }
 0x54d   : > { %9614 = vmatmul.bf16.gmra.mxu0 %v16778_v56  ;;  %v9783_v39 = vrot.slane %v9781_v62, 1  ;;  %11545 = vmatpush.bf16.msra.mxu1 %v16172_v21 }
 0x54e   : > { %9469 = vmatmul.bf16.gmra.mxu3 %v9365_v2  ;;  %v8593_v4 = vadd.f32 %v8577_v50, %v8557_v9  ;;  %v8333_v16 = vpop.f32.mrf.mxu2  ;;  %v8197_v9 = vadd.f32 %v20863_v48, %v20877_v0  ;;  %v9373_v46 = vor.u32 %v9372_v25, %v9369_v54  ;;  %v8559_v48 = vld [vmem:[%s17252_s14 + $0x68] sm:$0xff]  ;;  %v9985_v54 = vshll.u32 %v20956_v7, 16 }
 0x54f   : > { %v8355_v53 = vadd.f32 %v8333_v16, %v8196_v18  ;;  %v9784_v3 = vsel %vm1491_vm3, %v9779_v20, %v9783_v39  ;;  %v8199_v39 = vadd.f32 %v20885_v55, %v20908_v34 }
 0x550   : > { %v8609_v33 = vmax.f32 %v8593_v4, 0.0  ;;  %v9374_v45 = vsel %vm823_vm2, %v21138_v63, %v9373_v46 }
 0x551   : > { %v8520_v51 = vpop.f32.mrf.mxu3 }
 0x552   : > { %v8837_v49 = vpop.f32.mrf.mxu0  ;;  %8625 = vst [vmem:[%s20944_s25 + $0x58] sm:$0xff] %v8609_v33  ;;  %v8542_v22 = vadd.f32 %v8520_v51, %v8355_v53  ;;  %v9025_v24 = vpop.f32.mrf.mxu1  ;;  %v22153_v33 = vld [vmem:[#allocation12_spill] sm:$0xff] }
 0x553   : > { %v21169_v1 = vadd.f32 %v9025_v24, %v8837_v49  ;;  %v9097_v53 = vsel %vm823_vm2, %v22153_v33, %v9096_v35  ;;  %v16783_v49 = vor.u32 %v16782_v61, %v16781_v43  ;;  %v16155_v24 = vld [vmem:[%s21974_s4 + $0xb0] sm:$0xff]  ;;  %v10192_v33 = vrot.slane %v21185_v42, 1  ;;  %v16170_v42 = vld [vmem:[%s21974_s4 + $0x128] sm:$0xff] }
 0x554   : > { %v8578_v28 = vadd.f32 %v20919_v52, %v8542_v22  ;;  %v16139_v22 = vld [vmem:[%s21974_s4 + $0x30] sm:$0xff]  ;;  %11124 = vmatpush.bf16.msra.mxu3 %v16155_v24 }
 0x555   : > { %10954 = vmatpush.bf16.msra.mxu2 %v16139_v22  ;;  %v10350_v25 = vshrl.u32 %v16783_v49, 16  ;;  %v10353_v62 = vshll.u32 %v16783_v49, 16  ;;  %v22154_v22 = vld [vmem:[#allocation29_spill] sm:$0xff] }
 0x556   : > { %v8594_v38 = vadd.f32 %v8578_v28, %v8558_v13  ;;  %v8335_v56 = vpop.f32.mrf.mxu2  ;;  %v10692_v24 = vrot.slane %v22154_v22, 3 }
 0x557   : > { %v8356_v5 = vadd.f32 %v8335_v56, %v8197_v9  ;;  %v10357_v9 = vrot.slane %v9994_v26, 1  ;;  %v10358_v56 = vrot.slane %v9990_v36, 2 }
 0x558   : > { %v8610_v50 = vmax.f32 %v8594_v38, 0.0 }
 0x559   : > { %v8522_v2 = vpop.f32.mrf.mxu3  ;;  %v10359_v20 = vor.u32 %v10358_v56, %v10357_v9 }
 0x55a   : > { %v8840_v4 = vpop.f32.mrf.mxu0  ;;  %8626 = vst [vmem:[%s20944_s25 + $0x60] sm:$0xff] %v8610_v50  ;;  %v8543_v18 = vadd.f32 %v8522_v2, %v8356_v5  ;;  %v9028_v16 = vpop.f32.mrf.mxu1  ;;  %v9987_v50 = vrot.slane %v9985_v54, 1  ;;  %v10352_v5 = vrot.slane %v10350_v25, 1  ;;  %v10355_v2 = vrot.slane %v10353_v62, 2 }
 0x55b   : > { %v21181_v0 = vadd.f32 %v9028_v16, %v8840_v4  ;;  %9197 = vmatmul.bf16.gmra.mxu2 %v9097_v53  ;;  %v9992_v16 = vrot.slane %v9990_v36, 1  ;;  %v21220_v53 = vld [vmem:[#allocation3 + $0x8c] sm:$0xff] }
 0x55c   : > { %v8579_v51 = vadd.f32 %v20919_v52, %v8543_v18  ;;  %9884 = vmatmul.bf16.gmra.mxu1 %v9784_v3  ;;  %v9983_v18 = vshrl.u32 %v20956_v7, 16  ;;  %v10356_v21 = vor.u32 %v10355_v2, %v10352_v5  ;;  %v10191_v7 = vrot.slane %v16783_v49, 1  ;;  %v21230_v36 = vld [vmem:[#allocation3 + $0x68] sm:$0xff]  ;;  %v16171_v49 = vld [vmem:[%s21974_s4 + $0x130] sm:$0xff] }
 0x55d   : > { %9619 = vmatmul.bf16.gmra.mxu0 %v21132_v6  ;;  %v8198_v6 = vadd.f32 %v20870_v19, %v20896_v59  ;;  %v8560_v59 = vld [vmem:[%s17252_s14 + $0x70] sm:$0xff]  ;;  %11546 = vmatpush.bf16.msra.mxu1 %v16171_v49  ;;  %v9998_v62 = vshll.u32 %v21230_v36, 16 }
 0x55e   : > { %9474 = vmatmul.bf16.gmra.mxu3 %v9374_v45  ;;  %v8595_v63 = vadd.f32 %v8579_v51, %v8559_v48  ;;  %v8338_v58 = vpop.f32.mrf.mxu2  ;;  %v10693_v51 = vrot.slane %v21220_v53, 3  ;;  %v9988_v3 = vor.u32 %v9987_v50, %v9983_v18 }
 0x55f   : > { %v8357_v37 = vadd.f32 %v8338_v58, %v8198_v6  ;;  %v10360_v58 = vsel %vm2128_vm5, %v10356_v21, %v10359_v20  ;;  %v10362_v5 = vrot.slane %v9998_v62, 2 }
 0x560   : > { %v8611_v13 = vmax.f32 %v8595_v63, 0.0  ;;  %v8561_v63 = vld [vmem:[%s17252_s14 + $0x78] sm:$0xff]  ;;  %v9993_v6 = vsel %vm1491_vm3, %v9988_v3, %v9992_v16 }
 0x561   : > { %v8525_v30 = vpop.f32.mrf.mxu3  ;;  %11547 = vmatpush.bf16.msra.mxu1 %v16170_v42 }
 0x562   : > { %v8842_v28 = vpop.f32.mrf.mxu0  ;;  %8627 = vst [vmem:[%s20944_s25 + $0x68] sm:$0xff] %v8611_v13  ;;  %v8544_v10 = vadd.f32 %v8525_v30, %v8357_v37  ;;  %v9030_v19 = vpop.f32.mrf.mxu1  ;;  %v10193_v37 = vsel %vm1968_vm6, %v10191_v7, %v10192_v33  ;;  %v10694_v30 = vsel %vm490_vm0, %v10692_v24, %v10693_v51  ;;  %v21265_v24 = vld [vmem:[#allocation3 + $0x70] sm:$0xff] }
 0x563   : > { %v21208_v38 = vadd.f32 %v9030_v19, %v8842_v28  ;;  %v16138_v28 = vld [vmem:[%s21974_s4 + $0x28] sm:$0xff] }
 0x564   : > { %v8580_v35 = vadd.f32 %v20919_v52, %v8544_v10  ;;  %v10002_v10 = vshrl.u32 %v21230_v36, 16  ;;  %10955 = vmatpush.bf16.msra.mxu2 %v16138_v28 }
 0x566   : > { %v8596_v46 = vadd.f32 %v8580_v35, %v8560_v59  ;;  %v8340_v4 = vpop.f32.mrf.mxu2  ;;  %v10361_v50 = vrot.slane %v10002_v10, 1 }
 0x567   : > { %v8358_v61 = vadd.f32 %v8340_v4, %v8199_v39  ;;  %v10000_v4 = vrot.slane %v9998_v62, 1 }
 0x568   : > { %v8612_v43 = vmax.f32 %v8596_v46, 0.0  ;;  %v16162_v46 = vld [vmem:[%s21974_s4 + $0xe8] sm:$0xff] }
 0x569   : > { %v8527_v48 = vpop.f32.mrf.mxu3  ;;  %11402 = vmatpush.bf16.msra.mxu0 %v16162_v46  ;;  %v10004_v46 = vor.u32 %v10002_v10, %v10000_v4  ;;  %v16136_v10 = vld [vmem:[%s21974_s4 + $0x18] sm:$0xff] }
 0x56a   : > { %v9585_v45 = vpop.f32.mrf.mxu0  ;;  %8628 = vst [vmem:[%s20944_s25 + $0x70] sm:$0xff] %v8612_v43  ;;  %v8545_v55 = vadd.f32 %v8527_v48, %v8358_v61  ;;  %v21224_v34 = vpop.f32.mrf.mxu1  ;;  %v10194_v61 = vrot.slane %v21230_v36, 1  ;;  %v17168_v48 = vld [vmem:[#allocation3 + $0x94] sm:$0xff]  ;;  %v16169_v36 = vld [vmem:[%s21974_s4 + $0x120] sm:$0xff] }
 0x56b   : > { %10114 = vmatmul.bf16.vlgmr.msrb.gmra.mxu2 %v9993_v6  ;;  %v10695_v53 = vrot.slane %v17168_v48, 3  ;;  %11548 = vmatpush.bf16.msra.mxu1 %v16169_v36 }
 0x56c   : > { %v8581_v13 = vadd.f32 %v20919_v52, %v8545_v55  ;;  %10773 = vmatmul.bf16.vlgmr.msrb.gmra.mxu1 %v10694_v30  ;;  %v16154_v52 = vld [vmem:[%s21974_s4 + $0xa8] sm:$0xff] }
 0x56d   : > { %10458 = vmatmul.bf16.vlgmr.msrb.gmra.mxu0 %v10360_v58  ;;  %11125 = vmatpush.bf16.msra.mxu3 %v16154_v52  ;;  %v10696_v6 = vsel %vm490_vm0, %v10693_v51, %v10695_v53  ;;  %v10010_v51 = vshrl.u32 %v21265_v24, 16 }
 0x56e   : > { %10272 = vmatmul.bf16.vlgmr.msrb.gmra.mxu3 %v10193_v37  ;;  %v8597_v54 = vadd.f32 %v8581_v13, %v8561_v63  ;;  %v9163_v25 = vpop.f32.mrf.mxu2 }
 0x56f   : > { %v9203_v59 = vadd.f32 %v9163_v25, %v20906_v29  ;;  %v10363_v29 = vor.u32 %v10362_v5, %v10361_v50  ;;  %v10365_v28 = vrot.slane %v10010_v51, 1  ;;  %v16161_v25 = vld [vmem:[%s21974_s4 + $0xe0] sm:$0xff] }
 0x570   : > { %v8613_v19 = vmax.f32 %v8597_v54, 0.0  ;;  %11403 = vmatpush.bf16.msra.mxu0 %v16161_v25 }
 0x571   : > { %v9440_v9 = vpop.f32.mrf.mxu3  ;;  %v10364_v22 = vsel %vm2128_vm5, %v10359_v20, %v10363_v29 }
 0x572   : > { %v9587_v56 = vpop.f32.mrf.mxu0  ;;  %8629 = vst [vmem:[%s20944_s25 + $0x78] sm:$0xff] %v8613_v19  ;;  %v9480_v35 = vadd.f32 %v9440_v9, %v9203_v59  ;;  %v21248_v15 = vpop.f32.mrf.mxu1 }
 0x574   : > { %v21252_v2 = vadd.f32 %v9585_v45, %v9480_v35  ;;  %v9996_v45 = vor.u32 %v9994_v26, %v9992_v16  ;;  %v16137_v26 = vld [vmem:[%s21974_s4 + $0x20] sm:$0xff] }
 0x575   : > { %v16153_v16 = vld [vmem:[%s21974_s4 + $0xa0] sm:$0xff]  ;;  %10956 = vmatpush.bf16.msra.mxu2 %v16137_v26 }
 0x576   : > { %v9165_v39 = vpop.f32.mrf.mxu2  ;;  %v10001_v7 = vsel %vm1491_vm3, %v9996_v45, %v10000_v4  ;;  %11126 = vmatpush.bf16.msra.mxu3 %v16153_v16  ;;  %v17169_v35 = vld [vmem:[#allocation3 + $0x9c] sm:$0xff] }
 0x577   : > { %v9204_v18 = vadd.f32 %v9165_v39, %v20933_v44  ;;  %v10195_v44 = vsel %vm1968_vm6, %v10192_v33, %v10194_v61  ;;  %v10006_v33 = vshll.u32 %v21265_v24, 16  ;;  %v10697_v50 = vrot.slane %v17169_v35, 3  ;;  %v16152_v4 = vld [vmem:[%s21974_s4 + $0x98] sm:$0xff] }
 0x579   : > { %v9442_v43 = vpop.f32.mrf.mxu3  ;;  %v10366_v52 = vrot.slane %v10006_v33, 2  ;;  %v10008_v19 = vrot.slane %v10006_v33, 1  ;;  %10957 = vmatpush.bf16.msra.mxu2 %v16136_v10  ;;  %v16160_v33 = vld [vmem:[%s21974_s4 + $0xd8] sm:$0xff] }
 0x57a   : > { %v9590_v3 = vpop.f32.mrf.mxu0  ;;  %v9481_v21 = vadd.f32 %v9442_v43, %v9204_v18  ;;  %v21261_v55 = vpop.f32.mrf.mxu1  ;;  %11127 = vmatpush.bf16.msra.mxu3 %v16152_v4  ;;  %11404 = vmatpush.bf16.msra.mxu0 %v16160_v33 }
 0x57b   : > { %10119 = vmatmul.bf16.gmra.mxu2 %v10001_v7  ;;  %v10367_v59 = vor.u32 %v10366_v52, %v10365_v28  ;;  %v10009_v43 = vsel %vm1491_vm3, %v10004_v46, %v10008_v19  ;;  %v17170_v52 = vld [vmem:[#allocation3 + $0xa4] sm:$0xff] }
 0x57c   : > { %v21267_v63 = vadd.f32 %v9587_v56, %v9481_v21  ;;  %10778 = vmatmul.bf16.gmra.mxu1 %v10696_v6  ;;  %v10196_v56 = vrot.slane %v21265_v24, 1  ;;  %v10698_v21 = vsel %vm490_vm0, %v10695_v53, %v10697_v50  ;;  %v10699_v25 = vrot.slane %v17170_v52, 3  ;;  %v16168_v24 = vld [vmem:[%s21974_s4 + $0x118] sm:$0xff] }
 0x57d   : > { %10463 = vmatmul.bf16.gmra.mxu0 %v10364_v22  ;;  %v10368_v48 = vsel %vm2128_vm5, %v10363_v29, %v10367_v59  ;;  %11549 = vmatpush.bf16.msra.mxu1 %v16168_v24 }
 0x57e   : > { %10277 = vmatmul.bf16.gmra.mxu3 %v10195_v44  ;;  %v9168_v20 = vpop.f32.mrf.mxu2 }
 0x57f   : > { %v9205_v58 = vadd.f32 %v9168_v20, %v20954_v41 }
 0x581   : > { %v9445_v13 = vpop.f32.mrf.mxu3 }
 0x582   : > { %v9592_v37 = vpop.f32.mrf.mxu0  ;;  %v9482_v30 = vadd.f32 %v9445_v13, %v9205_v58  ;;  %v21283_v49 = vpop.f32.mrf.mxu1 }
 0x584   : > { %v21287_v54 = vadd.f32 %v9590_v3, %v9482_v30  ;;  %v21300_v3 = vld [vmem:[#allocation3 + $0x78] sm:$0xff] }
 0x585   : > { %v10018_v53 = vshrl.u32 %v21300_v3, 16  ;;  %v10198_v28 = vrot.slane %v21300_v3, 1 }
 0x586   : > { %v9170_v62 = vpop.f32.mrf.mxu2 }
 0x587   : > { %v9206_v41 = vadd.f32 %v9170_v62, %v20980_v23  ;;  %v10197_v23 = vsel %vm1968_vm6, %v10194_v61, %v10196_v56  ;;  %v10014_v61 = vshll.u32 %v21300_v3, 16  ;;  %v10369_v26 = vrot.slane %v10018_v53, 1  ;;  %v16167_v3 = vld [vmem:[%s21974_s4 + $0x110] sm:$0xff] }
 0x588   : > { %11550 = vmatpush.bf16.msra.mxu1 %v16167_v3 }
 0x589   : > { %v9447_v9 = vpop.f32.mrf.mxu3  ;;  %v10370_v16 = vrot.slane %v10014_v61, 2  ;;  %v10016_v13 = vrot.slane %v10014_v61, 1 }
 0x58a   : > { %v9595_v5 = vpop.f32.mrf.mxu0  ;;  %v9483_v39 = vadd.f32 %v9447_v9, %v9206_v41  ;;  %v21296_v18 = vpop.f32.mrf.mxu1  ;;  %v10012_v41 = vor.u32 %v10010_v51, %v10008_v19  ;;  %v16135_v51 = vld [vmem:[%s21974_s4 + $0x10] sm:$0xff] }
 0x58b   : > { %10124 = vmatmul.bf16.gmra.mxu2 %v10009_v43  ;;  %v16151_v19 = vld [vmem:[%s21974_s4 + $0x90] sm:$0xff]  ;;  %v10020_v52 = vor.u32 %v10018_v53, %v10016_v13  ;;  %v16134_v53 = vld [vmem:[%s21974_s4 + $0x8] sm:$0xff] }
 0x58c   : > { %v21302_v45 = vadd.f32 %v9592_v37, %v9483_v39  ;;  %10783 = vmatmul.bf16.gmra.mxu1 %v10698_v21  ;;  %v10371_v37 = vor.u32 %v10370_v16, %v10369_v26  ;;  %v21335_v39 = vld [vmem:[#allocation3 + $0x80] sm:$0xff]  ;;  %10958 = vmatpush.bf16.msra.mxu2 %v16135_v51 }
 0x58d   : > { %10468 = vmatmul.bf16.gmra.mxu0 %v10368_v48  ;;  %v10700_v48 = vsel %vm490_vm0, %v10697_v50, %v10699_v25  ;;  %v10026_v50 = vshrl.u32 %v21335_v39, 16  ;;  %11128 = vmatpush.bf16.msra.mxu3 %v16151_v19  ;;  %v10200_v33 = vrot.slane %v21335_v39, 1 }
 0x58e   : > { %10282 = vmatmul.bf16.gmra.mxu3 %v10197_v23  ;;  %v9173_v29 = vpop.f32.mrf.mxu2  ;;  %v10372_v46 = vsel %vm2128_vm5, %v10367_v59, %v10371_v37 }
 0x58f   : > { %v9207_v7 = vadd.f32 %v9173_v29, %v20994_v57  ;;  %v10373_v29 = vrot.slane %v10026_v50, 1 }
 0x590   : > { %10959 = vmatpush.bf16.msra.mxu2 %v16134_v53 }
 0x591   : > { %v9450_v22 = vpop.f32.mrf.mxu3 }
 0x592   : > { %v9597_v44 = vpop.f32.mrf.mxu0  ;;  %v9484_v6 = vadd.f32 %v9450_v22, %v9207_v7  ;;  %v21318_v42 = vpop.f32.mrf.mxu1  ;;  %v16159_v22 = vld [vmem:[%s21974_s4 + $0xd0] sm:$0xff] }
 0x593   : > { %11405 = vmatpush.bf16.msra.mxu0 %v16159_v22 }
 0x594   : > { %v21322_v20 = vadd.f32 %v9595_v5, %v9484_v6  ;;  %v10017_v5 = vsel %vm1491_vm3, %v10012_v41, %v10016_v13  ;;  %v16150_v13 = vld [vmem:[%s21974_s4 + $0x88] sm:$0xff] }
 0x595   : > { %11129 = vmatpush.bf16.msra.mxu3 %v16150_v13 }
 0x596   : > { %v9175_v58 = vpop.f32.mrf.mxu2 }
 0x597   : > { %v9208_v57 = vadd.f32 %v9175_v58, %v21017_v31  ;;  %v10199_v31 = vsel %vm1968_vm6, %v10196_v56, %v10198_v28  ;;  %v10022_v56 = vshll.u32 %v21335_v39, 16  ;;  %v17171_v58 = vld [vmem:[#allocation3 + $0xac] sm:$0xff] }
 0x598   : > { %v16166_v39 = vld [vmem:[%s21974_s4 + $0x108] sm:$0xff] }
 0x599   : > { %v9452_v30 = vpop.f32.mrf.mxu3  ;;  %v10374_v61 = vrot.slane %v10022_v56, 2  ;;  %v10024_v6 = vrot.slane %v10022_v56, 1  ;;  %11551 = vmatpush.bf16.msra.mxu1 %v16166_v39 }
 0x59a   : > { %v9600_v62 = vpop.f32.mrf.mxu0  ;;  %v9485_v9 = vadd.f32 %v9452_v30, %v9208_v57  ;;  %v21331_v35 = vpop.f32.mrf.mxu1  ;;  %v10701_v57 = vrot.slane %v17171_v58, 3 }
 0x59b   : > { %10129 = vmatmul.bf16.gmra.mxu2 %v10017_v5  ;;  %v10375_v26 = vor.u32 %v10374_v61, %v10373_v29 }
 0x59c   : > { %v21337_v43 = vadd.f32 %v9597_v44, %v9485_v9  ;;  %10788 = vmatmul.bf16.gmra.mxu1 %v10700_v48  ;;  %v10025_v9 = vsel %vm1491_vm3, %v10020_v52, %v10024_v6  ;;  %v10702_v48 = vsel %vm490_vm0, %v10699_v25, %v10701_v57 }
 0x59d   : > { %10473 = vmatmul.bf16.gmra.mxu0 %v10372_v46  ;;  %v10376_v5 = vsel %vm2128_vm5, %v10371_v37, %v10375_v26  ;;  %v21370_v46 = vld [vmem:[#allocation3 + $0x88] sm:$0xff] }
 0x59e   : > { %10287 = vmatmul.bf16.gmra.mxu3 %v10199_v31  ;;  %v9178_v59 = vpop.f32.mrf.mxu2  ;;  %v10034_v25 = vshrl.u32 %v21370_v46, 16 }
 0x59f   : > { %v9209_v23 = vadd.f32 %v9178_v59, %v21031_v60 }
 0x5a1   : > { %v9455_v21 = vpop.f32.mrf.mxu3 }
 0x5a2   : > { %v9602_v36 = vpop.f32.mrf.mxu0  ;;  %v9486_v10 = vadd.f32 %v9455_v21, %v9209_v23  ;;  %v21353_v4 = vpop.f32.mrf.mxu1  ;;  %v10377_v23 = vrot.slane %v10034_v25, 1 }
 0x5a4   : > { %v21357_v7 = vadd.f32 %v9600_v62, %v9486_v10  ;;  %v16158_v10 = vld [vmem:[%s21974_s4 + $0xc8] sm:$0xff] }
 0x5a5   : > { %11406 = vmatpush.bf16.msra.mxu0 %v16158_v10  ;;  %v16157_v10 = vld [vmem:[%s21974_s4 + $0xc0] sm:$0xff] }
 0x5a6   : > { %v9180_v44 = vpop.f32.mrf.mxu2 }
 0x5a7   : > { %v9210_v60 = vadd.f32 %v9180_v44, %v21054_v40  ;;  %v10201_v40 = vsel %vm1968_vm6, %v10198_v28, %v10200_v33  ;;  %v10030_v28 = vshll.u32 %v21370_v46, 16 }
 0x5a9   : > { %v9457_v16 = vpop.f32.mrf.mxu3  ;;  %v10378_v21 = vrot.slane %v10030_v28, 2  ;;  %v10032_v61 = vrot.slane %v10030_v28, 1  ;;  %11407 = vmatpush.bf16.msra.mxu0 %v16157_v10 }
 0x5aa   : > { %v9605_v30 = vpop.f32.mrf.mxu0  ;;  %v9487_v62 = vadd.f32 %v9457_v16, %v9210_v60  ;;  %v21366_v41 = vpop.f32.mrf.mxu1  ;;  %v10202_v60 = vrot.slane %v21370_v46, 1  ;;  %v17172_v16 = vld [vmem:[#allocation3 + $0xb4] sm:$0xff]  ;;  %v16165_v46 = vld [vmem:[%s21974_s4 + $0x100] sm:$0xff] }
 0x5ab   : > { %10134 = vmatmul.bf16.gmra.mxu2 %v10025_v9  ;;  %v10379_v22 = vor.u32 %v10378_v21, %v10377_v23  ;;  %v10703_v58 = vrot.slane %v17172_v16, 3  ;;  %v10329_v21 = vld [vmem:[#allocation3 + $0x98] sm:$0x3]  ;;  %11552 = vmatpush.bf16.msra.mxu1 %v16165_v46 }
 0x5ac   : > { %v21372_v31 = vadd.f32 %v9602_v36, %v9487_v62  ;;  %10793 = vmatmul.bf16.gmra.mxu1 %v10702_v48  ;;  %v21405_v48 = vld [vmem:[#allocation3 + $0x90] sm:$0xff] }
 0x5ad   : > { %10478 = vmatmul.bf16.gmra.mxu0 %v10376_v5  ;;  %v10704_v53 = vsel %vm490_vm0, %v10701_v57, %v10703_v58  ;;  %v10042_v57 = vshrl.u32 %v21405_v48, 16 }
 0x5ae   : > { %10292 = vmatmul.bf16.gmra.mxu3 %v10201_v40  ;;  %v9183_v37 = vpop.f32.mrf.mxu2  ;;  %v10380_v40 = vsel %vm2128_vm5, %v10375_v26, %v10379_v22 }
 0x5af   : > { %v9211_v24 = vadd.f32 %v9183_v37, %v21068_v14 }
 0x5b1   : > { %v9460_v51 = vpop.f32.mrf.mxu3 }
 0x5b2   : > { %v9607_v19 = vpop.f32.mrf.mxu0  ;;  %v9488_v59 = vadd.f32 %v9460_v51, %v9211_v24  ;;  %v21388_v56 = vpop.f32.mrf.mxu1 }
 0x5b4   : > { %v21392_v36 = vadd.f32 %v9605_v30, %v9488_v59  ;;  %v10028_v30 = vor.u32 %v10026_v50, %v10024_v6  ;;  %v16133_v50 = vld [vmem:[%s21974_s4] sm:$0xff] }
 0x5b5   : > { %v16149_v6 = vld [vmem:[%s21974_s4 + $0x80] sm:$0xff]  ;;  %10960 = vmatpush.bf16.msra.mxu2 %v16133_v50 }
 0x5b6   : > { %v9185_v29 = vpop.f32.mrf.mxu2  ;;  %v10033_v5 = vsel %vm1491_vm3, %v10028_v30, %v10032_v61  ;;  %11130 = vmatpush.bf16.msra.mxu3 %v16149_v6 }
 0x5b7   : > { %v9212_v14 = vadd.f32 %v9185_v29, %v21091_v8  ;;  %v10203_v8 = vsel %vm1968_vm6, %v10200_v33, %v10202_v60  ;;  %v10038_v33 = vshll.u32 %v21405_v48, 16 }
 0x5b9   : > { %v9462_v44 = vpop.f32.mrf.mxu3  ;;  %v10382_v59 = vrot.slane %v10038_v33, 2 }
 0x5ba   : > { %v9610_v52 = vpop.f32.mrf.mxu0  ;;  %v9489_v62 = vadd.f32 %v9462_v44, %v9212_v14  ;;  %v21401_v9 = vpop.f32.mrf.mxu1  ;;  %v10040_v14 = vrot.slane %v10038_v33, 1  ;;  %v10347_v44 = vunpack.c.l.b16 %v10329_v21 }
 0x5bb   : > { %10139 = vmatmul.bf16.gmra.mxu2 %v10033_v5  ;;  %v17173_v5 = vld [vmem:[#allocation3 + $0xbc] sm:$0xff] }
 0x5bc   : > { %v21407_v3 = vadd.f32 %v9607_v19, %v9489_v62  ;;  %10798 = vmatmul.bf16.gmra.mxu1 %v10704_v53  ;;  %v10381_v19 = vrot.slane %v10042_v57, 1  ;;  %v10204_v62 = vrot.slane %v21405_v48, 1  ;;  %v10036_v53 = vor.u32 %v10034_v25, %v10032_v61  ;;  %v16188_v25 = vld [vmem:[%s21974_s4 + $0x178] sm:$0xff] }
 0x5bd   : > { %10483 = vmatmul.bf16.gmra.mxu0 %v10380_v40  ;;  %v10705_v40 = vrot.slane %v17173_v5, 3  ;;  %v16203_v61 = vld [vmem:[%s21974_s4 + $0x1b8] sm:$0xff]  ;;  %11810 = vmatpush.bf16.msrb.mxu2 %v16188_v25  ;;  %v17122_v25 = vld [vmem:[#allocation3 + $0x8c] sm:$0xf0]  }
 0x5be   : > { %10297 = vmatmul.bf16.gmra.mxu3 %v10203_v8  ;;  %v9188_v26 = vpop.f32.mrf.mxu2  ;;  %v9922_v8 = vld [vmem:[#allocation3 + $0x98] sm:$0x1]  ;;  %v10041_v6 = vsel %vm1491_vm3, %v10036_v53, %v10040_v14 }
 0x5bf   : > { %v9213_v13 = vadd.f32 %v9188_v26, %v21105_v12  ;;  %v10383_v12 = vor.u32 %v10382_v59, %v10381_v19  ;;  %v9972_v33 = vunpack.c.l.b16 %v9922_v8  ;;  %12075 = vmatpush.bf16.msrb.mxu3 %v16203_v61  ;;  %v16211_v48 = vld [vmem:[%s21974_s4 + $0x1f8] sm:$0xff] }
 0x5c0   : > { %12233 = vmatpush.bf16.msrb.mxu0 %v16211_v48  ;;  %v16210_v48 = vld [vmem:[%s21974_s4 + $0x1f0] sm:$0xff] }
 0x5c1   : > { %v9465_v37 = vpop.f32.mrf.mxu3  ;;  %v10384_v26 = vsel %vm2128_vm5, %v10379_v22, %v10383_v12 }
 0x5c2   : > { %v9612_v28 = vpop.f32.mrf.mxu0  ;;  %v9490_v24 = vadd.f32 %v9465_v37, %v9213_v13  ;;  %v21423_v51 = vpop.f32.mrf.mxu1  ;;  %v10348_v13 = vpack.c.b16 %v10347_v44, %v10347_v44  ;;  %v10205_v37 = vsel %vm1968_vm6, %v10202_v60, %v10204_v62  ;;  %v9981_v60 = vpack.c.b16 %v9972_v33, %v9972_v33 }
 0x5c4   : > { %v21427_v23 = vadd.f32 %v9610_v52, %v9490_v24  ;;  %v10706_v24 = vsel %vm490_vm0, %v10703_v58, %v10705_v40  ;;  %v10389_v19 = vshll.u32 %v10348_v13, 16  ;;  %v10046_v44 = vshll.u32 %v9981_v60, 16  ;;  %12234 = vmatpush.bf16.msrb.mxu0 %v16210_v48  ;;  %v16209_v48 = vld [vmem:[%s21974_s4 + $0x1e8] sm:$0xff] }
 0x5c5   : > { %v10206_v33 = vrot.slane %v9981_v60, 1  ;;  %v16993_v60 = vld [vmem:[#allocation3 + $0x8c] sm:$0x8] }
 0x5c6   : > { %v9190_v29 = vpop.f32.mrf.mxu2  ;;  %v10048_v53 = vrot.slane %v10046_v44, 1 }
 0x5c7   : > { %v9214_v16 = vadd.f32 %v9190_v29, %v21128_v32 }
 0x5c8   : > { %12235 = vmatpush.bf16.msrb.mxu0 %v16209_v48 }
 0x5c9   : > { %v9467_v30 = vpop.f32.mrf.mxu3 }
 0x5ca   : > { %v9615_v52 = vpop.f32.mrf.mxu0  ;;  %v9491_v39 = vadd.f32 %v9467_v30, %v9214_v16  ;;  %v21436_v50 = vpop.f32.mrf.mxu1  ;;  %v10391_v30 = vrot.slane %v10389_v19, 2 }
 0x5cb   : > { %10144 = vmatmul.bf16.gmra.mxu2 %v10041_v6 }
 0x5cc   : > { %v21440_v32 = vadd.f32 %v9612_v28, %v9491_v39  ;;  %10803 = vmatmul.bf16.gmra.mxu1 %v10706_v24  ;;  %v10386_v28 = vshrl.u32 %v10348_v13, 16  ;;  %v10707_v13 = vrot.slane %v20771_v17, 3 }
 0x5cd   : > { %10488 = vmatmul.bf16.gmra.mxu0 %v10384_v26 }
 0x5ce   : > { %10302 = vmatmul.bf16.gmra.mxu3 %v10205_v37  ;;  %v9193_v22 = vpop.f32.mrf.mxu2  ;;  %v10388_v16 = vrot.slane %v10386_v28, 1  ;;  %v10044_v37 = vor.u32 %v10042_v57, %v10040_v14  ;;  %v10708_v17 = vsel %vm490_vm0, %v10705_v40, %v10707_v13  ;;  %v16994_v57 = vor.u32 %v17122_v25, %v16993_v60  ;;  %v16784_v60 = vld [vmem:[#allocation3 + $0x90] sm:$0xff]  }
 0x5cf   : > { %v9215_v58 = vadd.f32 %v9193_v22, %v21147_v27  ;;  %v17124_v22 = vld [vmem:[#allocation3 + $0x94] sm:$0xff]  }
 0x5d0   : > { %v10392_v39 = vor.u32 %v10391_v30, %v10388_v16  ;;  %v11276_v19 = vshll.u32 %v17124_v22, 16 }
 0x5d1   : > { %v9470_v59 = vpop.f32.mrf.mxu3 }
 0x5d2   : > { %v9617_v21 = vpop.f32.mrf.mxu0  ;;  %v9492_v10 = vadd.f32 %v9470_v59, %v9215_v58  ;;  %v21454_v29 = vpop.f32.mrf.mxu1  ;;  %v10393_v61 = vsel %vm2128_vm5, %v10383_v12, %v10392_v39  ;;  %v11273_v12 = vshrl.u32 %v17124_v22, 16  ;;  %v11278_v30 = vrot.slane %v11276_v19, 4  ;;  %v16187_v39 = vld [vmem:[%s21974_s4 + $0x170] sm:$0xff] }
 0x5d3   : > { %11811 = vmatpush.bf16.msrb.mxu2 %v16187_v39  ;;  %v9891_v39 = vadd.f32 %v21248_v15, %v21267_v63  ;;  %v22155_v15 = vld [vmem:[#allocation31_spill] sm:$0xff] }
 0x5d4   : > { %v21456_v5 = vadd.f32 %v9615_v52, %v9492_v10  ;;  %v10049_v52 = vsel %vm1491_vm3, %v10044_v37, %v10048_v53  ;;  %v11268_v10 = vshll.u32 %v16994_v57, 16  ;;  %v11275_v16 = vrot.slane %v11273_v12, 3  ;;  %v16219_v53 = vld [vmem:[%s21974_s4 + $0x238] sm:$0xff] }
 0x5d5   : > { %12419 = vmatpush.bf16.msrb.mxu1 %v16219_v53  ;;  %v21525_v63 = vld [vmem:[#allocation3 + $0x98] sm:$0xff]  }
 0x5d6   : > { %v9195_v8 = vpop.f32.mrf.mxu2  ;;  %v11279_v13 = vor.u32 %v11278_v30, %v11275_v16  ;;  %v16201_v16 = vld [vmem:[%s21974_s4 + $0x1a8] sm:$0xff]  ;;  %v10515_v30 = vld [vmem:[%s17252_s14 + $0x80] sm:$0xff] }
 0x5d7   : > { %v9216_v6 = vadd.f32 %v9195_v8, %v21169_v1  ;;  %v10207_v1 = vsel %vm1968_vm6, %v10204_v62, %v10206_v33  ;;  %v11265_v62 = vshrl.u32 %v16994_v57, 16 }
 0x5d9   : > { %v9472_v26 = vpop.f32.mrf.mxu3 }
 0x5da   : > { %v9620_v27 = vpop.f32.mrf.mxu0  ;;  %v9493_v24 = vadd.f32 %v9472_v26, %v9216_v6  ;;  %v21462_v46 = vpop.f32.mrf.mxu1  ;;  %v11267_v6 = vrot.slane %v11265_v62, 3  ;;  %v11270_v26 = vrot.slane %v11268_v10, 4 }
 0x5db   : > { %10149 = vmatmul.bf16.gmra.mxu2 %v10049_v52 }
 0x5dc   : > { %v21466_v28 = vadd.f32 %v9617_v21, %v9493_v24  ;;  %10808 = vmatmul.bf16.gmra.mxu1 %v10708_v17  ;;  %v11271_v25 = vor.u32 %v11270_v26, %v11267_v6 }
 0x5dd   : > { %10493 = vmatmul.bf16.gmra.mxu0 %v10393_v61 }
 0x5de   : > { %10307 = vmatmul.bf16.gmra.mxu3 %v10207_v1  ;;  %v9198_v14 = vpop.f32.mrf.mxu2  ;;  %v11280_v22 = vsel %vm823_vm2, %v11271_v25, %v11279_v13  ;;  %v17126_v1 = vld [vmem:[#allocation3 + $0x9c] sm:$0xff]  }
 0x5df   : > { %v9217_v58 = vadd.f32 %v9198_v14, %v21181_v0  ;;  %v16202_v0 = vld [vmem:[%s21974_s4 + $0x1b0] sm:$0xff]  ;;  %v11282_v14 = vshrl.u32 %v17126_v1, 16  ;;  %v11285_v12 = vshll.u32 %v17126_v1, 16  ;;  %v17128_v1 = vld [vmem:[#allocation3 + $0xa4] sm:$0xff]  }
 0x5e0   : > { %12076 = vmatpush.bf16.msrb.mxu3 %v16202_v0 }
 0x5e1   : > { %v9475_v59 = vpop.f32.mrf.mxu3  ;;  %v11287_v10 = vrot.slane %v11285_v12, 4 }
 0x5e2   : > { %v9622_v21 = vpop.f32.mrf.mxu0  ;;  %v9494_v44 = vadd.f32 %v9475_v59, %v9217_v58  ;;  %v21474_v40 = vpop.f32.mrf.mxu1 }
 0x5e4   : > { %v21476_v8 = vadd.f32 %v9620_v27, %v9494_v44  ;;  %12077 = vmatpush.bf16.msrb.mxu3 %v16201_v16 }
 0x5e6   : > { %v9200_v33 = vpop.f32.mrf.mxu2 }
 0x5e7   : > { %v9218_v27 = vadd.f32 %v9200_v33, %v21208_v38  ;;  %v9890_v38 = vadd.f32 %v21224_v34, %v21252_v2  ;;  %v16218_v34 = vld [vmem:[%s21974_s4 + $0x230] sm:$0xff]  ;;  %v16186_v2 = vld [vmem:[%s21974_s4 + $0x168] sm:$0xff] }
 0x5e8   : > { %12420 = vmatpush.bf16.msrb.mxu1 %v16218_v34  ;;  %11812 = vmatpush.bf16.msrb.mxu2 %v16186_v2 }
 0x5e9   : > { %v9477_v37 = vpop.f32.mrf.mxu3 }
 0x5ea   : > { %v10459_v24 = vpop.f32.mrf.mxu0  ;;  %v9495_v52 = vadd.f32 %v9477_v37, %v9218_v27  ;;  %v21488_v61 = vpop.f32.mrf.mxu1 }
 0x5eb   : > { %10961 = vmatmul.bf16.vlgmr.msra.gmra.mxu2 %v20418_v47 }
 0x5ec   : > { %v21491_v17 = vadd.f32 %v9622_v21, %v9495_v52  ;;  %11553 = vmatmul.bf16.vlgmr.msra.gmra.mxu1 %v16784_v60  ;;  %v21503_v21 = vld [vmem:[%s21975_s5] ss:$0 sm:$0xff] }
 0x5ed   : > { %11408 = vmatmul.bf16.vlgmr.msra.gmra.mxu0 %v11280_v22 }
 0x5ee   : > { %11131 = vmatmul.bf16.vlgmr.msra.gmra.mxu3 %v20425_v11  ;;  %v10115_v57 = vpop.f32.mrf.mxu2  ;;  %v11284_v11 = vrot.slane %v11282_v14, 3  ;;  %v9892_v14 = vadd.f32 %v21261_v55, %v21287_v54  ;;  %v16217_v55 = vld [vmem:[%s21974_s4 + $0x228] sm:$0xff]  ;;  %v16185_v54 = vld [vmem:[%s21974_s4 + $0x160] sm:$0xff] }
 0x5ef   : > { %v10155_v19 = vadd.f32 %v10115_v57, %v9890_v38  ;;  %v10516_v38 = vld [vmem:[%s17252_s14 + $0x88] sm:$0xff]  ;;  %v22156_v57 = vld [vmem:[#allocation32_spill] sm:$0xff]  ;;  %12421 = vmatpush.bf16.msrb.mxu1 %v16217_v55  ;;  %11813 = vmatpush.bf16.msrb.mxu2 %v16185_v54 }
 0x5f0   : > { %v11288_v6 = vor.u32 %v11287_v10, %v11284_v11 }
 0x5f1   : > { %v10273_v58 = vpop.f32.mrf.mxu3 }
 0x5f2   : > { %v10461_v47 = vpop.f32.mrf.mxu0  ;;  %v10313_v59 = vadd.f32 %v10273_v58, %v10155_v19  ;;  %v21505_v62 = vpop.f32.mrf.mxu1  ;;  %v11289_v22 = vsel %vm823_vm2, %v11279_v13, %v11288_v6  ;;  %v11291_v19 = vshrl.u32 %v17128_v1, 16  ;;  %v11294_v58 = vshll.u32 %v17128_v1, 16 }
 0x5f4   : > { %v10499_v44 = vadd.f32 %v10459_v24, %v10313_v59  ;;  %v11293_v16 = vrot.slane %v11291_v19, 3  ;;  %v22158_v19 = vld [vmem:[#allocation34_spill] sm:$0xff] }
 0x5f6   : > { %v10535_v53 = vadd.f32 %v21503_v21, %v10499_v44  ;;  %v10117_v0 = vpop.f32.mrf.mxu2 }
 0x5f7   : > { %v10156_v33 = vadd.f32 %v10117_v0, %v9891_v39  ;;  %v16200_v39 = vld [vmem:[%s21974_s4 + $0x1a0] sm:$0xff]  ;;  %v10517_v0 = vld [vmem:[%s17252_s14 + $0x90] sm:$0xff] }
 0x5f8   : > { %v10551_v26 = vadd.f32 %v10535_v53, %v10515_v30  ;;  %v11296_v30 = vrot.slane %v11294_v58, 4  ;;  %12078 = vmatpush.bf16.msrb.mxu3 %v16200_v39 }
 0x5f9   : > { %v10275_v27 = vpop.f32.mrf.mxu3 }
 0x5fa   : > { %v10464_v37 = vpop.f32.mrf.mxu0  ;;  %v10567_v24 = vmax.f32 %v10551_v26, 0.0  ;;  %v10314_v25 = vadd.f32 %v10275_v27, %v10156_v33  ;;  %v21520_v52 = vpop.f32.mrf.mxu1  ;;  %v9893_v33 = vadd.f32 %v21283_v49, %v21302_v45  ;;  %v22157_v49 = vld [vmem:[#allocation33_spill] sm:$0xff]  ;;  %v16786_v45 = vld [vmem:[#allocation3 + $0xa0] sm:$0xff]  }
 0x5fb   : > { %10966 = vmatmul.bf16.gmra.mxu2 %v22155_v15 }
 0x5fc   : > { %10583 = vst [vmem:[%s20944_s25 + $0x80] sm:$0xff] %v10567_v24  ;;  %v10500_v60 = vadd.f32 %v10461_v47, %v10314_v25  ;;  %11558 = vmatmul.bf16.gmra.mxu1 %v21525_v63 }
 0x5fd   : > { %11413 = vmatmul.bf16.gmra.mxu0 %v11289_v22 }
 0x5fe   : > { %11136 = vmatmul.bf16.gmra.mxu3 %v22156_v57  ;;  %v10536_v13 = vadd.f32 %v21503_v21, %v10500_v60  ;;  %v10120_v12 = vpop.f32.mrf.mxu2  ;;  %v17130_v57 = vld [vmem:[#allocation3 + $0xac] sm:$0xff]  }
 0x5ff   : > { %v10157_v59 = vadd.f32 %v10120_v12, %v9892_v14  ;;  %v16208_v14 = vld [vmem:[%s21974_s4 + $0x1e0] sm:$0xff]  ;;  %v10518_v12 = vld [vmem:[%s17252_s14 + $0x98] sm:$0xff] }
 0x600   : > { %v10552_v47 = vadd.f32 %v10536_v13, %v10516_v38  ;;  %12236 = vmatpush.bf16.msrb.mxu0 %v16208_v14  ;;  %v17132_v14 = vld [vmem:[#allocation3 + $0xb4] sm:$0xff]  }
 0x601   : > { %v10278_v11 = vpop.f32.mrf.mxu3 }
 0x602   : > { %v10466_v10 = vpop.f32.mrf.mxu0  ;;  %v10568_v44 = vmax.f32 %v10552_v47, 0.0  ;;  %v10315_v34 = vadd.f32 %v10278_v11, %v10157_v59  ;;  %v21536_v2 = vpop.f32.mrf.mxu1  ;;  %v11300_v59 = vshrl.u32 %v17130_v57, 16  ;;  %v11303_v11 = vshll.u32 %v17130_v57, 16 }
 0x604   : > { %10584 = vst [vmem:[%s20944_s25 + $0x88] sm:$0xff] %v10568_v44  ;;  %v10501_v53 = vadd.f32 %v10464_v37, %v10315_v34  ;;  %v11297_v37 = vor.u32 %v11296_v30, %v11293_v16  ;;  %v11302_v54 = vrot.slane %v11300_v59, 3  ;;  %v11305_v39 = vrot.slane %v11303_v11, 4 }
 0x605   : > { %v11309_v11 = vshrl.u32 %v17132_v14, 16 }
 0x606   : > { %v10537_v26 = vadd.f32 %v21503_v21, %v10501_v53  ;;  %v10122_v27 = vpop.f32.mrf.mxu2  ;;  %v11298_v38 = vsel %vm823_vm2, %v11288_v6, %v11297_v37  ;;  %v9894_v6 = vadd.f32 %v21296_v18, %v21322_v20  ;;  %v16216_v18 = vld [vmem:[%s21974_s4 + $0x220] sm:$0xff]  ;;  %v16184_v20 = vld [vmem:[%s21974_s4 + $0x158] sm:$0xff] }
 0x607   : > { %v10158_v25 = vadd.f32 %v10122_v27, %v9893_v33  ;;  %v10519_v33 = vld [vmem:[%s17252_s14 + $0xa0] sm:$0xff]  ;;  %12422 = vmatpush.bf16.msrb.mxu1 %v16216_v18  ;;  %11814 = vmatpush.bf16.msrb.mxu2 %v16184_v20 }
 0x608   : > { %v10553_v24 = vadd.f32 %v10537_v26, %v10517_v0  ;;  %v16199_v26 = vld [vmem:[%s21974_s4 + $0x198] sm:$0xff] }
 0x609   : > { %v10280_v22 = vpop.f32.mrf.mxu3  ;;  %12079 = vmatpush.bf16.msrb.mxu3 %v16199_v26  ;;  %v16198_v26 = vld [vmem:[%s21974_s4 + $0x190] sm:$0xff] }
 0x60a   : > { %v10469_v1 = vpop.f32.mrf.mxu0  ;;  %v10569_v60 = vmax.f32 %v10553_v24, 0.0  ;;  %v10316_v15 = vadd.f32 %v10280_v22, %v10158_v25  ;;  %v21552_v48 = vpop.f32.mrf.mxu1  ;;  %v9895_v24 = vadd.f32 %v21318_v42, %v21337_v43  ;;  %v11306_v22 = vor.u32 %v11305_v39, %v11302_v54  ;;  %v22159_v42 = vld [vmem:[#allocation35_spill] sm:$0xff]  ;;  %v16787_v43 = vld [vmem:[#allocation3 + $0xa8] sm:$0xff]  }
 0x60b   : > { %10971 = vmatmul.bf16.gmra.mxu2 %v22157_v49 }
 0x60c   : > { %10585 = vst [vmem:[%s20944_s25 + $0x90] sm:$0xff] %v10569_v60  ;;  %v10502_v13 = vadd.f32 %v10466_v10, %v10316_v15  ;;  %11563 = vmatmul.bf16.gmra.mxu1 %v16786_v45  ;;  %v11307_v45 = vsel %vm823_vm2, %v11297_v37, %v11306_v22  ;;  %v9896_v37 = vadd.f32 %v21331_v35, %v21357_v7  ;;  %v16215_v35 = vld [vmem:[%s21974_s4 + $0x218] sm:$0xff]  ;;  %v16183_v7 = vld [vmem:[%s21974_s4 + $0x150] sm:$0xff] }
 0x60d   : > { %11418 = vmatmul.bf16.gmra.mxu0 %v11298_v38  ;;  %12423 = vmatpush.bf16.msrb.mxu1 %v16215_v35  ;;  %v16197_v35 = vld [vmem:[%s21974_s4 + $0x188] sm:$0xff] }
 0x60e   : > { %11141 = vmatmul.bf16.gmra.mxu3 %v22158_v19  ;;  %v10538_v58 = vadd.f32 %v21503_v21, %v10502_v13  ;;  %v10125_v47 = vpop.f32.mrf.mxu2  ;;  %v16207_v19 = vld [vmem:[%s21974_s4 + $0x1d8] sm:$0xff]  ;;  %11815 = vmatpush.bf16.msrb.mxu2 %v16183_v7  ;;  %v10523_v7 = vld [vmem:[%s17252_s14 + $0xc0] sm:$0xff] }
 0x60f   : > { %v10159_v44 = vadd.f32 %v10125_v47, %v9894_v6  ;;  %v22160_v6 = vld [vmem:[#allocation36_spill] sm:$0xff]  ;;  %12237 = vmatpush.bf16.msrb.mxu0 %v16207_v19  ;;  %12080 = vmatpush.bf16.msrb.mxu3 %v16198_v26  ;;  %v16206_v19 = vld [vmem:[%s21974_s4 + $0x1d0] sm:$0xff] }
 0x610   : > { %v10554_v10 = vadd.f32 %v10538_v58, %v10518_v12  ;;  %v10520_v58 = vld [vmem:[%s17252_s14 + $0xa8] sm:$0xff] }
 0x611   : > { %v10283_v34 = vpop.f32.mrf.mxu3 }
 0x612   : > { %v10471_v16 = vpop.f32.mrf.mxu0  ;;  %v10570_v30 = vmax.f32 %v10554_v10, 0.0  ;;  %v10317_v53 = vadd.f32 %v10283_v34, %v10159_v44  ;;  %v21565_v55 = vpop.f32.mrf.mxu1  ;;  %v11312_v10 = vshll.u32 %v17132_v14, 16 }
 0x613   : > { %12238 = vmatpush.bf16.msrb.mxu0 %v16206_v19  ;;  %12081 = vmatpush.bf16.msrb.mxu3 %v16197_v35  ;;  %v22164_v19 = vld [vmem:[#allocation17_spill] sm:$0xff] }
 0x614   : > { %10586 = vst [vmem:[%s20944_s25 + $0x98] sm:$0xff] %v10570_v30  ;;  %v10503_v0 = vadd.f32 %v10469_v1, %v10317_v53  ;;  %v11314_v18 = vrot.slane %v11312_v10, 4 }
 0x616   : > { %v10539_v27 = vadd.f32 %v21503_v21, %v10503_v0  ;;  %v10127_v25 = vpop.f32.mrf.mxu2  ;;  %v11311_v0 = vrot.slane %v11309_v11, 3 }
 0x617   : > { %v10160_v60 = vadd.f32 %v10127_v25, %v9895_v24  ;;  %v9897_v24 = vadd.f32 %v21353_v4, %v21372_v31  ;;  %v22161_v4 = vld [vmem:[#allocation37_spill] sm:$0xff]  ;;  %v16788_v31 = vld [vmem:[#allocation3 + $0xb0] sm:$0xff]  }
 0x618   : > { %v10555_v1 = vadd.f32 %v10539_v27, %v10519_v33  ;;  %v10521_v33 = vld [vmem:[%s17252_s14 + $0xb0] sm:$0xff] }
 0x619   : > { %v10285_v15 = vpop.f32.mrf.mxu3 }
 0x61a   : > { %v10474_v38 = vpop.f32.mrf.mxu0  ;;  %v10571_v57 = vmax.f32 %v10555_v1, 0.0  ;;  %v10318_v13 = vadd.f32 %v10285_v15, %v10160_v60  ;;  %v21581_v49 = vpop.f32.mrf.mxu1  ;;  %v11315_v1 = vor.u32 %v11314_v18, %v11311_v0 }
 0x61b   : > { %10976 = vmatmul.bf16.gmra.mxu2 %v22159_v42  ;;  %v17134_v42 = vld [vmem:[#allocation3 + $0xbc] sm:$0xff]  }
 0x61c   : > { %10587 = vst [vmem:[%s20944_s25 + $0xa0] sm:$0xff] %v10571_v57  ;;  %v10504_v12 = vadd.f32 %v10471_v16, %v10318_v13  ;;  %11568 = vmatmul.bf16.gmra.mxu1 %v16787_v43  ;;  %v11321_v11 = vshll.u32 %v17134_v42, 16 }
 0x61d   : > { %11423 = vmatmul.bf16.gmra.mxu0 %v11307_v45 }
 0x61e   : > { %11146 = vmatmul.bf16.gmra.mxu3 %v22160_v6  ;;  %v10540_v47 = vadd.f32 %v21503_v21, %v10504_v12  ;;  %v10130_v59 = vpop.f32.mrf.mxu2  ;;  %v11316_v12 = vsel %vm823_vm2, %v11306_v22, %v11315_v1  ;;  %v22162_v6 = vld [vmem:[#allocation38_spill] sm:$0xff]  ;;  %v9898_v22 = vadd.f32 %v21366_v41, %v21392_v36  ;;  %v11323_v18 = vrot.slane %v11321_v11, 4  ;;  %v16182_v36 = vld [vmem:[%s21974_s4 + $0x148] sm:$0xff] }
 0x61f   : > { %v10161_v34 = vadd.f32 %v10130_v59, %v9896_v37  ;;  %v11318_v59 = vshrl.u32 %v17134_v42, 16  ;;  %v16214_v41 = vld [vmem:[%s21974_s4 + $0x210] sm:$0xff]  ;;  %11816 = vmatpush.bf16.msrb.mxu2 %v16182_v36  ;;  %v17135_v42 = vld [vmem:[#allocation3 + $0xc4] sm:$0xff]  }
 0x620   : > { %v10556_v44 = vadd.f32 %v10540_v47, %v10520_v58  ;;  %v10522_v58 = vld [vmem:[%s17252_s14 + $0xb8] sm:$0xff]  ;;  %12424 = vmatpush.bf16.msrb.mxu1 %v16214_v41  ;;  %v10525_v41 = vld [vmem:[%s17252_s14 + $0xd0] sm:$0xff]  ;;  %v11002_v36 = vld [vmem:[#allocation3 + $0xc4] sm:$0xf] }
 0x621   : > { %v10288_v16 = vpop.f32.mrf.mxu3  ;;  %v11320_v0 = vrot.slane %v11318_v59, 3 }
 0x622   : > { %v10476_v30 = vpop.f32.mrf.mxu0  ;;  %v10572_v53 = vmax.f32 %v10556_v44, 0.0  ;;  %v10319_v54 = vadd.f32 %v10288_v16, %v10161_v34  ;;  %v21594_v39 = vpop.f32.mrf.mxu1 }
 0x624   : > { %10588 = vst [vmem:[%s20944_s25 + $0xa8] sm:$0xff] %v10572_v53  ;;  %v10505_v20 = vadd.f32 %v10474_v38, %v10319_v54 }
 0x626   : > { %v10541_v27 = vadd.f32 %v21503_v21, %v10505_v20  ;;  %v10132_v25 = vpop.f32.mrf.mxu2 }
 0x627   : > { %v10162_v15 = vadd.f32 %v10132_v25, %v9897_v24  ;;  %v11324_v24 = vor.u32 %v11323_v18, %v11320_v0  ;;  %v21654_v0 = vld [vmem:[#allocation3 + $0xc8] sm:$0xff]  }
 0x628   : > { %v10557_v60 = vadd.f32 %v10541_v27, %v10521_v33  ;;  %v9899_v33 = vadd.f32 %v21388_v56, %v21407_v3  ;;  %v22163_v56 = vld [vmem:[#allocation14_spill] sm:$0xff]  ;;  %v16789_v3 = vld [vmem:[#allocation3 + $0xb8] sm:$0xff]  }
 0x629   : > { %v10290_v38 = vpop.f32.mrf.mxu3 }
 0x62a   : > { %v10479_v57 = vpop.f32.mrf.mxu0  ;;  %v10573_v13 = vmax.f32 %v10557_v60, 0.0  ;;  %v10320_v45 = vadd.f32 %v10290_v38, %v10162_v15  ;;  %v21610_v14 = vpop.f32.mrf.mxu1 }
 0x62b   : > { %10981 = vmatmul.bf16.gmra.mxu2 %v22161_v4  ;;  %v16205_v4 = vld [vmem:[%s21974_s4 + $0x1c8] sm:$0xff] }
 0x62c   : > { %10589 = vst [vmem:[%s20944_s25 + $0xb0] sm:$0xff] %v10573_v13  ;;  %v10506_v43 = vadd.f32 %v10476_v30, %v10320_v45  ;;  %11573 = vmatmul.bf16.gmra.mxu1 %v16788_v31  ;;  %v10524_v31 = vld [vmem:[%s17252_s14 + $0xc8] sm:$0xff]  ;;  %12239 = vmatpush.bf16.msrb.mxu0 %v16205_v4 }
 0x62d   : > { %11428 = vmatmul.bf16.gmra.mxu0 %v11316_v12  ;;  %v11325_v12 = vsel %vm823_vm2, %v11315_v1, %v11324_v24  ;;  %v9900_v1 = vadd.f32 %v21401_v9, %v21427_v23  ;;  %v16213_v9 = vld [vmem:[%s21974_s4 + $0x208] sm:$0xff]  ;;  %v16181_v23 = vld [vmem:[%s21974_s4 + $0x140] sm:$0xff] }
 0x62e   : > { %11151 = vmatmul.bf16.gmra.mxu3 %v22162_v6  ;;  %v10542_v47 = vadd.f32 %v21503_v21, %v10506_v43  ;;  %v10135_v37 = vpop.f32.mrf.mxu2  ;;  %12425 = vmatpush.bf16.msrb.mxu1 %v16213_v9 }
 0x62f   : > { %v10163_v44 = vadd.f32 %v10135_v37, %v9898_v22  ;;  %v11330_v22 = vshll.u32 %v17135_v42, 16  ;;  %11817 = vmatpush.bf16.msrb.mxu2 %v16181_v23 }
 0x630   : > { %v10558_v10 = vadd.f32 %v10542_v47, %v10522_v58  ;;  %v11327_v47 = vshrl.u32 %v17135_v42, 16 }
 0x631   : > { %v10293_v34 = vpop.f32.mrf.mxu3 }
 0x632   : > { %v10481_v16 = vpop.f32.mrf.mxu0  ;;  %v10574_v30 = vmax.f32 %v10558_v10, 0.0  ;;  %v10321_v53 = vadd.f32 %v10293_v34, %v10163_v44  ;;  %v21623_v54 = vpop.f32.mrf.mxu1 }
 0x634   : > { %10590 = vst [vmem:[%s20944_s25 + $0xb8] sm:$0xff] %v10574_v30  ;;  %v10507_v20 = vadd.f32 %v10479_v57, %v10321_v53  ;;  %v11329_v30 = vrot.slane %v11327_v47, 3  ;;  %v11332_v53 = vrot.slane %v11330_v22, 4 }
 0x636   : > { %v10543_v26 = vadd.f32 %v21503_v21, %v10507_v20  ;;  %v10137_v27 = vpop.f32.mrf.mxu2  ;;  %v16196_v20 = vld [vmem:[%s21974_s4 + $0x180] sm:$0xff] }
 0x637   : > { %v10164_v60 = vadd.f32 %v10137_v27, %v9899_v33  ;;  %v11333_v33 = vor.u32 %v11332_v53, %v11329_v30  ;;  %v16671_v27 = vunpack.c.h.b16 %v21654_v0  ;;  %12082 = vmatpush.bf16.msrb.mxu3 %v16196_v20 }
 0x638   : > { %v10559_v25 = vadd.f32 %v10543_v26, %v10523_v7  ;;  %v9901_v7 = vadd.f32 %v21423_v51, %v21440_v32 }
 0x639   : > { %v10295_v15 = vpop.f32.mrf.mxu3  ;;  %v11334_v51 = vsel %vm823_vm2, %v11324_v24, %v11333_v33  ;;  %v11263_v32 = vpack.c.b16 %v16671_v27, %v16671_v27  ;;  %v9902_v24 = vadd.f32 %v21436_v50, %v21456_v5 }
 0x63a   : > { %v10484_v38 = vpop.f32.mrf.mxu0  ;;  %v10575_v57 = vmax.f32 %v10559_v25, 0.0  ;;  %v10322_v13 = vadd.f32 %v10295_v15, %v10164_v60  ;;  %v21639_v45 = vpop.f32.mrf.mxu1 }
 0x63b   : > { %10986 = vmatmul.bf16.gmra.mxu2 %v22163_v56  ;;  %v22165_v56 = vld [vmem:[#allocation16_spill] sm:$0xff]  ;;  %v11336_v47 = vshrl.u32 %v11263_v32, 16  ;;  %v11339_v22 = vshll.u32 %v11263_v32, 16 }
 0x63c   : > { %10591 = vst [vmem:[%s20944_s25 + $0xc0] sm:$0xff] %v10575_v57  ;;  %v10508_v43 = vadd.f32 %v10481_v16, %v10322_v13  ;;  %11578 = vmatmul.bf16.gmra.mxu1 %v16789_v3  ;;  %v16790_v3 = vld [vmem:[#allocation3 + $0xc0] sm:$0xff]  }
 0x63d   : > { %11433 = vmatmul.bf16.gmra.mxu0 %v11325_v12  ;;  %v11338_v9 = vrot.slane %v11336_v47, 3  ;;  %v11341_v23 = vrot.slane %v11339_v22, 4  ;;  %v21708_v47 = vld [vmem:[#allocation3 + $0x98] sm:$0xff] }
 0x63e   : > { %11156 = vmatmul.bf16.gmra.mxu3 %v22164_v19  ;;  %v10544_v58 = vadd.f32 %v21503_v21, %v10508_v43  ;;  %v10140_v6 = vpop.f32.mrf.mxu2  ;;  %v10526_v19 = vld [vmem:[%s17252_s14 + $0xd8] sm:$0xff] }
 0x63f   : > { %v10165_v59 = vadd.f32 %v10140_v6, %v9900_v1  ;;  %v11342_v27 = vor.u32 %v11341_v23, %v11338_v9  ;;  %v11694_v23 = vshll.u32 %v21708_v47, 16 }
 0x640   : > { %v10560_v37 = vadd.f32 %v10544_v58, %v10524_v31  ;;  %v16204_v31 = vld [vmem:[%s21974_s4 + $0x1c0] sm:$0xff]  ;;  %v22166_v58 = vld [vmem:[#allocation9_spill] sm:$0xff] }
 0x641   : > { %v10298_v11 = vpop.f32.mrf.mxu3  ;;  %12240 = vmatpush.bf16.msrb.mxu0 %v16204_v31  ;;  %v11343_v32 = vsel %vm823_vm2, %v11333_v33, %v11342_v27  ;;  %v21701_v31 = vld [vmem:[#allocation3 + $0xa0] sm:$0xff]  ;;  %v9904_v33 = vadd.f32 %v21462_v46, %v21476_v8 }
 0x642   : > { %v10486_v10 = vpop.f32.mrf.mxu0  ;;  %v10576_v44 = vmax.f32 %v10560_v37, 0.0  ;;  %v10323_v34 = vadd.f32 %v10298_v11, %v10165_v59  ;;  %v21652_v16 = vpop.f32.mrf.mxu1 }
 0x644   : > { %10592 = vst [vmem:[%s20944_s25 + $0xc8] sm:$0xff] %v10576_v44  ;;  %v10509_v18 = vadd.f32 %v10484_v38, %v10323_v34  ;;  %v11020_v38 = vunpack.c.l.b16 %v11002_v36  ;;  %v10527_v36 = vld [vmem:[%s17252_s14 + $0xe0] sm:$0xff] }
 0x646   : > { %v10545_v35 = vadd.f32 %v21503_v21, %v10509_v18  ;;  %v10142_v26 = vpop.f32.mrf.mxu2  ;;  %v11021_v4 = vpack.c.b16 %v11020_v38, %v11020_v38 }
 0x647   : > { %v10166_v60 = vadd.f32 %v10142_v26, %v9901_v7  ;;  %v9903_v7 = vadd.f32 %v21454_v29, %v21466_v28  ;;  %v22167_v29 = vld [vmem:[#allocation19_spill] sm:$0xff] }
 0x648   : > { %v10561_v25 = vadd.f32 %v10545_v35, %v10525_v41  ;;  %v11062_v44 = vshll.u32 %v11021_v4, 16  ;;  %v16212_v41 = vld [vmem:[%s21974_s4 + $0x200] sm:$0xff]  ;;  %v22168_v28 = vld [vmem:[#allocation15_spill] sm:$0xff] }
 0x649   : > { %v10300_v15 = vpop.f32.mrf.mxu3  ;;  %12426 = vmatpush.bf16.msrb.mxu1 %v16212_v41  ;;  %v10529_v41 = vld [vmem:[%s17252_s14 + $0xf0] sm:$0xff] }
 0x64a   : > { %v10489_v57 = vpop.f32.mrf.mxu0  ;;  %v10577_v13 = vmax.f32 %v10561_v25, 0.0  ;;  %v10324_v12 = vadd.f32 %v10300_v15, %v10166_v60  ;;  %v21671_v42 = vpop.f32.mrf.mxu1  ;;  %v11064_v20 = vrot.slane %v11062_v44, 4 }
 0x64b   : > { %10991 = vmatmul.bf16.gmra.mxu2 %v22165_v56  ;;  %v16794_v56 = vld [vmem:[#allocation3 + $0x98] sm:$0xe] }
 0x64c   : > { %10593 = vst [vmem:[%s20944_s25 + $0xd0] sm:$0xff] %v10577_v13  ;;  %v10510_v43 = vadd.f32 %v10486_v10, %v10324_v12  ;;  %11583 = vmatmul.bf16.gmra.mxu1 %v16790_v3  ;;  %v11059_v10 = vshrl.u32 %v11021_v4, 16 }
 0x64d   : > { %11438 = vmatmul.bf16.gmra.mxu0 %v11334_v51 }
 0x64e   : > { %11161 = vmatmul.bf16.gmra.mxu3 %v22166_v58  ;;  %v10546_v1 = vadd.f32 %v21503_v21, %v10510_v43  ;;  %v10145_v6 = vpop.f32.mrf.mxu2  ;;  %v11061_v5 = vrot.slane %v11059_v10, 3  ;;  %v16793_v43 = vld [vmem:[#allocation3 + $0x98] sm:$0xf0]  ;;  %v16173_v58 = vld [vmem:[#allocation3 + $0x90] sm:$0xff]  ;;  %v11963_v10 = vshrl.u32 %v21701_v31, 16 }
 0x64f   : > { %v10167_v59 = vadd.f32 %v10145_v6, %v9902_v24  ;;  %v16795_v24 = vor.u32 %v16794_v56, %v16793_v43  ;;  %v11689_v44 = vshll.u32 %v16173_v58, 16 }
 0x650   : > { %v10562_v37 = vadd.f32 %v10546_v1, %v10526_v19  ;;  %v11065_v38 = vor.u32 %v11064_v20, %v11061_v5  ;;  %v10528_v19 = vld [vmem:[%s17252_s14 + $0xe8] sm:$0xff]  ;;  %v12326_v5 = vrot.slane %v11963_v10, 1 }
 0x651   : > { %v10303_v11 = vpop.f32.mrf.mxu3  ;;  %v12319_v8 = vshrl.u32 %v16795_v24, 16  ;;  %v12322_v9 = vshll.u32 %v16795_v24, 16 }
 0x652   : > { %v10491_v34 = vpop.f32.mrf.mxu0  ;;  %v10578_v30 = vmax.f32 %v10562_v37, 0.0  ;;  %v10325_v53 = vadd.f32 %v10303_v11, %v10167_v59  ;;  %v21684_v18 = vpop.f32.mrf.mxu1  ;;  %v11066_v4 = vsel %vm823_vm2, %v22168_v28, %v11065_v38  ;;  %v11959_v11 = vshll.u32 %v21701_v31, 16 }
 0x653   : > { %v12321_v27 = vrot.slane %v12319_v8, 1  ;;  %v11696_v38 = vrot.slane %v11694_v23, 1 }
 0x654   : > { %10594 = vst [vmem:[%s20944_s25 + $0xd8] sm:$0xff] %v10578_v30  ;;  %v10511_v50 = vadd.f32 %v10489_v57, %v10325_v53  ;;  %v12327_v20 = vrot.slane %v11959_v11, 2  ;;  %v11961_v56 = vrot.slane %v11959_v11, 1 }
 0x656   : > { %v10547_v35 = vadd.f32 %v21503_v21, %v10511_v50  ;;  %v10147_v26 = vpop.f32.mrf.mxu2 }
 0x657   : > { %v10168_v60 = vadd.f32 %v10147_v26, %v9903_v7  ;;  %v9905_v26 = vadd.f32 %v21474_v40, %v21491_v17 }
 0x658   : > { %v10563_v25 = vadd.f32 %v10547_v35, %v10527_v36  ;;  %v11691_v36 = vrot.slane %v11689_v44, 1 }
 0x659   : > { %v10305_v15 = vpop.f32.mrf.mxu3 }
 0x65a   : > { %v10494_v57 = vpop.f32.mrf.mxu0  ;;  %v10579_v13 = vmax.f32 %v10563_v25, 0.0  ;;  %v10326_v12 = vadd.f32 %v10305_v15, %v10168_v60  ;;  %v21694_v51 = vpop.f32.mrf.mxu1  ;;  %v12324_v25 = vrot.slane %v12322_v9, 2  ;;  %v11687_v15 = vshrl.u32 %v16173_v58, 16 }
 0x65b   : > { %10996 = vmatmul.bf16.gmra.mxu2 %v22167_v29 }
 0x65c   : > { %10595 = vst [vmem:[%s20944_s25 + $0xe0] sm:$0xff] %v10579_v13  ;;  %v10512_v3 = vadd.f32 %v10491_v34, %v10326_v12  ;;  %11588 = vmatmul.bf16.gmra.mxu1 %v21654_v0  ;;  %v11954_v34 = vshll.u32 %v21525_v63, 16  ;;  %v11952_v13 = vshrl.u32 %v21525_v63, 16  ;;  %v11692_v28 = vor.u32 %v11691_v36, %v11687_v15 }
 0x65d   : > { %11443 = vmatmul.bf16.gmra.mxu0 %v11343_v32 }
 0x65e   : > { %11166 = vmatmul.bf16.gmra.mxu3 %v11066_v4  ;;  %v10548_v1 = vadd.f32 %v21503_v21, %v10512_v3  ;;  %v10150_v6 = vpop.f32.mrf.mxu2  ;;  %v11956_v35 = vrot.slane %v11954_v34, 1  ;;  %v12328_v3 = vor.u32 %v12327_v20, %v12326_v5  ;;  %v12160_v4 = vrot.slane %v16795_v24, 1  ;;  %v10530_v24 = vld [vmem:[%s17252_s14 + $0xf8] sm:$0xff]  ;;  %v16175_v34 = vld [vmem:[#allocation3 + $0xa0] sm:$0xff] }
 0x65f   : > { %v10169_v37 = vadd.f32 %v10150_v6, %v9904_v33  ;;  %v11697_v63 = vsel %vm1491_vm3, %v11692_v28, %v11696_v38 }
 0x660   : > { %v10564_v22 = vadd.f32 %v10548_v1, %v10528_v19  ;;  %v11957_v58 = vor.u32 %v11956_v35, %v11952_v13  ;;  %v12325_v1 = vor.u32 %v12324_v25, %v12321_v27 }
 0x661   : > { %v10308_v59 = vpop.f32.mrf.mxu3 }
 0x662   : > { %v10496_v0 = vpop.f32.mrf.mxu0  ;;  %v10580_v30 = vmax.f32 %v10564_v22, 0.0  ;;  %v10327_v53 = vadd.f32 %v10308_v59, %v10169_v37  ;;  %v21713_v46 = vpop.f32.mrf.mxu1  ;;  %v11962_v22 = vsel %vm1491_vm3, %v11957_v58, %v11961_v56  ;;  %v12329_v37 = vsel %vm2128_vm5, %v12325_v1, %v12328_v3  ;;  %v21732_v59 = vld [vmem:[#allocation3 + $0xa8] sm:$0xff]  ;;  %v21757_v58 = vld [vmem:[#allocation3 + $0xb0] sm:$0xff] }
 0x663   : > { %v11967_v8 = vshll.u32 %v21732_v59, 16  ;;  %v11971_v9 = vshrl.u32 %v21732_v59, 16  ;;  %v12163_v27 = vrot.slane %v21732_v59, 1  ;;  %v16176_v1 = vld [vmem:[#allocation3 + $0xa8] sm:$0xff] }
 0x664   : > { %10596 = vst [vmem:[%s20944_s25 + $0xe8] sm:$0xff] %v10580_v30  ;;  %v10513_v50 = vadd.f32 %v10494_v57, %v10327_v53  ;;  %v12161_v57 = vrot.slane %v21701_v31, 1 }
 0x665   : > { %v12331_v35 = vrot.slane %v11967_v8, 2  ;;  %v11969_v15 = vrot.slane %v11967_v8, 1 }
 0x666   : > { %v10549_v7 = vadd.f32 %v21503_v21, %v10513_v50  ;;  %v10152_v60 = vpop.f32.mrf.mxu2  ;;  %v12162_v33 = vsel %vm1968_vm6, %v12160_v4, %v12161_v57 }
 0x667   : > { %v10170_v32 = vadd.f32 %v10152_v60, %v9905_v26  ;;  %v11698_v26 = vshrl.u32 %v21708_v47, 16  ;;  %v12164_v47 = vsel %vm1968_vm6, %v12161_v57, %v12163_v27  ;;  %v11979_v57 = vshrl.u32 %v21757_v58, 16 }
 0x668   : > { %v10565_v12 = vadd.f32 %v10549_v7, %v10529_v41  ;;  %v11702_v41 = vshll.u32 %v16175_v34, 16 }
 0x669   : > { %v10310_v43 = vpop.f32.mrf.mxu3 }
 0x66a   : > { %v11409_v29 = vpop.f32.mrf.mxu0  ;;  %v10581_v40 = vmax.f32 %v10565_v12, 0.0  ;;  %v10328_v17 = vadd.f32 %v10310_v43, %v10170_v32  ;;  %v21725_v19 = vpop.f32.mrf.mxu1  ;;  %v11700_v32 = vor.u32 %v11698_v26, %v11696_v38 }
 0x66b   : > { %11818 = vmatmul.bf16.vlgmr.msrb.gmra.mxu2 %v11697_v63 }
 0x66c   : > { %10597 = vst [vmem:[%s20944_s25 + $0xf0] sm:$0xff] %v10581_v40  ;;  %v10514_v6 = vadd.f32 %v10496_v0, %v10328_v17  ;;  %12427 = vmatmul.bf16.vlgmr.msrb.gmra.mxu1 %v12329_v37 }
 0x66d   : > { %12241 = vmatmul.bf16.vlgmr.msrb.gmra.mxu0 %v12162_v33 }
 0x66e   : > { %12083 = vmatmul.bf16.vlgmr.msrb.gmra.mxu3 %v11962_v22  ;;  %v10550_v11 = vadd.f32 %v21503_v21, %v10514_v6  ;;  %v10962_v44 = vpop.f32.mrf.mxu2  ;;  %v12330_v21 = vrot.slane %v11971_v9, 1  ;;  %v11710_v22 = vshll.u32 %v16176_v1, 16 }
 0x66f   : > { %v10963_v53 = vadd.f32 %v10962_v44, %v21488_v61  ;;  %v11704_v61 = vrot.slane %v11702_v41, 1 }
 0x670   : > { %v10566_v30 = vadd.f32 %v10550_v11, %v10530_v24  ;;  %v12332_v13 = vor.u32 %v12331_v35, %v12330_v21  ;;  %v11706_v11 = vshrl.u32 %v16175_v34, 16  ;;  %v11712_v44 = vrot.slane %v11710_v22, 1 }
 0x671   : > { %v11132_v0 = vpop.f32.mrf.mxu3  ;;  %v11705_v4 = vsel %vm1491_vm3, %v11700_v32, %v11704_v61  ;;  %v11973_v21 = vor.u32 %v11971_v9, %v11969_v15 }
 0x672   : > { %v11411_v23 = vpop.f32.mrf.mxu0  ;;  %v10582_v50 = vmax.f32 %v10566_v30, 0.0  ;;  %v11172_v5 = vadd.f32 %v11132_v0, %v10963_v53  ;;  %v21739_v20 = vpop.f32.mrf.mxu1  ;;  %v12333_v17 = vsel %vm2128_vm5, %v12328_v3, %v12332_v13  ;;  %v12334_v3 = vrot.slane %v11979_v57, 1 }
 0x673   : > { %v12165_v30 = vrot.slane %v21757_v58, 1 }
 0x674   : > { %10598 = vst [vmem:[%s20944_s25 + $0xf8] sm:$0xff] %v10582_v50  ;;  %v21742_v36 = vadd.f32 %v11409_v29, %v11172_v5  ;;  %v11965_v29 = vor.u32 %v11963_v10, %v11961_v56  ;;  %v11975_v56 = vshll.u32 %v21757_v58, 16  ;;  %v11708_v50 = vor.u32 %v11706_v11, %v11704_v61 }
 0x675   : > { %v11714_v58 = vshrl.u32 %v16176_v1, 16 }
 0x676   : > { %v10964_v7 = vpop.f32.mrf.mxu2  ;;  %v12335_v59 = vrot.slane %v11975_v56, 2  ;;  %v11977_v0 = vrot.slane %v11975_v56, 1  ;;  %v11713_v35 = vsel %vm1491_vm3, %v11708_v50, %v11712_v44  ;;  %v16178_v50 = vld [vmem:[#allocation3 + $0xb8] sm:$0xff] }
 0x677   : > { %v10965_v25 = vadd.f32 %v10964_v7, %v21505_v62  ;;  %v11970_v62 = vsel %vm1491_vm3, %v11965_v29, %v11969_v15  ;;  %v12166_v7 = vsel %vm1968_vm6, %v12163_v27, %v12165_v30  ;;  %v11716_v22 = vor.u32 %v11714_v58, %v11712_v44 }
 0x678   : > { %v12336_v8 = vor.u32 %v12335_v59, %v12334_v3  ;;  %v11978_v34 = vsel %vm1491_vm3, %v11973_v21, %v11977_v0 }
 0x679   : > { %v11134_v60 = vpop.f32.mrf.mxu3 }
 0x67a   : > { %v11414_v12 = vpop.f32.mrf.mxu0  ;;  %v11173_v43 = vadd.f32 %v11134_v60, %v10965_v25  ;;  %v21747_v28 = vpop.f32.mrf.mxu1  ;;  %v21776_v25 = vld [vmem:[#allocation3 + $0xb8] sm:$0xff]  ;;  %v16177_v60 = vld [vmem:[#allocation3 + $0xb0] sm:$0xff] }
 0x67b   : > { %11823 = vmatmul.bf16.gmra.mxu2 %v11705_v4  ;;  %v11987_v27 = vshrl.u32 %v21776_v25, 16  ;;  %v11718_v4 = vshll.u32 %v16177_v60, 16 }
 0x67c   : > { %v21753_v40 = vadd.f32 %v11411_v23, %v11173_v43  ;;  %12432 = vmatmul.bf16.gmra.mxu1 %v12333_v17 }
 0x67d   : > { %12246 = vmatmul.bf16.gmra.mxu0 %v12164_v47 }
 0x67e   : > { %12088 = vmatmul.bf16.gmra.mxu3 %v11970_v62  ;;  %v10967_v38 = vpop.f32.mrf.mxu2 }
 0x67f   : > { %v10968_v31 = vadd.f32 %v10967_v38, %v21520_v52  ;;  %v11720_v38 = vrot.slane %v11718_v4, 1 }
 0x681   : > { %v11137_v10 = vpop.f32.mrf.mxu3  ;;  %v11721_v11 = vsel %vm1491_vm3, %v11716_v22, %v11720_v38 }
 0x682   : > { %v11416_v63 = vpop.f32.mrf.mxu0  ;;  %v11174_v33 = vadd.f32 %v11137_v10, %v10968_v31  ;;  %v21762_v6 = vpop.f32.mrf.mxu1  ;;  %v12167_v31 = vrot.slane %v21776_v25, 1 }
 0x684   : > { %v21764_v37 = vadd.f32 %v11414_v12, %v11174_v33  ;;  %v11983_v12 = vshll.u32 %v21776_v25, 16 }
 0x686   : > { %v10969_v24 = vpop.f32.mrf.mxu2  ;;  %v12339_v62 = vrot.slane %v11983_v12, 2  ;;  %v11985_v56 = vrot.slane %v11983_v12, 1 }
 0x687   : > { %v10970_v52 = vadd.f32 %v10969_v24, %v21536_v2  ;;  %v12337_v2 = vsel %vm2128_vm5, %v12332_v13, %v12336_v8  ;;  %v12338_v13 = vrot.slane %v11987_v27, 1  ;;  %v11981_v24 = vor.u32 %v11979_v57, %v11977_v0 }
 0x689   : > { %v11139_v53 = vpop.f32.mrf.mxu3  ;;  %v11986_v1 = vsel %vm1491_vm3, %v11981_v24, %v11985_v56  ;;  %v21816_v24 = vld [vmem:[#allocation3 + $0xc0] sm:$0xff] }
 0x68a   : > { %v11419_v23 = vpop.f32.mrf.mxu0  ;;  %v11175_v5 = vadd.f32 %v11139_v53, %v10970_v52  ;;  %v21768_v41 = vpop.f32.mrf.mxu1  ;;  %v12168_v52 = vsel %vm1968_vm6, %v12165_v30, %v12167_v31 }
 0x68b   : > { %11828 = vmatmul.bf16.gmra.mxu2 %v11713_v35 }
 0x68c   : > { %v21772_v26 = vadd.f32 %v11416_v63, %v11175_v5  ;;  %12437 = vmatmul.bf16.gmra.mxu1 %v12337_v2  ;;  %v12340_v63 = vor.u32 %v12339_v62, %v12338_v13 }
 0x68d   : > { %12251 = vmatmul.bf16.gmra.mxu0 %v12166_v7 }
 0x68e   : > { %12093 = vmatmul.bf16.gmra.mxu3 %v11978_v34  ;;  %v10972_v61 = vpop.f32.mrf.mxu2  ;;  %v11726_v34 = vshll.u32 %v16178_v50, 16 }
 0x68f   : > { %v10973_v9 = vadd.f32 %v10972_v61, %v21552_v48 }
 0x691   : > { %v11142_v15 = vpop.f32.mrf.mxu3 }
 0x692   : > { %v11421_v32 = vpop.f32.mrf.mxu0  ;;  %v11176_v43 = vadd.f32 %v11142_v15, %v10973_v9  ;;  %v21781_v29 = vpop.f32.mrf.mxu1  ;;  %v11722_v9 = vshrl.u32 %v16177_v60, 16  ;;  %v11728_v15 = vrot.slane %v11726_v34, 1 }
 0x694   : > { %v21783_v47 = vadd.f32 %v11419_v23, %v11176_v43  ;;  %v21795_v23 = vld [vmem:[#allocation3 + $0xc0] sm:$0xff]  ;;  %v11724_v62 = vor.u32 %v11722_v9, %v11720_v38 }
 0x695   : > { %v11991_v5 = vshll.u32 %v21795_v23, 16  ;;  %v11995_v30 = vshrl.u32 %v21795_v23, 16  ;;  %v12169_v12 = vrot.slane %v21795_v23, 1 }
 0x696   : > { %v10974_v17 = vpop.f32.mrf.mxu2 }
 0x697   : > { %v10975_v48 = vadd.f32 %v10974_v17, %v21565_v55  ;;  %v12341_v55 = vsel %vm2128_vm5, %v12336_v8, %v12340_v63  ;;  %v12342_v8 = vrot.slane %v11995_v30, 1  ;;  %v12343_v25 = vrot.slane %v11991_v5, 2 }
 0x698   : > { %v11993_v43 = vrot.slane %v11991_v5, 1  ;;  %v11730_v5 = vshrl.u32 %v16178_v50, 16 }
 0x699   : > { %v11144_v10 = vpop.f32.mrf.mxu3  ;;  %v12344_v4 = vor.u32 %v12343_v25, %v12342_v8 }
 0x69a   : > { %v11424_v33 = vpop.f32.mrf.mxu0  ;;  %v11177_v3 = vadd.f32 %v11144_v10, %v10975_v48  ;;  %v21787_v59 = vpop.f32.mrf.mxu1  ;;  %v11989_v48 = vor.u32 %v11987_v27, %v11985_v56  ;;  %v11729_v10 = vsel %vm1491_vm3, %v11724_v62, %v11728_v15  ;;  %v11732_v9 = vor.u32 %v11730_v5, %v11728_v15 }
 0x69b   : > { %11833 = vmatmul.bf16.gmra.mxu2 %v11721_v11  ;;  %v11997_v62 = vor.u32 %v11995_v30, %v11993_v43 }
 0x69c   : > { %v21791_v53 = vadd.f32 %v11421_v32, %v11177_v3  ;;  %12442 = vmatmul.bf16.gmra.mxu1 %v12341_v55  ;;  %v11994_v60 = vsel %vm1491_vm3, %v11989_v48, %v11993_v43  ;;  %v21814_v3 = vld [vmem:[#allocation3 + $0xc8] sm:$0xff] }
 0x69d   : > { %12256 = vmatmul.bf16.gmra.mxu0 %v12168_v52  ;;  %v12003_v11 = vshrl.u32 %v21814_v3, 16 }
 0x69e   : > { %12098 = vmatmul.bf16.gmra.mxu3 %v11986_v1  ;;  %v10977_v44 = vpop.f32.mrf.mxu2 }
 0x69f   : > { %v10978_v57 = vadd.f32 %v10977_v44, %v21581_v49  ;;  %v12346_v44 = vrot.slane %v12003_v11, 1 }
 0x6a1   : > { %v11147_v0 = vpop.f32.mrf.mxu3 }
 0x6a2   : > { %v11426_v21 = vpop.f32.mrf.mxu0  ;;  %v11178_v35 = vadd.f32 %v11147_v0, %v10978_v57  ;;  %v21800_v7 = vpop.f32.mrf.mxu1 }
 0x6a4   : > { %v21802_v2 = vadd.f32 %v11424_v33, %v11178_v35  ;;  %v12170_v33 = vsel %vm1968_vm6, %v12167_v31, %v12169_v12  ;;  %v11999_v31 = vshll.u32 %v21814_v3, 16 }
 0x6a6   : > { %v10979_v61 = vpop.f32.mrf.mxu2  ;;  %v12347_v57 = vrot.slane %v11999_v31, 2  ;;  %v12001_v8 = vrot.slane %v11999_v31, 1 }
 0x6a7   : > { %v10980_v49 = vadd.f32 %v10979_v61, %v21594_v39  ;;  %v12345_v39 = vsel %vm2128_vm5, %v12340_v63, %v12344_v4  ;;  %v11734_v63 = vshll.u32 %v21816_v24, 16 }
 0x6a8   : > { %v12348_v25 = vor.u32 %v12347_v57, %v12346_v44  ;;  %v12002_v50 = vsel %vm1491_vm3, %v11997_v62, %v12001_v8  ;;  %v11626_v62 = vld [vmem:[#allocation3 + $0xd0] sm:$0x1] }
 0x6a9   : > { %v11149_v32 = vpop.f32.mrf.mxu3 }
 0x6aa   : > { %v11429_v13 = vpop.f32.mrf.mxu0  ;;  %v11179_v17 = vadd.f32 %v11149_v32, %v10980_v49  ;;  %v21806_v58 = vpop.f32.mrf.mxu1 }
 0x6ab   : > { %11838 = vmatmul.bf16.gmra.mxu2 %v11729_v10  ;;  %v21836_v10 = vld [vmem:[#allocation3 + $0xd0] sm:$0xff] }
 0x6ac   : > { %v21810_v22 = vadd.f32 %v11426_v21, %v11179_v17  ;;  %12447 = vmatmul.bf16.gmra.mxu1 %v12345_v39  ;;  %v11736_v21 = vrot.slane %v11734_v63, 1  ;;  %v12173_v57 = vrot.slane %v21836_v10, 1 }
 0x6ad   : > { %12261 = vmatmul.bf16.gmra.mxu0 %v12170_v33  ;;  %v21838_v33 = vld [vmem:[#allocation3 + $0xc8] sm:$0xff] }
 0x6ae   : > { %12103 = vmatmul.bf16.gmra.mxu3 %v11994_v60  ;;  %v10982_v38 = vpop.f32.mrf.mxu2  ;;  %v12011_v60 = vshrl.u32 %v21836_v10, 16 }
 0x6af   : > { %v10983_v27 = vadd.f32 %v10982_v38, %v21610_v14  ;;  %v12171_v14 = vrot.slane %v21814_v3, 1 }
 0x6b1   : > { %v11152_v56 = vpop.f32.mrf.mxu3  ;;  %v12172_v17 = vsel %vm1968_vm6, %v12169_v12, %v12171_v14  ;;  %v12007_v12 = vshll.u32 %v21836_v10, 16  ;;  %v11676_v10 = vunpack.c.l.b16 %v11626_v62 }
 0x6b2   : > { %v11431_v52 = vpop.f32.mrf.mxu0  ;;  %v11180_v1 = vadd.f32 %v11152_v56, %v10983_v27  ;;  %v21821_v55 = vpop.f32.mrf.mxu1  ;;  %v12350_v56 = vrot.slane %v12011_v60, 1 }
 0x6b3   : > { %v12351_v31 = vrot.slane %v12007_v12, 2 }
 0x6b4   : > { %v21824_v23 = vadd.f32 %v11429_v13, %v11180_v1  ;;  %v11737_v13 = vsel %vm1491_vm3, %v11732_v9, %v11736_v21  ;;  %v12009_v9 = vrot.slane %v12007_v12, 1 }
 0x6b6   : > { %v10984_v0 = vpop.f32.mrf.mxu2 }
 0x6b7   : > { %v10985_v35 = vadd.f32 %v10984_v0, %v21623_v54  ;;  %v12349_v54 = vsel %vm2128_vm5, %v12344_v4, %v12348_v25  ;;  %v11742_v4 = vshll.u32 %v21838_v33, 16  ;;  %v11891_v0 = vld [vmem:[#allocation3 + $0xd8] sm:$0x1] }
 0x6b9   : > { %v11154_v34 = vpop.f32.mrf.mxu3  ;;  %v11744_v44 = vrot.slane %v11742_v4, 1  ;;  %v11685_v4 = vpack.c.b16 %v11676_v10, %v11676_v10 }
 0x6ba   : > { %v11434_v61 = vpop.f32.mrf.mxu0  ;;  %v11181_v49 = vadd.f32 %v11154_v34, %v10985_v35  ;;  %v21828_v32 = vpop.f32.mrf.mxu1  ;;  %v12005_v34 = vor.u32 %v12003_v11, %v12001_v8 }
 0x6bb   : > { %11843 = vmatmul.bf16.gmra.mxu2 %v11737_v13 }
 0x6bc   : > { %v21832_v48 = vadd.f32 %v11431_v52, %v11181_v49  ;;  %12452 = vmatmul.bf16.gmra.mxu1 %v12349_v54  ;;  %v12298_v52 = vld [vmem:[#allocation3 + $0xd8] sm:$0x3]  ;;  %v12352_v49 = vor.u32 %v12351_v31, %v12350_v56  ;;  %v11941_v54 = vunpack.c.l.b16 %v11891_v0  ;;  %v11750_v0 = vshll.u32 %v11685_v4, 16 }
 0x6bd   : > { %12266 = vmatmul.bf16.gmra.mxu0 %v12172_v17  ;;  %v12316_v1 = vunpack.c.l.b16 %v12298_v52 }
 0x6be   : > { %12108 = vmatmul.bf16.gmra.mxu3 %v12002_v50  ;;  %v10987_v15 = vpop.f32.mrf.mxu2  ;;  %v12353_v11 = vsel %vm2128_vm5, %v12348_v25, %v12352_v49  ;;  %v11746_v25 = vshrl.u32 %v21838_v33, 16 }
 0x6bf   : > { %v10988_v30 = vadd.f32 %v10987_v15, %v21639_v45  ;;  %v11738_v45 = vshrl.u32 %v21816_v24, 16  ;;  %v12317_v15 = vpack.c.b16 %v12316_v1, %v12316_v1 }
 0x6c1   : > { %v11157_v43 = vpop.f32.mrf.mxu3  ;;  %v11740_v13 = vor.u32 %v11738_v45, %v11736_v21  ;;  %v11950_v21 = vpack.c.b16 %v11941_v54, %v11941_v54  ;;  %v12355_v8 = vshrl.u32 %v12317_v15, 16  ;;  %v12358_v12 = vshll.u32 %v12317_v15, 16 }
 0x6c2   : > { %v11436_v39 = vpop.f32.mrf.mxu0  ;;  %v11182_v3 = vadd.f32 %v11157_v43, %v10988_v30  ;;  %v21843_v38 = vpop.f32.mrf.mxu1  ;;  %v12174_v30 = vsel %vm1968_vm6, %v12171_v14, %v12173_v57  ;;  %v11748_v54 = vor.u32 %v11746_v25, %v11744_v44 }
 0x6c3   : > { %v11745_v24 = vsel %vm1491_vm3, %v11740_v13, %v11744_v44  ;;  %v12015_v1 = vshll.u32 %v11950_v21, 16  ;;  %v12360_v45 = vrot.slane %v12358_v12, 2 }
 0x6c4   : > { %v21846_v27 = vadd.f32 %v11434_v61, %v11182_v3 }
 0x6c5   : > { %v12017_v62 = vrot.slane %v12015_v1, 1 }
 0x6c6   : > { %v10989_v63 = vpop.f32.mrf.mxu2 }
 0x6c7   : > { %v10990_v5 = vadd.f32 %v10989_v63, %v21652_v16  ;;  %v12010_v16 = vsel %vm1491_vm3, %v12005_v34, %v12009_v9  ;;  %v12357_v63 = vrot.slane %v12355_v8, 1  ;;  %v12013_v34 = vor.u32 %v12011_v60, %v12009_v9 }
 0x6c9   : > { %v11159_v35 = vpop.f32.mrf.mxu3  ;;  %v12361_v13 = vor.u32 %v12360_v45, %v12357_v63 }
 0x6ca   : > { %v11439_v61 = vpop.f32.mrf.mxu0  ;;  %v11183_v17 = vadd.f32 %v11159_v35, %v10990_v5  ;;  %v21851_v50 = vpop.f32.mrf.mxu1  ;;  %v12175_v35 = vrot.slane %v11950_v21, 1 }
 0x6cb   : > { %11848 = vmatmul.bf16.gmra.mxu2 %v11745_v24  ;;  %v12362_v33 = vsel %vm2128_vm5, %v12352_v49, %v12361_v13 }
 0x6cc   : > { %v21855_v43 = vadd.f32 %v11436_v39, %v11183_v17  ;;  %12457 = vmatmul.bf16.gmra.mxu1 %v12353_v11  ;;  %v12176_v10 = vsel %vm1968_vm6, %v12173_v57, %v12175_v35 }
 0x6cd   : > { %12271 = vmatmul.bf16.gmra.mxu0 %v12174_v30 }
 0x6ce   : > { %12113 = vmatmul.bf16.gmra.mxu3 %v12010_v16  ;;  %v10992_v3 = vpop.f32.mrf.mxu2 }
 0x6cf   : > { %v10993_v56 = vadd.f32 %v10992_v3, %v21671_v42  ;;  %v11752_v42 = vrot.slane %v11750_v0, 1 }
 0x6d1   : > { %v11162_v31 = vpop.f32.mrf.mxu3  ;;  %v11753_v60 = vsel %vm1491_vm3, %v11748_v54, %v11752_v42  ;;  %v12484_v54 = vld [vmem:[%s17252_s14 + $0x100] sm:$0xff] }
 0x6d2   : > { %v11441_v14 = vpop.f32.mrf.mxu0  ;;  %v11184_v52 = vadd.f32 %v11162_v31, %v10993_v56  ;;  %v21860_v39 = vpop.f32.mrf.mxu1 }
 0x6d4   : > { %v21862_v5 = vadd.f32 %v11439_v61, %v11184_v52  ;;  %v12018_v61 = vsel %vm1491_vm3, %v12013_v34, %v12017_v62 }
 0x6d6   : > { %v10994_v17 = vpop.f32.mrf.mxu2 }
 0x6d7   : > { %v10995_v15 = vadd.f32 %v10994_v17, %v21684_v18  ;;  %v11595_v17 = vadd.f32 %v21739_v20, %v21753_v40  ;;  %v12485_v20 = vld [vmem:[%s17252_s14 + $0x108] sm:$0xff] }
 0x6d9   : > { %v11164_v24 = vpop.f32.mrf.mxu3 }
 0x6da   : > { %v11444_v30 = vpop.f32.mrf.mxu0  ;;  %v11185_v16 = vadd.f32 %v11164_v24, %v10995_v15  ;;  %v21867_v11 = vpop.f32.mrf.mxu1 }
 0x6db   : > { %11853 = vmatmul.bf16.gmra.mxu2 %v11753_v60 }
 0x6dc   : > { %v21872_v9 = vadd.f32 %v11441_v14, %v11185_v16  ;;  %12462 = vmatmul.bf16.gmra.mxu1 %v12362_v33 }
 0x6dd   : > { %12276 = vmatmul.bf16.gmra.mxu0 %v12176_v10 }
 0x6de   : > { %12118 = vmatmul.bf16.gmra.mxu3 %v12018_v61  ;;  %v10997_v18 = vpop.f32.mrf.mxu2 }
 0x6df   : > { %v10998_v44 = vadd.f32 %v10997_v18, %v21694_v51  ;;  %v11594_v51 = vadd.f32 %v21725_v19, %v21742_v36  ;;  %v11596_v18 = vadd.f32 %v21747_v28, %v21764_v37  ;;  %v12486_v28 = vld [vmem:[%s17252_s14 + $0x110] sm:$0xff] }
 0x6e1   : > { %v11167_v21 = vpop.f32.mrf.mxu3 }
 0x6e2   : > { %v11446_v57 = vpop.f32.mrf.mxu0  ;;  %v11186_v8 = vadd.f32 %v11167_v21, %v10998_v44  ;;  %v21875_v12 = vpop.f32.mrf.mxu1 }
 0x6e4   : > { %v21877_v3 = vadd.f32 %v11444_v30, %v11186_v8 }
 0x6e6   : > { %v10999_v4 = vpop.f32.mrf.mxu2 }
 0x6e7   : > { %v11000_v49 = vadd.f32 %v10999_v4, %v21713_v46  ;;  %v21887_v46 = vld [vmem:[%s21975_s5] ss:$0 sm:$0xff] }
 0x6e9   : > { %v11169_v56 = vpop.f32.mrf.mxu3 }
 0x6ea   : > { %v12242_v31 = vpop.f32.mrf.mxu0  ;;  %v11187_v14 = vadd.f32 %v11169_v56, %v11000_v49  ;;  %v12428_v52 = vpop.f32.mrf.mxu1 }
 0x6ec   : > { %v21880_v1 = vadd.f32 %v11446_v57, %v11187_v14 }
 0x6ee   : > { %v11819_v63 = vpop.f32.mrf.mxu2 }
 0x6ef   : > { %v11859_v45 = vadd.f32 %v11819_v63, %v11594_v51  ;;  %v11597_v51 = vadd.f32 %v21762_v6, %v21772_v26  ;;  %v12487_v6 = vld [vmem:[%s17252_s14 + $0x118] sm:$0xff] }
 0x6f1   : > { %v12084_v0 = vpop.f32.mrf.mxu3 }
 0x6f2   : > { %v12244_v25 = vpop.f32.mrf.mxu0  ;;  %v12124_v35 = vadd.f32 %v12084_v0, %v11859_v45  ;;  %v12430_v34 = vpop.f32.mrf.mxu1 }
 0x6f4   : > { %v12282_v62 = vadd.f32 %v12242_v31, %v12124_v35 }
 0x6f6   : > { %v12468_v13 = vadd.f32 %v12428_v52, %v12282_v62  ;;  %v11821_v19 = vpop.f32.mrf.mxu2 }
 0x6f7   : > { %v11860_v42 = vadd.f32 %v11821_v19, %v11595_v17  ;;  %v11598_v19 = vadd.f32 %v21768_v41, %v21783_v47  ;;  %v12488_v41 = vld [vmem:[%s17252_s14 + $0x120] sm:$0xff] }
 0x6f8   : > { %v12504_v36 = vadd.f32 %v21887_v46, %v12468_v13 }
 0x6f9   : > { %v12086_v15 = vpop.f32.mrf.mxu3 }
 0x6fa   : > { %v12247_v24 = vpop.f32.mrf.mxu0  ;;  %v12520_v30 = vadd.f32 %v12504_v36, %v12484_v54  ;;  %v12125_v10 = vadd.f32 %v12086_v15, %v11860_v42  ;;  %v12433_v16 = vpop.f32.mrf.mxu1 }
 0x6fc   : > { %v12536_v61 = vmax.f32 %v12520_v30, 0.0  ;;  %v12283_v33 = vadd.f32 %v12244_v25, %v12125_v10 }
 0x6fe   : > { %12552 = vst [vmem:[%s20944_s25 + $0x100] sm:$0xff] %v12536_v61  ;;  %v12469_v60 = vadd.f32 %v12430_v34, %v12283_v33  ;;  %v11824_v40 = vpop.f32.mrf.mxu2 }
 0x6ff   : > { %v11861_v21 = vadd.f32 %v11824_v40, %v11596_v18  ;;  %v11599_v18 = vadd.f32 %v21781_v29, %v21791_v53  ;;  %v12489_v29 = vld [vmem:[%s17252_s14 + $0x128] sm:$0xff] }
 0x700   : > { %v12505_v44 = vadd.f32 %v21887_v46, %v12469_v60 }
 0x701   : > { %v12089_v57 = vpop.f32.mrf.mxu3 }
 0x702   : > { %v12249_v8 = vpop.f32.mrf.mxu0  ;;  %v12521_v4 = vadd.f32 %v12505_v44, %v12485_v20  ;;  %v12126_v49 = vadd.f32 %v12089_v57, %v11861_v21  ;;  %v12435_v56 = vpop.f32.mrf.mxu1 }
 0x704   : > { %v12537_v31 = vmax.f32 %v12521_v4, 0.0  ;;  %v12284_v14 = vadd.f32 %v12247_v24, %v12126_v49 }
 0x706   : > { %12553 = vst [vmem:[%s20944_s25 + $0x108] sm:$0xff] %v12537_v31  ;;  %v12470_v52 = vadd.f32 %v12433_v16, %v12284_v14  ;;  %v11826_v37 = vpop.f32.mrf.mxu2  ;;  %v11600_v14 = vadd.f32 %v21787_v59, %v21802_v2  ;;  %v12490_v59 = vld [vmem:[%s17252_s14 + $0x130] sm:$0xff] }
 0x707   : > { %v11862_v45 = vadd.f32 %v11826_v37, %v11597_v51 }
 0x708   : > { %v12506_v63 = vadd.f32 %v21887_v46, %v12470_v52 }
 0x709   : > { %v12091_v0 = vpop.f32.mrf.mxu3 }
 0x70a   : > { %v12252_v25 = vpop.f32.mrf.mxu0  ;;  %v12522_v35 = vadd.f32 %v12506_v63, %v12486_v28  ;;  %v12127_v34 = vadd.f32 %v12091_v0, %v11862_v45  ;;  %v12438_v62 = vpop.f32.mrf.mxu1 }
 0x70c   : > { %v12538_v13 = vmax.f32 %v12522_v35, 0.0  ;;  %v12285_v17 = vadd.f32 %v12249_v8, %v12127_v34 }
 0x70e   : > { %12554 = vst [vmem:[%s20944_s25 + $0x110] sm:$0xff] %v12538_v13  ;;  %v12471_v54 = vadd.f32 %v12435_v56, %v12285_v17  ;;  %v11829_v26 = vpop.f32.mrf.mxu2 }
 0x70f   : > { %v11863_v42 = vadd.f32 %v11829_v26, %v11598_v19 }
 0x710   : > { %v12507_v36 = vadd.f32 %v21887_v46, %v12471_v54 }
 0x711   : > { %v12094_v15 = vpop.f32.mrf.mxu3 }
 0x712   : > { %v12254_v24 = vpop.f32.mrf.mxu0  ;;  %v12523_v30 = vadd.f32 %v12507_v36, %v12487_v6  ;;  %v12128_v10 = vadd.f32 %v12094_v15, %v11863_v42  ;;  %v12440_v16 = vpop.f32.mrf.mxu1 }
 0x714   : > { %v12539_v61 = vmax.f32 %v12523_v30, 0.0  ;;  %v12286_v33 = vadd.f32 %v12252_v25, %v12128_v10  ;;  %v11602_v30 = vadd.f32 %v21806_v58, %v21824_v23  ;;  %v12492_v58 = vld [vmem:[%s17252_s14 + $0x140] sm:$0xff] }
 0x716   : > { %12555 = vst [vmem:[%s20944_s25 + $0x118] sm:$0xff] %v12539_v61  ;;  %v12472_v60 = vadd.f32 %v12438_v62, %v12286_v33  ;;  %v11831_v47 = vpop.f32.mrf.mxu2  ;;  %v11601_v62 = vadd.f32 %v21800_v7, %v21810_v22  ;;  %v12491_v7 = vld [vmem:[%s17252_s14 + $0x138] sm:$0xff] }
 0x717   : > { %v11864_v40 = vadd.f32 %v11831_v47, %v11599_v18 }
 0x718   : > { %v12508_v20 = vadd.f32 %v21887_v46, %v12472_v60 }
 0x719   : > { %v12096_v44 = vpop.f32.mrf.mxu3 }
 0x71a   : > { %v12257_v21 = vpop.f32.mrf.mxu0  ;;  %v12524_v57 = vadd.f32 %v12508_v20, %v12488_v41  ;;  %v12129_v8 = vadd.f32 %v12096_v44, %v11864_v40  ;;  %v12443_v4 = vpop.f32.mrf.mxu1  ;;  %v11603_v44 = vadd.f32 %v21821_v55, %v21832_v48  ;;  %v12493_v55 = vld [vmem:[%s17252_s14 + $0x148] sm:$0xff] }
 0x71c   : > { %v12540_v49 = vmax.f32 %v12524_v57, 0.0  ;;  %v12287_v56 = vadd.f32 %v12254_v24, %v12129_v8 }
 0x71e   : > { %12556 = vst [vmem:[%s20944_s25 + $0x120] sm:$0xff] %v12540_v49  ;;  %v12473_v31 = vadd.f32 %v12440_v16, %v12287_v56  ;;  %v11834_v53 = vpop.f32.mrf.mxu2 }
 0x71f   : > { %v11865_v51 = vadd.f32 %v11834_v53, %v11600_v14 }
 0x720   : > { %v12509_v52 = vadd.f32 %v21887_v46, %v12473_v31 }
 0x721   : > { %v12099_v28 = vpop.f32.mrf.mxu3 }
 0x722   : > { %v12259_v37 = vpop.f32.mrf.mxu0  ;;  %v12525_v63 = vadd.f32 %v12509_v52, %v12489_v29  ;;  %v12130_v45 = vadd.f32 %v12099_v28, %v11865_v51  ;;  %v12445_v0 = vpop.f32.mrf.mxu1  ;;  %v11604_v52 = vadd.f32 %v21828_v32, %v21846_v27 }
 0x724   : > { %v12541_v25 = vmax.f32 %v12525_v63, 0.0  ;;  %v12288_v35 = vadd.f32 %v12257_v21, %v12130_v45 }
 0x726   : > { %12557 = vst [vmem:[%s20944_s25 + $0x128] sm:$0xff] %v12541_v25  ;;  %v12474_v34 = vadd.f32 %v12443_v4, %v12288_v35  ;;  %v11836_v2 = vpop.f32.mrf.mxu2 }
 0x727   : > { %v11866_v17 = vadd.f32 %v11836_v2, %v11601_v62  ;;  %v11605_v62 = vadd.f32 %v21843_v38, %v21855_v43 }
 0x728   : > { %v12510_v13 = vadd.f32 %v21887_v46, %v12474_v34 }
 0x729   : > { %v12101_v54 = vpop.f32.mrf.mxu3 }
 0x72a   : > { %v12262_v19 = vpop.f32.mrf.mxu0  ;;  %v12526_v6 = vadd.f32 %v12510_v13, %v12490_v59  ;;  %v12131_v26 = vadd.f32 %v12101_v54, %v11866_v17  ;;  %v12448_v36 = vpop.f32.mrf.mxu1  ;;  %v12494_v59 = vld [vmem:[%s17252_s14 + $0x150] sm:$0xff] }
 0x72c   : > { %v12542_v42 = vmax.f32 %v12526_v6, 0.0  ;;  %v12289_v15 = vadd.f32 %v12259_v37, %v12131_v26 }
 0x72e   : > { %12558 = vst [vmem:[%s20944_s25 + $0x130] sm:$0xff] %v12542_v42  ;;  %v12475_v24 = vadd.f32 %v12445_v0, %v12289_v15  ;;  %v11839_v22 = vpop.f32.mrf.mxu2  ;;  %v11606_v42 = vadd.f32 %v21851_v50, %v21862_v5  ;;  %v12495_v15 = vld [vmem:[%s17252_s14 + $0x158] sm:$0xff]  ;;  %v12496_v50 = vld [vmem:[%s17252_s14 + $0x160] sm:$0xff] }
 0x72f   : > { %v11867_v16 = vadd.f32 %v11839_v22, %v11602_v30 }
 0x730   : > { %v12511_v10 = vadd.f32 %v21887_v46, %v12475_v24 }
 0x731   : > { %v12104_v61 = vpop.f32.mrf.mxu3 }
 0x732   : > { %v12264_v33 = vpop.f32.mrf.mxu0  ;;  %v12527_v60 = vadd.f32 %v12511_v10, %v12491_v7  ;;  %v12132_v18 = vadd.f32 %v12104_v61, %v11867_v16  ;;  %v12450_v41 = vpop.f32.mrf.mxu1 }
 0x734   : > { %v12543_v47 = vmax.f32 %v12527_v60, 0.0  ;;  %v12290_v20 = vadd.f32 %v12262_v19, %v12132_v18  ;;  %v11607_v18 = vadd.f32 %v21860_v39, %v21872_v9  ;;  %v12497_v39 = vld [vmem:[%s17252_s14 + $0x168] sm:$0xff] }
 0x736   : > { %12559 = vst [vmem:[%s20944_s25 + $0x138] sm:$0xff] %v12543_v47  ;;  %v12476_v40 = vadd.f32 %v12448_v36, %v12290_v20  ;;  %v11841_v23 = vpop.f32.mrf.mxu2 }
 0x737   : > { %v11868_v57 = vadd.f32 %v11841_v23, %v11603_v44 }
 0x738   : > { %v12512_v21 = vadd.f32 %v21887_v46, %v12476_v40 }
 0x739   : > { %v12106_v8 = vpop.f32.mrf.mxu3 }
 0x73a   : > { %v12528_v4 = vadd.f32 %v12512_v21, %v12492_v58  ;;  %v12133_v49 = vadd.f32 %v12106_v8, %v11868_v57  ;;  %v12267_v56 = vpop.f32.mrf.mxu0  ;;  %v12453_v29 = vpop.f32.mrf.mxu1 }
 0x73c   : > { %v12544_v31 = vmax.f32 %v12528_v4, 0.0  ;;  %v12291_v14 = vadd.f32 %v12264_v33, %v12133_v49  ;;  %v11608_v4 = vadd.f32 %v21867_v11, %v21877_v3  ;;  %v12498_v11 = vld [vmem:[%s17252_s14 + $0x170] sm:$0xff] }
 0x73e   : > { %12560 = vst [vmem:[%s20944_s25 + $0x140] sm:$0xff] %v12544_v31  ;;  %v12477_v53 = vadd.f32 %v12450_v41, %v12291_v14  ;;  %v11844_v48 = vpop.f32.mrf.mxu2 }
 0x73f   : > { %v11869_v28 = vadd.f32 %v11844_v48, %v11604_v52 }
 0x740   : > { %v12513_v51 = vadd.f32 %v21887_v46, %v12477_v53 }
 0x741   : > { %v12109_v37 = vpop.f32.mrf.mxu3 }
 0x742   : > { %v12529_v63 = vadd.f32 %v12513_v51, %v12493_v55  ;;  %v12134_v45 = vadd.f32 %v12109_v37, %v11869_v28  ;;  %v12269_v35 = vpop.f32.mrf.mxu0  ;;  %v12455_v32 = vpop.f32.mrf.mxu1  ;;  %v11609_v28 = vadd.f32 %v21875_v12, %v21880_v1 }
 0x744   : > { %v12545_v0 = vmax.f32 %v12529_v63, 0.0  ;;  %v12292_v25 = vadd.f32 %v12267_v56, %v12134_v45 }
 0x746   : > { %12561 = vst [vmem:[%s20944_s25 + $0x148] sm:$0xff] %v12545_v0  ;;  %v12478_v34 = vadd.f32 %v12453_v29, %v12292_v25  ;;  %v11846_v27 = vpop.f32.mrf.mxu2 }
 0x747   : > { %v11870_v13 = vadd.f32 %v11846_v27, %v11605_v62  ;;  %v12499_v27 = vld [vmem:[%s17252_s14 + $0x178] sm:$0xff] }
 0x748   : > { %v12514_v2 = vadd.f32 %v21887_v46, %v12478_v34 }
 0x749   : > { %v12111_v17 = vpop.f32.mrf.mxu3 }
 0x74a   : > { %v12530_v54 = vadd.f32 %v12514_v2, %v12494_v59  ;;  %v12135_v19 = vadd.f32 %v12111_v17, %v11870_v13  ;;  %v12272_v38 = vpop.f32.mrf.mxu0  ;;  %v12458_v22 = vpop.f32.mrf.mxu1 }
 0x74c   : > { %v12546_v6 = vmax.f32 %v12530_v54, 0.0  ;;  %v12293_v26 = vadd.f32 %v12269_v35, %v12135_v19 }
 0x74e   : > { %12562 = vst [vmem:[%s20944_s25 + $0x150] sm:$0xff] %v12546_v6  ;;  %v12479_v36 = vadd.f32 %v12455_v32, %v12293_v26  ;;  %v11849_v43 = vpop.f32.mrf.mxu2 }
 0x74f   : > { %v11871_v30 = vadd.f32 %v11849_v43, %v11606_v42 }
 0x750   : > { %v12515_v24 = vadd.f32 %v21887_v46, %v12479_v36 }
 0x751   : > { %v12114_v7 = vpop.f32.mrf.mxu3 }
 0x752   : > { %v12531_v10 = vadd.f32 %v12515_v24, %v12495_v15  ;;  %v12136_v16 = vadd.f32 %v12114_v7, %v11871_v30  ;;  %v12274_v40 = vpop.f32.mrf.mxu0  ;;  %v12460_v23 = vpop.f32.mrf.mxu1 }
 0x754   : > { %v12547_v61 = vmax.f32 %v12531_v10, 0.0  ;;  %v12294_v33 = vadd.f32 %v12272_v38, %v12136_v16 }
 0x756   : > { %12563 = vst [vmem:[%s20944_s25 + $0x158] sm:$0xff] %v12547_v61  ;;  %v12480_v60 = vadd.f32 %v12458_v22, %v12294_v33  ;;  %v11851_v5 = vpop.f32.mrf.mxu2 }
 0x757   : > { %v11872_v47 = vadd.f32 %v11851_v5, %v11607_v18 }
 0x758   : > { %v12516_v41 = vadd.f32 %v21887_v46, %v12480_v60 }
 0x759   : > { %v12116_v20 = vpop.f32.mrf.mxu3 }
 0x75a   : > { %v12532_v44 = vadd.f32 %v12516_v41, %v12496_v50  ;;  %v12137_v58 = vadd.f32 %v12116_v20, %v11872_v47  ;;  %v12277_v14 = vpop.f32.mrf.mxu0  ;;  %v12463_v52 = vpop.f32.mrf.mxu1 }
 0x75c   : > { %v12548_v21 = vmax.f32 %v12532_v44, 0.0  ;;  %v12295_v57 = vadd.f32 %v12274_v40, %v12137_v58 }
 0x75e   : > { %12564 = vst [vmem:[%s20944_s25 + $0x160] sm:$0xff] %v12548_v21  ;;  %v12481_v8 = vadd.f32 %v12460_v23, %v12295_v57  ;;  %v11854_v9 = vpop.f32.mrf.mxu2 }
 0x75f   : > { %v11873_v56 = vadd.f32 %v11854_v9, %v11608_v4 }
 0x760   : > { %v12517_v49 = vadd.f32 %v21887_v46, %v12481_v8 }
 0x761   : > { %v12119_v31 = vpop.f32.mrf.mxu3 }
 0x762   : > { %v12533_v29 = vadd.f32 %v12517_v49, %v12497_v39  ;;  %v12138_v53 = vadd.f32 %v12119_v31, %v11873_v56  ;;  %v12279_v35 = vpop.f32.mrf.mxu0  ;;  %v12465_v59 = vpop.f32.mrf.mxu1 }
 0x764   : > { %v12549_v55 = vmax.f32 %v12533_v29, 0.0  ;;  %v12296_v48 = vadd.f32 %v12277_v14, %v12138_v53 }
 0x766   : > { %12565 = vst [vmem:[%s20944_s25 + $0x168] sm:$0xff] %v12549_v55  ;;  %v12482_v51 = vadd.f32 %v12463_v52, %v12296_v48  ;;  %v11856_v3 = vpop.f32.mrf.mxu2 }
 0x767   : > { %v11874_v63 = vadd.f32 %v11856_v3, %v11609_v28 }
 0x768   : > { %v12518_v37 = vadd.f32 %v21887_v46, %v12482_v51 }
 0x769   : > { %v12121_v45 = vpop.f32.mrf.mxu3 }
 0x76a   : > { %v12534_v0 = vadd.f32 %v12518_v37, %v12498_v11  ;;  %v12139_v25 = vadd.f32 %v12121_v45, %v11874_v63 }
 0x76c   : > { %v12550_v34 = vmax.f32 %v12534_v0, 0.0  ;;  %v12297_v62 = vadd.f32 %v12279_v35, %v12139_v25 }
 0x76e   : > { %12566 = vst [vmem:[%s20944_s25 + $0x170] sm:$0xff] %v12550_v34  ;;  %v12483_v32 = vadd.f32 %v12465_v59, %v12297_v62 }
 0x770   : > { %v12519_v2 = vadd.f32 %v21887_v46, %v12483_v32 }
 0x772   : > { %v12535_v13 = vadd.f32 %v12519_v2, %v12499_v27 }
 0x774   : > { %v12551_v12 = vmax.f32 %v12535_v13, 0.0 }
 0x776   : > { %12567 = vst [vmem:[%s20944_s25 + $0x178] sm:$0xff] %v12551_v12 }
 0x777 PF: > { %s16_s21 = sadd.s32 1, %s17180_s21  }
 0x778   : > { %p13_p4 = scmp.ge.s32.totalorder %s16_s21, 10  }
 0x77a   :  { %15 = sbr.rel (!%p13_p4) target bundleno = 1 (0x1), region = 90 }

</bundles_post_ra>
